<compile_context>
chip_gen: v7x
topology: tpu7x:2x2x1
jax: 0.10.0
libtpu: 0.0.40
codegen_flags: <defaults>
</compile_context>

<pallas_src>
import jax
import jax.numpy as jnp
import numpy as np
from jax.experimental import pallas as pl
from jax.experimental.pallas import tpu as pltpu


MXU_DTYPE = jnp.bfloat16          # matmul operand dtype (f32 accumulation everywhere)
POOL_H, POOL_W = 6, 10            # AdaptiveAvgPool2d((6, 10)) as in the module
POOL_LANES = 128                  # pooled spatial (60) padded to one full vreg width
_GELU_C = 0.7978845608028654      # sqrt(2/pi) for the tanh-approximate GELU


def _patch_dtype():
    """bf16 patch assembly on chips with a bf16 VALU (v6e/v7x); f32 elsewhere (v5e and older)."""
    try:
        kind = jax.devices()[0].device_kind.lower()
    except Exception:
        return jnp.float32
    return jnp.bfloat16 if ("v6" in kind or "v7" in kind) else jnp.float32


# ----------------------------------------------------------------------------
# Host-side constants (border masks for in-kernel im2col, combined adaptive-pool matrix)
# ----------------------------------------------------------------------------
def _make_shift_masks(hs, ws, lanes):
    """(9, lanes) {0,1} validity mask for each 3x3 tap of an (hs, ws) image flattened row-major."""
    m = np.zeros((9, lanes), np.float32)
    t = 0
    for dy in (-1, 0, 1):
        for dx in (-1, 0, 1):
            for h in range(hs):
                if 0 <= h + dy < hs:
                    for w in range(ws):
                        if 0 <= w + dx < ws:
                            m[t, h * ws + w] = 1.0
            t += 1
    return m


def _adaptive_pool_matrix(in_size, out_size):
    # exact PyTorch AdaptiveAvgPool bin boundaries
    p = np.zeros((out_size, in_size), np.float32)
    for i in range(out_size):
        s = (i * in_size) // out_size
        e = -(-((i + 1) * in_size) // out_size)
        p[i, s:e] = 1.0 / (e - s)
    return p


def _make_pool_matrix(h, w, out_h, out_w, lanes):
    """(h*w, lanes) matrix so x(C,HW) @ P = pooled(C, lanes); columns >= out_h*out_w are 0."""
    ph = _adaptive_pool_matrix(h, out_h)
    pw = _adaptive_pool_matrix(w, out_w)
    p = np.zeros((h * w, lanes), np.float32)
    for i in range(out_h):
        for j in range(out_w):
            p[:, i * out_w + j] = np.outer(ph[i], pw[j]).reshape(-1)
    return p


def _flatten_conv_weight(w_oihw):
    """PyTorch (Cout, Cin, 3, 3) -> (Cout, 9*Cin), tap-major / channel-minor (kernel tap order)."""
    cout, cin, kh, kw = w_oihw.shape
    return jnp.transpose(w_oihw, (0, 2, 3, 1)).reshape(cout, kh * kw * cin)


def _block_diag_oihw(wa, wb):
    """Stack two convs (different inputs / different outputs) into one block-diagonal OIHW weight."""
    oa, ia, kh, kw = wa.shape
    ob, ib, _, _ = wb.shape
    top = jnp.concatenate([wa, jnp.zeros((oa, ib, kh, kw), wa.dtype)], axis=1)
    bot = jnp.concatenate([jnp.zeros((ob, ia, kh, kw), wb.dtype), wb], axis=1)
    return jnp.concatenate([top, bot], axis=0)


# ----------------------------------------------------------------------------
# The fused kernel
# ----------------------------------------------------------------------------
def _make_fused_kernel(H, W, C, ch_ms, cin_align, patch_dtype, mxu_dtype):
    HW = H * W
    NPOOL = POOL_H * POOL_W
    TAPS = [(dy, dx) for dy in (-1, 0, 1) for dx in (-1, 0, 1)]

    def _conv3x3(x, mref, w, b, row_stride, lanes, cin):
        # x: (cin, lanes) ; mref: (9, Cmax, lanes) pre-expanded border masks (patch dtype)
        # w: (cout, 9*cin) mxu dtype ; b: (cout, 1) f32
        xq = x.astype(patch_dtype)
        taps = []
        for t, (dy, dx) in enumerate(TAPS):
            off = dy * row_stride + dx
            if off == 0:
                taps.append(xq)                       # centre tap never crosses a border
            else:
                rolled = pltpu.roll(xq, shift=(-off) % lanes, axis=1)
                taps.append(rolled * mref[t][0:cin, :])
        patches = jnp.concatenate(taps, axis=0).astype(mxu_dtype)     # (9*cin, lanes)
        return jnp.dot(w, patches, preferred_element_type=jnp.float32) + b

    def _inorm_lrelu(h, npix, valid=None):
        # InstanceNorm2d(affine=False, eps=1e-5) + LeakyReLU(0.3); `valid` masks padded lanes.
        if valid is not None:
            h = h * valid
        mu = jnp.sum(h, axis=-1, keepdims=True) * (1.0 / npix)
        d = h - mu
        if valid is not None:
            d = d * valid
        var = jnp.sum(d * d, axis=-1, keepdims=True) * (1.0 / npix)
        h = d * jax.lax.rsqrt(var + 1e-5)
        return jnp.where(h >= 0, h, 0.3 * h)

    def _softmax(m):
        m = m - jnp.max(m, axis=-1, keepdims=True)
        e = jnp.exp(m)
        return e * pl.reciprocal(jnp.sum(e, axis=-1, keepdims=True), approx=True)

    def _mm(a, b):
        return jnp.dot(a.astype(mxu_dtype), b.astype(mxu_dtype),
                       preferred_element_type=jnp.float32)

    def kernel(w12_ref, x_ref, mfull_ref, mpool_ref, pool_ref,
               wk432_ref, wk288_ref, wk576_ref, wk144_ref, bias_ref, out_ref):
        # pan/feat channel-align: ONE block-diagonal conv over the stacked (pan|feat) channels
        al = _conv3x3(x_ref[0], mfull_ref, wk432_ref[...], bias_ref[0:2 * C, :],
                      W, HW, cin_align)
        al = _inorm_lrelu(al, HW)                      # rows [0,C) = pan_a, [C,2C) = feat_a
        pan_a = al[0:C, :]
        x = pan_a + al[C:2 * C, :]

        # adaptive avg-pool to (6, 10): one bf16 matmul with the combined pooling matrix
        y = jnp.dot(x.astype(mxu_dtype), pool_ref[...], preferred_element_type=jnp.float32)
        valid = mpool_ref[4][0:1, :].astype(jnp.float32)   # 1 exactly on the 60 real pooled pixels

        # c_attention1 + c_attention2 fused into ONE conv matmul (shared im2col of y)
        y12 = _inorm_lrelu(
            _conv3x3(y, mpool_ref, wk288_ref[0:2 * C, :], bias_ref[2 * C:4 * C, :],
                     POOL_W, POOL_LANES, C),
            NPOOL, valid)                                   # rows [0,C) = y1, [C,2C) = y2

        # all four gram matrices from ONE (2C,2C) = Y @ Y.T (bf16 operands, f32 acc)
        yb = y12.astype(mxu_dtype)
        G = jax.lax.dot_general(yb, yb, (((1,), (1,)), ((), ())),
                                preferred_element_type=jnp.float32)
        M_t1 = _softmax(G[0:C, 0:C])
        M_s1 = _softmax(G[0:C, C:2 * C])
        M_s2 = _softmax(G[C:2 * C, 0:C])
        M_t2 = _softmax(G[C:2 * C, C:2 * C])
        w1 = w12_ref[0]
        w2 = w12_ref[1]
        A1 = w1 * M_t1 + (1.0 - w1) * M_s1
        A2 = w2 * M_t2 + (1.0 - w2) * M_s2

        # block-diagonal attention apply + residual for both streams in one matmul
        zero = jnp.zeros_like(A1)
        A_bd = jnp.concatenate([jnp.concatenate([A1, zero], axis=1),
                                jnp.concatenate([zero, A2], axis=1)], axis=0)
        att = _mm(A_bd, al) + al                            # (2C, HW) = [x_t1; x_t2]

        # final_pan / final_feat aligns as ONE block-diagonal conv over [x_t1; x_t2]
        ff = _inorm_lrelu(
            _conv3x3(att, mfull_ref, wk576_ref[0:2 * C, :], bias_ref[4 * C:6 * C, :],
                     W, HW, 2 * C),
            HW)

        # TODO(synk): CrossAttention / CoorAttention live in netutils (not provided);
        #             placeholders: sum fusion / identity.
        ca = ff[0:C, :] + ff[C:2 * C, :]
        edge = jnp.concatenate([ca, pan_a], axis=0)         # (2C, HW)

        # TODO(synk): ResBlock lives in netutils (not provided); placeholder =
        #             GELU(conv3x3(2C->C)) + 1x1-conv skip(2C->C); the skip weights sit on the
        #             centre-tap columns of the same patch matmul (output rows [C,2C)).
        rs = _conv3x3(edge, mfull_ref, wk576_ref[2 * C:4 * C, :], bias_ref[6 * C:8 * C, :],
                      W, HW, 2 * C)
        r = rs[0:C, :]
        r = 0.5 * r * (1.0 + jnp.tanh(_GELU_C * (r + 0.044715 * r * r * r)))   # tanh GELU
        h1 = r + rs[C:2 * C, :]

        # proj_conv1 (eval-mode BatchNorm folded into its weights/bias), then proj_conv2
        h2 = _conv3x3(h1, mfull_ref, wk288_ref[2 * C:2 * C + C // 2, :],
                      bias_ref[8 * C:8 * C + C // 2, :], W, HW, C)
        out_ref[0] = _conv3x3(h2, mfull_ref, wk144_ref[...],
                              bias_ref[8 * C + C // 2:8 * C + C // 2 + ch_ms, :],
                              W, HW, C // 2)

    return kernel


# ----------------------------------------------------------------------------
# Parameters (deterministic synthetic init; PyTorch layouts)
# ----------------------------------------------------------------------------
def init_params(key, ch_pan, ch_feat, ch_ms):
    def conv_p(k, cin, cout, scale=0.05):
        kw, kb = jax.random.split(k)
        return {"w": scale * jax.random.normal(kw, (cout, cin, 3, 3), jnp.float32),
                "b": 0.01 * jax.random.normal(kb, (cout,), jnp.float32)}

    keys = jax.random.split(key, 12)
    return {
        "pan_ch_align": conv_p(keys[0], ch_pan, ch_feat),
        "feat_ch_align": conv_p(keys[1], ch_feat, ch_feat),
        "c_attention1": conv_p(keys[2], ch_feat, ch_feat),
        "c_attention2": conv_p(keys[3], ch_feat, ch_feat),
        "final_pan_ch_align": conv_p(keys[4], ch_feat, ch_feat),
        "final_feat_ch_align": conv_p(keys[5], ch_feat, ch_feat),
        "w12": jnp.array([0.5, 0.5], jnp.float32),              # (w1, w2)
        "res_conv": conv_p(keys[6], 2 * ch_feat, ch_feat),
        "res_skip_w": 0.05 * jax.random.normal(keys[7], (ch_feat, 2 * ch_feat), jnp.float32),
        "res_skip_b": jnp.zeros((ch_feat,), jnp.float32),
        "proj_conv1": conv_p(keys[8], ch_feat, ch_feat // 2),
        "bn": {"gamma": jnp.ones((ch_feat // 2,), jnp.float32),
               "beta": jnp.zeros((ch_feat // 2,), jnp.float32),
               "mean": jnp.zeros((ch_feat // 2,), jnp.float32),
               "var": jnp.ones((ch_feat // 2,), jnp.float32)},
        "proj_conv2": conv_p(keys[9], ch_feat // 2, ch_ms),
    }


# ----------------------------------------------------------------------------
# Forward pass (single fused pallas_call, grid over batch)
# ----------------------------------------------------------------------------
@jax.jit
def edge_detection_attention_v2(params, pan_nchw, feat_nchw):
    B, ch_pan, H, W = pan_nchw.shape
    C = feat_nchw.shape[1]
    ch_ms = params["proj_conv2"]["w"].shape[0]
    HW = H * W
    cp_pad = ((ch_pan + 15) // 16) * 16          # Cin % 16 == 0 -> clean bf16 sublane packing
    patch_dtype = _patch_dtype()

    # ---- host-side constants (static under jit) -------------------------------------------
    mexp_full = jnp.asarray(
        np.repeat(_make_shift_masks(H, W, HW)[:, None, :], 2 * C, axis=1), dtype=patch_dtype)
    mexp_pool = jnp.asarray(
        np.repeat(_make_shift_masks(POOL_H, POOL_W, POOL_LANES)[:, None, :], C, axis=1),
        dtype=patch_dtype)
    pool_mat = jnp.asarray(_make_pool_matrix(H, W, POOL_H, POOL_W, POOL_LANES), dtype=MXU_DTYPE)

    # ---- layout plumbing: NCHW -> lane-dense (C, H*W); pan+feat stacked along channels -----
    pan_flat = jnp.pad(pan_nchw.reshape(B, ch_pan, HW).astype(jnp.float32),
                       ((0, 0), (0, cp_pad - ch_pan), (0, 0)))
    feat_flat = feat_nchw.reshape(B, C, HW).astype(jnp.float32)
    x_in = jnp.concatenate([pan_flat, feat_flat], axis=1)            # (B, cp_pad + C, HW)

    # ---- weights: im2col-flattened, fused, packed into per-K bf16 slabs + one bias slab ----
    w_pan = jnp.pad(params["pan_ch_align"]["w"],
                    ((0, 0), (0, cp_pad - ch_pan), (0, 0), (0, 0)))
    w_align = _flatten_conv_weight(_block_diag_oihw(w_pan, params["feat_ch_align"]["w"]))
    b_align = jnp.concatenate([params["pan_ch_align"]["b"], params["feat_ch_align"]["b"]])

    w_c12 = jnp.concatenate([_flatten_conv_weight(params["c_attention1"]["w"]),
                             _flatten_conv_weight(params["c_attention2"]["w"])], axis=0)
    b_c12 = jnp.concatenate([params["c_attention1"]["b"], params["c_attention2"]["b"]])

    w_fpff = _flatten_conv_weight(_block_diag_oihw(params["final_pan_ch_align"]["w"],
                                                   params["final_feat_ch_align"]["w"]))
    b_fpff = jnp.concatenate([params["final_pan_ch_align"]["b"],
                              params["final_feat_ch_align"]["b"]])

    w_res = _flatten_conv_weight(params["res_conv"]["w"])
    w_skip = jnp.zeros((C, 9, 2 * C), jnp.float32).at[:, 4, :].set(params["res_skip_w"])
    w_res_skip = jnp.concatenate([w_res, w_skip.reshape(C, 9 * 2 * C)], axis=0)
    b_res_skip = jnp.concatenate([params["res_conv"]["b"], params["res_skip_b"]])

    # eval-mode BatchNorm2d (running stats) folded into proj_conv1
    bn = params["bn"]
    s = bn["gamma"] * jax.lax.rsqrt(bn["var"] + 1e-5)
    w_p1 = _flatten_conv_weight(params["proj_conv1"]["w"]) * s[:, None]
    b_p1 = params["proj_conv1"]["b"] * s + bn["beta"] - bn["mean"] * s
    w_p2 = _flatten_conv_weight(params["proj_conv2"]["w"])
    b_p2 = params["proj_conv2"]["b"]

    wk432 = w_align.astype(MXU_DTYPE)                                        # (2C, 9*(cp_pad+C))
    wk288 = jnp.concatenate([w_c12, w_p1], axis=0).astype(MXU_DTYPE)         # (2C + C//2, 9C)
    wk576 = jnp.concatenate([w_fpff, w_res_skip], axis=0).astype(MXU_DTYPE)  # (4C, 18C)
    wk144 = w_p2.astype(MXU_DTYPE)                                           # (ch_ms, 9*C//2)
    bias_slab = jnp.concatenate([b_align, b_c12, b_fpff, b_res_skip, b_p1, b_p2]
                                ).reshape(-1, 1).astype(jnp.float32)         # (8C + C//2 + ch_ms, 1)

    const_args = [mexp_full, mexp_pool, pool_mat, wk432, wk288, wk576, wk144, bias_slab]
    const_specs = [pl.BlockSpec(a.shape, (lambda nd: (lambda i: (0,) * nd))(a.ndim))
                   for a in const_args]

    kernel = _make_fused_kernel(H, W, C, ch_ms, cp_pad + C, patch_dtype, MXU_DTYPE)

    out = pl.pallas_call(
        kernel,
        out_shape=jax.ShapeDtypeStruct((B, ch_ms, HW), jnp.float32),
        grid=(B,),
        in_specs=([pl.BlockSpec(memory_space=pltpu.MemorySpace.SMEM),          # (w1, w2)
                   pl.BlockSpec((1, cp_pad + C, HW), lambda i: (i, 0, 0))]     # stacked pan|feat
                  + const_specs),
        out_specs=pl.BlockSpec((1, ch_ms, HW), lambda i: (i, 0, 0)),
        compiler_params=pltpu.CompilerParams(
            dimension_semantics=("parallel",),          # v7x: 2 TCs split the batch; no-op elsewhere
            vmem_limit_bytes=32 * 1024 * 1024),
    )(params["w12"], x_in, *const_args)

    return out.reshape(B, ch_ms, H, W)


# ----------------------------------------------------------------------------
if __name__ == "__main__":
    B, ch_pan, ch_feat, ch_ms, H, W = 2, 4, 32, 4, 16, 16

    key = jax.random.PRNGKey(0)
    k_pan, k_feat, k_params = jax.random.split(key, 3)
    pan_in = jax.random.normal(k_pan, (B, ch_pan, H, W), jnp.float32)
    feat_in = jax.random.normal(k_feat, (B, ch_feat, H, W), jnp.float32)
    params = init_params(k_params, ch_pan, ch_feat, ch_ms)

    out = edge_detection_attention_v2(params, pan_in, feat_in)
    out = jax.block_until_ready(out)
    assert out.shape == (B, ch_ms, H, W), out.shape
    assert bool(jnp.all(jnp.isfinite(out)))
    print("KERNEL_OK")
</pallas_src>

<mosaic_0001>
module attributes {stable_mosaic.version = 11 : i64} {
  func.func @kernel(%arg0: i32, %arg1: memref<2xf32, #tpu.memory_space<smem>>, %arg2: memref<1x48x256xf32, #tpu.memory_space<vmem>>, %arg3: memref<9x64x256xf32, #tpu.memory_space<vmem>>, %arg4: memref<9x32x128xf32, #tpu.memory_space<vmem>>, %arg5: memref<256x128xbf16, #tpu.memory_space<vmem>>, %arg6: memref<64x432xbf16, #tpu.memory_space<vmem>>, %arg7: memref<80x288xbf16, #tpu.memory_space<vmem>>, %arg8: memref<128x576xbf16, #tpu.memory_space<vmem>>, %arg9: memref<4x144xbf16, #tpu.memory_space<vmem>>, %arg10: memref<276x1xf32, #tpu.memory_space<vmem>>, %arg11: memref<1x4x256xf32, #tpu.memory_space<vmem>>) attributes {dimension_semantics = [#tpu.dimension_semantics<parallel>], iteration_bounds = array<i64: 2>, scalar_prefetch = 0 : i64, scratch_operands = 0 : i64, tpu.core_type = #tpu.core_type<tc>, window_params = [{transform_indices = @transform_0, window_bounds = array<i64: 2>}, {transform_indices = @transform_1, window_bounds = array<i64: 1, 48, 256>}, {pipeline_mode = #tpu.pipeline_mode<synchronous>, transform_indices = @transform_2, window_bounds = array<i64: 9, 64, 256>}, {pipeline_mode = #tpu.pipeline_mode<synchronous>, transform_indices = @transform_3, window_bounds = array<i64: 9, 32, 128>}, {pipeline_mode = #tpu.pipeline_mode<synchronous>, transform_indices = @transform_4, window_bounds = array<i64: 256, 128>}, {pipeline_mode = #tpu.pipeline_mode<synchronous>, transform_indices = @transform_5, window_bounds = array<i64: 64, 432>}, {pipeline_mode = #tpu.pipeline_mode<synchronous>, transform_indices = @transform_6, window_bounds = array<i64: 80, 288>}, {pipeline_mode = #tpu.pipeline_mode<synchronous>, transform_indices = @transform_7, window_bounds = array<i64: 128, 576>}, {pipeline_mode = #tpu.pipeline_mode<synchronous>, transform_indices = @transform_8, window_bounds = array<i64: 4, 144>}, {pipeline_mode = #tpu.pipeline_mode<synchronous>, transform_indices = @transform_9, window_bounds = array<i64: 276, 1>}, {transform_indices = @transform_10, window_bounds = array<i64: 1, 4, 256>}]} {
    %c0 = arith.constant 0 : index
    %c0_0 = arith.constant 0 : index
    %c0_1 = arith.constant 0 : index
    %0 = vector.load %arg2[%c0, %c0_0, %c0_1] : memref<1x48x256xf32, #tpu.memory_space<vmem>>, vector<1x48x256xf32>
    %1 = vector.shape_cast %0 : vector<1x48x256xf32> to vector<48x256xf32>
    %c0_2 = arith.constant 0 : index
    %c0_3 = arith.constant 0 : index
    %2 = vector.load %arg6[%c0_2, %c0_3] : memref<64x432xbf16, #tpu.memory_space<vmem>>, vector<64x432xbf16>
    %c0_4 = arith.constant 0 : index
    %c0_5 = arith.constant 0 : index
    %3 = vector.load %arg10[%c0_4, %c0_5] : memref<276x1xf32, #tpu.memory_space<vmem>>, vector<64x1xf32>
    %c17_i32 = arith.constant 17 : i32
    %4 = tpu.dynamic_rotate %1 by %c17_i32 dim 1 : vector<48x256xf32>, i32 -> vector<48x256xf32>
    %c0_6 = arith.constant 0 : index
    %c0_7 = arith.constant 0 : index
    %c0_8 = arith.constant 0 : index
    %5 = vector.load %arg3[%c0_6, %c0_7, %c0_8] : memref<9x64x256xf32, #tpu.memory_space<vmem>>, vector<1x64x256xf32>
    %6 = vector.shape_cast %5 : vector<1x64x256xf32> to vector<64x256xf32>
    %7 = vector.extract_strided_slice %6 {offsets = [0, 0], sizes = [48, 256], strides = [1, 1]} : vector<64x256xf32> to vector<48x256xf32>
    %8 = arith.mulf %4, %7 : vector<48x256xf32>
    %c16_i32 = arith.constant 16 : i32
    %9 = tpu.dynamic_rotate %1 by %c16_i32 dim 1 : vector<48x256xf32>, i32 -> vector<48x256xf32>
    %c1 = arith.constant 1 : index
    %c0_9 = arith.constant 0 : index
    %c0_10 = arith.constant 0 : index
    %10 = vector.load %arg3[%c1, %c0_9, %c0_10] : memref<9x64x256xf32, #tpu.memory_space<vmem>>, vector<1x64x256xf32>
    %11 = vector.shape_cast %10 : vector<1x64x256xf32> to vector<64x256xf32>
    %12 = vector.extract_strided_slice %11 {offsets = [0, 0], sizes = [48, 256], strides = [1, 1]} : vector<64x256xf32> to vector<48x256xf32>
    %13 = arith.mulf %9, %12 : vector<48x256xf32>
    %c15_i32 = arith.constant 15 : i32
    %14 = tpu.dynamic_rotate %1 by %c15_i32 dim 1 : vector<48x256xf32>, i32 -> vector<48x256xf32>
    %c2 = arith.constant 2 : index
    %c0_11 = arith.constant 0 : index
    %c0_12 = arith.constant 0 : index
    %15 = vector.load %arg3[%c2, %c0_11, %c0_12] : memref<9x64x256xf32, #tpu.memory_space<vmem>>, vector<1x64x256xf32>
    %16 = vector.shape_cast %15 : vector<1x64x256xf32> to vector<64x256xf32>
    %17 = vector.extract_strided_slice %16 {offsets = [0, 0], sizes = [48, 256], strides = [1, 1]} : vector<64x256xf32> to vector<48x256xf32>
    %18 = arith.mulf %14, %17 : vector<48x256xf32>
    %c1_i32 = arith.constant 1 : i32
    %19 = tpu.dynamic_rotate %1 by %c1_i32 dim 1 : vector<48x256xf32>, i32 -> vector<48x256xf32>
    %c3 = arith.constant 3 : index
    %c0_13 = arith.constant 0 : index
    %c0_14 = arith.constant 0 : index
    %20 = vector.load %arg3[%c3, %c0_13, %c0_14] : memref<9x64x256xf32, #tpu.memory_space<vmem>>, vector<1x64x256xf32>
    %21 = vector.shape_cast %20 : vector<1x64x256xf32> to vector<64x256xf32>
    %22 = vector.extract_strided_slice %21 {offsets = [0, 0], sizes = [48, 256], strides = [1, 1]} : vector<64x256xf32> to vector<48x256xf32>
    %23 = arith.mulf %19, %22 : vector<48x256xf32>
    %c255_i32 = arith.constant 255 : i32
    %24 = tpu.dynamic_rotate %1 by %c255_i32 dim 1 : vector<48x256xf32>, i32 -> vector<48x256xf32>
    %c5 = arith.constant 5 : index
    %c0_15 = arith.constant 0 : index
    %c0_16 = arith.constant 0 : index
    %25 = vector.load %arg3[%c5, %c0_15, %c0_16] : memref<9x64x256xf32, #tpu.memory_space<vmem>>, vector<1x64x256xf32>
    %26 = vector.shape_cast %25 : vector<1x64x256xf32> to vector<64x256xf32>
    %27 = vector.extract_strided_slice %26 {offsets = [0, 0], sizes = [48, 256], strides = [1, 1]} : vector<64x256xf32> to vector<48x256xf32>
    %28 = arith.mulf %24, %27 : vector<48x256xf32>
    %c241_i32 = arith.constant 241 : i32
    %29 = tpu.dynamic_rotate %1 by %c241_i32 dim 1 : vector<48x256xf32>, i32 -> vector<48x256xf32>
    %c6 = arith.constant 6 : index
    %c0_17 = arith.constant 0 : index
    %c0_18 = arith.constant 0 : index
    %30 = vector.load %arg3[%c6, %c0_17, %c0_18] : memref<9x64x256xf32, #tpu.memory_space<vmem>>, vector<1x64x256xf32>
    %31 = vector.shape_cast %30 : vector<1x64x256xf32> to vector<64x256xf32>
    %32 = vector.extract_strided_slice %31 {offsets = [0, 0], sizes = [48, 256], strides = [1, 1]} : vector<64x256xf32> to vector<48x256xf32>
    %33 = arith.mulf %29, %32 : vector<48x256xf32>
    %c240_i32 = arith.constant 240 : i32
    %34 = tpu.dynamic_rotate %1 by %c240_i32 dim 1 : vector<48x256xf32>, i32 -> vector<48x256xf32>
    %c7 = arith.constant 7 : index
    %c0_19 = arith.constant 0 : index
    %c0_20 = arith.constant 0 : index
    %35 = vector.load %arg3[%c7, %c0_19, %c0_20] : memref<9x64x256xf32, #tpu.memory_space<vmem>>, vector<1x64x256xf32>
    %36 = vector.shape_cast %35 : vector<1x64x256xf32> to vector<64x256xf32>
    %37 = vector.extract_strided_slice %36 {offsets = [0, 0], sizes = [48, 256], strides = [1, 1]} : vector<64x256xf32> to vector<48x256xf32>
    %38 = arith.mulf %34, %37 : vector<48x256xf32>
    %c239_i32 = arith.constant 239 : i32
    %39 = tpu.dynamic_rotate %1 by %c239_i32 dim 1 : vector<48x256xf32>, i32 -> vector<48x256xf32>
    %c8 = arith.constant 8 : index
    %c0_21 = arith.constant 0 : index
    %c0_22 = arith.constant 0 : index
    %40 = vector.load %arg3[%c8, %c0_21, %c0_22] : memref<9x64x256xf32, #tpu.memory_space<vmem>>, vector<1x64x256xf32>
    %41 = vector.shape_cast %40 : vector<1x64x256xf32> to vector<64x256xf32>
    %42 = vector.extract_strided_slice %41 {offsets = [0, 0], sizes = [48, 256], strides = [1, 1]} : vector<64x256xf32> to vector<48x256xf32>
    %43 = arith.mulf %39, %42 : vector<48x256xf32>
    %44 = tpu.concatenate %8, %13, %18, %23, %1, %28, %33, %38, %43 in 0 : vector<48x256xf32>, vector<48x256xf32>, vector<48x256xf32>, vector<48x256xf32>, vector<48x256xf32>, vector<48x256xf32>, vector<48x256xf32>, vector<48x256xf32>, vector<48x256xf32> -> vector<432x256xf32>
    %45 = arith.truncf %44 : vector<432x256xf32> to vector<432x256xbf16>
    %cst = arith.constant dense<0.000000e+00> : vector<64x256xf32>
    %46 = tpu.matmul %2, %45, %cst {dimension_numbers = #tpu.dot_dimension_numbers<[1], [0], [0], [1], [0, 0, 1, 1], [], []>} : vector<64x432xbf16>, vector<432x256xbf16>, vector<64x256xf32> -> vector<64x256xf32>
    %47 = vector.broadcast %3 : vector<64x1xf32> to vector<64x256xf32>
    %48 = arith.addf %46, %47 : vector<64x256xf32>
    %cst_23 = arith.constant dense<0.000000e+00> : vector<64xf32>
    %49 = vector.multi_reduction <add>, %48, %cst_23 [1] : vector<64x256xf32> to vector<64xf32>
    %50 = vector.shape_cast %49 : vector<64xf32> to vector<64x1xf32>
    %cst_24 = arith.constant 3.906250e-03 : f32
    %51 = vector.broadcast %cst_24 : f32 to vector<64x1xf32>
    %52 = arith.mulf %50, %51 : vector<64x1xf32>
    %53 = vector.broadcast %52 : vector<64x1xf32> to vector<64x256xf32>
    %54 = arith.subf %48, %53 : vector<64x256xf32>
    %55 = arith.mulf %54, %54 : vector<64x256xf32>
    %cst_25 = arith.constant dense<0.000000e+00> : vector<64xf32>
    %56 = vector.multi_reduction <add>, %55, %cst_25 [1] : vector<64x256xf32> to vector<64xf32>
    %57 = vector.shape_cast %56 : vector<64xf32> to vector<64x1xf32>
    %cst_26 = arith.constant 3.906250e-03 : f32
    %58 = vector.broadcast %cst_26 : f32 to vector<64x1xf32>
    %59 = arith.mulf %57, %58 : vector<64x1xf32>
    %cst_27 = arith.constant 9.99999974E-6 : f32
    %60 = vector.broadcast %cst_27 : f32 to vector<64x1xf32>
    %61 = arith.addf %59, %60 : vector<64x1xf32>
    %62 = math.rsqrt %61 : vector<64x1xf32>
    %63 = vector.broadcast %62 : vector<64x1xf32> to vector<64x256xf32>
    %64 = arith.mulf %54, %63 : vector<64x256xf32>
    %cst_28 = arith.constant 0.000000e+00 : f32
    %65 = vector.broadcast %cst_28 : f32 to vector<64x256xf32>
    %66 = arith.cmpf oge, %64, %65 : vector<64x256xf32>
    %cst_29 = arith.constant 3.000000e-01 : f32
    %67 = vector.broadcast %cst_29 : f32 to vector<64x256xf32>
    %68 = arith.mulf %67, %64 : vector<64x256xf32>
    %69 = arith.select %66, %64, %68 : vector<64x256xi1>, vector<64x256xf32>
    %70 = vector.extract_strided_slice %69 {offsets = [0, 0], sizes = [32, 256], strides = [1, 1]} : vector<64x256xf32> to vector<32x256xf32>
    %71 = vector.extract_strided_slice %69 {offsets = [32, 0], sizes = [32, 256], strides = [1, 1]} : vector<64x256xf32> to vector<32x256xf32>
    %72 = arith.addf %70, %71 : vector<32x256xf32>
    %73 = arith.truncf %72 : vector<32x256xf32> to vector<32x256xbf16>
    %c0_30 = arith.constant 0 : index
    %c0_31 = arith.constant 0 : index
    %74 = vector.load %arg5[%c0_30, %c0_31] : memref<256x128xbf16, #tpu.memory_space<vmem>>, vector<256x128xbf16>
    %cst_32 = arith.constant dense<0.000000e+00> : vector<32x128xf32>
    %75 = tpu.matmul %73, %74, %cst_32 {dimension_numbers = #tpu.dot_dimension_numbers<[1], [0], [0], [1], [0, 0, 1, 1], [], []>} : vector<32x256xbf16>, vector<256x128xbf16>, vector<32x128xf32> -> vector<32x128xf32>
    %c4 = arith.constant 4 : index
    %c0_33 = arith.constant 0 : index
    %c0_34 = arith.constant 0 : index
    %76 = vector.load %arg4[%c4, %c0_33, %c0_34] : memref<9x32x128xf32, #tpu.memory_space<vmem>>, vector<1x32x128xf32>
    %77 = vector.shape_cast %76 : vector<1x32x128xf32> to vector<32x128xf32>
    %78 = vector.extract_strided_slice %77 {offsets = [0, 0], sizes = [1, 128], strides = [1, 1]} : vector<32x128xf32> to vector<1x128xf32>
    %c0_35 = arith.constant 0 : index
    %c0_36 = arith.constant 0 : index
    %79 = vector.load %arg7[%c0_35, %c0_36] : memref<80x288xbf16, #tpu.memory_space<vmem>>, vector<64x288xbf16>
    %c64 = arith.constant 64 : index
    %c0_37 = arith.constant 0 : index
    %80 = vector.load %arg10[%c64, %c0_37] : memref<276x1xf32, #tpu.memory_space<vmem>>, vector<64x1xf32>
    %c11_i32 = arith.constant 11 : i32
    %81 = tpu.dynamic_rotate %75 by %c11_i32 dim 1 : vector<32x128xf32>, i32 -> vector<32x128xf32>
    %c0_38 = arith.constant 0 : index
    %c0_39 = arith.constant 0 : index
    %c0_40 = arith.constant 0 : index
    %82 = vector.load %arg4[%c0_38, %c0_39, %c0_40] : memref<9x32x128xf32, #tpu.memory_space<vmem>>, vector<1x32x128xf32>
    %83 = vector.shape_cast %82 : vector<1x32x128xf32> to vector<32x128xf32>
    %84 = arith.mulf %81, %83 : vector<32x128xf32>
    %c10_i32 = arith.constant 10 : i32
    %85 = tpu.dynamic_rotate %75 by %c10_i32 dim 1 : vector<32x128xf32>, i32 -> vector<32x128xf32>
    %c1_41 = arith.constant 1 : index
    %c0_42 = arith.constant 0 : index
    %c0_43 = arith.constant 0 : index
    %86 = vector.load %arg4[%c1_41, %c0_42, %c0_43] : memref<9x32x128xf32, #tpu.memory_space<vmem>>, vector<1x32x128xf32>
    %87 = vector.shape_cast %86 : vector<1x32x128xf32> to vector<32x128xf32>
    %88 = arith.mulf %85, %87 : vector<32x128xf32>
    %c9_i32 = arith.constant 9 : i32
    %89 = tpu.dynamic_rotate %75 by %c9_i32 dim 1 : vector<32x128xf32>, i32 -> vector<32x128xf32>
    %c2_44 = arith.constant 2 : index
    %c0_45 = arith.constant 0 : index
    %c0_46 = arith.constant 0 : index
    %90 = vector.load %arg4[%c2_44, %c0_45, %c0_46] : memref<9x32x128xf32, #tpu.memory_space<vmem>>, vector<1x32x128xf32>
    %91 = vector.shape_cast %90 : vector<1x32x128xf32> to vector<32x128xf32>
    %92 = arith.mulf %89, %91 : vector<32x128xf32>
    %c1_i32_47 = arith.constant 1 : i32
    %93 = tpu.dynamic_rotate %75 by %c1_i32_47 dim 1 : vector<32x128xf32>, i32 -> vector<32x128xf32>
    %c3_48 = arith.constant 3 : index
    %c0_49 = arith.constant 0 : index
    %c0_50 = arith.constant 0 : index
    %94 = vector.load %arg4[%c3_48, %c0_49, %c0_50] : memref<9x32x128xf32, #tpu.memory_space<vmem>>, vector<1x32x128xf32>
    %95 = vector.shape_cast %94 : vector<1x32x128xf32> to vector<32x128xf32>
    %96 = arith.mulf %93, %95 : vector<32x128xf32>
    %c127_i32 = arith.constant 127 : i32
    %97 = tpu.dynamic_rotate %75 by %c127_i32 dim 1 : vector<32x128xf32>, i32 -> vector<32x128xf32>
    %c5_51 = arith.constant 5 : index
    %c0_52 = arith.constant 0 : index
    %c0_53 = arith.constant 0 : index
    %98 = vector.load %arg4[%c5_51, %c0_52, %c0_53] : memref<9x32x128xf32, #tpu.memory_space<vmem>>, vector<1x32x128xf32>
    %99 = vector.shape_cast %98 : vector<1x32x128xf32> to vector<32x128xf32>
    %100 = arith.mulf %97, %99 : vector<32x128xf32>
    %c119_i32 = arith.constant 119 : i32
    %101 = tpu.dynamic_rotate %75 by %c119_i32 dim 1 : vector<32x128xf32>, i32 -> vector<32x128xf32>
    %c6_54 = arith.constant 6 : index
    %c0_55 = arith.constant 0 : index
    %c0_56 = arith.constant 0 : index
    %102 = vector.load %arg4[%c6_54, %c0_55, %c0_56] : memref<9x32x128xf32, #tpu.memory_space<vmem>>, vector<1x32x128xf32>
    %103 = vector.shape_cast %102 : vector<1x32x128xf32> to vector<32x128xf32>
    %104 = arith.mulf %101, %103 : vector<32x128xf32>
    %c118_i32 = arith.constant 118 : i32
    %105 = tpu.dynamic_rotate %75 by %c118_i32 dim 1 : vector<32x128xf32>, i32 -> vector<32x128xf32>
    %c7_57 = arith.constant 7 : index
    %c0_58 = arith.constant 0 : index
    %c0_59 = arith.constant 0 : index
    %106 = vector.load %arg4[%c7_57, %c0_58, %c0_59] : memref<9x32x128xf32, #tpu.memory_space<vmem>>, vector<1x32x128xf32>
    %107 = vector.shape_cast %106 : vector<1x32x128xf32> to vector<32x128xf32>
    %108 = arith.mulf %105, %107 : vector<32x128xf32>
    %c117_i32 = arith.constant 117 : i32
    %109 = tpu.dynamic_rotate %75 by %c117_i32 dim 1 : vector<32x128xf32>, i32 -> vector<32x128xf32>
    %c8_60 = arith.constant 8 : index
    %c0_61 = arith.constant 0 : index
    %c0_62 = arith.constant 0 : index
    %110 = vector.load %arg4[%c8_60, %c0_61, %c0_62] : memref<9x32x128xf32, #tpu.memory_space<vmem>>, vector<1x32x128xf32>
    %111 = vector.shape_cast %110 : vector<1x32x128xf32> to vector<32x128xf32>
    %112 = arith.mulf %109, %111 : vector<32x128xf32>
    %113 = tpu.concatenate %84, %88, %92, %96, %75, %100, %104, %108, %112 in 0 : vector<32x128xf32>, vector<32x128xf32>, vector<32x128xf32>, vector<32x128xf32>, vector<32x128xf32>, vector<32x128xf32>, vector<32x128xf32>, vector<32x128xf32>, vector<32x128xf32> -> vector<288x128xf32>
    %114 = arith.truncf %113 : vector<288x128xf32> to vector<288x128xbf16>
    %cst_63 = arith.constant dense<0.000000e+00> : vector<64x128xf32>
    %115 = tpu.matmul %79, %114, %cst_63 {dimension_numbers = #tpu.dot_dimension_numbers<[1], [0], [0], [1], [0, 0, 1, 1], [], []>} : vector<64x288xbf16>, vector<288x128xbf16>, vector<64x128xf32> -> vector<64x128xf32>
    %116 = vector.broadcast %80 : vector<64x1xf32> to vector<64x128xf32>
    %117 = arith.addf %115, %116 : vector<64x128xf32>
    %118 = vector.broadcast %78 : vector<1x128xf32> to vector<64x128xf32>
    %119 = arith.mulf %117, %118 : vector<64x128xf32>
    %cst_64 = arith.constant dense<0.000000e+00> : vector<64xf32>
    %120 = vector.multi_reduction <add>, %119, %cst_64 [1] : vector<64x128xf32> to vector<64xf32>
    %121 = vector.shape_cast %120 : vector<64xf32> to vector<64x1xf32>
    %cst_65 = arith.constant 0.0166666675 : f32
    %122 = vector.broadcast %cst_65 : f32 to vector<64x1xf32>
    %123 = arith.mulf %121, %122 : vector<64x1xf32>
    %124 = vector.broadcast %123 : vector<64x1xf32> to vector<64x128xf32>
    %125 = arith.subf %119, %124 : vector<64x128xf32>
    %126 = vector.broadcast %78 : vector<1x128xf32> to vector<64x128xf32>
    %127 = arith.mulf %125, %126 : vector<64x128xf32>
    %128 = arith.mulf %127, %127 : vector<64x128xf32>
    %cst_66 = arith.constant dense<0.000000e+00> : vector<64xf32>
    %129 = vector.multi_reduction <add>, %128, %cst_66 [1] : vector<64x128xf32> to vector<64xf32>
    %130 = vector.shape_cast %129 : vector<64xf32> to vector<64x1xf32>
    %cst_67 = arith.constant 0.0166666675 : f32
    %131 = vector.broadcast %cst_67 : f32 to vector<64x1xf32>
    %132 = arith.mulf %130, %131 : vector<64x1xf32>
    %cst_68 = arith.constant 9.99999974E-6 : f32
    %133 = vector.broadcast %cst_68 : f32 to vector<64x1xf32>
    %134 = arith.addf %132, %133 : vector<64x1xf32>
    %135 = math.rsqrt %134 : vector<64x1xf32>
    %136 = vector.broadcast %135 : vector<64x1xf32> to vector<64x128xf32>
    %137 = arith.mulf %127, %136 : vector<64x128xf32>
    %cst_69 = arith.constant 0.000000e+00 : f32
    %138 = vector.broadcast %cst_69 : f32 to vector<64x128xf32>
    %139 = arith.cmpf oge, %137, %138 : vector<64x128xf32>
    %cst_70 = arith.constant 3.000000e-01 : f32
    %140 = vector.broadcast %cst_70 : f32 to vector<64x128xf32>
    %141 = arith.mulf %140, %137 : vector<64x128xf32>
    %142 = arith.select %139, %137, %141 : vector<64x128xi1>, vector<64x128xf32>
    %143 = arith.truncf %142 : vector<64x128xf32> to vector<64x128xbf16>
    %cst_71 = arith.constant dense<0.000000e+00> : vector<64x64xf32>
    %144 = tpu.matmul %143, %143, %cst_71 {dimension_numbers = #tpu.dot_dimension_numbers<[1], [1], [0], [0], [0, 0, 1, 0], [], []>} : vector<64x128xbf16>, vector<64x128xbf16>, vector<64x64xf32> -> vector<64x64xf32>
    %145 = vector.extract_strided_slice %144 {offsets = [0, 0], sizes = [32, 32], strides = [1, 1]} : vector<64x64xf32> to vector<32x32xf32>
    %cst_72 = arith.constant dense<0xFF800000> : vector<32xf32>
    %146 = vector.multi_reduction <maximumf>, %145, %cst_72 [1] : vector<32x32xf32> to vector<32xf32>
    %147 = vector.shape_cast %146 : vector<32xf32> to vector<32x1xf32>
    %148 = vector.broadcast %147 : vector<32x1xf32> to vector<32x32xf32>
    %149 = arith.subf %145, %148 : vector<32x32xf32>
    %150 = math.exp %149 : vector<32x32xf32>
    %cst_73 = arith.constant dense<0.000000e+00> : vector<32xf32>
    %151 = vector.multi_reduction <add>, %150, %cst_73 [1] : vector<32x32xf32> to vector<32xf32>
    %152 = vector.shape_cast %151 : vector<32xf32> to vector<32x1xf32>
    %153 = tpu.reciprocal %152 {approx = true} : vector<32x1xf32> -> vector<32x1xf32>
    %154 = vector.broadcast %153 : vector<32x1xf32> to vector<32x32xf32>
    %155 = arith.mulf %150, %154 : vector<32x32xf32>
    %156 = vector.extract_strided_slice %144 {offsets = [0, 32], sizes = [32, 32], strides = [1, 1]} : vector<64x64xf32> to vector<32x32xf32>
    %cst_74 = arith.constant dense<0xFF800000> : vector<32xf32>
    %157 = vector.multi_reduction <maximumf>, %156, %cst_74 [1] : vector<32x32xf32> to vector<32xf32>
    %158 = vector.shape_cast %157 : vector<32xf32> to vector<32x1xf32>
    %159 = vector.broadcast %158 : vector<32x1xf32> to vector<32x32xf32>
    %160 = arith.subf %156, %159 : vector<32x32xf32>
    %161 = math.exp %160 : vector<32x32xf32>
    %cst_75 = arith.constant dense<0.000000e+00> : vector<32xf32>
    %162 = vector.multi_reduction <add>, %161, %cst_75 [1] : vector<32x32xf32> to vector<32xf32>
    %163 = vector.shape_cast %162 : vector<32xf32> to vector<32x1xf32>
    %164 = tpu.reciprocal %163 {approx = true} : vector<32x1xf32> -> vector<32x1xf32>
    %165 = vector.broadcast %164 : vector<32x1xf32> to vector<32x32xf32>
    %166 = arith.mulf %161, %165 : vector<32x32xf32>
    %167 = vector.extract_strided_slice %144 {offsets = [32, 0], sizes = [32, 32], strides = [1, 1]} : vector<64x64xf32> to vector<32x32xf32>
    %cst_76 = arith.constant dense<0xFF800000> : vector<32xf32>
    %168 = vector.multi_reduction <maximumf>, %167, %cst_76 [1] : vector<32x32xf32> to vector<32xf32>
    %169 = vector.shape_cast %168 : vector<32xf32> to vector<32x1xf32>
    %170 = vector.broadcast %169 : vector<32x1xf32> to vector<32x32xf32>
    %171 = arith.subf %167, %170 : vector<32x32xf32>
    %172 = math.exp %171 : vector<32x32xf32>
    %cst_77 = arith.constant dense<0.000000e+00> : vector<32xf32>
    %173 = vector.multi_reduction <add>, %172, %cst_77 [1] : vector<32x32xf32> to vector<32xf32>
    %174 = vector.shape_cast %173 : vector<32xf32> to vector<32x1xf32>
    %175 = tpu.reciprocal %174 {approx = true} : vector<32x1xf32> -> vector<32x1xf32>
    %176 = vector.broadcast %175 : vector<32x1xf32> to vector<32x32xf32>
    %177 = arith.mulf %172, %176 : vector<32x32xf32>
    %178 = vector.extract_strided_slice %144 {offsets = [32, 32], sizes = [32, 32], strides = [1, 1]} : vector<64x64xf32> to vector<32x32xf32>
    %cst_78 = arith.constant dense<0xFF800000> : vector<32xf32>
    %179 = vector.multi_reduction <maximumf>, %178, %cst_78 [1] : vector<32x32xf32> to vector<32xf32>
    %180 = vector.shape_cast %179 : vector<32xf32> to vector<32x1xf32>
    %181 = vector.broadcast %180 : vector<32x1xf32> to vector<32x32xf32>
    %182 = arith.subf %178, %181 : vector<32x32xf32>
    %183 = math.exp %182 : vector<32x32xf32>
    %cst_79 = arith.constant dense<0.000000e+00> : vector<32xf32>
    %184 = vector.multi_reduction <add>, %183, %cst_79 [1] : vector<32x32xf32> to vector<32xf32>
    %185 = vector.shape_cast %184 : vector<32xf32> to vector<32x1xf32>
    %186 = tpu.reciprocal %185 {approx = true} : vector<32x1xf32> -> vector<32x1xf32>
    %187 = vector.broadcast %186 : vector<32x1xf32> to vector<32x32xf32>
    %188 = arith.mulf %183, %187 : vector<32x32xf32>
    %c0_80 = arith.constant 0 : index
    %189 = memref.load %arg1[%c0_80] : memref<2xf32, #tpu.memory_space<smem>>
    %c1_81 = arith.constant 1 : index
    %190 = memref.load %arg1[%c1_81] : memref<2xf32, #tpu.memory_space<smem>>
    %191 = vector.broadcast %189 : f32 to vector<32x32xf32>
    %192 = arith.mulf %191, %155 : vector<32x32xf32>
    %cst_82 = arith.constant 1.000000e+00 : f32
    %193 = arith.subf %cst_82, %189 : f32
    %194 = vector.broadcast %193 : f32 to vector<32x32xf32>
    %195 = arith.mulf %194, %166 : vector<32x32xf32>
    %196 = arith.addf %192, %195 : vector<32x32xf32>
    %197 = vector.broadcast %190 : f32 to vector<32x32xf32>
    %198 = arith.mulf %197, %188 : vector<32x32xf32>
    %cst_83 = arith.constant 1.000000e+00 : f32
    %199 = arith.subf %cst_83, %190 : f32
    %200 = vector.broadcast %199 : f32 to vector<32x32xf32>
    %201 = arith.mulf %200, %177 : vector<32x32xf32>
    %202 = arith.addf %198, %201 : vector<32x32xf32>
    %cst_84 = arith.constant 0.000000e+00 : f32
    %203 = vector.broadcast %cst_84 : f32 to vector<32x32xf32>
    %204 = tpu.concatenate %196, %203 in 1 : vector<32x32xf32>, vector<32x32xf32> -> vector<32x64xf32>
    %205 = tpu.concatenate %203, %202 in 1 : vector<32x32xf32>, vector<32x32xf32> -> vector<32x64xf32>
    %206 = tpu.concatenate %204, %205 in 0 : vector<32x64xf32>, vector<32x64xf32> -> vector<64x64xf32>
    %207 = arith.truncf %206 : vector<64x64xf32> to vector<64x64xbf16>
    %208 = arith.truncf %69 : vector<64x256xf32> to vector<64x256xbf16>
    %cst_85 = arith.constant dense<0.000000e+00> : vector<64x256xf32>
    %209 = tpu.matmul %207, %208, %cst_85 {dimension_numbers = #tpu.dot_dimension_numbers<[1], [0], [0], [1], [0, 0, 1, 1], [], []>} : vector<64x64xbf16>, vector<64x256xbf16>, vector<64x256xf32> -> vector<64x256xf32>
    %210 = arith.addf %209, %69 : vector<64x256xf32>
    %c0_86 = arith.constant 0 : index
    %c0_87 = arith.constant 0 : index
    %211 = vector.load %arg8[%c0_86, %c0_87] : memref<128x576xbf16, #tpu.memory_space<vmem>>, vector<64x576xbf16>
    %c128 = arith.constant 128 : index
    %c0_88 = arith.constant 0 : index
    %212 = vector.load %arg10[%c128, %c0_88] : memref<276x1xf32, #tpu.memory_space<vmem>>, vector<64x1xf32>
    %c17_i32_89 = arith.constant 17 : i32
    %213 = tpu.dynamic_rotate %210 by %c17_i32_89 dim 1 : vector<64x256xf32>, i32 -> vector<64x256xf32>
    %c0_90 = arith.constant 0 : index
    %c0_91 = arith.constant 0 : index
    %c0_92 = arith.constant 0 : index
    %214 = vector.load %arg3[%c0_90, %c0_91, %c0_92] : memref<9x64x256xf32, #tpu.memory_space<vmem>>, vector<1x64x256xf32>
    %215 = vector.shape_cast %214 : vector<1x64x256xf32> to vector<64x256xf32>
    %216 = arith.mulf %213, %215 : vector<64x256xf32>
    %c16_i32_93 = arith.constant 16 : i32
    %217 = tpu.dynamic_rotate %210 by %c16_i32_93 dim 1 : vector<64x256xf32>, i32 -> vector<64x256xf32>
    %c1_94 = arith.constant 1 : index
    %c0_95 = arith.constant 0 : index
    %c0_96 = arith.constant 0 : index
    %218 = vector.load %arg3[%c1_94, %c0_95, %c0_96] : memref<9x64x256xf32, #tpu.memory_space<vmem>>, vector<1x64x256xf32>
    %219 = vector.shape_cast %218 : vector<1x64x256xf32> to vector<64x256xf32>
    %220 = arith.mulf %217, %219 : vector<64x256xf32>
    %c15_i32_97 = arith.constant 15 : i32
    %221 = tpu.dynamic_rotate %210 by %c15_i32_97 dim 1 : vector<64x256xf32>, i32 -> vector<64x256xf32>
    %c2_98 = arith.constant 2 : index
    %c0_99 = arith.constant 0 : index
    %c0_100 = arith.constant 0 : index
    %222 = vector.load %arg3[%c2_98, %c0_99, %c0_100] : memref<9x64x256xf32, #tpu.memory_space<vmem>>, vector<1x64x256xf32>
    %223 = vector.shape_cast %222 : vector<1x64x256xf32> to vector<64x256xf32>
    %224 = arith.mulf %221, %223 : vector<64x256xf32>
    %c1_i32_101 = arith.constant 1 : i32
    %225 = tpu.dynamic_rotate %210 by %c1_i32_101 dim 1 : vector<64x256xf32>, i32 -> vector<64x256xf32>
    %c3_102 = arith.constant 3 : index
    %c0_103 = arith.constant 0 : index
    %c0_104 = arith.constant 0 : index
    %226 = vector.load %arg3[%c3_102, %c0_103, %c0_104] : memref<9x64x256xf32, #tpu.memory_space<vmem>>, vector<1x64x256xf32>
    %227 = vector.shape_cast %226 : vector<1x64x256xf32> to vector<64x256xf32>
    %228 = arith.mulf %225, %227 : vector<64x256xf32>
    %c255_i32_105 = arith.constant 255 : i32
    %229 = tpu.dynamic_rotate %210 by %c255_i32_105 dim 1 : vector<64x256xf32>, i32 -> vector<64x256xf32>
    %c5_106 = arith.constant 5 : index
    %c0_107 = arith.constant 0 : index
    %c0_108 = arith.constant 0 : index
    %230 = vector.load %arg3[%c5_106, %c0_107, %c0_108] : memref<9x64x256xf32, #tpu.memory_space<vmem>>, vector<1x64x256xf32>
    %231 = vector.shape_cast %230 : vector<1x64x256xf32> to vector<64x256xf32>
    %232 = arith.mulf %229, %231 : vector<64x256xf32>
    %c241_i32_109 = arith.constant 241 : i32
    %233 = tpu.dynamic_rotate %210 by %c241_i32_109 dim 1 : vector<64x256xf32>, i32 -> vector<64x256xf32>
    %c6_110 = arith.constant 6 : index
    %c0_111 = arith.constant 0 : index
    %c0_112 = arith.constant 0 : index
    %234 = vector.load %arg3[%c6_110, %c0_111, %c0_112] : memref<9x64x256xf32, #tpu.memory_space<vmem>>, vector<1x64x256xf32>
    %235 = vector.shape_cast %234 : vector<1x64x256xf32> to vector<64x256xf32>
    %236 = arith.mulf %233, %235 : vector<64x256xf32>
    %c240_i32_113 = arith.constant 240 : i32
    %237 = tpu.dynamic_rotate %210 by %c240_i32_113 dim 1 : vector<64x256xf32>, i32 -> vector<64x256xf32>
    %c7_114 = arith.constant 7 : index
    %c0_115 = arith.constant 0 : index
    %c0_116 = arith.constant 0 : index
    %238 = vector.load %arg3[%c7_114, %c0_115, %c0_116] : memref<9x64x256xf32, #tpu.memory_space<vmem>>, vector<1x64x256xf32>
    %239 = vector.shape_cast %238 : vector<1x64x256xf32> to vector<64x256xf32>
    %240 = arith.mulf %237, %239 : vector<64x256xf32>
    %c239_i32_117 = arith.constant 239 : i32
    %241 = tpu.dynamic_rotate %210 by %c239_i32_117 dim 1 : vector<64x256xf32>, i32 -> vector<64x256xf32>
    %c8_118 = arith.constant 8 : index
    %c0_119 = arith.constant 0 : index
    %c0_120 = arith.constant 0 : index
    %242 = vector.load %arg3[%c8_118, %c0_119, %c0_120] : memref<9x64x256xf32, #tpu.memory_space<vmem>>, vector<1x64x256xf32>
    %243 = vector.shape_cast %242 : vector<1x64x256xf32> to vector<64x256xf32>
    %244 = arith.mulf %241, %243 : vector<64x256xf32>
    %245 = tpu.concatenate %216, %220, %224, %228, %210, %232, %236, %240, %244 in 0 : vector<64x256xf32>, vector<64x256xf32>, vector<64x256xf32>, vector<64x256xf32>, vector<64x256xf32>, vector<64x256xf32>, vector<64x256xf32>, vector<64x256xf32>, vector<64x256xf32> -> vector<576x256xf32>
    %246 = arith.truncf %245 : vector<576x256xf32> to vector<576x256xbf16>
    %cst_121 = arith.constant dense<0.000000e+00> : vector<64x256xf32>
    %247 = tpu.matmul %211, %246, %cst_121 {dimension_numbers = #tpu.dot_dimension_numbers<[1], [0], [0], [1], [0, 0, 1, 1], [], []>} : vector<64x576xbf16>, vector<576x256xbf16>, vector<64x256xf32> -> vector<64x256xf32>
    %248 = vector.broadcast %212 : vector<64x1xf32> to vector<64x256xf32>
    %249 = arith.addf %247, %248 : vector<64x256xf32>
    %cst_122 = arith.constant dense<0.000000e+00> : vector<64xf32>
    %250 = vector.multi_reduction <add>, %249, %cst_122 [1] : vector<64x256xf32> to vector<64xf32>
    %251 = vector.shape_cast %250 : vector<64xf32> to vector<64x1xf32>
    %cst_123 = arith.constant 3.906250e-03 : f32
    %252 = vector.broadcast %cst_123 : f32 to vector<64x1xf32>
    %253 = arith.mulf %251, %252 : vector<64x1xf32>
    %254 = vector.broadcast %253 : vector<64x1xf32> to vector<64x256xf32>
    %255 = arith.subf %249, %254 : vector<64x256xf32>
    %256 = arith.mulf %255, %255 : vector<64x256xf32>
    %cst_124 = arith.constant dense<0.000000e+00> : vector<64xf32>
    %257 = vector.multi_reduction <add>, %256, %cst_124 [1] : vector<64x256xf32> to vector<64xf32>
    %258 = vector.shape_cast %257 : vector<64xf32> to vector<64x1xf32>
    %cst_125 = arith.constant 3.906250e-03 : f32
    %259 = vector.broadcast %cst_125 : f32 to vector<64x1xf32>
    %260 = arith.mulf %258, %259 : vector<64x1xf32>
    %cst_126 = arith.constant 9.99999974E-6 : f32
    %261 = vector.broadcast %cst_126 : f32 to vector<64x1xf32>
    %262 = arith.addf %260, %261 : vector<64x1xf32>
    %263 = math.rsqrt %262 : vector<64x1xf32>
    %264 = vector.broadcast %263 : vector<64x1xf32> to vector<64x256xf32>
    %265 = arith.mulf %255, %264 : vector<64x256xf32>
    %cst_127 = arith.constant 0.000000e+00 : f32
    %266 = vector.broadcast %cst_127 : f32 to vector<64x256xf32>
    %267 = arith.cmpf oge, %265, %266 : vector<64x256xf32>
    %cst_128 = arith.constant 3.000000e-01 : f32
    %268 = vector.broadcast %cst_128 : f32 to vector<64x256xf32>
    %269 = arith.mulf %268, %265 : vector<64x256xf32>
    %270 = arith.select %267, %265, %269 : vector<64x256xi1>, vector<64x256xf32>
    %271 = vector.extract_strided_slice %270 {offsets = [0, 0], sizes = [32, 256], strides = [1, 1]} : vector<64x256xf32> to vector<32x256xf32>
    %272 = vector.extract_strided_slice %270 {offsets = [32, 0], sizes = [32, 256], strides = [1, 1]} : vector<64x256xf32> to vector<32x256xf32>
    %273 = arith.addf %271, %272 : vector<32x256xf32>
    %274 = tpu.concatenate %273, %70 in 0 : vector<32x256xf32>, vector<32x256xf32> -> vector<64x256xf32>
    %c64_129 = arith.constant 64 : index
    %c0_130 = arith.constant 0 : index
    %275 = vector.load %arg8[%c64_129, %c0_130] : memref<128x576xbf16, #tpu.memory_space<vmem>>, vector<64x576xbf16>
    %c192 = arith.constant 192 : index
    %c0_131 = arith.constant 0 : index
    %276 = vector.load %arg10[%c192, %c0_131] : memref<276x1xf32, #tpu.memory_space<vmem>>, vector<64x1xf32>
    %c17_i32_132 = arith.constant 17 : i32
    %277 = tpu.dynamic_rotate %274 by %c17_i32_132 dim 1 : vector<64x256xf32>, i32 -> vector<64x256xf32>
    %c0_133 = arith.constant 0 : index
    %c0_134 = arith.constant 0 : index
    %c0_135 = arith.constant 0 : index
    %278 = vector.load %arg3[%c0_133, %c0_134, %c0_135] : memref<9x64x256xf32, #tpu.memory_space<vmem>>, vector<1x64x256xf32>
    %279 = vector.shape_cast %278 : vector<1x64x256xf32> to vector<64x256xf32>
    %280 = arith.mulf %277, %279 : vector<64x256xf32>
    %c16_i32_136 = arith.constant 16 : i32
    %281 = tpu.dynamic_rotate %274 by %c16_i32_136 dim 1 : vector<64x256xf32>, i32 -> vector<64x256xf32>
    %c1_137 = arith.constant 1 : index
    %c0_138 = arith.constant 0 : index
    %c0_139 = arith.constant 0 : index
    %282 = vector.load %arg3[%c1_137, %c0_138, %c0_139] : memref<9x64x256xf32, #tpu.memory_space<vmem>>, vector<1x64x256xf32>
    %283 = vector.shape_cast %282 : vector<1x64x256xf32> to vector<64x256xf32>
    %284 = arith.mulf %281, %283 : vector<64x256xf32>
    %c15_i32_140 = arith.constant 15 : i32
    %285 = tpu.dynamic_rotate %274 by %c15_i32_140 dim 1 : vector<64x256xf32>, i32 -> vector<64x256xf32>
    %c2_141 = arith.constant 2 : index
    %c0_142 = arith.constant 0 : index
    %c0_143 = arith.constant 0 : index
    %286 = vector.load %arg3[%c2_141, %c0_142, %c0_143] : memref<9x64x256xf32, #tpu.memory_space<vmem>>, vector<1x64x256xf32>
    %287 = vector.shape_cast %286 : vector<1x64x256xf32> to vector<64x256xf32>
    %288 = arith.mulf %285, %287 : vector<64x256xf32>
    %c1_i32_144 = arith.constant 1 : i32
    %289 = tpu.dynamic_rotate %274 by %c1_i32_144 dim 1 : vector<64x256xf32>, i32 -> vector<64x256xf32>
    %c3_145 = arith.constant 3 : index
    %c0_146 = arith.constant 0 : index
    %c0_147 = arith.constant 0 : index
    %290 = vector.load %arg3[%c3_145, %c0_146, %c0_147] : memref<9x64x256xf32, #tpu.memory_space<vmem>>, vector<1x64x256xf32>
    %291 = vector.shape_cast %290 : vector<1x64x256xf32> to vector<64x256xf32>
    %292 = arith.mulf %289, %291 : vector<64x256xf32>
    %c255_i32_148 = arith.constant 255 : i32
    %293 = tpu.dynamic_rotate %274 by %c255_i32_148 dim 1 : vector<64x256xf32>, i32 -> vector<64x256xf32>
    %c5_149 = arith.constant 5 : index
    %c0_150 = arith.constant 0 : index
    %c0_151 = arith.constant 0 : index
    %294 = vector.load %arg3[%c5_149, %c0_150, %c0_151] : memref<9x64x256xf32, #tpu.memory_space<vmem>>, vector<1x64x256xf32>
    %295 = vector.shape_cast %294 : vector<1x64x256xf32> to vector<64x256xf32>
    %296 = arith.mulf %293, %295 : vector<64x256xf32>
    %c241_i32_152 = arith.constant 241 : i32
    %297 = tpu.dynamic_rotate %274 by %c241_i32_152 dim 1 : vector<64x256xf32>, i32 -> vector<64x256xf32>
    %c6_153 = arith.constant 6 : index
    %c0_154 = arith.constant 0 : index
    %c0_155 = arith.constant 0 : index
    %298 = vector.load %arg3[%c6_153, %c0_154, %c0_155] : memref<9x64x256xf32, #tpu.memory_space<vmem>>, vector<1x64x256xf32>
    %299 = vector.shape_cast %298 : vector<1x64x256xf32> to vector<64x256xf32>
    %300 = arith.mulf %297, %299 : vector<64x256xf32>
    %c240_i32_156 = arith.constant 240 : i32
    %301 = tpu.dynamic_rotate %274 by %c240_i32_156 dim 1 : vector<64x256xf32>, i32 -> vector<64x256xf32>
    %c7_157 = arith.constant 7 : index
    %c0_158 = arith.constant 0 : index
    %c0_159 = arith.constant 0 : index
    %302 = vector.load %arg3[%c7_157, %c0_158, %c0_159] : memref<9x64x256xf32, #tpu.memory_space<vmem>>, vector<1x64x256xf32>
    %303 = vector.shape_cast %302 : vector<1x64x256xf32> to vector<64x256xf32>
    %304 = arith.mulf %301, %303 : vector<64x256xf32>
    %c239_i32_160 = arith.constant 239 : i32
    %305 = tpu.dynamic_rotate %274 by %c239_i32_160 dim 1 : vector<64x256xf32>, i32 -> vector<64x256xf32>
    %c8_161 = arith.constant 8 : index
    %c0_162 = arith.constant 0 : index
    %c0_163 = arith.constant 0 : index
    %306 = vector.load %arg3[%c8_161, %c0_162, %c0_163] : memref<9x64x256xf32, #tpu.memory_space<vmem>>, vector<1x64x256xf32>
    %307 = vector.shape_cast %306 : vector<1x64x256xf32> to vector<64x256xf32>
    %308 = arith.mulf %305, %307 : vector<64x256xf32>
    %309 = tpu.concatenate %280, %284, %288, %292, %274, %296, %300, %304, %308 in 0 : vector<64x256xf32>, vector<64x256xf32>, vector<64x256xf32>, vector<64x256xf32>, vector<64x256xf32>, vector<64x256xf32>, vector<64x256xf32>, vector<64x256xf32>, vector<64x256xf32> -> vector<576x256xf32>
    %310 = arith.truncf %309 : vector<576x256xf32> to vector<576x256xbf16>
    %cst_164 = arith.constant dense<0.000000e+00> : vector<64x256xf32>
    %311 = tpu.matmul %275, %310, %cst_164 {dimension_numbers = #tpu.dot_dimension_numbers<[1], [0], [0], [1], [0, 0, 1, 1], [], []>} : vector<64x576xbf16>, vector<576x256xbf16>, vector<64x256xf32> -> vector<64x256xf32>
    %312 = vector.broadcast %276 : vector<64x1xf32> to vector<64x256xf32>
    %313 = arith.addf %311, %312 : vector<64x256xf32>
    %314 = vector.extract_strided_slice %313 {offsets = [0, 0], sizes = [32, 256], strides = [1, 1]} : vector<64x256xf32> to vector<32x256xf32>
    %cst_165 = arith.constant 5.000000e-01 : f32
    %315 = vector.broadcast %cst_165 : f32 to vector<32x256xf32>
    %316 = arith.mulf %315, %314 : vector<32x256xf32>
    %cst_166 = arith.constant 4.471500e-02 : f32
    %317 = vector.broadcast %cst_166 : f32 to vector<32x256xf32>
    %318 = arith.mulf %317, %314 : vector<32x256xf32>
    %319 = arith.mulf %318, %314 : vector<32x256xf32>
    %320 = arith.mulf %319, %314 : vector<32x256xf32>
    %321 = arith.addf %314, %320 : vector<32x256xf32>
    %cst_167 = arith.constant 0.797884583 : f32
    %322 = vector.broadcast %cst_167 : f32 to vector<32x256xf32>
    %323 = arith.mulf %322, %321 : vector<32x256xf32>
    %324 = math.tanh %323 : vector<32x256xf32>
    %cst_168 = arith.constant 1.000000e+00 : f32
    %325 = vector.broadcast %cst_168 : f32 to vector<32x256xf32>
    %326 = arith.addf %325, %324 : vector<32x256xf32>
    %327 = arith.mulf %316, %326 : vector<32x256xf32>
    %328 = vector.extract_strided_slice %313 {offsets = [32, 0], sizes = [32, 256], strides = [1, 1]} : vector<64x256xf32> to vector<32x256xf32>
    %329 = arith.addf %327, %328 : vector<32x256xf32>
    %c64_169 = arith.constant 64 : index
    %c0_170 = arith.constant 0 : index
    %330 = vector.load %arg7[%c64_169, %c0_170] : memref<80x288xbf16, #tpu.memory_space<vmem>>, vector<16x288xbf16>
    %c256 = arith.constant 256 : index
    %c0_171 = arith.constant 0 : index
    %331 = vector.load %arg10[%c256, %c0_171] : memref<276x1xf32, #tpu.memory_space<vmem>>, vector<16x1xf32>
    %c17_i32_172 = arith.constant 17 : i32
    %332 = tpu.dynamic_rotate %329 by %c17_i32_172 dim 1 : vector<32x256xf32>, i32 -> vector<32x256xf32>
    %c0_173 = arith.constant 0 : index
    %c0_174 = arith.constant 0 : index
    %c0_175 = arith.constant 0 : index
    %333 = vector.load %arg3[%c0_173, %c0_174, %c0_175] : memref<9x64x256xf32, #tpu.memory_space<vmem>>, vector<1x64x256xf32>
    %334 = vector.shape_cast %333 : vector<1x64x256xf32> to vector<64x256xf32>
    %335 = vector.extract_strided_slice %334 {offsets = [0, 0], sizes = [32, 256], strides = [1, 1]} : vector<64x256xf32> to vector<32x256xf32>
    %336 = arith.mulf %332, %335 : vector<32x256xf32>
    %c16_i32_176 = arith.constant 16 : i32
    %337 = tpu.dynamic_rotate %329 by %c16_i32_176 dim 1 : vector<32x256xf32>, i32 -> vector<32x256xf32>
    %c1_177 = arith.constant 1 : index
    %c0_178 = arith.constant 0 : index
    %c0_179 = arith.constant 0 : index
    %338 = vector.load %arg3[%c1_177, %c0_178, %c0_179] : memref<9x64x256xf32, #tpu.memory_space<vmem>>, vector<1x64x256xf32>
    %339 = vector.shape_cast %338 : vector<1x64x256xf32> to vector<64x256xf32>
    %340 = vector.extract_strided_slice %339 {offsets = [0, 0], sizes = [32, 256], strides = [1, 1]} : vector<64x256xf32> to vector<32x256xf32>
    %341 = arith.mulf %337, %340 : vector<32x256xf32>
    %c15_i32_180 = arith.constant 15 : i32
    %342 = tpu.dynamic_rotate %329 by %c15_i32_180 dim 1 : vector<32x256xf32>, i32 -> vector<32x256xf32>
    %c2_181 = arith.constant 2 : index
    %c0_182 = arith.constant 0 : index
    %c0_183 = arith.constant 0 : index
    %343 = vector.load %arg3[%c2_181, %c0_182, %c0_183] : memref<9x64x256xf32, #tpu.memory_space<vmem>>, vector<1x64x256xf32>
    %344 = vector.shape_cast %343 : vector<1x64x256xf32> to vector<64x256xf32>
    %345 = vector.extract_strided_slice %344 {offsets = [0, 0], sizes = [32, 256], strides = [1, 1]} : vector<64x256xf32> to vector<32x256xf32>
    %346 = arith.mulf %342, %345 : vector<32x256xf32>
    %c1_i32_184 = arith.constant 1 : i32
    %347 = tpu.dynamic_rotate %329 by %c1_i32_184 dim 1 : vector<32x256xf32>, i32 -> vector<32x256xf32>
    %c3_185 = arith.constant 3 : index
    %c0_186 = arith.constant 0 : index
    %c0_187 = arith.constant 0 : index
    %348 = vector.load %arg3[%c3_185, %c0_186, %c0_187] : memref<9x64x256xf32, #tpu.memory_space<vmem>>, vector<1x64x256xf32>
    %349 = vector.shape_cast %348 : vector<1x64x256xf32> to vector<64x256xf32>
    %350 = vector.extract_strided_slice %349 {offsets = [0, 0], sizes = [32, 256], strides = [1, 1]} : vector<64x256xf32> to vector<32x256xf32>
    %351 = arith.mulf %347, %350 : vector<32x256xf32>
    %c255_i32_188 = arith.constant 255 : i32
    %352 = tpu.dynamic_rotate %329 by %c255_i32_188 dim 1 : vector<32x256xf32>, i32 -> vector<32x256xf32>
    %c5_189 = arith.constant 5 : index
    %c0_190 = arith.constant 0 : index
    %c0_191 = arith.constant 0 : index
    %353 = vector.load %arg3[%c5_189, %c0_190, %c0_191] : memref<9x64x256xf32, #tpu.memory_space<vmem>>, vector<1x64x256xf32>
    %354 = vector.shape_cast %353 : vector<1x64x256xf32> to vector<64x256xf32>
    %355 = vector.extract_strided_slice %354 {offsets = [0, 0], sizes = [32, 256], strides = [1, 1]} : vector<64x256xf32> to vector<32x256xf32>
    %356 = arith.mulf %352, %355 : vector<32x256xf32>
    %c241_i32_192 = arith.constant 241 : i32
    %357 = tpu.dynamic_rotate %329 by %c241_i32_192 dim 1 : vector<32x256xf32>, i32 -> vector<32x256xf32>
    %c6_193 = arith.constant 6 : index
    %c0_194 = arith.constant 0 : index
    %c0_195 = arith.constant 0 : index
    %358 = vector.load %arg3[%c6_193, %c0_194, %c0_195] : memref<9x64x256xf32, #tpu.memory_space<vmem>>, vector<1x64x256xf32>
    %359 = vector.shape_cast %358 : vector<1x64x256xf32> to vector<64x256xf32>
    %360 = vector.extract_strided_slice %359 {offsets = [0, 0], sizes = [32, 256], strides = [1, 1]} : vector<64x256xf32> to vector<32x256xf32>
    %361 = arith.mulf %357, %360 : vector<32x256xf32>
    %c240_i32_196 = arith.constant 240 : i32
    %362 = tpu.dynamic_rotate %329 by %c240_i32_196 dim 1 : vector<32x256xf32>, i32 -> vector<32x256xf32>
    %c7_197 = arith.constant 7 : index
    %c0_198 = arith.constant 0 : index
    %c0_199 = arith.constant 0 : index
    %363 = vector.load %arg3[%c7_197, %c0_198, %c0_199] : memref<9x64x256xf32, #tpu.memory_space<vmem>>, vector<1x64x256xf32>
    %364 = vector.shape_cast %363 : vector<1x64x256xf32> to vector<64x256xf32>
    %365 = vector.extract_strided_slice %364 {offsets = [0, 0], sizes = [32, 256], strides = [1, 1]} : vector<64x256xf32> to vector<32x256xf32>
    %366 = arith.mulf %362, %365 : vector<32x256xf32>
    %c239_i32_200 = arith.constant 239 : i32
    %367 = tpu.dynamic_rotate %329 by %c239_i32_200 dim 1 : vector<32x256xf32>, i32 -> vector<32x256xf32>
    %c8_201 = arith.constant 8 : index
    %c0_202 = arith.constant 0 : index
    %c0_203 = arith.constant 0 : index
    %368 = vector.load %arg3[%c8_201, %c0_202, %c0_203] : memref<9x64x256xf32, #tpu.memory_space<vmem>>, vector<1x64x256xf32>
    %369 = vector.shape_cast %368 : vector<1x64x256xf32> to vector<64x256xf32>
    %370 = vector.extract_strided_slice %369 {offsets = [0, 0], sizes = [32, 256], strides = [1, 1]} : vector<64x256xf32> to vector<32x256xf32>
    %371 = arith.mulf %367, %370 : vector<32x256xf32>
    %372 = tpu.concatenate %336, %341, %346, %351, %329, %356, %361, %366, %371 in 0 : vector<32x256xf32>, vector<32x256xf32>, vector<32x256xf32>, vector<32x256xf32>, vector<32x256xf32>, vector<32x256xf32>, vector<32x256xf32>, vector<32x256xf32>, vector<32x256xf32> -> vector<288x256xf32>
    %373 = arith.truncf %372 : vector<288x256xf32> to vector<288x256xbf16>
    %cst_204 = arith.constant dense<0.000000e+00> : vector<16x256xf32>
    %374 = tpu.matmul %330, %373, %cst_204 {dimension_numbers = #tpu.dot_dimension_numbers<[1], [0], [0], [1], [0, 0, 1, 1], [], []>} : vector<16x288xbf16>, vector<288x256xbf16>, vector<16x256xf32> -> vector<16x256xf32>
    %375 = vector.broadcast %331 : vector<16x1xf32> to vector<16x256xf32>
    %376 = arith.addf %374, %375 : vector<16x256xf32>
    %c0_205 = arith.constant 0 : index
    %c0_206 = arith.constant 0 : index
    %377 = vector.load %arg9[%c0_205, %c0_206] : memref<4x144xbf16, #tpu.memory_space<vmem>>, vector<4x144xbf16>
    %c272 = arith.constant 272 : index
    %c0_207 = arith.constant 0 : index
    %378 = vector.load %arg10[%c272, %c0_207] : memref<276x1xf32, #tpu.memory_space<vmem>>, vector<4x1xf32>
    %c17_i32_208 = arith.constant 17 : i32
    %379 = tpu.dynamic_rotate %376 by %c17_i32_208 dim 1 : vector<16x256xf32>, i32 -> vector<16x256xf32>
    %c0_209 = arith.constant 0 : index
    %c0_210 = arith.constant 0 : index
    %c0_211 = arith.constant 0 : index
    %380 = vector.load %arg3[%c0_209, %c0_210, %c0_211] : memref<9x64x256xf32, #tpu.memory_space<vmem>>, vector<1x64x256xf32>
    %381 = vector.shape_cast %380 : vector<1x64x256xf32> to vector<64x256xf32>
    %382 = vector.extract_strided_slice %381 {offsets = [0, 0], sizes = [16, 256], strides = [1, 1]} : vector<64x256xf32> to vector<16x256xf32>
    %383 = arith.mulf %379, %382 : vector<16x256xf32>
    %c16_i32_212 = arith.constant 16 : i32
    %384 = tpu.dynamic_rotate %376 by %c16_i32_212 dim 1 : vector<16x256xf32>, i32 -> vector<16x256xf32>
    %c1_213 = arith.constant 1 : index
    %c0_214 = arith.constant 0 : index
    %c0_215 = arith.constant 0 : index
    %385 = vector.load %arg3[%c1_213, %c0_214, %c0_215] : memref<9x64x256xf32, #tpu.memory_space<vmem>>, vector<1x64x256xf32>
    %386 = vector.shape_cast %385 : vector<1x64x256xf32> to vector<64x256xf32>
    %387 = vector.extract_strided_slice %386 {offsets = [0, 0], sizes = [16, 256], strides = [1, 1]} : vector<64x256xf32> to vector<16x256xf32>
    %388 = arith.mulf %384, %387 : vector<16x256xf32>
    %c15_i32_216 = arith.constant 15 : i32
    %389 = tpu.dynamic_rotate %376 by %c15_i32_216 dim 1 : vector<16x256xf32>, i32 -> vector<16x256xf32>
    %c2_217 = arith.constant 2 : index
    %c0_218 = arith.constant 0 : index
    %c0_219 = arith.constant 0 : index
    %390 = vector.load %arg3[%c2_217, %c0_218, %c0_219] : memref<9x64x256xf32, #tpu.memory_space<vmem>>, vector<1x64x256xf32>
    %391 = vector.shape_cast %390 : vector<1x64x256xf32> to vector<64x256xf32>
    %392 = vector.extract_strided_slice %391 {offsets = [0, 0], sizes = [16, 256], strides = [1, 1]} : vector<64x256xf32> to vector<16x256xf32>
    %393 = arith.mulf %389, %392 : vector<16x256xf32>
    %c1_i32_220 = arith.constant 1 : i32
    %394 = tpu.dynamic_rotate %376 by %c1_i32_220 dim 1 : vector<16x256xf32>, i32 -> vector<16x256xf32>
    %c3_221 = arith.constant 3 : index
    %c0_222 = arith.constant 0 : index
    %c0_223 = arith.constant 0 : index
    %395 = vector.load %arg3[%c3_221, %c0_222, %c0_223] : memref<9x64x256xf32, #tpu.memory_space<vmem>>, vector<1x64x256xf32>
    %396 = vector.shape_cast %395 : vector<1x64x256xf32> to vector<64x256xf32>
    %397 = vector.extract_strided_slice %396 {offsets = [0, 0], sizes = [16, 256], strides = [1, 1]} : vector<64x256xf32> to vector<16x256xf32>
    %398 = arith.mulf %394, %397 : vector<16x256xf32>
    %c255_i32_224 = arith.constant 255 : i32
    %399 = tpu.dynamic_rotate %376 by %c255_i32_224 dim 1 : vector<16x256xf32>, i32 -> vector<16x256xf32>
    %c5_225 = arith.constant 5 : index
    %c0_226 = arith.constant 0 : index
    %c0_227 = arith.constant 0 : index
    %400 = vector.load %arg3[%c5_225, %c0_226, %c0_227] : memref<9x64x256xf32, #tpu.memory_space<vmem>>, vector<1x64x256xf32>
    %401 = vector.shape_cast %400 : vector<1x64x256xf32> to vector<64x256xf32>
    %402 = vector.extract_strided_slice %401 {offsets = [0, 0], sizes = [16, 256], strides = [1, 1]} : vector<64x256xf32> to vector<16x256xf32>
    %403 = arith.mulf %399, %402 : vector<16x256xf32>
    %c241_i32_228 = arith.constant 241 : i32
    %404 = tpu.dynamic_rotate %376 by %c241_i32_228 dim 1 : vector<16x256xf32>, i32 -> vector<16x256xf32>
    %c6_229 = arith.constant 6 : index
    %c0_230 = arith.constant 0 : index
    %c0_231 = arith.constant 0 : index
    %405 = vector.load %arg3[%c6_229, %c0_230, %c0_231] : memref<9x64x256xf32, #tpu.memory_space<vmem>>, vector<1x64x256xf32>
    %406 = vector.shape_cast %405 : vector<1x64x256xf32> to vector<64x256xf32>
    %407 = vector.extract_strided_slice %406 {offsets = [0, 0], sizes = [16, 256], strides = [1, 1]} : vector<64x256xf32> to vector<16x256xf32>
    %408 = arith.mulf %404, %407 : vector<16x256xf32>
    %c240_i32_232 = arith.constant 240 : i32
    %409 = tpu.dynamic_rotate %376 by %c240_i32_232 dim 1 : vector<16x256xf32>, i32 -> vector<16x256xf32>
    %c7_233 = arith.constant 7 : index
    %c0_234 = arith.constant 0 : index
    %c0_235 = arith.constant 0 : index
    %410 = vector.load %arg3[%c7_233, %c0_234, %c0_235] : memref<9x64x256xf32, #tpu.memory_space<vmem>>, vector<1x64x256xf32>
    %411 = vector.shape_cast %410 : vector<1x64x256xf32> to vector<64x256xf32>
    %412 = vector.extract_strided_slice %411 {offsets = [0, 0], sizes = [16, 256], strides = [1, 1]} : vector<64x256xf32> to vector<16x256xf32>
    %413 = arith.mulf %409, %412 : vector<16x256xf32>
    %c239_i32_236 = arith.constant 239 : i32
    %414 = tpu.dynamic_rotate %376 by %c239_i32_236 dim 1 : vector<16x256xf32>, i32 -> vector<16x256xf32>
    %c8_237 = arith.constant 8 : index
    %c0_238 = arith.constant 0 : index
    %c0_239 = arith.constant 0 : index
    %415 = vector.load %arg3[%c8_237, %c0_238, %c0_239] : memref<9x64x256xf32, #tpu.memory_space<vmem>>, vector<1x64x256xf32>
    %416 = vector.shape_cast %415 : vector<1x64x256xf32> to vector<64x256xf32>
    %417 = vector.extract_strided_slice %416 {offsets = [0, 0], sizes = [16, 256], strides = [1, 1]} : vector<64x256xf32> to vector<16x256xf32>
    %418 = arith.mulf %414, %417 : vector<16x256xf32>
    %419 = tpu.concatenate %383, %388, %393, %398, %376, %403, %408, %413, %418 in 0 : vector<16x256xf32>, vector<16x256xf32>, vector<16x256xf32>, vector<16x256xf32>, vector<16x256xf32>, vector<16x256xf32>, vector<16x256xf32>, vector<16x256xf32>, vector<16x256xf32> -> vector<144x256xf32>
    %420 = arith.truncf %419 : vector<144x256xf32> to vector<144x256xbf16>
    %cst_240 = arith.constant dense<0.000000e+00> : vector<4x256xf32>
    %421 = tpu.matmul %377, %420, %cst_240 {dimension_numbers = #tpu.dot_dimension_numbers<[1], [0], [0], [1], [0, 0, 1, 1], [], []>} : vector<4x144xbf16>, vector<144x256xbf16>, vector<4x256xf32> -> vector<4x256xf32>
    %422 = vector.broadcast %378 : vector<4x1xf32> to vector<4x256xf32>
    %423 = arith.addf %421, %422 : vector<4x256xf32>
    %c0_241 = arith.constant 0 : index
    %c0_242 = arith.constant 0 : index
    %c0_243 = arith.constant 0 : index
    %424 = vector.load %arg11[%c0_241, %c0_242, %c0_243] : memref<1x4x256xf32, #tpu.memory_space<vmem>>, vector<1x4x256xf32>
    %425 = vector.shape_cast %424 : vector<1x4x256xf32> to vector<4x256xf32>
    %426 = vector.shape_cast %423 : vector<4x256xf32> to vector<1x4x256xf32>
    tpu.vector_store %arg11[%c0_241, %c0_242, %c0_243], %426 {strides = array<i32>} : memref<1x4x256xf32, #tpu.memory_space<vmem>>, vector<1x4x256xf32>,
    return
  }
  func.func @transform_0(%arg0: i32) -> i32 {
    %c0_i32 = arith.constant 0 : i32
    %c0_i32_0 = arith.constant 0 : i32
    return %c0_i32 : i32
  }
  func.func @transform_1(%arg0: i32) -> (i32, i32, i32) {
    %c0_i32 = arith.constant 0 : i32
    %c0_i32_0 = arith.constant 0 : i32
    %c0_i32_1 = arith.constant 0 : i32
    return %arg0, %c0_i32, %c0_i32_0 : i32, i32, i32
  }
  func.func @transform_2(%arg0: i32) -> (i32, i32, i32) {
    %c0_i32 = arith.constant 0 : i32
    %c0_i32_0 = arith.constant 0 : i32
    %c0_i32_1 = arith.constant 0 : i32
    %c0_i32_2 = arith.constant 0 : i32
    return %c0_i32, %c0_i32_0, %c0_i32_1 : i32, i32, i32
  }
  func.func @transform_3(%arg0: i32) -> (i32, i32, i32) {
    %c0_i32 = arith.constant 0 : i32
    %c0_i32_0 = arith.constant 0 : i32
    %c0_i32_1 = arith.constant 0 : i32
    %c0_i32_2 = arith.constant 0 : i32
    return %c0_i32, %c0_i32_0, %c0_i32_1 : i32, i32, i32
  }
  func.func @transform_4(%arg0: i32) -> (i32, i32) {
    %c0_i32 = arith.constant 0 : i32
    %c0_i32_0 = arith.constant 0 : i32
    %c0_i32_1 = arith.constant 0 : i32
    return %c0_i32, %c0_i32_0 : i32, i32
  }
  func.func @transform_5(%arg0: i32) -> (i32, i32) {
    %c0_i32 = arith.constant 0 : i32
    %c0_i32_0 = arith.constant 0 : i32
    %c0_i32_1 = arith.constant 0 : i32
    return %c0_i32, %c0_i32_0 : i32, i32
  }
  func.func @transform_6(%arg0: i32) -> (i32, i32) {
    %c0_i32 = arith.constant 0 : i32
    %c0_i32_0 = arith.constant 0 : i32
    %c0_i32_1 = arith.constant 0 : i32
    return %c0_i32, %c0_i32_0 : i32, i32
  }
  func.func @transform_7(%arg0: i32) -> (i32, i32) {
    %c0_i32 = arith.constant 0 : i32
    %c0_i32_0 = arith.constant 0 : i32
    %c0_i32_1 = arith.constant 0 : i32
    return %c0_i32, %c0_i32_0 : i32, i32
  }
  func.func @transform_8(%arg0: i32) -> (i32, i32) {
    %c0_i32 = arith.constant 0 : i32
    %c0_i32_0 = arith.constant 0 : i32
    %c0_i32_1 = arith.constant 0 : i32
    return %c0_i32, %c0_i32_0 : i32, i32
  }
  func.func @transform_9(%arg0: i32) -> (i32, i32) {
    %c0_i32 = arith.constant 0 : i32
    %c0_i32_0 = arith.constant 0 : i32
    %c0_i32_1 = arith.constant 0 : i32
    return %c0_i32, %c0_i32_0 : i32, i32
  }
  func.func @transform_10(%arg0: i32) -> (i32, i32, i32) {
    %c0_i32 = arith.constant 0 : i32
    %c0_i32_0 = arith.constant 0 : i32
    %c0_i32_1 = arith.constant 0 : i32
    return %arg0, %c0_i32, %c0_i32_0 : i32, i32, i32
  }
}

</mosaic_0001>

<bundles_post_ra>
// kernel: edge_detection_attention_v2.1
= control target key start
LH: loop header
LB: loop body
LE: loop exit
PB: predicated region body
PF: predicated region fallthrough
CT: control target
= control target key end

     0   :  { %15 = vsyncpa [#allocation3], 0  ;;  %s6740_s13 = smov 0   ;;  %s12051_s0 = inlined_call_operand.vmem [shape: f32[2], index: 0, kind: input, shape index: {}]   ;;  %s12052_s1 = inlined_call_operand.vmem [shape: f32[2,48,256], index: 1, kind: input, shape index: {}]   ;;  %s12053_s2 = inlined_call_operand.vmem [shape: f32[9,64,256], index: 2, kind: input, shape index: {}]   ;;  %s12054_s3 = inlined_call_operand.vmem [shape: f32[9,32,128], index: 3, kind: input, shape index: {}]   ;;  %s12055_s4 = inlined_call_operand.vmem [shape: bf16[256,128], index: 4, kind: input, shape index: {}]   ;;  %s12056_s5 = inlined_call_operand.vmem [shape: bf16[64,432], index: 5, kind: input, shape index: {}]   ;;  %s12057_s6 = inlined_call_operand.vmem [shape: bf16[80,288], index: 6, kind: input, shape index: {}]   ;;  %s12058_s7 = inlined_call_operand.vmem [shape: bf16[128,576], index: 7, kind: input, shape index: {}]   ;;  %s12059_s8 = inlined_call_operand.vmem [shape: bf16[4,144], index: 8, kind: input, shape index: {}]   ;;  %s12060_s9 = inlined_call_operand.vmem [shape: f32[276,1], index: 9, kind: input, shape index: {}]   ;;  %s12061_s10 = inlined_call_operand.vmem [shape: f32[2,4,256], index: 10, kind: output, shape index: {}]  }
   0x1 LB: > { %s5562_s14 = sadd.s32 4294967295, %s6665_s13   ;;  %p5564_p0 = scmp.ge.s32.totalorder %s6665_s13, 1  ;;  %s6665_s13 = sphi %s6740_s13, %s21_s13  }
   0x2   : > { %p267_p1 = scmp.lt.s32.totalorder %s6665_s13, 3  ;;  %s280_s17 = sshll.u32 %s12051_s0, 4  ;;  %s281_s17 = int_to_ptr.vmem [resolvable:$true] %s280_s17 }
   0x3   : > { %p6082_p3 = scmp.eq.s32.totalorder %s5562_s14, 0  ;;  %s6640_s19 = scalar_lea.vmem %s281_s17, 16 }
   0x4   : > { %p6751_p2 = pnand %p5564_p0, %p267_p1  ;;  %p6641_p6 = scmp.ne.s32.totalorder %s281_s17, %s6640_s19 }
   0x5   : > { %p6648_p10 = scmp.lt.s32.totalorder %s281_s17, %s281_s17  ;;  %p6649_p11 = scmp.lt.s32.totalorder %s6640_s19, %s6640_s19 }
   0x6   : > { %p6078_p4 = pneg %p6751_p2 }
   0x7   : > { %p6650_p12 = por %p6649_p11, %p6648_p10 }
   0x8   : > { %p6079_p5 = pnand %p6082_p3, %p6078_p4 }
   0xa   : > { %p6642_p7 = pneg %p6079_p5 }
   0xc   : > { %p6643_p8 = pnand %p6642_p7, %p6641_p6 }
   0xe   : > { %p6644_p9 = pneg %p6643_p8 }
  0x10   : > { %p6651_p13 = pnand %p6650_p12, %p6644_p9 }
  0x12   : > { %6654 = shalt.err (!%p6651_p13)
}
  0x13   : > { %s6667_s20 = smov [#allocation2]   ;;  %325 = sbr.rel (%p6751_p2) target bundleno = 5251 (0x1483), region = 60 }
  0x14   : > { %6081 = dma.vmem_to_smem (!%p6079_p5), %s281_s17, 16, %s6667_s20, [#allocation3]  }
  0x1a   : > { %6660 = dma.done.wait (%p6082_p3), [#allocation3], 16  }
  0x1b   : > { %6662 = vsyncadd (%p6082_p3), [#allocation3], 4294967280 }
  0x1c   : > { %331 = sfence }
  0x1d   : > { %p364_p0 = scmp.lt.s32.totalorder %s5562_s14, 1  ;;  %s6668_s25 = smov 17   ;;  %v6114_v12 = vld [vmem:[%s12056_s5 + $0x4] ss:$16 sps:$4 sm:$0xff]   ;;  %v435_v13 = vlaneseq  ;;  %v451_v18 = vld [vmem:[%s12053_s2 + $0x8] sm:$0xff]  ;;  %v453_v20 = vld [vmem:[%s12053_s2 + $0x18] sm:$0xff] }
  0x1e   : > { %s6669_s26 = smov 16   ;;  %s6670_s27 = smov 15   ;;  %1155 = vmatprep.mubr.bf16.mxu0 %v6114_v12  ;;  %v450_v21 = vld [vmem:[%s12053_s2] sm:$0xff]  ;;  %v452_v22 = vld [vmem:[%s12053_s2 + $0x10] sm:$0xff]  ;;  %v457_v36 = vld [vmem:[%s12053_s2 + $0x38] sm:$0xff]  ;;  %vm1110_vm6 = vcmask 392192  }
  0x1f   : > { %s12201_s14 = smov (!%p364_p0, %s5562_s14), 1  ;;  %s6671_s28 = smov 1   ;;  %v6908_v14 = vand.u32 127, %v435_v13  ;;  %v456_v35 = vld [vmem:[%s12053_s2 + $0x30] sm:$0xff]  ;;  %v454_v37 = vld [vmem:[%s12053_s2 + $0x20] sm:$0xff]  ;;  %v455_v38 = vld [vmem:[%s12053_s2 + $0x28] sm:$0xff] }
  0x20   : > { %s6073_s21 = smul.u32 96, %s12201_s14  ;;  %s6672_s29 = smov 127   ;;  %v460_v53 = vld [vmem:[%s12053_s2 + $0x50] sm:$0xff]  ;;  %v461_v54 = vld [vmem:[%s12053_s2 + $0x58] sm:$0xff]  ;;  %v458_v55 = vld [vmem:[%s12053_s2 + $0x40] sm:$0xff] }
  0x21   : > { %vm437_vm0 = vcmp.lt.s32.totalorder %v6908_v14, 17  ;;  %s6673_s22 = smov 113   ;;  %v459_v56 = vld [vmem:[%s12053_s2 + $0x48] sm:$0xff]  ;;  %vm502_vm1 = vcmp.lt.s32.totalorder %v6908_v14, 16  ;;  %s6674_s23 = smov 112   ;;  %vm568_vm2 = vcmp.lt.s32.totalorder %v6908_v14, 15 }
  0x22   : > { %s368_s24 = scalar_lea.vmem %s12052_s1, %s6073_s21  ;;  %s12062_s11 = smov 111   ;;  %vm634_vm3 = vcmp.lt.s32.totalorder %v6908_v14, 1  ;;  %vm700_vm4 = vcmp.lt.s32.totalorder %v6908_v14, 127  ;;  %vm766_vm5 = vcmp.lt.s32.totalorder %v6908_v14, 113  ;;  %vm832_vm7 = vcmp.lt.s32.totalorder %v6908_v14, 112 }
  0x23   : > { %v6768_v0 = vld [vmem:[%s368_s24 + $0x8] sm:$0xff]  ;;  %v6770_v1 = vld [vmem:[%s368_s24] sm:$0xff]  ;;  %v6776_v2 = vld [vmem:[%s368_s24 + $0x18] sm:$0xff]  ;;  %vm898_vm8 = vcmp.lt.s32.totalorder %v6908_v14, 111  ;;  %s6677_s16 = smov 11   ;;  %s6678_s17 = smov 10  }
  0x24   : > { %423 = vrot.lane.b32.xlu1 %v6768_v0, %s6668_s25  ;;  %411 = vrot.lane.b32.xlu0 %v6770_v1, %s6668_s25  ;;  %v6778_v3 = vld [vmem:[%s368_s24 + $0x10] sm:$0xff]  ;;  %v6786_v5 = vld [vmem:[%s368_s24 + $0x20] sm:$0xff]  ;;  %s6679_s18 = smov 119   ;;  %s6681_s19 = smov 118  }
  0x25   : > { %v6784_v4 = vld [vmem:[%s368_s24 + $0x30] sm:$0xff]  ;;  %v6792_v6 = vld [vmem:[%s368_s24 + $0x38] sm:$0xff]  ;;  %v6794_v7 = vld [vmem:[%s368_s24 + $0x28] sm:$0xff]  ;;  %s12141_s12 = smov 111  }
  0x26   : > { %v6800_v8 = vld [vmem:[%s368_s24 + $0x50] sm:$0xff]  ;;  %v6802_v9 = vld [vmem:[%s368_s24 + $0x40] sm:$0xff]  ;;  %v6808_v10 = vld [vmem:[%s368_s24 + $0x58] sm:$0xff] }
  0x27   : > { %v6810_v11 = vld [vmem:[%s368_s24 + $0x48] sm:$0xff]  ;;  %s6682_s24 = smov 117  }
  0x28   : > { %425 = vrot.lane.b32.xlu1 %v6776_v2, %s6668_s25  ;;  %413 = vrot.lane.b32.xlu0 %v6778_v3, %s6668_s25 }
  0x2c   : > { %417 = vrot.lane.b32.xlu1 %v6784_v4, %s6668_s25  ;;  %415 = vrot.lane.b32.xlu0 %v6786_v5, %s6668_s25 }
  0x30   : > { %429 = vrot.lane.b32.xlu1 %v6792_v6, %s6668_s25  ;;  %427 = vrot.lane.b32.xlu0 %v6794_v7, %s6668_s25 }
  0x34   : > { %421 = vrot.lane.b32.xlu1 %v6800_v8, %s6668_s25  ;;  %419 = vrot.lane.b32.xlu0 %v6802_v9, %s6668_s25 }
  0x38   : > { %433 = vrot.lane.b32.xlu1 %v6808_v10, %s6668_s25  ;;  %431 = vrot.lane.b32.xlu0 %v6810_v11, %s6668_s25 }
  0x3c   : > { %480 = vrot.lane.b32.xlu1 %v6778_v3, %s6669_s26  ;;  %478 = vrot.lane.b32.xlu0 %v6770_v1, %s6669_s26 }
  0x40   : > { %492 = vrot.lane.b32.xlu1 %v6776_v2, %s6669_s26  ;;  %490 = vrot.lane.b32.xlu0 %v6768_v0, %s6669_s26 }
  0x44   : > { %484 = vrot.lane.b32.xlu1 %v6784_v4, %s6669_s26  ;;  %482 = vrot.lane.b32.xlu0 %v6786_v5, %s6669_s26 }
  0x48   : > { %496 = vrot.lane.b32.xlu1 %v6792_v6, %s6669_s26  ;;  %494 = vrot.lane.b32.xlu0 %v6794_v7, %s6669_s26 }
  0x4c   : > { %488 = vrot.lane.b32.xlu1 %v6800_v8, %s6669_s26  ;;  %486 = vrot.lane.b32.xlu0 %v6802_v9, %s6669_s26 }
  0x50   : > { %500 = vrot.lane.b32.xlu1 %v6808_v10, %s6669_s26  ;;  %498 = vrot.lane.b32.xlu0 %v6810_v11, %s6669_s26 }
  0x54   : > { %546 = vrot.lane.b32.xlu1 %v6778_v3, %s6670_s27  ;;  %544 = vrot.lane.b32.xlu0 %v6770_v1, %s6670_s27 }
  0x58   : > { %558 = vrot.lane.b32.xlu1 %v6776_v2, %s6670_s27  ;;  %556 = vrot.lane.b32.xlu0 %v6768_v0, %s6670_s27 }
  0x5c   : > { %550 = vrot.lane.b32.xlu1 %v6784_v4, %s6670_s27  ;;  %548 = vrot.lane.b32.xlu0 %v6786_v5, %s6670_s27 }
  0x60   : > { %562 = vrot.lane.b32.xlu1 %v6792_v6, %s6670_s27  ;;  %560 = vrot.lane.b32.xlu0 %v6794_v7, %s6670_s27 }
  0x64   : > { %554 = vrot.lane.b32.xlu1 %v6800_v8, %s6670_s27  ;;  %552 = vrot.lane.b32.xlu0 %v6802_v9, %s6670_s27 }
  0x68   : > { %566 = vrot.lane.b32.xlu1 %v6808_v10, %s6670_s27  ;;  %564 = vrot.lane.b32.xlu0 %v6810_v11, %s6670_s27 }
  0x6c   : > { %612 = vrot.lane.b32.xlu1 %v6778_v3, %s6671_s28  ;;  %610 = vrot.lane.b32.xlu0 %v6770_v1, %s6671_s28 }
  0x70   : > { %624 = vrot.lane.b32.xlu1 %v6776_v2, %s6671_s28  ;;  %622 = vrot.lane.b32.xlu0 %v6768_v0, %s6671_s28 }
  0x74   : > { %616 = vrot.lane.b32.xlu1 %v6784_v4, %s6671_s28  ;;  %614 = vrot.lane.b32.xlu0 %v6786_v5, %s6671_s28 }
  0x78   : > { %628 = vrot.lane.b32.xlu1 %v6792_v6, %s6671_s28  ;;  %626 = vrot.lane.b32.xlu0 %v6794_v7, %s6671_s28 }
  0x7c   : > { %620 = vrot.lane.b32.xlu1 %v6800_v8, %s6671_s28  ;;  %618 = vrot.lane.b32.xlu0 %v6802_v9, %s6671_s28 }
  0x80   : > { %632 = vrot.lane.b32.xlu1 %v6808_v10, %s6671_s28  ;;  %630 = vrot.lane.b32.xlu0 %v6810_v11, %s6671_s28 }
  0x84   : > { %678 = vrot.lane.b32.xlu1 %v6778_v3, %s6672_s29  ;;  %676 = vrot.lane.b32.xlu0 %v6770_v1, %s6672_s29 }
  0x88   : > { %690 = vrot.lane.b32.xlu1 %v6776_v2, %s6672_s29  ;;  %688 = vrot.lane.b32.xlu0 %v6768_v0, %s6672_s29 }
  0x8c   : > { %682 = vrot.lane.b32.xlu1 %v6784_v4, %s6672_s29  ;;  %680 = vrot.lane.b32.xlu0 %v6786_v5, %s6672_s29 }
  0x90   : > { %694 = vrot.lane.b32.xlu1 %v6792_v6, %s6672_s29  ;;  %692 = vrot.lane.b32.xlu0 %v6794_v7, %s6672_s29 }
  0x94   : > { %686 = vrot.lane.b32.xlu1 %v6800_v8, %s6672_s29  ;;  %684 = vrot.lane.b32.xlu0 %v6802_v9, %s6672_s29 }
  0x96   : > { %v424_v15 = vpop.permute.xlu1 %423  ;;  %v412_v16 = vpop.permute.xlu0 %411 }
  0x97   : > { %v438_v17 = vsel %vm437_vm0, %v412_v16, %v424_v15  ;;  %v444_v19 = vsel %vm437_vm0, %v424_v15, %v412_v16 }
  0x98   : > { %698 = vrot.lane.b32.xlu1 %v6808_v10, %s6672_s29  ;;  %696 = vrot.lane.b32.xlu0 %v6810_v11, %s6672_s29  ;;  %v467_v27 = vmul.f32 %v451_v18, %v438_v17  ;;  %v466_v29 = vmul.f32 %v450_v21, %v444_v19  ;;  %v5574_v21 = vld [vmem:[%s12053_s2 + $0x90] sm:$0xff] }
  0x9a   : > { %v426_v23 = vpop.permute.xlu1 %425  ;;  %v414_v24 = vpop.permute.xlu0 %413 }
  0x9b   : > { %v445_v25 = vsel %vm437_vm0, %v426_v23, %v414_v24  ;;  %v439_v26 = vsel %vm437_vm0, %v414_v24, %v426_v23  ;;  %v5572_v23 = vld [vmem:[%s12053_s2 + $0x80] sm:$0xff]  ;;  %v5573_v24 = vld [vmem:[%s12053_s2 + $0x88] sm:$0xff] }
  0x9c   : > { %744 = vrot.lane.b32.xlu1 %v6778_v3, %s6673_s22  ;;  %742 = vrot.lane.b32.xlu0 %v6770_v1, %s6673_s22  ;;  %v469_v28 = vmul.f32 %v453_v20, %v439_v26  ;;  %v468_v30 = vmul.f32 %v452_v22, %v445_v25  ;;  %v5575_v22 = vld [vmem:[%s12053_s2 + $0x98] sm:$0xff] }
  0x9e   : > { %v418_v31 = vpop.permute.xlu1 %417  ;;  %v416_v32 = vpop.permute.xlu0 %415  ;;  %v941_v33 = vpack.c.bf16 %v469_v28, %v467_v27  ;;  %v940_v34 = vpack.c.bf16 %v468_v30, %v466_v29 }
  0xa0   : > { %756 = vrot.lane.b32.xlu1 %v6776_v2, %s6673_s22  ;;  %754 = vrot.lane.b32.xlu0 %v6768_v0, %s6673_s22 }
  0xa1   : > { %1123 = vmatprep.subr.bf16.mxu0 %v941_v33 }
  0xa2   : > { %1124 = vmatpush1.bf16.msra.mxu0 %v940_v34  ;;  %v430_v39 = vpop.permute.xlu1 %429  ;;  %v428_v40 = vpop.permute.xlu0 %427 }
  0xa3   : > { %v441_v41 = vsel %vm437_vm0, %v418_v31, %v430_v39  ;;  %v447_v42 = vsel %vm437_vm0, %v430_v39, %v418_v31  ;;  %v440_v43 = vsel %vm437_vm0, %v416_v32, %v428_v40  ;;  %v446_v44 = vsel %vm437_vm0, %v428_v40, %v416_v32  ;;  %v5578_v39 = vld [vmem:[%s12053_s2 + $0xb0] sm:$0xff]  ;;  %v5579_v40 = vld [vmem:[%s12053_s2 + $0xb8] sm:$0xff] }
  0xa4   : > { %v472_v45 = vmul.f32 %v456_v35, %v447_v42  ;;  %v473_v46 = vmul.f32 %v457_v36, %v441_v41  ;;  %v470_v47 = vmul.f32 %v454_v37, %v446_v44  ;;  %v471_v48 = vmul.f32 %v455_v38, %v440_v43  ;;  %748 = vrot.lane.b32.xlu1 %v6784_v4, %s6673_s22  ;;  %v5576_v41 = vld [vmem:[%s12053_s2 + $0xa0] sm:$0xff]  ;;  %v5577_v42 = vld [vmem:[%s12053_s2 + $0xa8] sm:$0xff] }
  0xa5   : > { %746 = vrot.lane.b32.xlu0 %v6786_v5, %s6673_s22 }
  0xa6   : > { %v422_v49 = vpop.permute.xlu1 %421  ;;  %v420_v50 = vpop.permute.xlu0 %419  ;;  %v943_v51 = vpack.c.bf16 %v473_v46, %v471_v48  ;;  %v942_v52 = vpack.c.bf16 %v472_v45, %v470_v47 }
  0xa8   : > { %760 = vrot.lane.b32.xlu1 %v6792_v6, %s6673_s22  ;;  %1125 = vmatprep.subr.bf16.mxu0 %v943_v51 }
  0xa9   : > { %758 = vrot.lane.b32.xlu0 %v6794_v7, %s6673_s22  ;;  %1126 = vmatpush1.bf16.msra.mxu0 %v942_v52 }
  0xaa   : > { %v434_v57 = vpop.permute.xlu1 %433  ;;  %v432_v58 = vpop.permute.xlu0 %431 }
  0xab   : > { %v443_v59 = vsel %vm437_vm0, %v422_v49, %v434_v57  ;;  %v449_v60 = vsel %vm437_vm0, %v434_v57, %v422_v49  ;;  %v442_v61 = vsel %vm437_vm0, %v420_v50, %v432_v58  ;;  %v448_v62 = vsel %vm437_vm0, %v432_v58, %v420_v50  ;;  %v5582_v57 = vld [vmem:[%s12053_s2 + $0xd0] sm:$0xff]  ;;  %v5583_v58 = vld [vmem:[%s12053_s2 + $0xd8] sm:$0xff] }
  0xac   : > { %v476_v63 = vmul.f32 %v460_v53, %v449_v60  ;;  %v477_v12 = vmul.f32 %v461_v54, %v443_v59  ;;  %v474_v15 = vmul.f32 %v458_v55, %v448_v62  ;;  %v475_v16 = vmul.f32 %v459_v56, %v442_v61  ;;  %752 = vrot.lane.b32.xlu1 %v6800_v8, %s6673_s22  ;;  %v5580_v59 = vld [vmem:[%s12053_s2 + $0xc0] sm:$0xff]  ;;  %v5581_v60 = vld [vmem:[%s12053_s2 + $0xc8] sm:$0xff] }
  0xad   : > { %750 = vrot.lane.b32.xlu0 %v6802_v9, %s6673_s22 }
  0xae   : > { %v481_v17 = vpop.permute.xlu1 %480  ;;  %v479_v18 = vpop.permute.xlu0 %478  ;;  %v945_v19 = vpack.c.bf16 %v477_v12, %v475_v16  ;;  %v944_v20 = vpack.c.bf16 %v476_v63, %v474_v15 }
  0xb0   : > { %764 = vrot.lane.b32.xlu1 %v6808_v10, %s6673_s22  ;;  %1127 = vmatprep.subr.bf16.mxu0 %v945_v19 }
  0xb1   : > { %762 = vrot.lane.b32.xlu0 %v6810_v11, %s6673_s22  ;;  %1128 = vmatpush1.bf16.msra.mxu0 %v944_v20 }
  0xb2   : > { %v493_v25 = vpop.permute.xlu1 %492  ;;  %v491_v26 = vpop.permute.xlu0 %490 }
  0xb3   : > { %v504_v27 = vsel %vm502_vm1, %v481_v17, %v493_v25  ;;  %v510_v28 = vsel %vm502_vm1, %v493_v25, %v481_v17  ;;  %v503_v29 = vsel %vm502_vm1, %v479_v18, %v491_v26  ;;  %v509_v30 = vsel %vm502_vm1, %v491_v26, %v479_v18  ;;  %v5590_v25 = vld [vmem:[%s12053_s2 + $0x110] sm:$0xff]  ;;  %v5591_v26 = vld [vmem:[%s12053_s2 + $0x118] sm:$0xff] }
  0xb4   : > { %v534_v31 = vmul.f32 %v5574_v21, %v510_v28  ;;  %v535_v32 = vmul.f32 %v5575_v22, %v504_v27  ;;  %v532_v33 = vmul.f32 %v5572_v23, %v509_v30  ;;  %v533_v34 = vmul.f32 %v5573_v24, %v503_v29  ;;  %810 = vrot.lane.b32.xlu1 %v6778_v3, %s6674_s23  ;;  %v5588_v27 = vld [vmem:[%s12053_s2 + $0x100] sm:$0xff]  ;;  %v5589_v28 = vld [vmem:[%s12053_s2 + $0x108] sm:$0xff] }
  0xb5   : > { %808 = vrot.lane.b32.xlu0 %v6770_v1, %s6674_s23 }
  0xb6   : > { %v485_v35 = vpop.permute.xlu1 %484  ;;  %v483_v36 = vpop.permute.xlu0 %482  ;;  %v947_v37 = vpack.c.bf16 %v535_v32, %v533_v34  ;;  %v946_v38 = vpack.c.bf16 %v534_v31, %v532_v33 }
  0xb8   : > { %822 = vrot.lane.b32.xlu1 %v6776_v2, %s6674_s23  ;;  %1129 = vmatprep.subr.bf16.mxu0 %v947_v37 }
  0xb9   : > { %820 = vrot.lane.b32.xlu0 %v6768_v0, %s6674_s23  ;;  %1130 = vmatpush1.bf16.msra.mxu0 %v946_v38 }
  0xba   : > { %v497_v43 = vpop.permute.xlu1 %496  ;;  %v495_v44 = vpop.permute.xlu0 %494 }
  0xbb   : > { %v506_v45 = vsel %vm502_vm1, %v485_v35, %v497_v43  ;;  %v512_v46 = vsel %vm502_vm1, %v497_v43, %v485_v35  ;;  %v505_v47 = vsel %vm502_vm1, %v483_v36, %v495_v44  ;;  %v511_v48 = vsel %vm502_vm1, %v495_v44, %v483_v36  ;;  %v5594_v43 = vld [vmem:[%s12053_s2 + $0x130] sm:$0xff]  ;;  %v5595_v44 = vld [vmem:[%s12053_s2 + $0x138] sm:$0xff] }
  0xbc   : > { %v538_v49 = vmul.f32 %v5578_v39, %v512_v46  ;;  %v539_v50 = vmul.f32 %v5579_v40, %v506_v45  ;;  %v536_v51 = vmul.f32 %v5576_v41, %v511_v48  ;;  %v537_v52 = vmul.f32 %v5577_v42, %v505_v47  ;;  %814 = vrot.lane.b32.xlu1 %v6784_v4, %s6674_s23  ;;  %v5592_v45 = vld [vmem:[%s12053_s2 + $0x120] sm:$0xff]  ;;  %v5593_v46 = vld [vmem:[%s12053_s2 + $0x128] sm:$0xff] }
  0xbd   : > { %812 = vrot.lane.b32.xlu0 %v6786_v5, %s6674_s23 }
  0xbe   : > { %v489_v53 = vpop.permute.xlu1 %488  ;;  %v487_v54 = vpop.permute.xlu0 %486  ;;  %v949_v55 = vpack.c.bf16 %v539_v50, %v537_v52  ;;  %v948_v56 = vpack.c.bf16 %v538_v49, %v536_v51 }
  0xc0   : > { %826 = vrot.lane.b32.xlu1 %v6792_v6, %s6674_s23  ;;  %1131 = vmatprep.subr.bf16.mxu0 %v949_v55 }
  0xc1   : > { %824 = vrot.lane.b32.xlu0 %v6794_v7, %s6674_s23  ;;  %1132 = vmatpush1.bf16.msra.mxu0 %v948_v56 }
  0xc2   : > { %v501_v61 = vpop.permute.xlu1 %500  ;;  %v499_v62 = vpop.permute.xlu0 %498 }
  0xc3   : > { %v508_v63 = vsel %vm502_vm1, %v489_v53, %v501_v61  ;;  %v514_v12 = vsel %vm502_vm1, %v501_v61, %v489_v53  ;;  %v507_v15 = vsel %vm502_vm1, %v487_v54, %v499_v62  ;;  %v513_v16 = vsel %vm502_vm1, %v499_v62, %v487_v54  ;;  %v5598_v61 = vld [vmem:[%s12053_s2 + $0x150] sm:$0xff]  ;;  %v5599_v62 = vld [vmem:[%s12053_s2 + $0x158] sm:$0xff] }
  0xc4   : > { %v542_v17 = vmul.f32 %v5582_v57, %v514_v12  ;;  %v543_v18 = vmul.f32 %v5583_v58, %v508_v63  ;;  %v540_v19 = vmul.f32 %v5580_v59, %v513_v16  ;;  %v541_v20 = vmul.f32 %v5581_v60, %v507_v15  ;;  %818 = vrot.lane.b32.xlu1 %v6800_v8, %s6674_s23  ;;  %v5596_v63 = vld [vmem:[%s12053_s2 + $0x140] sm:$0xff]  ;;  %v5597_v12 = vld [vmem:[%s12053_s2 + $0x148] sm:$0xff] }
  0xc5   : > { %816 = vrot.lane.b32.xlu0 %v6802_v9, %s6674_s23 }
  0xc6   : > { %v547_v21 = vpop.permute.xlu1 %546  ;;  %v545_v22 = vpop.permute.xlu0 %544  ;;  %v951_v23 = vpack.c.bf16 %v543_v18, %v541_v20  ;;  %v950_v24 = vpack.c.bf16 %v542_v17, %v540_v19 }
  0xc8   : > { %830 = vrot.lane.b32.xlu1 %v6808_v10, %s6674_s23  ;;  %1133 = vmatprep.subr.bf16.mxu0 %v951_v23 }
  0xc9   : > { %828 = vrot.lane.b32.xlu0 %v6810_v11, %s6674_s23  ;;  %1134 = vmatpush1.bf16.msra.mxu0 %v950_v24 }
  0xca   : > { %v559_v29 = vpop.permute.xlu1 %558  ;;  %v557_v30 = vpop.permute.xlu0 %556 }
  0xcb   : > { %v570_v31 = vsel %vm568_vm2, %v547_v21, %v559_v29  ;;  %v576_v32 = vsel %vm568_vm2, %v559_v29, %v547_v21  ;;  %v569_v33 = vsel %vm568_vm2, %v545_v22, %v557_v30  ;;  %v575_v34 = vsel %vm568_vm2, %v557_v30, %v545_v22  ;;  %v5606_v29 = vld [vmem:[%s12053_s2 + $0x190] sm:$0xff]  ;;  %v5607_v30 = vld [vmem:[%s12053_s2 + $0x198] sm:$0xff] }
  0xcc   : > { %v600_v35 = vmul.f32 %v5590_v25, %v576_v32  ;;  %v601_v36 = vmul.f32 %v5591_v26, %v570_v31  ;;  %v598_v37 = vmul.f32 %v5588_v27, %v575_v34  ;;  %v599_v38 = vmul.f32 %v5589_v28, %v569_v33  ;;  %876 = vrot.lane.b32.xlu1 %v6778_v3, %s12062_s11  ;;  %v5604_v31 = vld [vmem:[%s12053_s2 + $0x180] sm:$0xff]  ;;  %v5605_v32 = vld [vmem:[%s12053_s2 + $0x188] sm:$0xff] }
  0xcd   : > { %874 = vrot.lane.b32.xlu0 %v6770_v1, %s12062_s11 }
  0xce   : > { %v551_v39 = vpop.permute.xlu1 %550  ;;  %v549_v40 = vpop.permute.xlu0 %548  ;;  %v953_v41 = vpack.c.bf16 %v601_v36, %v599_v38  ;;  %v952_v42 = vpack.c.bf16 %v600_v35, %v598_v37 }
  0xd0   : > { %888 = vrot.lane.b32.xlu1 %v6776_v2, %s12062_s11  ;;  %1135 = vmatprep.subr.bf16.mxu0 %v953_v41 }
  0xd1   : > { %886 = vrot.lane.b32.xlu0 %v6768_v0, %s12062_s11  ;;  %1136 = vmatpush1.bf16.msra.mxu0 %v952_v42 }
  0xd2   : > { %v563_v47 = vpop.permute.xlu1 %562  ;;  %v561_v48 = vpop.permute.xlu0 %560 }
  0xd3   : > { %v572_v49 = vsel %vm568_vm2, %v551_v39, %v563_v47  ;;  %v578_v50 = vsel %vm568_vm2, %v563_v47, %v551_v39  ;;  %v571_v51 = vsel %vm568_vm2, %v549_v40, %v561_v48  ;;  %v577_v52 = vsel %vm568_vm2, %v561_v48, %v549_v40  ;;  %v5610_v47 = vld [vmem:[%s12053_s2 + $0x1b0] sm:$0xff]  ;;  %v5611_v48 = vld [vmem:[%s12053_s2 + $0x1b8] sm:$0xff] }
  0xd4   : > { %v604_v53 = vmul.f32 %v5594_v43, %v578_v50  ;;  %v605_v54 = vmul.f32 %v5595_v44, %v572_v49  ;;  %v602_v55 = vmul.f32 %v5592_v45, %v577_v52  ;;  %v603_v56 = vmul.f32 %v5593_v46, %v571_v51  ;;  %880 = vrot.lane.b32.xlu1 %v6784_v4, %s12062_s11  ;;  %v5608_v49 = vld [vmem:[%s12053_s2 + $0x1a0] sm:$0xff]  ;;  %v5609_v50 = vld [vmem:[%s12053_s2 + $0x1a8] sm:$0xff] }
  0xd5   : > { %878 = vrot.lane.b32.xlu0 %v6786_v5, %s12062_s11 }
  0xd6   : > { %v555_v57 = vpop.permute.xlu1 %554  ;;  %v553_v58 = vpop.permute.xlu0 %552  ;;  %v955_v59 = vpack.c.bf16 %v605_v54, %v603_v56  ;;  %v954_v60 = vpack.c.bf16 %v604_v53, %v602_v55 }
  0xd8   : > { %892 = vrot.lane.b32.xlu1 %v6792_v6, %s12062_s11  ;;  %1137 = vmatprep.subr.bf16.mxu0 %v955_v59 }
  0xd9   : > { %890 = vrot.lane.b32.xlu0 %v6794_v7, %s12062_s11  ;;  %1138 = vmatpush1.bf16.msra.mxu0 %v954_v60 }
  0xda   : > { %v567_v15 = vpop.permute.xlu1 %566  ;;  %v565_v16 = vpop.permute.xlu0 %564 }
  0xdb   : > { %v574_v17 = vsel %vm568_vm2, %v555_v57, %v567_v15  ;;  %v580_v18 = vsel %vm568_vm2, %v567_v15, %v555_v57  ;;  %v573_v19 = vsel %vm568_vm2, %v553_v58, %v565_v16  ;;  %v579_v20 = vsel %vm568_vm2, %v565_v16, %v553_v58  ;;  %v5614_v15 = vld [vmem:[%s12053_s2 + $0x1d0] sm:$0xff]  ;;  %v5615_v16 = vld [vmem:[%s12053_s2 + $0x1d8] sm:$0xff] }
  0xdc   : > { %v608_v21 = vmul.f32 %v5598_v61, %v580_v18  ;;  %v609_v22 = vmul.f32 %v5599_v62, %v574_v17  ;;  %v606_v23 = vmul.f32 %v5596_v63, %v579_v20  ;;  %v607_v24 = vmul.f32 %v5597_v12, %v573_v19  ;;  %884 = vrot.lane.b32.xlu1 %v6800_v8, %s12062_s11  ;;  %v5612_v17 = vld [vmem:[%s12053_s2 + $0x1c0] sm:$0xff]  ;;  %v5613_v18 = vld [vmem:[%s12053_s2 + $0x1c8] sm:$0xff] }
  0xdd   : > { %882 = vrot.lane.b32.xlu0 %v6802_v9, %s12062_s11 }
  0xde   : > { %v613_v25 = vpop.permute.xlu1 %612  ;;  %v611_v26 = vpop.permute.xlu0 %610  ;;  %v957_v27 = vpack.c.bf16 %v609_v22, %v607_v24  ;;  %v956_v28 = vpack.c.bf16 %v608_v21, %v606_v23 }
  0xe0   : > { %896 = vrot.lane.b32.xlu1 %v6808_v10, %s12062_s11  ;;  %1139 = vmatprep.subr.bf16.mxu0 %v957_v27 }
  0xe1   : > { %894 = vrot.lane.b32.xlu0 %v6810_v11, %s12062_s11  ;;  %1140 = vmatpush1.bf16.msra.mxu0 %v956_v28  ;;  %s6680_s11 = smov 9  }
  0xe2   : > { %v625_v33 = vpop.permute.xlu1 %624  ;;  %v623_v34 = vpop.permute.xlu0 %622 }
  0xe3   : > { %v636_v35 = vsel %vm634_vm3, %v613_v25, %v625_v33  ;;  %v642_v36 = vsel %vm634_vm3, %v625_v33, %v613_v25  ;;  %v635_v37 = vsel %vm634_vm3, %v611_v26, %v623_v34  ;;  %v641_v38 = vsel %vm634_vm3, %v623_v34, %v611_v26 }
  0xe4   : > { %v666_v39 = vmul.f32 %v5606_v29, %v642_v36  ;;  %v667_v40 = vmul.f32 %v5607_v30, %v636_v35  ;;  %v664_v41 = vmul.f32 %v5604_v31, %v641_v38  ;;  %v665_v42 = vmul.f32 %v5605_v32, %v635_v37  ;;  %v404_v29 = vld [vmem:[%s12060_s9 + $0x8] sm:$0xff]  ;;  %v403_v30 = vld [vmem:[%s12060_s9] sm:$0xff] }
  0xe5   : > { %v965_v35 = vpack.c.bf16 %v6776_v2, %v6768_v0  ;;  %v12064_v36 = vmov 0   ;;  %v407_v37 = vld [vmem:[%s12060_s9 + $0x20] sm:$0xff]  ;;  %v964_v38 = vpack.c.bf16 %v6778_v3, %v6770_v1  ;;  %v408_v0 = vld [vmem:[%s12060_s9 + $0x28] sm:$0xff]  ;;  %v5623_v1 = vld [vmem:[%s12053_s2 + $0x298] sm:$0xff] }
  0xe6   : > { %v617_v43 = vpop.permute.xlu1 %616  ;;  %v615_v44 = vpop.permute.xlu0 %614  ;;  %v959_v45 = vpack.c.bf16 %v667_v40, %v665_v42  ;;  %v958_v46 = vpack.c.bf16 %v666_v39, %v664_v41  ;;  %6111 = vset.pattern.permute.xlu1 %v12064_v36  ;;  %6110 = vset.pattern.permute.xlu0 %v12064_v36  ;;  %v967_v40 = vpack.c.bf16 %v6792_v6, %v6794_v7  ;;  %v405_v41 = vld [vmem:[%s12060_s9 + $0x10] sm:$0xff]  ;;  %v5621_v42 = vld [vmem:[%s12053_s2 + $0x288] sm:$0xff] }
  0xe7   : > { %1001 = vperm.xlu1 %6111, %v404_v29   ;;  %996 = vperm.xlu0 %6110, %v403_v30   ;;  %v966_v7 = vpack.c.bf16 %v6784_v4, %v6786_v5  ;;  %v5620_v4 = vld [vmem:[%s12053_s2 + $0x280] sm:$0xff] }
  0xe8   : > { %1141 = vmatprep.subr.bf16.mxu0 %v959_v45 }
  0xe9   : > { %1142 = vmatpush1.bf16.msra.mxu0 %v958_v46  ;;  %v969_v46 = vpack.c.bf16 %v6808_v10, %v6810_v11  ;;  %v409_v10 = vld [vmem:[%s12060_s9 + $0x30] sm:$0xff]  ;;  %v5627_v11 = vld [vmem:[%s12053_s2 + $0x2b8] sm:$0xff] }
  0xea   : > { %v629_v51 = vpop.permute.xlu1 %628  ;;  %v627_v52 = vpop.permute.xlu0 %626 }
  0xeb   : > { %v638_v53 = vsel %vm634_vm3, %v617_v43, %v629_v51  ;;  %v644_v54 = vsel %vm634_vm3, %v629_v51, %v617_v43  ;;  %v637_v55 = vsel %vm634_vm3, %v615_v44, %v627_v52  ;;  %v643_v56 = vsel %vm634_vm3, %v627_v52, %v615_v44  ;;  %1016 = vperm.xlu1 %6111, %v407_v37   ;;  %v406_v43 = vld [vmem:[%s12060_s9 + $0x18] sm:$0xff]  ;;  %v5625_v51 = vld [vmem:[%s12053_s2 + $0x2a8] sm:$0xff] }
  0xec   : > { %v670_v57 = vmul.f32 %v5610_v47, %v644_v54  ;;  %v671_v58 = vmul.f32 %v5611_v48, %v638_v53  ;;  %v668_v59 = vmul.f32 %v5608_v49, %v643_v56  ;;  %v669_v60 = vmul.f32 %v5609_v50, %v637_v55  ;;  %1021 = vperm.xlu0 %6110, %v408_v0   ;;  %v5622_v47 = vld [vmem:[%s12053_s2 + $0x290] sm:$0xff]  ;;  %v410_v53 = vld [vmem:[%s12060_s9 + $0x38] sm:$0xff] }
  0xed   : > { %v968_v52 = vpack.c.bf16 %v6800_v8, %v6802_v9  ;;  %v5624_v8 = vld [vmem:[%s12053_s2 + $0x2a0] sm:$0xff] }
  0xee   : > { %v621_v61 = vpop.permute.xlu1 %620  ;;  %v619_v62 = vpop.permute.xlu0 %618  ;;  %v961_v63 = vpack.c.bf16 %v671_v58, %v669_v60  ;;  %v960_v12 = vpack.c.bf16 %v670_v57, %v668_v59  ;;  %v5626_v58 = vld [vmem:[%s12053_s2 + $0x2b0] sm:$0xff] }
  0xef   : > { %1006 = vperm.xlu1 %6111, %v405_v41   ;;  %v5638_v41 = vld [vmem:[%s12053_s2 + $0x310] sm:$0xff] }
  0xf0   : > { %1143 = vmatprep.subr.bf16.mxu0 %v961_v63  ;;  %1011 = vperm.xlu0 %6110, %v406_v43  }
  0xf1   : > { %1144 = vmatpush1.bf16.msra.mxu0 %v960_v12 }
  0xf2   : > { %v633_v19 = vpop.permute.xlu1 %632  ;;  %v631_v20 = vpop.permute.xlu0 %630 }
  0xf3   : > { %v640_v21 = vsel %vm634_vm3, %v621_v61, %v633_v19  ;;  %v646_v22 = vsel %vm634_vm3, %v633_v19, %v621_v61  ;;  %v639_v23 = vsel %vm634_vm3, %v619_v62, %v631_v20  ;;  %v645_v24 = vsel %vm634_vm3, %v631_v20, %v619_v62  ;;  %1026 = vperm.xlu1 %6111, %v409_v10   ;;  %v5630_v20 = vld [vmem:[%s12053_s2 + $0x2d0] sm:$0xff] }
  0xf4   : > { %v674_v25 = vmul.f32 %v5614_v15, %v646_v22  ;;  %v675_v26 = vmul.f32 %v5615_v16, %v640_v21  ;;  %v672_v27 = vmul.f32 %v5612_v17, %v645_v24  ;;  %v673_v28 = vmul.f32 %v5613_v18, %v639_v23  ;;  %1031 = vperm.xlu0 %6110, %v410_v53   ;;  %v5631_v21 = vld [vmem:[%s12053_s2 + $0x2d8] sm:$0xff]  ;;  %v6112_v23 = vld [vmem:[%s12056_s5] ss:$16 sps:$4 sm:$0xff]  }
  0xf5   : > { %v5628_v24 = vld [vmem:[%s12053_s2 + $0x2c0] sm:$0xff] }
  0xf6   : > { %v679_v31 = vpop.permute.xlu1 %678  ;;  %v677_v32 = vpop.permute.xlu0 %676  ;;  %v963_v33 = vpack.c.bf16 %v675_v26, %v673_v28  ;;  %v962_v34 = vpack.c.bf16 %v674_v25, %v672_v27  ;;  %v5629_v25 = vld [vmem:[%s12053_s2 + $0x2c8] sm:$0xff]  ;;  %v6115_v26 = vld [vmem:[%s12056_s5 + $0x24] ss:$16 sps:$4 sm:$0xff]   ;;  %v6120_v53 = vld [vmem:[%s12056_s5 + $0x40] ss:$16 sps:$4 sm:$0xff]  }
  0xf8   : > { %1145 = vmatprep.subr.bf16.mxu0 %v963_v33 }
  0xf9   : > { %1146 = vmatpush1.bf16.msra.mxu0 %v962_v34 }
  0xfa   : > { %v691_v2 = vpop.permute.xlu1 %690  ;;  %v689_v39 = vpop.permute.xlu0 %688  ;;  %1147 = vmatprep.subr.bf16.mxu0 %v965_v35 }
  0xfb   : > { %v708_v3 = vsel %vm700_vm4, %v691_v2, %v679_v31  ;;  %v707_v6 = vsel %vm700_vm4, %v689_v39, %v677_v32  ;;  %v702_v48 = vsel %vm700_vm4, %v679_v31, %v691_v2  ;;  %v701_v5 = vsel %vm700_vm4, %v677_v32, %v689_v39 }
  0xfc   : > { %v733_v49 = vmul.f32 %v5623_v1, %v708_v3  ;;  %v731_v50 = vmul.f32 %v5621_v42, %v707_v6  ;;  %v732_v54 = vmul.f32 %v5622_v47, %v702_v48  ;;  %v730_v55 = vmul.f32 %v5620_v4, %v701_v5  ;;  %v5639_v1 = vld [vmem:[%s12053_s2 + $0x318] sm:$0xff]  ;;  %v6117_v3 = vld [vmem:[%s12056_s5 + $0x20] ss:$16 sps:$4 sm:$0xff]   ;;  %v5637_v6 = vld [vmem:[%s12053_s2 + $0x308] sm:$0xff] }
  0xfd   : > { %1148 = vmatpush1.bf16.msra.mxu0 %v964_v38  ;;  %v5636_v42 = vld [vmem:[%s12053_s2 + $0x300] sm:$0xff] }
  0xfe   : > { %v683_v44 = vpop.permute.xlu1 %682  ;;  %v681_v45 = vpop.permute.xlu0 %680  ;;  %1149 = vmatprep.subr.bf16.mxu0 %v967_v40  ;;  %v971_v12 = vpack.c.bf16 %v733_v49, %v731_v50  ;;  %v970_v19 = vpack.c.bf16 %v732_v54, %v730_v55  ;;  %v5642_v54 = vld [vmem:[%s12053_s2 + $0x330] sm:$0xff]  ;;  %v5643_v55 = vld [vmem:[%s12053_s2 + $0x338] sm:$0xff] }
 0x101   : > { %1150 = vmatpush1.bf16.msra.mxu0 %v966_v7  ;;  %v6118_v7 = vld [vmem:[%s12056_s5 + $0x44] ss:$16 sps:$4 sm:$0xff]  }
 0x102   : > { %v695_v56 = vpop.permute.xlu1 %694  ;;  %v693_v57 = vpop.permute.xlu0 %692  ;;  %1151 = vmatprep.subr.bf16.mxu0 %v969_v46 }
 0x103   : > { %v704_v59 = vsel %vm700_vm4, %v683_v44, %v695_v56  ;;  %v710_v60 = vsel %vm700_vm4, %v695_v56, %v683_v44  ;;  %v703_v9 = vsel %vm700_vm4, %v681_v45, %v693_v57  ;;  %v709_v61 = vsel %vm700_vm4, %v693_v57, %v681_v45  ;;  %v6121_v56 = vld [vmem:[%s12056_s5 + $0x64] ss:$16 sps:$4 sm:$0xff]  }
 0x104   : > { %v737_v62 = vmul.f32 %v5627_v11, %v710_v60  ;;  %v735_v63 = vmul.f32 %v5625_v51, %v709_v61  ;;  %v736_v15 = vmul.f32 %v5626_v58, %v704_v59  ;;  %v734_v16 = vmul.f32 %v5624_v8, %v703_v9  ;;  %v5640_v58 = vld [vmem:[%s12053_s2 + $0x320] sm:$0xff]  ;;  %v5641_v59 = vld [vmem:[%s12053_s2 + $0x328] sm:$0xff] }
 0x105   : > { %1152 = vmatpush1.bf16.msra.mxu0 %v968_v52 }
 0x106   : > { %v687_v17 = vpop.permute.xlu1 %686  ;;  %v685_v18 = vpop.permute.xlu0 %684  ;;  %1153 = vmatprep.subr.bf16.mxu0 %v971_v12  ;;  %v973_v22 = vpack.c.bf16 %v737_v62, %v735_v63  ;;  %v972_v27 = vpack.c.bf16 %v736_v15, %v734_v16 }
 0x109   : > { %1154 = vmatpush1.bf16.msra.mxu0 %v970_v19 }
 0x10a   : > { %v699_v28 = vpop.permute.xlu1 %698  ;;  %v697_v29 = vpop.permute.xlu0 %696  ;;  %1196 = vmatprep.subr.bf16.mxu0 %v973_v22  ;;  %v5646_v22 = vld [vmem:[%s12053_s2 + $0x350] sm:$0xff] }
 0x10b   : > { %v706_v30 = vsel %vm700_vm4, %v687_v17, %v699_v28  ;;  %v712_v31 = vsel %vm700_vm4, %v699_v28, %v687_v17  ;;  %v705_v32 = vsel %vm700_vm4, %v685_v18, %v697_v29  ;;  %v711_v33 = vsel %vm700_vm4, %v697_v29, %v685_v18 }
 0x10c   : > { %v740_v34 = vmul.f32 %v5630_v20, %v706_v30  ;;  %v741_v35 = vmul.f32 %v5631_v21, %v712_v31  ;;  %v738_v37 = vmul.f32 %v5628_v24, %v705_v32  ;;  %v739_v38 = vmul.f32 %v5629_v25, %v711_v33  ;;  %1156 = vmatmul.mubr.bf16.vlgmr.msra.gmra.mrb[0].mxu0 %v6112_v23  ;;  %v6123_v21 = vld [vmem:[%s12056_s5 + $0x60] ss:$16 sps:$4 sm:$0xff]   ;;  %v5647_v23 = vld [vmem:[%s12053_s2 + $0x358] sm:$0xff] }
 0x10d   : > { %1197 = vmatpush1.bf16.msra.mxu0 %v972_v27  ;;  %1165 = vmatprep.mubr.bf16.mxu0 %v6115_v26  ;;  %v6126_v24 = vld [vmem:[%s12056_s5 + $0xc] ss:$16 sps:$4 sm:$0xff]   ;;  %v5644_v26 = vld [vmem:[%s12053_s2 + $0x340] sm:$0xff] }
 0x10e   : > { %v974_v0 = vpack.c.bf16 %v740_v34, %v738_v37  ;;  %v745_v2 = vpop.permute.xlu1 %744  ;;  %v743_v39 = vpop.permute.xlu0 %742  ;;  %v975_v40 = vpack.c.bf16 %v741_v35, %v739_v38  ;;  %v5645_v27 = vld [vmem:[%s12053_s2 + $0x348] sm:$0xff] }
 0x110   : > { %1198 = vmatprep.subr.bf16.mxu0 %v975_v40  ;;  %v5654_v40 = vld [vmem:[%s12053_s2 + $0x390] sm:$0xff] }
 0x111   : > { %1199 = vmatpush1.bf16.msra.mxu0 %v974_v0 }
 0x112   : > { %v757_v43 = vpop.permute.xlu1 %756  ;;  %v755_v44 = vpop.permute.xlu0 %754 }
 0x113   : > { %v768_v45 = vsel %vm766_vm5, %v745_v2, %v757_v43  ;;  %v774_v46 = vsel %vm766_vm5, %v757_v43, %v745_v2  ;;  %v767_v47 = vsel %vm766_vm5, %v743_v39, %v755_v44  ;;  %v773_v48 = vsel %vm766_vm5, %v755_v44, %v743_v39 }
 0x114   : > { %v798_v4 = vmul.f32 %v5638_v41, %v768_v45  ;;  %v799_v5 = vmul.f32 %v5639_v1, %v774_v46  ;;  %v796_v49 = vmul.f32 %v5636_v42, %v767_v47  ;;  %v797_v50 = vmul.f32 %v5637_v6, %v773_v48  ;;  %1166 = vmatmul.mubr.bf16.gmra.mrb[4].mxu0 %v6117_v3  ;;  %v5655_v41 = vld [vmem:[%s12053_s2 + $0x398] sm:$0xff]  ;;  %v5652_v3 = vld [vmem:[%s12053_s2 + $0x380] sm:$0xff]  ;;  %v5653_v42 = vld [vmem:[%s12053_s2 + $0x388] sm:$0xff] }
 0x115   : > { %1175 = vmatprep.mubr.bf16.mxu0 %v6118_v7 }
 0x116   : > { %v976_v10 = vpack.c.bf16 %v798_v4, %v796_v49  ;;  %v749_v11 = vpop.permute.xlu1 %748  ;;  %v977_v51 = vpack.c.bf16 %v799_v5, %v797_v50 }
 0x117   : > { %v747_v52 = vpop.permute.xlu0 %746 }
 0x118   : > { %1200 = vmatprep.subr.bf16.mxu0 %v977_v51  ;;  %v5659_v51 = vld [vmem:[%s12053_s2 + $0x3b8] sm:$0xff] }
 0x119   : > { %1201 = vmatpush1.bf16.msra.mxu0 %v976_v10 }
 0x11a   : > { %v761_v57 = vpop.permute.xlu1 %760 }
 0x11b   : > { %v770_v60 = vsel %vm766_vm5, %v749_v11, %v761_v57  ;;  %v776_v8 = vsel %vm766_vm5, %v761_v57, %v749_v11  ;;  %v759_v9 = vpop.permute.xlu0 %758  ;;  %v5658_v11 = vld [vmem:[%s12053_s2 + $0x3b0] sm:$0xff] }
 0x11c   : > { %v802_v61 = vmul.f32 %v5642_v54, %v770_v60  ;;  %v803_v62 = vmul.f32 %v5643_v55, %v776_v8  ;;  %v769_v63 = vsel %vm766_vm5, %v747_v52, %v759_v9  ;;  %v775_v12 = vsel %vm766_vm5, %v759_v9, %v747_v52  ;;  %1176 = vmatmul.mubr.bf16.gmra.mrb[8].mxu0 %v6120_v53  ;;  %v5656_v53 = vld [vmem:[%s12053_s2 + $0x3a0] sm:$0xff]  ;;  %v5657_v54 = vld [vmem:[%s12053_s2 + $0x3a8] sm:$0xff] }
 0x11d   : > { %v800_v15 = vmul.f32 %v5640_v58, %v769_v63  ;;  %v801_v16 = vmul.f32 %v5641_v59, %v775_v12  ;;  %1185 = vmatprep.mubr.bf16.mxu0 %v6121_v56 }
 0x11e   : > { %v753_v17 = vpop.permute.xlu1 %752 }
 0x11f   : > { %v978_v18 = vpack.c.bf16 %v802_v61, %v800_v15  ;;  %v751_v19 = vpop.permute.xlu0 %750  ;;  %v979_v20 = vpack.c.bf16 %v803_v62, %v801_v16  ;;  %v5662_v16 = vld [vmem:[%s12053_s2 + $0x3d0] sm:$0xff] }
 0x121   : > { %1202 = vmatprep.subr.bf16.mxu0 %v979_v20  ;;  %v5661_v20 = vld [vmem:[%s12053_s2 + $0x3c8] sm:$0xff] }
 0x122   : > { %1203 = vmatpush1.bf16.msra.mxu0 %v978_v18  ;;  %v765_v25 = vpop.permute.xlu1 %764 }
 0x123   : > { %v772_v28 = vsel %vm766_vm5, %v753_v17, %v765_v25  ;;  %v778_v29 = vsel %vm766_vm5, %v765_v25, %v753_v17  ;;  %v763_v30 = vpop.permute.xlu0 %762  ;;  %v5663_v17 = vld [vmem:[%s12053_s2 + $0x3d8] sm:$0xff] }
 0x124   : > { %v806_v31 = vmul.f32 %v5646_v22, %v772_v28  ;;  %v807_v32 = vmul.f32 %v5647_v23, %v778_v29  ;;  %v771_v33 = vsel %vm766_vm5, %v751_v19, %v763_v30  ;;  %v777_v34 = vsel %vm766_vm5, %v763_v30, %v751_v19  ;;  %1186 = vmatmul.mubr.bf16.gmra.mrb[12].mxu0 %v6123_v21  ;;  %v5660_v19 = vld [vmem:[%s12053_s2 + $0x3c0] sm:$0xff] }
 0x125   : > { %v804_v35 = vmul.f32 %v5644_v26, %v771_v33  ;;  %v805_v37 = vmul.f32 %v5645_v27, %v777_v34  ;;  %5700 = vmatprep.mubr.msk.bf16.mxu0 %vm1110_vm6, %v6126_v24  ;;  %v5670_v34 = vld [vmem:[%s12053_s2 + $0x410] sm:$0xff] }
 0x126   : > { %v811_v38 = vpop.permute.xlu1 %810 }
 0x127   : > { %v980_v0 = vpack.c.bf16 %v806_v31, %v804_v35  ;;  %v809_v2 = vpop.permute.xlu0 %808  ;;  %v981_v39 = vpack.c.bf16 %v807_v32, %v805_v37  ;;  %v5671_v35 = vld [vmem:[%s12053_s2 + $0x418] sm:$0xff] }
 0x129   : > { %1204 = vmatprep.subr.bf16.mxu0 %v981_v39 }
 0x12a   : > { %1205 = vmatpush1.bf16.msra.mxu0 %v980_v0  ;;  %v823_v1 = vpop.permute.xlu1 %822  ;;  %v5669_v0 = vld [vmem:[%s12053_s2 + $0x408] sm:$0xff] }
 0x12b   : > { %v834_v6 = vsel %vm832_vm7, %v811_v38, %v823_v1  ;;  %v840_v7 = vsel %vm832_vm7, %v823_v1, %v811_v38  ;;  %v821_v43 = vpop.permute.xlu0 %820  ;;  %v5668_v38 = vld [vmem:[%s12053_s2 + $0x400] sm:$0xff] }
 0x12c   : > { %v864_v44 = vmul.f32 %v5654_v40, %v834_v6  ;;  %v865_v45 = vmul.f32 %v5655_v41, %v840_v7  ;;  %v833_v46 = vsel %vm832_vm7, %v809_v2, %v821_v43  ;;  %v839_v47 = vsel %vm832_vm7, %v821_v43, %v809_v2 }
 0x12d   : > { %v862_v48 = vmul.f32 %v5652_v3, %v833_v46  ;;  %v863_v4 = vmul.f32 %v5653_v42, %v839_v47  ;;  %v5674_v47 = vld [vmem:[%s12053_s2 + $0x430] sm:$0xff] }
 0x12e   : > { %v815_v5 = vpop.permute.xlu1 %814 }
 0x12f   : > { %v982_v49 = vpack.c.bf16 %v864_v44, %v862_v48  ;;  %v813_v50 = vpop.permute.xlu0 %812  ;;  %v983_v10 = vpack.c.bf16 %v865_v45, %v863_v4  ;;  %v5675_v48 = vld [vmem:[%s12053_s2 + $0x438] sm:$0xff] }
 0x131   : > { %1206 = vmatprep.subr.bf16.mxu0 %v983_v10 }
 0x132   : > { %1207 = vmatpush1.bf16.msra.mxu0 %v982_v49  ;;  %v827_v52 = vpop.permute.xlu1 %826  ;;  %v5673_v49 = vld [vmem:[%s12053_s2 + $0x428] sm:$0xff] }
 0x133   : > { %v836_v55 = vsel %vm832_vm7, %v815_v5, %v827_v52  ;;  %v842_v56 = vsel %vm832_vm7, %v827_v52, %v815_v5  ;;  %v825_v57 = vpop.permute.xlu0 %824  ;;  %v5672_v5 = vld [vmem:[%s12053_s2 + $0x420] sm:$0xff] }
 0x134   : > { %v868_v58 = vmul.f32 %v5658_v11, %v836_v55  ;;  %v869_v59 = vmul.f32 %v5659_v51, %v842_v56  ;;  %v835_v60 = vsel %vm832_vm7, %v813_v50, %v825_v57  ;;  %v841_v8 = vsel %vm832_vm7, %v825_v57, %v813_v50 }
 0x135   : > { %v866_v9 = vmul.f32 %v5656_v53, %v835_v60  ;;  %v867_v61 = vmul.f32 %v5657_v54, %v841_v8  ;;  %v5678_v8 = vld [vmem:[%s12053_s2 + $0x450] sm:$0xff] }
 0x136   : > { %v819_v62 = vpop.permute.xlu1 %818 }
 0x137   : > { %v984_v63 = vpack.c.bf16 %v868_v58, %v866_v9  ;;  %v817_v12 = vpop.permute.xlu0 %816  ;;  %v985_v15 = vpack.c.bf16 %v869_v59, %v867_v61  ;;  %v5679_v9 = vld [vmem:[%s12053_s2 + $0x458] sm:$0xff] }
 0x139   : > { %1208 = vmatprep.subr.bf16.mxu0 %v985_v15 }
 0x13a   : > { %1209 = vmatpush1.bf16.msra.mxu0 %v984_v63  ;;  %v831_v18 = vpop.permute.xlu1 %830  ;;  %v5677_v63 = vld [vmem:[%s12053_s2 + $0x448] sm:$0xff] }
 0x13b   : > { %v838_v21 = vsel %vm832_vm7, %v819_v62, %v831_v18  ;;  %v844_v22 = vsel %vm832_vm7, %v831_v18, %v819_v62  ;;  %v829_v23 = vpop.permute.xlu0 %828  ;;  %v5676_v62 = vld [vmem:[%s12053_s2 + $0x440] sm:$0xff] }
 0x13c   : > { %v872_v24 = vmul.f32 %v5662_v16, %v838_v21  ;;  %v873_v25 = vmul.f32 %v5663_v17, %v844_v22  ;;  %v837_v26 = vsel %vm832_vm7, %v817_v12, %v829_v23  ;;  %v843_v27 = vsel %vm832_vm7, %v829_v23, %v817_v12 }
 0x13d   : > { %v870_v28 = vmul.f32 %v5660_v19, %v837_v26  ;;  %v871_v29 = vmul.f32 %v5661_v20, %v843_v27  ;;  %v6127_v26 = vld [vmem:[%s12056_s5 + $0x2c] ss:$16 sps:$4 sm:$0xff]   ;;  %v6129_v27 = vld [vmem:[%s12056_s5 + $0x28] ss:$16 sps:$4 sm:$0xff]  }
 0x13e   : > { %v877_v30 = vpop.permute.xlu1 %876 }
 0x13f   : > { %v986_v31 = vpack.c.bf16 %v872_v24, %v870_v28  ;;  %v875_v32 = vpop.permute.xlu0 %874  ;;  %v987_v33 = vpack.c.bf16 %v873_v25, %v871_v29  ;;  %v6124_v25 = vld [vmem:[%s12056_s5 + $0x8] ss:$16 sps:$4 sm:$0xff]   ;;  %v6130_v28 = vld [vmem:[%s12056_s5 + $0x4c] ss:$16 sps:$4 sm:$0xff]  }
 0x140   : > { %v6132_v29 = vld [vmem:[%s12056_s5 + $0x48] ss:$16 sps:$4 sm:$0xff]  }
 0x141   : > { %1210 = vmatprep.subr.bf16.mxu0 %v987_v33 }
 0x142   : > { %1211 = vmatpush1.bf16.msra.mxu0 %v986_v31  ;;  %v889_v37 = vpop.permute.xlu1 %888  ;;  %v6135_v31 = vld [vmem:[%s12056_s5 + $0x68] ss:$16 sps:$4 sm:$0xff]  }
 0x143   : > { %v900_v2 = vsel %vm898_vm8, %v877_v30, %v889_v37  ;;  %v906_v39 = vsel %vm898_vm8, %v889_v37, %v877_v30  ;;  %v887_v40 = vpop.permute.xlu0 %886  ;;  %v6133_v30 = vld [vmem:[%s12056_s5 + $0x6c] ss:$16 sps:$4 sm:$0xff]  }
 0x144   : > { %v930_v41 = vmul.f32 %v5670_v34, %v900_v2  ;;  %v931_v1 = vmul.f32 %v5671_v35, %v906_v39  ;;  %v899_v3 = vsel %vm898_vm8, %v875_v32, %v887_v40  ;;  %v905_v42 = vsel %vm898_vm8, %v887_v40, %v875_v32 }
 0x145   : > { %v928_v6 = vmul.f32 %v5668_v38, %v899_v3  ;;  %v929_v7 = vmul.f32 %v5669_v0, %v905_v42 }
 0x146   : > { %v881_v43 = vpop.permute.xlu1 %880 }
 0x147   : > { %v988_v44 = vpack.c.bf16 %v930_v41, %v928_v6  ;;  %v879_v45 = vpop.permute.xlu0 %878  ;;  %v989_v46 = vpack.c.bf16 %v931_v1, %v929_v7 }
 0x149   : > { %1212 = vmatprep.subr.bf16.mxu0 %v989_v46 }
 0x14a   : > { %1213 = vmatpush1.bf16.msra.mxu0 %v988_v44  ;;  %v893_v4 = vpop.permute.xlu1 %892 }
 0x14b   : > { %v902_v50 = vsel %vm898_vm8, %v881_v43, %v893_v4  ;;  %v908_v10 = vsel %vm898_vm8, %v893_v4, %v881_v43  ;;  %v891_v11 = vpop.permute.xlu0 %890 }
 0x14c   : > { %v934_v51 = vmul.f32 %v5674_v47, %v902_v50  ;;  %v935_v52 = vmul.f32 %v5675_v48, %v908_v10  ;;  %v901_v53 = vsel %vm898_vm8, %v879_v45, %v891_v11  ;;  %v907_v54 = vsel %vm898_vm8, %v891_v11, %v879_v45 }
 0x14d   : > { %v932_v55 = vmul.f32 %v5672_v5, %v901_v53  ;;  %v933_v56 = vmul.f32 %v5673_v49, %v907_v54 }
 0x14e   : > { %v885_v57 = vpop.permute.xlu1 %884 }
 0x14f   : > { %v990_v58 = vpack.c.bf16 %v934_v51, %v932_v55  ;;  %v883_v59 = vpop.permute.xlu0 %882  ;;  %v991_v60 = vpack.c.bf16 %v935_v52, %v933_v56 }
 0x151   : > { %1214 = vmatprep.subr.bf16.mxu0 %v991_v60 }
 0x152   : > { %1215 = vmatpush1.bf16.msra.mxu0 %v990_v58  ;;  %v897_v61 = vpop.permute.xlu1 %896 }
 0x153   : > { %v904_v12 = vsel %vm898_vm8, %v885_v57, %v897_v61  ;;  %v910_v15 = vsel %vm898_vm8, %v897_v61, %v885_v57  ;;  %v895_v16 = vpop.permute.xlu0 %894 }
 0x154   : > { %v938_v17 = vmul.f32 %v5678_v8, %v904_v12  ;;  %v939_v18 = vmul.f32 %v5679_v9, %v910_v15  ;;  %v903_v19 = vsel %vm898_vm8, %v883_v59, %v895_v16  ;;  %v909_v20 = vsel %vm898_vm8, %v895_v16, %v883_v59 }
 0x155   : > { %v936_v21 = vmul.f32 %v5676_v62, %v903_v19  ;;  %v937_v22 = vmul.f32 %v5677_v63, %v909_v20 }
 0x157   : > { %v992_v23 = vpack.c.bf16 %v938_v17, %v936_v21  ;;  %v993_v24 = vpack.c.bf16 %v939_v18, %v937_v22 }
 0x159   : > { %1216 = vmatprep.subr.bf16.mxu0 %v993_v24 }
 0x15a   : > { %1217 = vmatpush1.bf16.msra.mxu0 %v992_v23 }
 0x15d   : > { %1229 = vmatmul.mubr.bf16.vlgmr.msra.gmra.mrb[0].mxu0 %v6124_v25 }
 0x15e   : > { %5701 = vmatprep.mubr.msk.bf16.mxu0 %vm1110_vm6, %v6127_v26 }
 0x165   : > { %1239 = vmatmul.mubr.bf16.gmra.mrb[4].mxu0 %v6129_v27 }
 0x166   : > { %5702 = vmatprep.mubr.msk.bf16.mxu0 %vm1110_vm6, %v6130_v28  ;;  %v997_v32 = vpop.permute.xlu0 %996  ;;  %v1002_v37 = vpop.permute.xlu1 %1001 }
 0x16a   : > { %v1017_v7 = vpop.permute.xlu1 %1016 }
 0x16b   : > { %v1022_v44 = vpop.permute.xlu0 %1021 }
 0x16d   : > { %1249 = vmatmul.mubr.bf16.gmra.mrb[8].mxu0 %v6132_v29 }
 0x16e   : > { %5703 = vmatprep.mubr.msk.bf16.mxu0 %vm1110_vm6, %v6133_v30  ;;  %v1007_v46 = vpop.permute.xlu1 %1006 }
 0x16f   : > { %v1012_v49 = vpop.permute.xlu0 %1011 }
 0x172   : > { %v1027_v58 = vpop.permute.xlu1 %1026 }
 0x173   : > { %v1032_v61 = vpop.permute.xlu0 %1031 }
 0x175   : > { %1259 = vmatmul.mubr.bf16.gmra.mrb[12].mxu0 %v6135_v31 }
 0x230   : > { %v1230_v33 = vpop.f32.mrb[0].mxu0 }
 0x231   : > { %v5937_v34 = vadd.f32 %v1230_v33, %v997_v32  ;;  %v1232_v35 = vpop.f32.mrb[1].mxu0 }
 0x232   : > { %v5938_v38 = vadd.f32 %v1232_v35, %v997_v32  ;;  %v1234_v0 = vpop.f32.mrb[2].mxu0 }
 0x233   : > { %v5939_v2 = vadd.f32 %v1234_v0, %v1002_v37  ;;  %v1236_v39 = vpop.f32.mrb[3].mxu0 }
 0x234   : > { %v1269_v40 = vadd.f32 %v5938_v38, %v5937_v34  ;;  %v5940_v41 = vadd.f32 %v1236_v39, %v1002_v37 }
 0x236   : > { %v1272_v1 = vadd.f32 %v5940_v41, %v5939_v2  ;;  %1270 = vadd.xlane.f32.xlu1 %v1269_v40 }
 0x238   : > { %v1240_v3 = vpop.f32.mrb[4].mxu0  ;;  %1273 = vadd.xlane.f32.xlu0 %v1272_v1 }
 0x239   : > { %v1242_v42 = vpop.f32.mrb[5].mxu0  ;;  %v5941_v11 = vadd.f32 %v1240_v3, %v1007_v46 }
 0x23a   : > { %v1244_v6 = vpop.f32.mrb[6].mxu0  ;;  %v5942_v51 = vadd.f32 %v1242_v42, %v1007_v46 }
 0x23b   : > { %v1246_v43 = vpop.f32.mrb[7].mxu0  ;;  %v5943_v54 = vadd.f32 %v1244_v6, %v1012_v49 }
 0x23c   : > { %v5944_v55 = vadd.f32 %v1246_v43, %v1012_v49  ;;  %v1275_v57 = vadd.f32 %v5942_v51, %v5941_v11 }
 0x23e   : > { %v1278_v9 = vadd.f32 %v5944_v55, %v5943_v54 }
 0x240   : > { %v1250_v45 = vpop.f32.mrb[8].mxu0 }
 0x241   : > { %v5945_v47 = vadd.f32 %v1250_v45, %v1017_v7  ;;  %v1252_v48 = vpop.f32.mrb[9].mxu0 }
 0x242   : > { %v5946_v4 = vadd.f32 %v1252_v48, %v1017_v7  ;;  %v1254_v5 = vpop.f32.mrb[10].mxu0 }
 0x243   : > { %v5947_v50 = vadd.f32 %v1254_v5, %v1022_v44  ;;  %v1256_v10 = vpop.f32.mrb[11].mxu0 }
 0x244   : > { %v1281_v52 = vadd.f32 %v5946_v4, %v5945_v47  ;;  %v5948_v53 = vadd.f32 %v1256_v10, %v1022_v44 }
 0x246   : > { %v1284_v56 = vadd.f32 %v5948_v53, %v5947_v50  ;;  %1282 = vadd.xlane.f32.xlu0 %v1281_v52 }
 0x248   : > { %v1260_v59 = vpop.f32.mrb[12].mxu0  ;;  %1285 = vadd.xlane.f32.xlu1 %v1284_v56 }
 0x249   : > { %v5949_v60 = vadd.f32 %v1260_v59, %v1027_v58  ;;  %v1262_v8 = vpop.f32.mrb[13].mxu0 }
 0x24a   : > { %v5950_v62 = vadd.f32 %v1262_v8, %v1027_v58  ;;  %v1264_v63 = vpop.f32.mrb[14].mxu0  ;;  %1276 = vadd.xlane.f32.xlu0 %v1275_v57 }
 0x24b   : > { %v5951_v12 = vadd.f32 %v1264_v63, %v1032_v61  ;;  %v1266_v15 = vpop.f32.mrb[15].mxu0  ;;  %v6136_v63 = vld [vmem:[%s12055_s4 + $0x40] sm:$0xff]  }
 0x24c   : > { %v1287_v16 = vadd.f32 %v5950_v62, %v5949_v60  ;;  %v5952_v17 = vadd.f32 %v1266_v15, %v1032_v61  ;;  %1279 = vadd.xlane.f32.xlu1 %v1278_v9  ;;  %5827 = vmatprep.subr.bf16.mxu0 %v6136_v63 }
 0x24e   : > { %v1290_v18 = vadd.f32 %v5952_v17, %v5951_v12  ;;  %1288 = vadd.xlane.f32.xlu0 %v1287_v16  ;;  %v6138_v16 = vld [vmem:[%s12055_s4 + $0x48] sm:$0xff]  }
 0x250   : > { %1291 = vadd.xlane.f32.xlu1 %v1290_v18  ;;  %v6140_v18 = vld [vmem:[%s12055_s4 + $0x50] sm:$0xff]  }
 0x2c3   : > { %v1271_v19 = vpop.xlane.xlu1 %1270 }
 0x2c4   : > { %v1293_v20 = vmul.f32 0.00390625, %v1271_v19  ;;  %v6141_v19 = vld [vmem:[%s12055_s4 + $0x10] sm:$0xff]  }
 0x2c5   : > { %v1274_v21 = vpop.xlane.xlu0 %1273 }
 0x2c6   : > { %v7565_v22 = vsub.f32 %v5937_v34, %v1293_v20  ;;  %v7567_v23 = vsub.f32 %v5938_v38, %v1293_v20  ;;  %v1294_v24 = vmul.f32 0.00390625, %v1274_v21  ;;  %v6142_v20 = vld [vmem:[%s12055_s4 + $0x58] sm:$0xff]  }
 0x2c7   : > { %v6143_v21 = vld [vmem:[%s12055_s4 + $0x18] sm:$0xff]  }
 0x2c8   : > { %v1317_v25 = vmul.f32 %v7565_v22, %v7565_v22  ;;  %v1318_v26 = vmul.f32 %v7567_v23, %v7567_v23  ;;  %v7573_v27 = vsub.f32 %v5939_v2, %v1294_v24  ;;  %v7575_v28 = vsub.f32 %v5940_v41, %v1294_v24  ;;  %v6144_v24 = vld [vmem:[%s12055_s4 + $0x60] sm:$0xff]  }
 0x2ca   : > { %v1319_v29 = vmul.f32 %v7573_v27, %v7573_v27  ;;  %v1320_v30 = vmul.f32 %v7575_v28, %v7575_v28  ;;  %v1333_v31 = vadd.f32 %v1318_v26, %v1317_v25  ;;  %v6145_v25 = vld [vmem:[%s12055_s4 + $0x20] sm:$0xff]   ;;  %v6146_v26 = vld [vmem:[%s12055_s4 + $0x68] sm:$0xff]  }
 0x2cc   : > { %1334 = vadd.xlane.f32.xlu0 %v1333_v31  ;;  %v1336_v32 = vadd.f32 %v1320_v30, %v1319_v29  ;;  %v6147_v29 = vld [vmem:[%s12055_s4 + $0x28] sm:$0xff]   ;;  %v6148_v30 = vld [vmem:[%s12055_s4 + $0x70] sm:$0xff]  }
 0x2cd   : > { %v6149_v31 = vld [vmem:[%s12055_s4 + $0x30] sm:$0xff]  }
 0x2ce   : > { %1337 = vadd.xlane.f32.xlu1 %v1336_v32  ;;  %v6150_v32 = vld [vmem:[%s12055_s4 + $0x78] sm:$0xff]  }
 0x2d3   : > { %v1283_v33 = vpop.xlane.xlu0 %1282 }
 0x2d4   : > { %v1297_v34 = vmul.f32 0.00390625, %v1283_v33  ;;  %v6151_v33 = vld [vmem:[%s12055_s4 + $0x38] sm:$0xff]  }
 0x2d5   : > { %v1286_v35 = vpop.xlane.xlu1 %1285 }
 0x2d6   : > { %v7581_v37 = vsub.f32 %v5945_v47, %v1297_v34  ;;  %v7583_v38 = vsub.f32 %v5946_v4, %v1297_v34  ;;  %v1298_v0 = vmul.f32 0.00390625, %v1286_v35 }
 0x2d7   : > { %v1277_v2 = vpop.xlane.xlu0 %1276 }
 0x2d8   : > { %v1325_v39 = vmul.f32 %v7581_v37, %v7581_v37  ;;  %v1326_v40 = vmul.f32 %v7583_v38, %v7583_v38  ;;  %v7589_v41 = vsub.f32 %v5947_v50, %v1298_v0  ;;  %v7591_v1 = vsub.f32 %v5948_v53, %v1298_v0 }
 0x2d9   : > { %v1295_v3 = vmul.f32 0.00390625, %v1277_v2  ;;  %v1280_v42 = vpop.xlane.xlu1 %1279 }
 0x2da   : > { %v1327_v6 = vmul.f32 %v7589_v41, %v7589_v41  ;;  %v1328_v7 = vmul.f32 %v7591_v1, %v7591_v1  ;;  %v1296_v43 = vmul.f32 0.00390625, %v1280_v42  ;;  %v1345_v44 = vadd.f32 %v1326_v40, %v1325_v39 }
 0x2db   : > { %v7597_v45 = vsub.f32 %v5941_v11, %v1295_v3  ;;  %v7599_v46 = vsub.f32 %v5942_v51, %v1295_v3  ;;  %v1289_v47 = vpop.xlane.xlu0 %1288 }
 0x2dc   : > { %v7601_v48 = vsub.f32 %v5943_v54, %v1296_v43  ;;  %v7603_v4 = vsub.f32 %v5944_v55, %v1296_v43  ;;  %v1299_v5 = vmul.f32 0.00390625, %v1289_v47  ;;  %1346 = vadd.xlane.f32.xlu0 %v1345_v44  ;;  %v1348_v49 = vadd.f32 %v1328_v7, %v1327_v6 }
 0x2dd   : > { %v1321_v50 = vmul.f32 %v7597_v45, %v7597_v45  ;;  %v1322_v10 = vmul.f32 %v7599_v46, %v7599_v46  ;;  %v1292_v52 = vpop.xlane.xlu1 %1291 }
 0x2de   : > { %v1323_v11 = vmul.f32 %v7601_v48, %v7601_v48  ;;  %v1324_v51 = vmul.f32 %v7603_v4, %v7603_v4  ;;  %v7613_v53 = vsub.f32 %v5949_v60, %v1299_v5  ;;  %v7615_v54 = vsub.f32 %v5950_v62, %v1299_v5  ;;  %1349 = vadd.xlane.f32.xlu1 %v1348_v49 }
 0x2df   : > { %v1300_v55 = vmul.f32 0.00390625, %v1292_v52  ;;  %v1339_v56 = vadd.f32 %v1322_v10, %v1321_v50 }
 0x2e0   : > { %v1329_v57 = vmul.f32 %v7613_v53, %v7613_v53  ;;  %v1330_v58 = vmul.f32 %v7615_v54, %v7615_v54  ;;  %v1342_v59 = vadd.f32 %v1324_v51, %v1323_v11 }
 0x2e1   : > { %v7621_v8 = vsub.f32 %v5951_v12, %v1300_v55  ;;  %v7623_v9 = vsub.f32 %v5952_v17, %v1300_v55  ;;  %1340 = vadd.xlane.f32.xlu0 %v1339_v56  ;;  %v6137_v12 = vld [vmem:[%s12055_s4] sm:$0xff]   ;;  %v6139_v17 = vld [vmem:[%s12055_s4 + $0x8] sm:$0xff]  }
 0x2e2   : > { %1343 = vadd.xlane.f32.xlu1 %v1342_v59  ;;  %v1351_v60 = vadd.f32 %v1330_v58, %v1329_v57  ;;  %5828 = vmatpush3.bf16.msra.mxu0 %v6137_v12 }
 0x2e3   : > { %v1331_v61 = vmul.f32 %v7621_v8, %v7621_v8  ;;  %v1332_v62 = vmul.f32 %v7623_v9, %v7623_v9  ;;  %5829 = vmatprep.subr.bf16.mxu0 %v6138_v16 }
 0x2e5   : > { %1352 = vadd.xlane.f32.xlu0 %v1351_v60  ;;  %v1354_v15 = vadd.f32 %v1332_v62, %v1331_v61 }
 0x2e6   : > { %5830 = vmatpush3.bf16.msra.mxu0 %v6139_v17 }
 0x2e7   : > { %1355 = vadd.xlane.f32.xlu1 %v1354_v15  ;;  %5831 = vmatprep.subr.bf16.mxu0 %v6140_v18 }
 0x2ea   : > { %5832 = vmatpush3.bf16.msra.mxu0 %v6141_v19 }
 0x2eb   : > { %5833 = vmatprep.subr.bf16.mxu0 %v6142_v20 }
 0x2ee   : > { %5834 = vmatpush3.bf16.msra.mxu0 %v6143_v21 }
 0x2ef   : > { %5835 = vmatprep.subr.bf16.mxu0 %v6144_v24 }
 0x2f2   : > { %5836 = vmatpush3.bf16.msra.mxu0 %v6145_v25 }
 0x2f3   : > { %5837 = vmatprep.subr.bf16.mxu0 %v6146_v26 }
 0x2f6   : > { %5838 = vmatpush3.bf16.msra.mxu0 %v6147_v29 }
 0x2f7   : > { %5839 = vmatprep.subr.bf16.mxu0 %v6148_v30 }
 0x2fa   : > { %5840 = vmatpush3.bf16.msra.mxu0 %v6149_v31 }
 0x2fb   : > { %5841 = vmatprep.subr.bf16.mxu0 %v6150_v32 }
 0x2fe   : > { %5842 = vmatpush3.bf16.msra.mxu0 %v6151_v33 }
 0x359   : > { %v1335_v34 = vpop.xlane.xlu0 %1334 }
 0x35a   : > { %v1357_v0 = vmul.f32 0.00390625, %v1335_v34 }
 0x35b   : > { %v1338_v35 = vpop.xlane.xlu1 %1337 }
 0x35c   : > { %v1358_v2 = vmul.f32 0.00390625, %v1338_v35  ;;  %v1365_v39 = vadd.f32 1e-05, %v1357_v0 }
 0x35e   : > { %v1366_v40 = vadd.f32 1e-05, %v1358_v2  ;;  %6228 = vrsqrt.f32 %v1365_v39 }
 0x360   : > { %6230 = vrsqrt.f32 %v1366_v40 }
 0x368   : > { %v6229_v10 = vpop.eup %6228 }
 0x369   : > { %v1347_v3 = vpop.xlane.xlu0 %1346  ;;  %v1381_v57 = vmul.f32 %v6229_v10, %v7565_v22  ;;  %v1382_v58 = vmul.f32 %v6229_v10, %v7567_v23 }
 0x36a   : > { %v1361_v42 = vmul.f32 0.00390625, %v1347_v3  ;;  %v6231_v11 = vpop.eup %6230 }
 0x36b   : > { %v1350_v6 = vpop.xlane.xlu1 %1349  ;;  %v1383_v60 = vmul.f32 %v6231_v11, %v7573_v27  ;;  %v1384_v61 = vmul.f32 %v6231_v11, %v7575_v28  ;;  %vm1397_vm9 = vcmp.ge.f32.partialorder %v1381_v57, 0.0  ;;  %v1413_v12 = vmul.f32 0.3, %v1381_v57 }
 0x36c   : > { %v1369_v7 = vadd.f32 1e-05, %v1361_v42  ;;  %v1362_v43 = vmul.f32 0.00390625, %v1350_v6  ;;  %v1414_v17 = vmul.f32 0.3, %v1382_v58  ;;  %vm1398_vm10 = vcmp.ge.f32.partialorder %v1382_v58, 0.0 }
 0x36d   : > { %v1415_v18 = vmul.f32 0.3, %v1383_v60  ;;  %v1416_v19 = vmul.f32 0.3, %v1384_v61  ;;  %vm1399_vm11 = vcmp.ge.f32.partialorder %v1383_v60, 0.0  ;;  %vm1400_vm12 = vcmp.ge.f32.partialorder %v1384_v61, 0.0 }
 0x36e   : > { %v1341_v44 = vpop.xlane.xlu0 %1340  ;;  %6232 = vrsqrt.f32 %v1369_v7  ;;  %v1370_v47 = vadd.f32 1e-05, %v1362_v43  ;;  %v7686_v24 = vsel %vm1397_vm9, %v1381_v57, %v1413_v12  ;;  %v7688_v25 = vsel %vm1398_vm10, %v1382_v58, %v1414_v17 }
 0x36f   : > { %v1359_v5 = vmul.f32 0.00390625, %v1341_v44  ;;  %v1344_v49 = vpop.xlane.xlu1 %1343  ;;  %12116 = vst [vmem:[#allocation5_spill] sm:$0xff] %v7686_v24  ;;  %12117 = vst [vmem:[#allocation6_spill] sm:$0xff] %v7688_v25  ;;  %v7690_v26 = vsel %vm1399_vm11, %v1383_v60, %v1415_v18  ;;  %v7692_v29 = vsel %vm1400_vm12, %v1384_v61, %v1416_v19 }
 0x370   : > { %v1360_v50 = vmul.f32 0.00390625, %v1344_v49  ;;  %6234 = vrsqrt.f32 %v1370_v47  ;;  %12118 = vst [vmem:[#allocation7_spill] sm:$0xff] %v7690_v26  ;;  %12119 = vst [vmem:[#allocation8_spill] sm:$0xff] %v7692_v29 }
 0x371   : > { %v1367_v52 = vadd.f32 1e-05, %v1359_v5 }
 0x372   : > { %v1368_v51 = vadd.f32 1e-05, %v1360_v50  ;;  %v1353_v55 = vpop.xlane.xlu0 %1352 }
 0x373   : > { %6236 = vrsqrt.f32 %v1367_v52  ;;  %v1363_v56 = vmul.f32 0.00390625, %v1353_v55 }
 0x374   : > { %6238 = vrsqrt.f32 %v1368_v51  ;;  %v1356_v59 = vpop.xlane.xlu1 %1355 }
 0x375   : > { %v1371_v62 = vadd.f32 1e-05, %v1363_v56  ;;  %v1364_v63 = vmul.f32 0.00390625, %v1356_v59 }
 0x377   : > { %6240 = vrsqrt.f32 %v1371_v62  ;;  %v1372_v15 = vadd.f32 1e-05, %v1364_v63 }
 0x378   : > { %v6233_v16 = vpop.eup %6232 }
 0x379   : > { %6242 = vrsqrt.f32 %v1372_v15  ;;  %v1390_v22 = vmul.f32 %v6233_v16, %v7583_v38  ;;  %v1389_v27 = vmul.f32 %v6233_v16, %v7581_v37 }
 0x37a   : > { %v6235_v23 = vpop.eup %6234 }
 0x37b   : > { %v1391_v28 = vmul.f32 %v6235_v23, %v7589_v41  ;;  %v1392_v20 = vmul.f32 %v6235_v23, %v7591_v1  ;;  %vm1406_vm13 = vcmp.ge.f32.partialorder %v1390_v22, 0.0  ;;  %v1422_v37 = vmul.f32 0.3, %v1390_v22 }
 0x37c   : > { %vm1405_vm15 = vcmp.ge.f32.partialorder %v1389_v27, 0.0  ;;  %v1421_v33 = vmul.f32 0.3, %v1389_v27 }
 0x37d   : > { %v6237_v21 = vpop.eup %6236  ;;  %vm1408_vm14 = vcmp.ge.f32.partialorder %v1392_v20, 0.0  ;;  %v1424_v32 = vmul.f32 0.3, %v1392_v20  ;;  %vm1407_vm6 = vcmp.ge.f32.partialorder %v1391_v28, 0.0  ;;  %v1423_v34 = vmul.f32 0.3, %v1391_v28 }
 0x37e   : > { %v6239_v30 = vpop.eup %6238  ;;  %v1385_v38 = vmul.f32 %v6237_v21, %v7597_v45  ;;  %v1386_v31 = vmul.f32 %v6237_v21, %v7599_v46  ;;  %v7699_v45 = vsel %vm1406_vm13, %v1390_v22, %v1422_v37  ;;  %v7708_v42 = vsel %vm1405_vm15, %v1389_v27, %v1421_v33  ;;  %v1655_v33 = vld [vmem:[%s12060_s9 + $0x58] sm:$0xff] }
 0x37f   : > { %v1387_v41 = vmul.f32 %v6239_v30, %v7601_v48  ;;  %v1388_v1 = vmul.f32 %v6239_v30, %v7603_v4  ;;  %v7701_v46 = vsel %vm1408_vm14, %v1392_v20, %v1424_v32  ;;  %v1446_v40 = vadd.f32 %v7699_v45, %v7688_v25  ;;  %v1652_v32 = vld [vmem:[%s12060_s9 + $0x40] sm:$0xff] }
 0x380   : > { %vm1401_vm9 = vcmp.ge.f32.partialorder %v1385_v38, 0.0  ;;  %vm1402_vm10 = vcmp.ge.f32.partialorder %v1386_v31, 0.0  ;;  %v1417_v0 = vmul.f32 0.3, %v1385_v38  ;;  %v1418_v2 = vmul.f32 0.3, %v1386_v31 }
 0x381   : > { %v6241_v35 = vpop.eup %6240  ;;  %vm1403_vm11 = vcmp.ge.f32.partialorder %v1387_v41, 0.0  ;;  %vm1404_vm12 = vcmp.ge.f32.partialorder %v1388_v1, 0.0  ;;  %v1419_v4 = vmul.f32 0.3, %v1387_v41  ;;  %v1420_v39 = vmul.f32 0.3, %v1388_v1 }
 0x382   : > { %v1448_v3 = vadd.f32 %v7701_v46, %v7692_v29  ;;  %v7711_v6 = vsel %vm1407_vm6, %v1391_v28, %v1423_v34  ;;  %v1394_v7 = vmul.f32 %v6241_v35, %v7615_v54  ;;  %v1445_v47 = vadd.f32 %v7708_v42, %v7686_v24  ;;  %v1654_v34 = vld [vmem:[%s12060_s9 + $0x50] sm:$0xff] }
 0x383   : > { %v6243_v48 = vpop.eup %6242  ;;  %v1447_v5 = vadd.f32 %v7711_v6, %v7690_v26  ;;  %v1393_v49 = vmul.f32 %v6241_v35, %v7613_v53  ;;  %v7725_v51 = vsel %vm1404_vm12, %v1388_v1, %v1420_v39  ;;  %v7738_v59 = vsel %vm1401_vm9, %v1385_v38, %v1417_v0  ;;  %v1653_v1 = vld [vmem:[%s12060_s9 + $0x48] sm:$0xff]  ;;  %v1656_v0 = vld [vmem:[%s12060_s9 + $0x60] sm:$0xff] }
 0x384   : > { %v1396_v43 = vmul.f32 %v6243_v48, %v7623_v9  ;;  %v1454_v44 = vpack.c.bf16 %v1448_v3, %v1446_v40  ;;  %vm1410_vm13 = vcmp.ge.f32.partialorder %v1394_v7, 0.0  ;;  %v1426_v50 = vmul.f32 0.3, %v1394_v7  ;;  %12121 = vst [vmem:[#allocation10_spill] sm:$0xff] %v7725_v51  ;;  %12122 = vst [vmem:[#allocation11_spill] sm:$0xff] %v7738_v59  ;;  %v1657_v35 = vld [vmem:[%s12060_s9 + $0x68] sm:$0xff] }
 0x385   : > { %v1453_v52 = vpack.c.bf16 %v1447_v5, %v1445_v47  ;;  %v1395_v11 = vmul.f32 %v6243_v48, %v7621_v8  ;;  %vm1409_vm15 = vcmp.ge.f32.partialorder %v1393_v49, 0.0  ;;  %v1425_v54 = vmul.f32 0.3, %v1393_v49  ;;  %v1658_v48 = vld [vmem:[%s12060_s9 + $0x70] sm:$0xff] }
 0x386   : > { %vm1412_vm14 = vcmp.ge.f32.partialorder %v1396_v43, 0.0  ;;  %v1428_v10 = vmul.f32 0.3, %v1396_v43  ;;  %1617 = vmatprep.mubr.bf16.mxu0 %v1454_v44  ;;  %v7722_v9 = vsel %vm1402_vm10, %v1386_v31, %v1418_v2  ;;  %v7727_v55 = vsel %vm1410_vm13, %v1394_v7, %v1426_v50  ;;  %v1659_v2 = vld [vmem:[%s12060_s9 + $0x78] sm:$0xff] }
 0x387   : > { %12120 = vst [vmem:[#allocation9_spill] sm:$0xff] %v7722_v9  ;;  %1618 = vmatmul.mubr.bf16.vlgmr.msra.gmra.mrb[16].mxu0 %v1453_v52  ;;  %v1450_v53 = vadd.f32 %v7727_v55, %v7722_v9  ;;  %vm1411_vm6 = vcmp.ge.f32.partialorder %v1395_v11, 0.0  ;;  %v1427_v8 = vmul.f32 0.3, %v1395_v11  ;;  %v7735_v58 = vsel %vm1409_vm15, %v1393_v49, %v1425_v54  ;;  %v1668_v52 = vld [vmem:[%s12054_s3] sm:$0xff] }
 0x388   : > { %v7729_v56 = vsel %vm1412_vm14, %v1396_v43, %v1428_v10  ;;  %v7741_v60 = vsel %vm1403_vm11, %v1387_v41, %v1419_v4  ;;  %v1449_v63 = vadd.f32 %v7735_v58, %v7738_v59  ;;  %v6154_v41 = vld [vmem:[%s12057_s6 + $0x4] ss:$12 sps:$4 sm:$0xff]   ;;  %vm12102_vm9 = vcmask 261120  }
 0x389   : > { %v1452_v57 = vadd.f32 %v7729_v56, %v7725_v51  ;;  %12123 = vst [vmem:[#allocation12_spill] sm:$0xff] %v7741_v60  ;;  %v7743_v62 = vsel %vm1411_vm6, %v1395_v11, %v1427_v8  ;;  %1958 = vmatprep.mubr.bf16.mxu1 %v6154_v41  ;;  %v1669_v11 = vld [vmem:[%s12054_s3 + $0x8] sm:$0xff] }
 0x38a   : > { %v1451_v15 = vadd.f32 %v7743_v62, %v7741_v60  ;;  %v5734_v8 = vld [vmem:[%s12054_s3 + $0xa8] sm:$0xff] }
 0x38b   : > { %v1456_v61 = vpack.c.bf16 %v1452_v57, %v1450_v53 }
 0x38c   : > { %v1455_v12 = vpack.c.bf16 %v1451_v15, %v1449_v63  ;;  %v1671_v63 = vld [vmem:[%s12054_s3 + $0x18] sm:$0xff]  ;;  %v1670_v15 = vld [vmem:[%s12054_s3 + $0x10] sm:$0xff] }
 0x38d   : > { %1625 = vmatprep.mubr.bf16.mxu0 %v1456_v61 }
 0x38f   : > { %1626 = vmatmul.mubr.bf16.gmra.mrb[20].mxu0 %v1455_v12  ;;  %v5733_v12 = vld [vmem:[%s12054_s3 + $0xa0] sm:$0xff] }
 0x45a   : > { %v5843_v16 = vpop.f32.mrb[16].mxu0 }
 0x45b   : > { %v5844_v17 = vpop.f32.mrb[17].mxu0 }
 0x45c   : > { %v5845_v18 = vadd.f32 %v5844_v17, %v5843_v16  ;;  %v5846_v19 = vpop.f32.mrb[18].mxu0 }
 0x45d   : > { %v5847_v22 = vpop.f32.mrb[19].mxu0 }
 0x45e   : > { %v5848_v23 = vadd.f32 %v5847_v22, %v5846_v19  ;;  %1727 = vrot.lane.b32.xlu1 %v5845_v18, %s6672_s29  ;;  %1660 = vrot.lane.b32.xlu0 %v5845_v18, %s6677_s16 }
 0x460   : > { %v1803_v27 = vpack.c.bf16 %v5848_v23, %v5845_v18 }
 0x462   : > { %1676 = vrot.lane.b32.xlu1 %v5845_v18, %s6678_s17  ;;  %1729 = vrot.lane.b32.xlu0 %v5848_v23, %s6672_s29  ;;  %v5849_v28 = vpop.f32.mrb[20].mxu0 }
 0x463   : > { %5855 = vmatprep.subr.bf16.mxu1 %v1803_v27  ;;  %v5850_v20 = vpop.f32.mrb[21].mxu0 }
 0x464   : > { %v7751_v21 = vadd.f32 %v5850_v20, %v5849_v28  ;;  %v5852_v30 = vpop.f32.mrb[22].mxu0  ;;  %v5721_v20 = vld [vmem:[%s12054_s3 + $0x20] sm:$0xff] }
 0x465   : > { %v5853_v38 = vpop.f32.mrb[23].mxu0 }
 0x466   : > { %v7753_v31 = vadd.f32 %v5853_v38, %v5852_v30  ;;  %1744 = vrot.lane.b32.xlu1 %v5845_v18, %s6679_s18  ;;  %1678 = vrot.lane.b32.xlu0 %v5848_v23, %s6678_s17  ;;  %v5736_v30 = vld [vmem:[%s12054_s3 + $0xb8] sm:$0xff]  ;;  %v5735_v38 = vld [vmem:[%s12054_s3 + $0xb0] sm:$0xff] }
 0x468   : > { %v1804_v37 = vpack.c.bf16 %v7753_v31, %v7751_v21 }
 0x46a   : > { %1693 = vrot.lane.b32.xlu1 %v5845_v18, %s6680_s11  ;;  %1746 = vrot.lane.b32.xlu0 %v5848_v23, %s6679_s18 }
 0x46e   : > { %1761 = vrot.lane.b32.xlu1 %v5845_v18, %s6681_s19  ;;  %1695 = vrot.lane.b32.xlu0 %v5848_v23, %s6680_s11 }
 0x472   : > { %1710 = vrot.lane.b32.xlu1 %v5845_v18, %s6671_s28  ;;  %1763 = vrot.lane.b32.xlu0 %v5848_v23, %s6681_s19 }
 0x476   : > { %1662 = vrot.lane.b32.xlu1 %v5848_v23, %s6677_s16  ;;  %1712 = vrot.lane.b32.xlu0 %v5848_v23, %s6671_s28 }
 0x47a   : > { %1666 = vrot.lane.b32.xlu0 %v7753_v31, %s6677_s16  ;;  %1664 = vrot.lane.b32.xlu1 %v7751_v21, %s6677_s16 }
 0x47e   : > { %1733 = vrot.lane.b32.xlu0 %v7753_v31, %s6672_s29  ;;  %1731 = vrot.lane.b32.xlu1 %v7751_v21, %s6672_s29 }
 0x482   : > { %1682 = vrot.lane.b32.xlu0 %v7753_v31, %s6678_s17  ;;  %1680 = vrot.lane.b32.xlu1 %v7751_v21, %s6678_s17 }
 0x486   : > { %1750 = vrot.lane.b32.xlu0 %v7753_v31, %s6679_s18  ;;  %1748 = vrot.lane.b32.xlu1 %v7751_v21, %s6679_s18  ;;  %s6683_s18 = smov 96  }
 0x48a   : > { %1699 = vrot.lane.b32.xlu0 %v7753_v31, %s6680_s11  ;;  %1697 = vrot.lane.b32.xlu1 %v7751_v21, %s6680_s11  ;;  %s8196_s11 = sld [smem:[#allocation2]] }
 0x48e   : > { %1767 = vrot.lane.b32.xlu0 %v7753_v31, %s6681_s19  ;;  %1765 = vrot.lane.b32.xlu1 %v7751_v21, %s6681_s19  ;;  %s8198_s19 = sld [smem:[#allocation2 + $0x1]] }
 0x490   : > { %s2473_s20 = ssub.f32 1.0, %s8196_s11 }
 0x492   : > { %1716 = vrot.lane.b32.xlu0 %v7753_v31, %s6671_s28  ;;  %1714 = vrot.lane.b32.xlu1 %v7751_v21, %s6671_s28 }
 0x494   : > { %s2504_s21 = ssub.f32 1.0, %s8198_s19 }
 0x496   : > { %1780 = vrot.lane.b32.xlu0 %v5848_v23, %s6682_s24  ;;  %1778 = vrot.lane.b32.xlu1 %v5845_v18, %s6682_s24  ;;  %v5722_v18 = vld [vmem:[%s12054_s3 + $0x28] sm:$0xff] }
 0x49a   : > { %1784 = vrot.lane.b32.xlu0 %v7753_v31, %s6682_s24  ;;  %1782 = vrot.lane.b32.xlu1 %v7751_v21, %s6682_s24  ;;  %s6684_s24 = smov 32  }
 0x49e   : > { %1820 = vperm.xlu0 %6110, %v1653_v1   ;;  %1815 = vperm.xlu1 %6111, %v1652_v32  }
 0x4a2   : > { %1830 = vperm.xlu0 %6110, %v1655_v33   ;;  %1825 = vperm.xlu1 %6111, %v1654_v34  }
 0x4a6   : > { %1840 = vperm.xlu0 %6110, %v1657_v35   ;;  %1835 = vperm.xlu1 %6111, %v1656_v0   ;;  %v5738_v0 = vld [vmem:[%s12054_s3 + $0xc8] sm:$0xff] }
 0x4aa   : > { %1850 = vperm.xlu0 %6110, %v1659_v2   ;;  %1845 = vperm.xlu1 %6111, %v1658_v48   ;;  %v5723_v2 = vld [vmem:[%s12054_s3 + $0x30] sm:$0xff] }
 0x4d0   : > { %v1661_v4 = vpop.permute.xlu0 %1660  ;;  %v1728_v39 = vpop.permute.xlu1 %1727 }
 0x4d1   : > { %v1672_v57 = vmul.f32 %v1668_v52, %v1661_v4  ;;  %v1740_v28 = vmul.f32 %v5733_v12, %v1728_v39  ;;  %v5737_v4 = vld [vmem:[%s12054_s3 + $0xc0] sm:$0xff] }
 0x4d4   : > { %v1730_v40 = vpop.permute.xlu0 %1729  ;;  %v1677_v3 = vpop.permute.xlu1 %1676 }
 0x4d5   : > { %v1741_v17 = vmul.f32 %v5734_v8, %v1730_v40  ;;  %v1689_v35 = vmul.f32 %v5721_v20, %v1677_v3  ;;  %v5726_v3 = vld [vmem:[%s12054_s3 + $0x48] sm:$0xff]  ;;  %v5725_v8 = vld [vmem:[%s12054_s3 + $0x40] sm:$0xff] }
 0x4d7   : > { %v1805_v32 = vpack.c.bf16 %v1741_v17, %v1740_v28 }
 0x4d8   : > { %v1679_v7 = vpop.permute.xlu0 %1678  ;;  %v1745_v43 = vpop.permute.xlu1 %1744 }
 0x4d9   : > { %v1690_v41 = vmul.f32 %v5722_v18, %v1679_v7 }
 0x4db   : > { %v1797_v48 = vpack.c.bf16 %v1690_v41, %v1689_v35  ;;  %v5743_v35 = vld [vmem:[%s12054_s3 + $0xf0] sm:$0xff] }
 0x4dc   : > { %v1747_v44 = vpop.permute.xlu0 %1746  ;;  %v1694_v47 = vpop.permute.xlu1 %1693 }
 0x4dd   : > { %v1758_v40 = vmul.f32 %v5738_v0, %v1747_v44  ;;  %v5739_v44 = vld [vmem:[%s12054_s3 + $0xd0] sm:$0xff]  ;;  %v1706_v18 = vmul.f32 %v5725_v8, %v1694_v47  ;;  %v5741_v47 = vld [vmem:[%s12054_s3 + $0xe0] sm:$0xff] }
 0x4e0   : > { %v1696_v5 = vpop.permute.xlu0 %1695  ;;  %v7806_v49 = vpop.permute.xlu1 %1761 }
 0x4e4   : > { %v7808_v50 = vpop.permute.xlu0 %1763  ;;  %v7810_v10 = vpop.permute.xlu1 %1710 }
 0x4e8   : > { %v7818_v54 = vpop.permute.xlu0 %1712  ;;  %v1663_v53 = vpop.permute.xlu1 %1662 }
 0x4e9   : > { %v1673_v61 = vmul.f32 %v1669_v11, %v1663_v53 }
 0x4eb   : > { %v1795_v16 = vpack.c.bf16 %v1673_v61, %v1672_v57  ;;  %v1757_v57 = vmul.f32 %v5737_v4, %v1745_v43  ;;  %v5740_v61 = vld [vmem:[%s12054_s3 + $0xd8] sm:$0xff]  ;;  %v5742_v43 = vld [vmem:[%s12054_s3 + $0xe8] sm:$0xff] }
 0x4ec   : > { %v1667_v19 = vpop.permute.xlu0 %1666  ;;  %v1665_v22 = vpop.permute.xlu1 %1664  ;;  %v1775_v20 = vmul.f32 %v5742_v43, %v7808_v50  ;;  %v5744_v50 = vld [vmem:[%s12054_s3 + $0xf8] sm:$0xff] }
 0x4ed   : > { %v1675_v23 = vmul.f32 %v1671_v63, %v1667_v19  ;;  %v1674_v27 = vmul.f32 %v1670_v15, %v1665_v22  ;;  %5856 = vmatpush3.bf16.msra.mxu1 %v1795_v16  ;;  %v1707_v63 = vmul.f32 %v5726_v3, %v1696_v5  ;;  %v1807_v12 = vpack.c.bf16 %v1758_v40, %v1757_v57  ;;  %v5727_v5 = vld [vmem:[%s12054_s3 + $0x50] sm:$0xff]  ;;  %v5745_v57 = vld [vmem:[%s12054_s3 + $0x100] sm:$0xff] }
 0x4ee   : > { %5857 = vmatprep.subr.bf16.mxu1 %v1804_v37  ;;  %v5724_v37 = vld [vmem:[%s12054_s3 + $0x38] sm:$0xff]  ;;  %v5731_v40 = vld [vmem:[%s12054_s3 + $0x70] sm:$0xff] }
 0x4ef   : > { %v1796_v1 = vpack.c.bf16 %v1675_v23, %v1674_v27  ;;  %v5728_v23 = vld [vmem:[%s12054_s3 + $0x58] sm:$0xff]  ;;  %v1799_v27 = vpack.c.bf16 %v1707_v63, %v1706_v18  ;;  %v6152_v63 = vld [vmem:[%s12057_s6] ss:$12 sps:$4 sm:$0xff]   ;;  %v5747_v18 = vld [vmem:[%s12054_s3 + $0x110] sm:$0xff] }
 0x4f0   : > { %v1734_v33 = vpop.permute.xlu0 %1733  ;;  %v1732_v34 = vpop.permute.xlu1 %1731 }
 0x4f1   : > { %v1743_v21 = vmul.f32 %v5736_v30, %v1734_v33  ;;  %v1742_v31 = vmul.f32 %v5735_v38, %v1732_v34  ;;  %5858 = vmatpush3.bf16.msra.mxu1 %v1796_v1  ;;  %v5730_v30 = vld [vmem:[%s12054_s3 + $0x68] sm:$0xff]  ;;  %v1774_v33 = vmul.f32 %v5741_v47, %v7806_v49  ;;  %v5729_v34 = vld [vmem:[%s12054_s3 + $0x60] sm:$0xff] }
 0x4f2   : > { %5859 = vmatprep.subr.bf16.mxu1 %v1805_v32  ;;  %v1724_v0 = vmul.f32 %v5730_v30, %v7818_v54  ;;  %v1723_v49 = vmul.f32 %v5729_v34, %v7810_v10  ;;  %v5746_v10 = vld [vmem:[%s12054_s3 + $0x108] sm:$0xff]  ;;  %v6157_v47 = vld [vmem:[%s12057_s6 + $0x18] ss:$12 sps:$4 sm:$0xff]  }
 0x4f3   : > { %v1806_v39 = vpack.c.bf16 %v1743_v21, %v1742_v31  ;;  %v1809_v31 = vpack.c.bf16 %v1775_v20, %v1774_v33  ;;  %v6160_v20 = vld [vmem:[%s12057_s6 + $0x30] ss:$12 sps:$4 sm:$0xff]   ;;  %v6161_v30 = vld [vmem:[%s12057_s6 + $0x4c] ss:$12 sps:$4 sm:$0xff]  }
 0x4f4   : > { %v1683_v7 = vpop.permute.xlu0 %1682  ;;  %v1681_v52 = vpop.permute.xlu1 %1680  ;;  %v1801_v3 = vpack.c.bf16 %v1724_v0, %v1723_v49  ;;  %v6167_v33 = vld [vmem:[%s12057_s6 + $0x50] ss:$12 sps:$4 sm:$0xff]  }
 0x4f5   : > { %v1692_v11 = vmul.f32 %v5724_v37, %v1683_v7  ;;  %v1691_v53 = vmul.f32 %v5723_v2, %v1681_v52  ;;  %5860 = vmatpush3.bf16.msra.mxu1 %v1797_v48 }
 0x4f6   : > { %5861 = vmatprep.subr.bf16.mxu1 %v1806_v39  ;;  %v5732_v39 = vld [vmem:[%s12054_s3 + $0x78] sm:$0xff] }
 0x4f7   : > { %v1798_v15 = vpack.c.bf16 %v1692_v11, %v1691_v53 }
 0x4f8   : > { %v1751_v16 = vpop.permute.xlu0 %1750  ;;  %v1749_v17 = vpop.permute.xlu1 %1748 }
 0x4f9   : > { %v1760_v19 = vmul.f32 %v5740_v61, %v1751_v16  ;;  %v1759_v22 = vmul.f32 %v5739_v44, %v1749_v17  ;;  %5862 = vmatpush3.bf16.msra.mxu1 %v1798_v15  ;;  %v6155_v16 = vld [vmem:[%s12057_s6 + $0x1c] ss:$12 sps:$4 sm:$0xff]  }
 0x4fa   : > { %5863 = vmatprep.subr.bf16.mxu1 %v1807_v12  ;;  %v5748_v17 = vld [vmem:[%s12054_s3 + $0x118] sm:$0xff] }
 0x4fb   : > { %v1808_v28 = vpack.c.bf16 %v1760_v19, %v1759_v22 }
 0x4fc   : > { %v1700_v38 = vpop.permute.xlu0 %1699  ;;  %v1698_v41 = vpop.permute.xlu1 %1697 }
 0x4fd   : > { %v1709_v1 = vmul.f32 %v5728_v23, %v1700_v38  ;;  %v1708_v32 = vmul.f32 %v5727_v5, %v1698_v41  ;;  %5864 = vmatpush3.bf16.msra.mxu1 %v1799_v27  ;;  %v6163_v38 = vld [vmem:[%s12057_s6 + $0x48] ss:$12 sps:$4 sm:$0xff]  }
 0x4fe   : > { %5865 = vmatprep.subr.bf16.mxu1 %v1808_v28  ;;  %v6158_v28 = vld [vmem:[%s12057_s6 + $0x34] ss:$12 sps:$4 sm:$0xff]  }
 0x4ff   : > { %v1800_v21 = vpack.c.bf16 %v1709_v1, %v1708_v32  ;;  %v6164_v41 = vld [vmem:[%s12057_s6 + $0x8] ss:$12 sps:$4 sm:$0xff]   ;;  %v6165_v1 = vld [vmem:[%s12057_s6 + $0x20] ss:$12 sps:$4 sm:$0xff]   ;;  %v6166_v32 = vld [vmem:[%s12057_s6 + $0x38] ss:$12 sps:$4 sm:$0xff]  }
 0x500   : > { %v1768_v37 = vpop.permute.xlu0 %1767  ;;  %v1766_v2 = vpop.permute.xlu1 %1765 }
 0x501   : > { %v1777_v48 = vmul.f32 %v5744_v50, %v1768_v37  ;;  %v1776_v4 = vmul.f32 %v5743_v35, %v1766_v2  ;;  %5866 = vmatpush3.bf16.msra.mxu1 %v1800_v21 }
 0x502   : > { %5867 = vmatprep.subr.bf16.mxu1 %v1809_v31 }
 0x503   : > { %v1810_v54 = vpack.c.bf16 %v1777_v48, %v1776_v4 }
 0x504   : > { %v1717_v7 = vpop.permute.xlu0 %1716  ;;  %v1715_v52 = vpop.permute.xlu1 %1714 }
 0x505   : > { %v1726_v11 = vmul.f32 %v5732_v39, %v1717_v7  ;;  %v1725_v53 = vmul.f32 %v5731_v40, %v1715_v52  ;;  %5868 = vmatpush3.bf16.msra.mxu1 %v1801_v3 }
 0x506   : > { %5869 = vmatprep.subr.bf16.mxu1 %v1810_v54 }
 0x507   : > { %v1802_v8 = vpack.c.bf16 %v1726_v11, %v1725_v53 }
 0x508   : > { %v1781_v61 = vpop.permute.xlu0 %1780  ;;  %v1779_v44 = vpop.permute.xlu1 %1778 }
 0x509   : > { %v1792_v15 = vmul.f32 %v5746_v10, %v1781_v61  ;;  %v1791_v12 = vmul.f32 %v5745_v57, %v1779_v44  ;;  %5870 = vmatpush3.bf16.msra.mxu1 %v1802_v8  ;;  %v2057_v8 = vshrl.u32 %v435_v13, 7 }
 0x50b   : > { %v1811_v43 = vpack.c.bf16 %v1792_v15, %v1791_v12 }
 0x50c   : > { %v1785_v19 = vpop.permute.xlu0 %1784  ;;  %1959 = vmatmul.mubr.bf16.vlgmr.msra.gmra.mrb[0].mxu1 %v6152_v63  ;;  %v1783_v22 = vpop.permute.xlu1 %1782 }
 0x50d   : > { %v1794_v23 = vmul.f32 %v5748_v17, %v1785_v19  ;;  %v1793_v5 = vmul.f32 %v5747_v18, %v1783_v22  ;;  %5909 = vmatprep.subr.bf16.mxu1 %v1811_v43  ;;  %1966 = vmatprep.mubr.bf16.mxu1 %v6155_v16  ;;  %v2058_v18 = vsub.s32 0, %v2057_v8 }
 0x50e   : > { %5910 = vmatpush3.bf16.msra.mxu1 %v1811_v43  ;;  %v5720_v43 = vld [vmem:[%s12054_s3 + $0x80] sm:$0xff] }
 0x50f   : > { %v1812_v27 = vpack.c.bf16 %v1794_v23, %v1793_v5  ;;  %v7958_v5 = vrot.slane %v5720_v43, %v2058_v18 }
 0x511   : > { %5911 = vmatprep.subr.bf16.mxu1 %v1812_v27 }
 0x512   : > { %5912 = vmatpush3.bf16.msra.mxu1 %v1812_v27 }
 0x514   : > { %1967 = vmatmul.mubr.bf16.gmra.mrb[4].mxu1 %v6157_v47 }
 0x515   : > { %1974 = vmatprep.mubr.bf16.mxu1 %v6158_v28 }
 0x51c   : > { %1975 = vmatmul.mubr.bf16.gmra.mrb[8].mxu1 %v6160_v20 }
 0x51d   : > { %1982 = vmatprep.mubr.bf16.mxu1 %v6161_v30  ;;  %v1816_v11 = vpop.permute.xlu1 %1815  ;;  %v1821_v10 = vpop.permute.xlu0 %1820 }
 0x521   : > { %v1826_v44 = vpop.permute.xlu1 %1825  ;;  %v1831_v16 = vpop.permute.xlu0 %1830 }
 0x524   : > { %1983 = vmatmul.mubr.bf16.gmra.mrb[12].mxu1 %v6163_v38 }
 0x525   : > { %5913 = vmatprep.mubr.msk.bf16.mxu1 %vm12102_vm9, %v6164_v41  ;;  %v1836_v22 = vpop.permute.xlu1 %1835  ;;  %v1841_v20 = vpop.permute.xlu0 %1840 }
 0x52c   : > { %5914 = vmatmul.mubr.msk.bf16.vlgmr.msra.gmra.mrb[16].mxu1 %vm12102_vm9, %v6165_v1 }
 0x52d   : > { %5917 = vmatprep.mubr.msk.bf16.mxu1 %vm12102_vm9, %v6166_v32 }
 0x534   : > { %5918 = vmatmul.mubr.msk.bf16.gmra.mrb[20].mxu1 %vm12102_vm9, %v6167_v33 }
 0x5df   : > { %v5871_v34 = vpop.f32.mrb[0].mxu1 }
 0x5e0   : > { %v5872_v50 = vpop.f32.mrb[1].mxu1 }
 0x5e1   : > { %v5873_v35 = vadd.f32 %v5872_v50, %v5871_v34  ;;  %v5874_v0 = vpop.f32.mrb[2].mxu1  ;;  %v1846_v50 = vpop.permute.xlu1 %1845 }
 0x5e2   : > { %v5875_v21 = vpop.f32.mrb[3].mxu1 }
 0x5e3   : > { %v5876_v31 = vadd.f32 %v5875_v21, %v5874_v0  ;;  %v1961_v27 = vadd.f32 %v5873_v35, %v1816_v11 }
 0x5e5   : > { %v1964_v41 = vadd.f32 %v5876_v31, %v1821_v10 }
 0x5e7   : > { %v5877_v37 = vpop.f32.mrb[4].mxu1 }
 0x5e8   : > { %v5878_v2 = vpop.f32.mrb[5].mxu1 }
 0x5e9   : > { %v5879_v49 = vadd.f32 %v5878_v2, %v5877_v37  ;;  %v5880_v48 = vpop.f32.mrb[6].mxu1  ;;  %v1851_v37 = vpop.permute.xlu0 %1850 }
 0x5ea   : > { %v5881_v4 = vpop.f32.mrb[7].mxu1 }
 0x5eb   : > { %v5882_v39 = vadd.f32 %v5881_v4, %v5880_v48  ;;  %v1969_v19 = vadd.f32 %v5879_v49, %v1826_v44 }
 0x5ed   : > { %v1972_v28 = vadd.f32 %v5882_v39, %v1831_v16 }
 0x5ef   : > { %v5883_v40 = vpop.f32.mrb[8].mxu1 }
 0x5f0   : > { %v5884_v3 = vpop.f32.mrb[9].mxu1 }
 0x5f1   : > { %v5885_v54 = vadd.f32 %v5884_v3, %v5883_v40  ;;  %v5886_v7 = vpop.f32.mrb[10].mxu1 }
 0x5f2   : > { %v5887_v52 = vpop.f32.mrb[11].mxu1 }
 0x5f3   : > { %v5888_v53 = vadd.f32 %v5887_v52, %v5886_v7  ;;  %v1977_v49 = vadd.f32 %v5885_v54, %v1836_v22 }
 0x5f5   : > { %v1980_v7 = vadd.f32 %v5888_v53, %v1841_v20 }
 0x5f7   : > { %v5889_v57 = vpop.f32.mrb[12].mxu1 }
 0x5f8   : > { %v5890_v61 = vpop.f32.mrb[13].mxu1 }
 0x5f9   : > { %v5891_v63 = vadd.f32 %v5890_v61, %v5889_v57  ;;  %v5892_v15 = vpop.f32.mrb[14].mxu1 }
 0x5fa   : > { %v5893_v12 = vpop.f32.mrb[15].mxu1 }
 0x5fb   : > { %v5894_v17 = vadd.f32 %v5893_v12, %v5892_v15  ;;  %v1985_v21 = vadd.f32 %v5891_v63, %v1846_v50 }
 0x5fd   : > { %v1988_v39 = vadd.f32 %v5894_v17, %v1851_v37 }
 0x5ff   : > { %v5915_v23 = vpop.f32.mrb[16].mxu1 }
 0x600   : > { %v2034_v47 = vadd.f32 %v5915_v23, %v1969_v19  ;;  %v2025_v13 = vpop.f32.mrb[17].mxu1 }
 0x601   : > { %v2026_v30 = vadd.f32 %v2025_v13, %v1961_v27  ;;  %v5916_v38 = vpop.f32.mrb[18].mxu1 }
 0x602   : > { %v2037_v1 = vadd.f32 %v5916_v38, %v1972_v28  ;;  %v2028_v32 = vpop.f32.mrb[19].mxu1  ;;  %v2062_v31 = vmul.f32 %v7958_v5, %v2034_v47 }
 0x603   : > { %v2060_v33 = vmul.f32 %v7958_v5, %v2026_v30  ;;  %v2029_v34 = vadd.f32 %v2028_v32, %v1964_v41 }
 0x604   : > { %v2063_v35 = vmul.f32 %v7958_v5, %v2037_v1 }
 0x605   : > { %v2061_v0 = vmul.f32 %v7958_v5, %v2029_v34  ;;  %2068 = vadd.xlane.f32.xlu1 %v2060_v33 }
 0x607   : > { %v5919_v2 = vpop.f32.mrb[20].mxu1  ;;  %2070 = vadd.xlane.f32.xlu0 %v2061_v0 }
 0x608   : > { %v2050_v48 = vadd.f32 %v5919_v2, %v1985_v21  ;;  %v2041_v4 = vpop.f32.mrb[21].mxu1 }
 0x609   : > { %v2042_v40 = vadd.f32 %v2041_v4, %v1977_v49  ;;  %v5920_v3 = vpop.f32.mrb[22].mxu1  ;;  %2074 = vadd.xlane.f32.xlu1 %v2063_v35 }
 0x60a   : > { %v2053_v52 = vadd.f32 %v5920_v3, %v1988_v39  ;;  %v2044_v11 = vpop.f32.mrb[23].mxu1  ;;  %v2066_v54 = vmul.f32 %v7958_v5, %v2050_v48 }
 0x60b   : > { %v2045_v10 = vadd.f32 %v2044_v11, %v1980_v7  ;;  %2072 = vadd.xlane.f32.xlu0 %v2062_v31  ;;  %v2064_v57 = vmul.f32 %v7958_v5, %v2042_v40 }
 0x60c   : > { %v2067_v61 = vmul.f32 %v7958_v5, %v2053_v52 }
 0x60d   : > { %v2065_v8 = vmul.f32 %v7958_v5, %v2045_v10 }
 0x60f   : > { %2078 = vadd.xlane.f32.xlu1 %v2065_v8  ;;  %2076 = vadd.xlane.f32.xlu0 %v2064_v57 }
 0x613   : > { %2082 = vadd.xlane.f32.xlu1 %v2067_v61  ;;  %2080 = vadd.xlane.f32.xlu0 %v2066_v54 }
 0x692   : > { %v2069_v44 = vpop.xlane.xlu1 %2068 }
 0x693   : > { %v2084_v63 = vmul.f32 0.016666668, %v2069_v44 }
 0x694   : > { %v2071_v15 = vpop.xlane.xlu0 %2070 }
 0x695   : > { %v2092_v53 = vsub.f32 %v2060_v33, %v2084_v63  ;;  %v2085_v12 = vmul.f32 0.016666668, %v2071_v15 }
 0x696   : > { %v2075_v16 = vpop.xlane.xlu1 %2074 }
 0x697   : > { %v7969_v17 = vmul.f32 %v2092_v53, %v7958_v5  ;;  %v2093_v18 = vsub.f32 %v2061_v0, %v2085_v12  ;;  %v2087_v43 = vmul.f32 0.016666668, %v2075_v16 }
 0x698   : > { %v2073_v19 = vpop.xlane.xlu0 %2072 }
 0x699   : > { %v7972_v22 = vmul.f32 %v2093_v18, %v7958_v5  ;;  %v2095_v23 = vsub.f32 %v2063_v35, %v2087_v43  ;;  %v2086_v27 = vmul.f32 0.016666668, %v2073_v19  ;;  %v2108_v47 = vmul.f32 %v7969_v17, %v7969_v17 }
 0x69b   : > { %v7977_v13 = vmul.f32 %v2095_v23, %v7958_v5  ;;  %v2094_v28 = vsub.f32 %v2062_v31, %v2086_v27  ;;  %2116 = vadd.xlane.f32.xlu0 %v2108_v47  ;;  %v2109_v20 = vmul.f32 %v7972_v22, %v7972_v22 }
 0x69c   : > { %v2077_v30 = vpop.xlane.xlu0 %2076  ;;  %v2079_v38 = vpop.xlane.xlu1 %2078 }
 0x69d   : > { %v7982_v41 = vmul.f32 %v2094_v28, %v7958_v5  ;;  %v2088_v1 = vmul.f32 0.016666668, %v2077_v30  ;;  %v2089_v32 = vmul.f32 0.016666668, %v2079_v38  ;;  %2118 = vadd.xlane.f32.xlu1 %v2109_v20  ;;  %v2111_v0 = vmul.f32 %v7977_v13, %v7977_v13 }
 0x69f   : > { %v2096_v33 = vsub.f32 %v2064_v57, %v2088_v1  ;;  %v2097_v34 = vsub.f32 %v2065_v8, %v2089_v32  ;;  %v2110_v50 = vmul.f32 %v7982_v41, %v7982_v41 }
 0x6a0   : > { %v2081_v21 = vpop.xlane.xlu0 %2080  ;;  %v2083_v37 = vpop.xlane.xlu1 %2082 }
 0x6a1   : > { %v7989_v35 = vmul.f32 %v2096_v33, %v7958_v5  ;;  %v7992_v2 = vmul.f32 %v2097_v34, %v7958_v5  ;;  %v2090_v49 = vmul.f32 0.016666668, %v2081_v21  ;;  %v2091_v48 = vmul.f32 0.016666668, %v2083_v37  ;;  %2120 = vadd.xlane.f32.xlu0 %v2110_v50  ;;  %2122 = vadd.xlane.f32.xlu1 %v2111_v0 }
 0x6a3   : > { %v2098_v4 = vsub.f32 %v2066_v54, %v2090_v49  ;;  %v2099_v39 = vsub.f32 %v2067_v61, %v2091_v48  ;;  %v2112_v31 = vmul.f32 %v7989_v35, %v7989_v35  ;;  %v2113_v40 = vmul.f32 %v7992_v2, %v7992_v2 }
 0x6a5   : > { %v7999_v3 = vmul.f32 %v2098_v4, %v7958_v5  ;;  %v8002_v7 = vmul.f32 %v2099_v39, %v7958_v5  ;;  %2124 = vadd.xlane.f32.xlu0 %v2112_v31  ;;  %2126 = vadd.xlane.f32.xlu1 %v2113_v40 }
 0x6a7   : > { %v2114_v52 = vmul.f32 %v7999_v3, %v7999_v3  ;;  %v2115_v11 = vmul.f32 %v8002_v7, %v8002_v7 }
 0x6a9   : > { %2128 = vadd.xlane.f32.xlu0 %v2114_v52  ;;  %2130 = vadd.xlane.f32.xlu1 %v2115_v11 }
 0x728   : > { %v2117_v10 = vpop.xlane.xlu0 %2116 }
 0x729   : > { %v2132_v57 = vmul.f32 0.016666668, %v2117_v10 }
 0x72a   : > { %v2119_v8 = vpop.xlane.xlu1 %2118 }
 0x72b   : > { %v2140_v54 = vadd.f32 1e-05, %v2132_v57  ;;  %v2133_v61 = vmul.f32 0.016666668, %v2119_v8 }
 0x72d   : > { %6244 = vrsqrt.f32 %v2140_v54  ;;  %v2141_v44 = vadd.f32 1e-05, %v2133_v61 }
 0x72e   : > { %v2121_v63 = vpop.xlane.xlu0 %2120  ;;  %v2123_v5 = vpop.xlane.xlu1 %2122 }
 0x72f   : > { %6246 = vrsqrt.f32 %v2141_v44  ;;  %v2134_v15 = vmul.f32 0.016666668, %v2121_v63  ;;  %v2135_v53 = vmul.f32 0.016666668, %v2123_v5 }
 0x731   : > { %v2142_v12 = vadd.f32 1e-05, %v2134_v15  ;;  %v2143_v16 = vadd.f32 1e-05, %v2135_v53 }
 0x732   : > { %v2125_v18 = vpop.xlane.xlu0 %2124  ;;  %v2127_v43 = vpop.xlane.xlu1 %2126 }
 0x733   : > { %6248 = vrsqrt.f32 %v2142_v12  ;;  %v2136_v19 = vmul.f32 0.016666668, %v2125_v18  ;;  %v2137_v23 = vmul.f32 0.016666668, %v2127_v43 }
 0x734   : > { %6250 = vrsqrt.f32 %v2143_v16 }
 0x735   : > { %v2144_v27 = vadd.f32 1e-05, %v2136_v19  ;;  %v2145_v47 = vadd.f32 1e-05, %v2137_v23 }
 0x736   : > { %v2129_v28 = vpop.xlane.xlu0 %2128  ;;  %v2131_v20 = vpop.xlane.xlu1 %2130 }
 0x737   : > { %v6245_v30 = vpop.eup %6244  ;;  %6252 = vrsqrt.f32 %v2144_v27  ;;  %v2138_v38 = vmul.f32 0.016666668, %v2129_v28  ;;  %v2139_v1 = vmul.f32 0.016666668, %v2131_v20  ;;  %v8018_v27 = vpack.c.bf16 %v7692_v29, %v7688_v25 }
 0x738   : > { %6254 = vrsqrt.f32 %v2145_v47  ;;  %v2156_v32 = vmul.f32 %v6245_v30, %v7969_v17  ;;  %v8033_v47 = vpack.c.bf16 %v7741_v60, %v7738_v59  ;;  %v2547_v28 = vpack.c.bf16 %v7701_v46, %v7699_v45 }
 0x739   : > { %v6247_v33 = vpop.eup %6246  ;;  %v2146_v34 = vadd.f32 1e-05, %v2138_v38  ;;  %v2147_v50 = vadd.f32 1e-05, %v2139_v1  ;;  %12124 = vst [vmem:[#allocation13_spill] sm:$0xff] %v8018_v27  ;;  %v2546_v20 = vpack.c.bf16 %v7711_v6, %v7708_v42  ;;  %v2549_v30 = vpack.c.bf16 %v7729_v56, %v7727_v55 }
 0x73a   : > { %v2157_v0 = vmul.f32 %v6247_v33, %v7972_v22  ;;  %v2172_v21 = vmul.f32 0.3, %v2156_v32  ;;  %vm2164_vm10 = vcmp.ge.f32.partialorder %v2156_v32, 0.0  ;;  %12127 = vst [vmem:[#allocation16_spill] sm:$0xff] %v8033_v47  ;;  %v2548_v38 = vpack.c.bf16 %v7743_v62, %v7735_v58 }
 0x73b   : > { %6256 = vrsqrt.f32 %v2146_v34 }
 0x73c   : > { %6258 = vrsqrt.f32 %v2147_v50  ;;  %vm2165_vm11 = vcmp.ge.f32.partialorder %v2157_v0, 0.0  ;;  %v2173_v37 = vmul.f32 0.3, %v2157_v0  ;;  %v2180_v4 = vsel %vm2164_vm10, %v2156_v32, %v2172_v21 }
 0x73d   : > { %v6249_v49 = vpop.eup %6248 }
 0x73e   : > { %v6251_v48 = vpop.eup %6250  ;;  %v2181_v39 = vsel %vm2165_vm11, %v2157_v0, %v2173_v37  ;;  %v2158_v31 = vmul.f32 %v6249_v49, %v7982_v41  ;;  %vm2301_vm11 = vcmask 523520  }
 0x73f   : > { %v2188_v40 = vpack.c.bf16 %v2181_v39, %v2180_v4  ;;  %v2159_v17 = vmul.f32 %v6251_v48, %v7977_v13 }
 0x740   : > { %vm2166_vm12 = vcmp.ge.f32.partialorder %v2158_v31, 0.0  ;;  %v2174_v52 = vmul.f32 0.3, %v2158_v31 }
 0x741   : > { %v6253_v11 = vpop.eup %6252  ;;  %5921 = vmatprep.subr.bf16.mxu1 %v2188_v40  ;;  %5929 = vmatprep.mubr.bf16.mxu1 %v2188_v40  ;;  %vm2167_vm13 = vcmp.ge.f32.partialorder %v2159_v17, 0.0  ;;  %v2175_v22 = vmul.f32 0.3, %v2159_v17 }
 0x742   : > { %v6255_v10 = vpop.eup %6254  ;;  %5922 = vmatpush3.bf16.xpose.msra.mxu1 %v2188_v40  ;;  %v2182_v57 = vsel %vm2166_vm12, %v2158_v31, %v2174_v52  ;;  %v2160_v8 = vmul.f32 %v6253_v11, %v7989_v35  ;;  %vm12103_vm12 = vcmask 523264  }
 0x743   : > { %v2183_v54 = vsel %vm2167_vm13, %v2159_v17, %v2175_v22  ;;  %v2161_v61 = vmul.f32 %v6255_v10, %v7992_v2 }
 0x744   : > { %v2189_v44 = vpack.c.bf16 %v2183_v54, %v2182_v57  ;;  %vm2168_vm14 = vcmp.ge.f32.partialorder %v2160_v8, 0.0  ;;  %v2176_v41 = vmul.f32 0.3, %v2160_v8 }
 0x745   : > { %v6257_v63 = vpop.eup %6256  ;;  %vm2169_vm15 = vcmp.ge.f32.partialorder %v2161_v61, 0.0  ;;  %v2177_v13 = vmul.f32 0.3, %v2161_v61 }
 0x746   : > { %v6259_v5 = vpop.eup %6258  ;;  %5923 = vmatprep.subr.bf16.mxu1 %v2189_v44  ;;  %v2184_v15 = vsel %vm2168_vm14, %v2160_v8, %v2176_v41  ;;  %v2162_v53 = vmul.f32 %v6257_v63, %v7999_v3  ;;  %v8023_v3 = vpack.c.bf16 %v7690_v26, %v7686_v24 }
 0x747   : > { %v2185_v12 = vsel %vm2169_vm15, %v2161_v61, %v2177_v13  ;;  %v2163_v16 = vmul.f32 %v6259_v5, %v8002_v7  ;;  %v8027_v7 = vpack.c.bf16 %v7725_v51, %v7722_v9 }
 0x748   : > { %v2190_v18 = vpack.c.bf16 %v2185_v12, %v2184_v15  ;;  %v2178_v35 = vmul.f32 0.3, %v2162_v53  ;;  %vm2170_vm6 = vcmp.ge.f32.partialorder %v2162_v53, 0.0  ;;  %12125 = vst [vmem:[#allocation14_spill] sm:$0xff] %v8023_v3 }
 0x749   : > { %v2179_v43 = vmul.f32 0.3, %v2163_v16  ;;  %vm2171_vm10 = vcmp.ge.f32.partialorder %v2163_v16, 0.0  ;;  %12126 = vst [vmem:[#allocation15_spill] sm:$0xff] %v8027_v7 }
 0x74a   : > { %5924 = vmatpush3.bf16.xpose.msra.mxu1 %v2189_v44  ;;  %v2186_v2 = vsel %vm2170_vm6, %v2162_v53, %v2178_v35 }
 0x74b   : > { %5925 = vmatprep.subr.bf16.mxu1 %v2190_v18  ;;  %v2187_v19 = vsel %vm2171_vm10, %v2163_v16, %v2179_v43 }
 0x74c   : > { %v2191_v23 = vpack.c.bf16 %v2187_v19, %v2186_v2 }
 0x752   : > { %5926 = vmatpush3.bf16.xpose.msra.mxu1 %v2190_v18 }
 0x753   : > { %5927 = vmatprep.subr.bf16.mxu1 %v2191_v23 }
 0x75a   : > { %5928 = vmatpush3.bf16.xpose.msra.mxu1 %v2191_v23 }
 0x75b   : > { %2563 = vmatprep.subr.bf16.mxu1 %v8018_v27  ;;  %v6364_v27 = vld [vmem:[%s12053_s2 + $0x40] sm:$0xff] }
 0x761   : > { %5930 = vmatmul.mubr.bf16.vlgmr.msra.gmra.mrb[24].mxu1 %v2189_v44 }
 0x762   : > { %5933 = vmatprep.mubr.bf16.mxu1 %v2190_v18  ;;  %2564 = vmatpush1.bf16.msra.mxu1 %v8023_v3 }
 0x763   : > { %2565 = vmatprep.subr.bf16.mxu1 %v8027_v7 }
 0x766   : > { %2566 = vmatpush1.bf16.msra.mxu1 %v8033_v47 }
 0x767   : > { %2567 = vmatprep.subr.bf16.mxu1 %v2547_v28 }
 0x769   : > { %5934 = vmatmul.mubr.bf16.gmra.mrb[28].mxu1 %v2191_v23 }
 0x76a   : > { %2568 = vmatpush1.bf16.msra.mxu1 %v2546_v20  ;;  %2595 = vmatprep.mubr.bf16.mxu1 %v12064_v36 }
 0x76b   : > { %2569 = vmatprep.subr.bf16.mxu1 %v2549_v30 }
 0x76e   : > { %2570 = vmatpush1.bf16.msra.mxu1 %v2548_v38 }
 0x834   : > { %v8045_v1 = vpop.f32.mrb[24].mxu1 }
 0x835   : > { %v8047_v32 = vpop.f32.mrb[25].mxu1  ;;  %v2308_v21 = vsel %vm2301_vm11, %v8045_v1, -inf  ;;  %v2263_v39 = vsel %vm12102_vm9, %v8045_v1, -inf }
 0x836   : > { %v8049_v33 = vpop.f32.mrb[26].mxu1  ;;  %v2302_v34 = vsel %vm2301_vm11, %v8047_v32, -inf  ;;  %v2257_v50 = vsel %vm12102_vm9, %v8047_v32, -inf }
 0x837   : > { %2303 = vmax.xlane.f32.xlu0 %v2302_v34  ;;  %2258 = vmax.xlane.f32.xlu1 %v2257_v50  ;;  %v8055_v0 = vpop.f32.mrb[27].mxu1  ;;  %v2311_v37 = vsel %vm2301_vm11, %v8049_v33, -inf  ;;  %v2266_v31 = vsel %vm12102_vm9, %v8049_v33, -inf }
 0x838   : > { %v2305_v17 = vsel %vm2301_vm11, %v8055_v0, -inf  ;;  %v2260_v52 = vsel %vm12102_vm9, %v8055_v0, -inf }
 0x83b   : > { %2309 = vmax.xlane.f32.xlu0 %v2308_v21  ;;  %2312 = vmax.xlane.f32.xlu1 %v2311_v37 }
 0x83c   : > { %v8061_v49 = vpop.f32.mrb[28].mxu1 }
 0x83d   : > { %v8063_v48 = vpop.f32.mrb[29].mxu1  ;;  %v2368_v11 = vsel %vm12102_vm9, %v8061_v49, -inf  ;;  %v2412_v10 = vsel %vm2301_vm11, %v8061_v49, -inf }
 0x83e   : > { %v8065_v4 = vpop.f32.mrb[30].mxu1  ;;  %v2362_v8 = vsel %vm12102_vm9, %v8063_v48, -inf  ;;  %v2406_v61 = vsel %vm2301_vm11, %v8063_v48, -inf }
 0x83f   : > { %2264 = vmax.xlane.f32.xlu0 %v2263_v39  ;;  %2267 = vmax.xlane.f32.xlu1 %v2266_v31  ;;  %v8071_v40 = vpop.f32.mrb[31].mxu1  ;;  %v2371_v22 = vsel %vm12102_vm9, %v8065_v4, -inf  ;;  %v2415_v57 = vsel %vm2301_vm11, %v8065_v4, -inf }
 0x840   : > { %v2365_v54 = vsel %vm12102_vm9, %v8071_v40, -inf  ;;  %v2409_v44 = vsel %vm2301_vm11, %v8071_v40, -inf }
 0x843   : > { %2306 = vmax.xlane.f32.xlu1 %v2305_v17  ;;  %2261 = vmax.xlane.f32.xlu0 %v2260_v52 }
 0x847   : > { %2369 = vmax.xlane.f32.xlu0 %v2368_v11  ;;  %2372 = vmax.xlane.f32.xlu1 %v2371_v22 }
 0x84b   : > { %2413 = vmax.xlane.f32.xlu0 %v2412_v10  ;;  %2416 = vmax.xlane.f32.xlu1 %v2415_v57 }
 0x84f   : > { %2363 = vmax.xlane.f32.xlu0 %v2362_v8  ;;  %2366 = vmax.xlane.f32.xlu1 %v2365_v54 }
 0x853   : > { %2407 = vmax.xlane.f32.xlu0 %v2406_v61  ;;  %2410 = vmax.xlane.f32.xlu1 %v2409_v44 }
 0x8c4   : > { %v2304_v41 = vpop.xlane.xlu0 %2303  ;;  %v8093_v63 = vpop.xlane.xlu1 %2258 }
 0x8c5   : > { %v2314_v13 = vsub.f32 %v8047_v32, %v2304_v41 }
 0x8c7   : > { %v2318_v5 = vmul.f32 1.442695, %v2314_v13 }
 0x8c8   : > { %v2310_v15 = vpop.xlane.xlu0 %2309  ;;  %v2313_v53 = vpop.xlane.xlu1 %2312 }
 0x8c9   : > { %6260 = vpow2.f32 %v2318_v5  ;;  %v2316_v12 = vsub.f32 %v8045_v1, %v2310_v15  ;;  %v2317_v16 = vsub.f32 %v8049_v33, %v2313_v53 }
 0x8cb   : > { %v2322_v18 = vmul.f32 1.442695, %v2316_v12  ;;  %v2324_v35 = vmul.f32 1.442695, %v2317_v16 }
 0x8cc   : > { %v8098_v43 = vpop.xlane.xlu0 %2264  ;;  %v8100_v2 = vpop.xlane.xlu1 %2267 }
 0x8cd   : > { %6262 = vpow2.f32 %v2322_v18 }
 0x8ce   : > { %6264 = vpow2.f32 %v2324_v35 }
 0x8d0   : > { %v2307_v19 = vpop.xlane.xlu1 %2306  ;;  %v8102_v23 = vpop.xlane.xlu0 %2261 }
 0x8d1   : > { %v2315_v28 = vsub.f32 %v8055_v0, %v2307_v19 }
 0x8d3   : > { %v8105_v20 = vpop.eup %6260  ;;  %v2320_v30 = vmul.f32 1.442695, %v2315_v28 }
 0x8d4   : > { %v8107_v38 = vpop.xlane.xlu0 %2369  ;;  %2330 = vrot.lane.b32.xlu0 %v8105_v20, %s6683_s18  ;;  %v2373_v11 = vpop.xlane.xlu1 %2372 }
 0x8d5   : > { %6266 = vpow2.f32 %v2320_v30 }
 0x8d7   : > { %v8111_v34 = vpop.eup %6262 }
 0x8d8   : > { %v8113_v50 = vpop.eup %6264  ;;  %v2414_v21 = vpop.xlane.xlu0 %2413  ;;  %2334 = vrot.lane.b32.xlu1 %v8111_v34, %s6683_s18 }
 0x8d9   : > { %2336 = vrot.lane.b32.xlu0 %v8113_v50, %s6683_s18  ;;  %v2417_v57 = vpop.xlane.xlu1 %2416 }
 0x8dc   : > { %v2364_v37 = vpop.xlane.xlu0 %2363 }
 0x8dd   : > { %v2374_v22 = vsub.f32 %v8063_v48, %v2364_v37  ;;  %v2367_v54 = vpop.xlane.xlu1 %2366  ;;  %v2421_v37 = vsub.f32 %v8065_v4, %v2417_v57  ;;  %v2377_v57 = vsub.f32 %v8065_v4, %v2373_v11  ;;  %v2272_v4 = vsub.f32 %v8049_v33, %v8100_v2 }
 0x8de   : > { %v2375_v61 = vsub.f32 %v8071_v40, %v2367_v54 }
 0x8df   : > { %v8119_v39 = vpop.eup %6266  ;;  %v2378_v8 = vmul.f32 1.442695, %v2374_v22  ;;  %v2428_v22 = vmul.f32 1.442695, %v2421_v37 }
 0x8e0   : > { %v2408_v31 = vpop.xlane.xlu0 %2407  ;;  %2332 = vrot.lane.b32.xlu1 %v8119_v39, %s6683_s18  ;;  %v2380_v44 = vmul.f32 1.442695, %v2375_v61 }
 0x8e1   : > { %v2418_v17 = vsub.f32 %v8063_v48, %v2408_v31  ;;  %v2411_v41 = vpop.xlane.xlu1 %2410 }
 0x8e2   : > { %v2419_v5 = vsub.f32 %v8071_v40, %v2411_v41  ;;  %v2384_v41 = vmul.f32 1.442695, %v2377_v57 }
 0x8e3   : > { %v2422_v52 = vmul.f32 1.442695, %v2418_v17  ;;  %v2420_v17 = vsub.f32 %v8061_v49, %v2414_v21  ;;  %v2269_v21 = vsub.f32 %v8047_v32, %v8093_v63  ;;  %v2279_v32 = vmul.f32 1.442695, %v2272_v4 }
 0x8e4   : > { %v2424_v15 = vmul.f32 1.442695, %v2419_v5 }
 0x8e5   : > { %6268 = vpow2.f32 %v2422_v52  ;;  %v2273_v5 = vmul.f32 1.442695, %v2269_v21 }
 0x8e6   : > { %6270 = vpow2.f32 %v2378_v8  ;;  %v2426_v8 = vmul.f32 1.442695, %v2420_v17 }
 0x8e7   : > { %6272 = vpow2.f32 %v2380_v44  ;;  %v2376_v44 = vsub.f32 %v8061_v49, %v8107_v38 }
 0x8e8   : > { %6274 = vpow2.f32 %v2424_v15  ;;  %v2270_v15 = vsub.f32 %v8055_v0, %v8102_v23 }
 0x8e9   : > { %6276 = vpow2.f32 %v2428_v22 }
 0x8ea   : > { %6278 = vpow2.f32 %v2426_v8  ;;  %v2275_v11 = vmul.f32 1.442695, %v2270_v15 }
 0x8eb   : > { %6280 = vpow2.f32 %v2384_v41 }
 0x8ec   : > { %6282 = vpow2.f32 %v2273_v5 }
 0x8ef   : > { %v8125_v10 = vpop.eup %6268 }
 0x8f0   : > { %2434 = vrot.lane.b32.xlu0 %v8125_v10, %s6683_s18  ;;  %v8130_v13 = vpop.eup %6270 }
 0x8f1   : > { %v2386_v48 = vsel %vm12102_vm9, %v8130_v13, 0.0  ;;  %v8135_v53 = vpop.eup %6272 }
 0x8f2   : > { %v2389_v12 = vsel %vm12102_vm9, %v8135_v53, 0.0  ;;  %v8139_v16 = vpop.eup %6274 }
 0x8f3   : > { %v8149_v54 = vpop.eup %6276 }
 0x8f4   : > { %v8151_v61 = vpop.eup %6278 }
 0x8f5   : > { %v8168_v49 = vpop.eup %6280 }
 0x8f6   : > { %v8170_v63 = vpop.eup %6282 }
 0x8f7   : > { %v2281_v33 = vsel %vm12102_vm9, %v8170_v63, 0.0 }
 0x904   : > { %2387 = vadd.xlane.f32.xlu1 %v2386_v48  ;;  %v2271_v48 = vsub.f32 %v8045_v1, %v8098_v43  ;;  %v2395_v1 = vsel %vm12102_vm9, %v8168_v49, 0.0 }
 0x90f   : > { %2390 = vadd.xlane.f32.xlu0 %v2389_v12  ;;  %v2382_v12 = vmul.f32 1.442695, %v2376_v44 }
 0x911   : > { %6284 = vpow2.f32 %v2382_v12 }
 0x915   : > { %2436 = vrot.lane.b32.xlu1 %v8139_v16, %s6683_s18 }
 0x91b   : > { %v8174_v0 = vpop.eup %6284 }
 0x91c   : > { %v2392_v2 = vsel %vm12102_vm9, %v8174_v0, 0.0 }
 0x946   : > { %v2331_v18 = vpop.permute.xlu0 %2330 }
 0x947   : > { %v2342_v30 = vsel %vm12102_vm9, %v2331_v18, 0.0  ;;  %v2277_v18 = vmul.f32 1.442695, %v2271_v48 }
 0x949   : > { %6286 = vpow2.f32 %v2277_v18 }
 0x94a   : > { %v2335_v35 = vpop.permute.xlu1 %2334  ;;  %6288 = vpow2.f32 %v2275_v11 }
 0x94b   : > { %v2337_v40 = vpop.permute.xlu0 %2336  ;;  %v2348_v19 = vsel %vm12102_vm9, %v2335_v35, 0.0  ;;  %6290 = vpow2.f32 %v2279_v32 }
 0x94c   : > { %v2351_v28 = vsel %vm12102_vm9, %v2337_v40, 0.0  ;;  %2349 = vadd.xlane.f32.xlu0 %v2348_v19 }
 0x94d   : > { %2352 = vadd.xlane.f32.xlu1 %v2351_v28 }
 0x950   : > { %2343 = vadd.xlane.f32.xlu0 %v2342_v30 }
 0x952   : > { %v2333_v31 = vpop.permute.xlu1 %2332 }
 0x953   : > { %v2345_v52 = vsel %vm12102_vm9, %v2333_v31, 0.0  ;;  %v8176_v43 = vpop.eup %6286 }
 0x954   : > { %2346 = vadd.xlane.f32.xlu1 %v2345_v52  ;;  %v8182_v23 = vpop.eup %6288  ;;  %v2287_v38 = vsel %vm12102_vm9, %v8176_v43, 0.0 }
 0x955   : > { %v2284_v35 = vsel %vm12102_vm9, %v8182_v23, 0.0  ;;  %v8188_v40 = vpop.eup %6290 }
 0x956   : > { %v2290_v19 = vsel %vm12102_vm9, %v8188_v40, 0.0 }
 0x962   : > { %v2435_v28 = vpop.permute.xlu0 %2434 }
 0x963   : > { %v2446_v41 = vsel %vm12102_vm9, %v2435_v28, 0.0 }
 0x965   : > { %2440 = vrot.lane.b32.xlu1 %v8149_v54, %s6683_s18 }
 0x966   : > { %2438 = vrot.lane.b32.xlu0 %v8151_v61, %s6683_s18 }
 0x985   : > { %2396 = vadd.xlane.f32.xlu0 %v2395_v1  ;;  %v2474_v1 = vstv %s2473_s20  ;;  %s5826_s20 = sshll.u32 %s12201_s14, 3 }
 0x986   : > { %s373_s30 = scalar_lea.vmem %s12061_s10, %s5826_s20 }
 0x989   : > { %2282 = vadd.xlane.f32.xlu0 %v2281_v33  ;;  %2393 = vadd.xlane.f32.xlu1 %v2392_v2 }
 0x98d   : > { %2288 = vadd.xlane.f32.xlu0 %v2287_v38  ;;  %2285 = vadd.xlane.f32.xlu1 %v2284_v35 }
 0x991   : > { %2291 = vadd.xlane.f32.xlu1 %v2290_v19  ;;  %v2388_v30 = vpop.xlane.xlu1 %2387 }
 0x995   : > { %v2437_v31 = vpop.permute.xlu1 %2436 }
 0x996   : > { %v2449_v48 = vsel %vm12102_vm9, %v2437_v31, 0.0 }
 0x99c   : > { %v2391_v37 = vpop.xlane.xlu0 %2390 }
 0x9d9   : > { %v2350_v17 = vpop.xlane.xlu0 %2349 }
 0x9da   : > { %v2353_v52 = vpop.xlane.xlu1 %2352 }
 0x9dd   : > { %v2344_v22 = vpop.xlane.xlu0 %2343 }
 0x9e1   : > { %v2439_v8 = vpop.permute.xlu0 %2438  ;;  %v2347_v57 = vpop.xlane.xlu1 %2346 }
 0x9e2   : > { %v2452_v21 = vsel %vm12102_vm9, %v2439_v8, 0.0  ;;  %6292 = vrcp.f32 %v2347_v57 }
 0x9e3   : > { %2453 = vadd.xlane.f32.xlu0 %v2452_v21  ;;  %6294 = vrcp.f32 %v2344_v22 }
 0x9e4   : > { %6296 = vrcp.f32 %v2350_v17 }
 0x9e5   : > { %v2441_v44 = vpop.permute.xlu1 %2440  ;;  %6298 = vrcp.f32 %v2353_v52 }
 0x9e6   : > { %v2455_v5 = vsel %vm12102_vm9, %v2441_v44, 0.0  ;;  %6300 = vrcp.f32 %v2388_v30 }
 0x9e7   : > { %2447 = vadd.xlane.f32.xlu0 %v2446_v41  ;;  %2456 = vadd.xlane.f32.xlu1 %v2455_v5  ;;  %6302 = vrcp.f32 %v2391_v37 }
 0x9eb   : > { %2450 = vadd.xlane.f32.xlu1 %v2449_v48 }
 0x9ec   : > { %v6293_v15 = vpop.eup %6292 }
 0x9ed   : > { %v6295_v12 = vpop.eup %6294  ;;  %v2359_v18 = vmul.f32 %v6293_v15, %v8119_v39 }
 0x9ee   : > { %v6297_v4 = vpop.eup %6296  ;;  %v2358_v11 = vmul.f32 %v6295_v12, %v8105_v20  ;;  %v2505_v20 = vstv %s2504_s21 }
 0x9ef   : > { %v6299_v32 = vpop.eup %6298  ;;  %v2476_v33 = vmul.f32 %v2474_v1, %v2359_v18  ;;  %v2360_v2 = vmul.f32 %v6297_v4, %v8111_v34 }
 0x9f0   : > { %v6301_v38 = vpop.eup %6300  ;;  %v2475_v35 = vmul.f32 %v2474_v1, %v2358_v11  ;;  %v2361_v19 = vmul.f32 %v6299_v32, %v8113_v50 }
 0x9f1   : > { %v6303_v28 = vpop.eup %6302  ;;  %v2477_v30 = vmul.f32 %v2474_v1, %v2360_v2  ;;  %v2402_v39 = vmul.f32 %v6301_v38, %v8130_v13 }
 0x9f2   : > { %v2478_v37 = vmul.f32 %v2474_v1, %v2361_v19  ;;  %v2403_v31 = vmul.f32 %v6303_v28, %v8135_v53 }
 0x9f3   : > { %v2506_v34 = vmul.f32 %v2505_v20, %v2402_v39 }
 0x9f4   : > { %v2507_v17 = vmul.f32 %v2505_v20, %v2403_v31 }
 0x9fc   : > { %2485 = vrot.lane.b32.xlu1 %v2476_v33, %s6683_s18 }
 0x9fd   : > { %2483 = vrot.lane.b32.xlu0 %v2475_v35, %s6683_s18 }
 0xa00   : > { %2487 = vrot.lane.b32.xlu1 %v2477_v30, %s6683_s18 }
 0xa01   : > { %2489 = vrot.lane.b32.xlu0 %v2478_v37, %s6683_s18 }
 0xa04   : > { %2514 = vrot.lane.b32.xlu1 %v2506_v34, %s6684_s24 }
 0xa05   : > { %2516 = vrot.lane.b32.xlu0 %v2507_v17, %s6684_s24 }
 0xa12   : > { %v2397_v50 = vpop.xlane.xlu0 %2396 }
 0xa13   : > { %6304 = vrcp.f32 %v2397_v50 }
 0xa16   : > { %v2394_v52 = vpop.xlane.xlu1 %2393  ;;  %v2283_v44 = vpop.xlane.xlu0 %2282 }
 0xa17   : > { %6306 = vrcp.f32 %v2394_v52 }
 0xa18   : > { %6308 = vrcp.f32 %v2283_v44 }
 0xa1a   : > { %v2286_v41 = vpop.xlane.xlu1 %2285  ;;  %v2289_v5 = vpop.xlane.xlu0 %2288 }
 0xa1b   : > { %6310 = vrcp.f32 %v2286_v41 }
 0xa1c   : > { %6312 = vrcp.f32 %v2289_v5 }
 0xa1d   : > { %v6305_v22 = vpop.eup %6304 }
 0xa1e   : > { %v2405_v13 = vmul.f32 %v6305_v22, %v8168_v49  ;;  %v2292_v48 = vpop.xlane.xlu1 %2291 }
 0xa1f   : > { %6314 = vrcp.f32 %v2292_v48 }
 0xa20   : > { %v2509_v8 = vmul.f32 %v2505_v20, %v2405_v13 }
 0xa21   : > { %v6307_v57 = vpop.eup %6306 }
 0xa22   : > { %2520 = vrot.lane.b32.xlu0 %v2509_v8, %s6684_s24  ;;  %v2404_v53 = vmul.f32 %v6307_v57, %v8174_v0  ;;  %v6309_v12 = vpop.eup %6308  ;;  %v2468_v0 = vstv %s8196_s11 }
 0xa23   : > { %v2297_v11 = vmul.f32 %v6309_v12, %v8170_v63 }
 0xa24   : > { %v2508_v21 = vmul.f32 %v2505_v20, %v2404_v53  ;;  %v2499_v53 = vstv %s8198_s19 }
 0xa25   : > { %v6311_v18 = vpop.eup %6310  ;;  %v2469_v38 = vmul.f32 %v2468_v0, %v2297_v11 }
 0xa26   : > { %2518 = vrot.lane.b32.xlu1 %v2508_v21, %s6684_s24  ;;  %v2298_v32 = vmul.f32 %v6311_v18, %v8182_v23  ;;  %v6313_v1 = vpop.eup %6312 }
 0xa27   : > { %v2299_v30 = vmul.f32 %v6313_v1, %v8176_v43 }
 0xa28   : > { %v2470_v28 = vmul.f32 %v2468_v0, %v2298_v32 }
 0xa29   : > { %v6315_v35 = vpop.eup %6314  ;;  %v2471_v23 = vmul.f32 %v2468_v0, %v2299_v30 }
 0xa2a   : > { %v2300_v37 = vmul.f32 %v6315_v35, %v8188_v40 }
 0xa2c   : > { %v2472_v22 = vmul.f32 %v2468_v0, %v2300_v37 }
 0xa70   : > { %v2454_v15 = vpop.xlane.xlu0 %2453 }
 0xa74   : > { %v2448_v49 = vpop.xlane.xlu0 %2447  ;;  %v2457_v4 = vpop.xlane.xlu1 %2456 }
 0xa75   : > { %6316 = vrcp.f32 %v2448_v49 }
 0xa78   : > { %v2484_v33 = vpop.permute.xlu0 %2483  ;;  %v2451_v2 = vpop.xlane.xlu1 %2450 }
 0xa79   : > { %6318 = vrcp.f32 %v2451_v2  ;;  %v2495_v19 = vadd.f32 %v2484_v33, %v2469_v38 }
 0xa7a   : > { %6320 = vrcp.f32 %v2457_v4 }
 0xa7b   : > { %v2530_v63 = vsel %vm12102_vm9, %v2495_v19, 0.0  ;;  %6322 = vrcp.f32 %v2454_v15 }
 0xa7c   : > { %v2486_v39 = vpop.permute.xlu1 %2485  ;;  %v2490_v17 = vpop.permute.xlu0 %2489 }
 0xa7d   : > { %v2496_v20 = vadd.f32 %v2486_v39, %v2470_v28  ;;  %v2498_v8 = vadd.f32 %v2490_v17, %v2472_v22 }
 0xa7f   : > { %v2531_v31 = vsel %vm12102_vm9, %v2496_v20, 0.0  ;;  %v6317_v34 = vpop.eup %6316  ;;  %v2533_v41 = vsel %vm12102_vm9, %v2498_v8, 0.0 }
 0xa80   : > { %v2538_v50 = vpack.c.bf16 %v2531_v31, %v2530_v63  ;;  %v2488_v52 = vpop.permute.xlu1 %2487  ;;  %v2462_v40 = vmul.f32 %v6317_v34, %v8125_v10  ;;  %v2517_v48 = vpop.permute.xlu0 %2516 }
 0xa81   : > { %v2497_v13 = vadd.f32 %v2488_v52, %v2471_v23 }
 0xa82   : > { %5766 = vmatmul.mubr.msk.bf16.vlgmr.msra.gmra.mrb[32].mxu1 %vm12103_vm12, %v2538_v50  ;;  %v2500_v5 = vmul.f32 %v2499_v53, %v2462_v40 }
 0xa83   : > { %v6319_v43 = vpop.eup %6318  ;;  %2605 = vmatprep.mubr.bf16.mxu1 %v12064_v36  ;;  %v2532_v21 = vsel %vm12102_vm9, %v2497_v13, 0.0 }
 0xa84   : > { %v2463_v57 = vmul.f32 %v6319_v43, %v8139_v16  ;;  %v2539_v12 = vpack.c.bf16 %v2533_v41, %v2532_v21  ;;  %v2515_v18 = vpop.permute.xlu1 %2514  ;;  %v6321_v4 = vpop.eup %6320 }
 0xa85   : > { %v2526_v10 = vadd.f32 %v2515_v18, %v2500_v5  ;;  %v6323_v32 = vpop.eup %6322  ;;  %v2465_v15 = vmul.f32 %v6321_v4, %v8149_v54 }
 0xa86   : > { %v2501_v44 = vmul.f32 %v2499_v53, %v2463_v57  ;;  %v2464_v1 = vmul.f32 %v6323_v32, %v8151_v61 }
 0xa87   : > { %v2534_v11 = vsel %vm12102_vm9, 0.0, %v2526_v10  ;;  %v2503_v2 = vmul.f32 %v2499_v53, %v2465_v15 }
 0xa88   : > { %v2527_v49 = vadd.f32 %v2517_v48, %v2501_v44  ;;  %v2502_v35 = vmul.f32 %v2499_v53, %v2464_v1 }
 0xa8a   : > { %5767 = vmatmul.mubr.msk.bf16.gmra.mrb[36].mxu1 %vm12103_vm12, %v2539_v12  ;;  %v2535_v16 = vsel %vm12102_vm9, 0.0, %v2527_v49 }
 0xa8b   : > { %2615 = vmatprep.mubr.bf16.mxu1 %v12064_v36  ;;  %v2540_v0 = vpack.c.bf16 %v2535_v16, %v2534_v11 }
 0xa92   : > { %5768 = vmatmul.mubr.msk.bf16.gmra.mrb[40].mxu1 %vm12103_vm12, %v2540_v0 }
 0xa93   : > { %2625 = vmatprep.mubr.bf16.mxu1 %v12064_v36 }
 0xa94   : > { %v2521_v33 = vpop.permute.xlu0 %2520 }
 0xa95   : > { %v2529_v38 = vadd.f32 %v2521_v33, %v2503_v2 }
 0xa97   : > { %v2537_v30 = vsel %vm12102_vm9, 0.0, %v2529_v38 }
 0xa98   : > { %v2519_v19 = vpop.permute.xlu1 %2518 }
 0xa99   : > { %v2528_v28 = vadd.f32 %v2519_v19, %v2502_v35 }
 0xa9b   : > { %v2536_v39 = vsel %vm12102_vm9, 0.0, %v2528_v28  ;;  %v6356_v28 = vld [vmem:[%s12053_s2] sm:$0xff] }
 0xa9c   : > { %v2541_v37 = vpack.c.bf16 %v2537_v30, %v2536_v39  ;;  %v6357_v39 = vld [vmem:[%s12053_s2 + $0x8] sm:$0xff] }
 0xa9e   : > { %5769 = vmatmul.mubr.msk.bf16.gmra.mrb[44].mxu1 %vm12103_vm12, %v2541_v37 }
 0xb55   : > { %v2597_v20 = vpop.f32.mrb[32].mxu1 }
 0xb56   : > { %v8240_v54 = vadd.f32 %v2597_v20, %v7686_v24  ;;  %v2599_v63 = vpop.f32.mrb[33].mxu1  ;;  %v6358_v20 = vld [vmem:[%s12053_s2 + $0x10] sm:$0xff] }
 0xb57   : > { %v2601_v31 = vpop.f32.mrb[34].mxu1  ;;  %v8260_v13 = vadd.f32 %v2599_v63, %v7688_v25 }
 0xb58   : > { %12128 = vst [vmem:[#allocation17_spill] sm:$0xff] %v8240_v54  ;;  %v8243_v61 = vadd.f32 %v2601_v31, %v7690_v26  ;;  %v2603_v23 = vpop.f32.mrb[35].mxu1  ;;  %2668 = vrot.lane.b32.xlu1 %v8240_v54, %s6668_s25  ;;  %v6359_v31 = vld [vmem:[%s12053_s2 + $0x18] sm:$0xff]  ;;  %v463_v26 = vld [vmem:[%s12053_s2 + $0x68] sm:$0xff] }
 0xb59   : > { %v8265_v40 = vadd.f32 %v2603_v23, %v7692_v29  ;;  %v462_v29 = vld [vmem:[%s12053_s2 + $0x60] sm:$0xff] }
 0xb5a   : > { %2670 = vrot.lane.b32.xlu0 %v8243_v61, %s6668_s25 }
 0xb5c   : > { %2732 = vrot.lane.b32.xlu1 %v8240_v54, %s6669_s26 }
 0xb5d   : > { %v2607_v34 = vpop.f32.mrb[36].mxu1 }
 0xb5e   : > { %2734 = vrot.lane.b32.xlu0 %v8243_v61, %s6669_s26  ;;  %v2609_v17 = vpop.f32.mrb[37].mxu1  ;;  %v8282_v5 = vadd.f32 %v2607_v34, %v7738_v59  ;;  %v6367_v59 = vld [vmem:[%s12053_s2 + $0x58] sm:$0xff] }
 0xb5f   : > { %v2611_v50 = vpop.f32.mrb[38].mxu1  ;;  %v8304_v12 = vadd.f32 %v2609_v17, %v7722_v9  ;;  %v6365_v9 = vld [vmem:[%s12053_s2 + $0x48] sm:$0xff] }
 0xb60   : > { %2796 = vrot.lane.b32.xlu1 %v8240_v54, %s6670_s27  ;;  %v2613_v52 = vpop.f32.mrb[39].mxu1  ;;  %v8287_v48 = vadd.f32 %v2611_v50, %v7741_v60 }
 0xb61   : > { %v8309_v18 = vadd.f32 %v2613_v52, %v7725_v51 }
 0xb62   : > { %2798 = vrot.lane.b32.xlu0 %v8243_v61, %s6670_s27 }
 0xb64   : > { %2860 = vrot.lane.b32.xlu1 %v8240_v54, %s6671_s28 }
 0xb65   : > { %v2617_v22 = vpop.f32.mrb[40].mxu1 }
 0xb66   : > { %2862 = vrot.lane.b32.xlu0 %v8243_v61, %s6671_s28  ;;  %v2619_v43 = vpop.f32.mrb[41].mxu1  ;;  %v8326_v49 = vadd.f32 %v2617_v22, %v7708_v42 }
 0xb67   : > { %v2621_v8 = vpop.f32.mrb[42].mxu1  ;;  %v8348_v42 = vadd.f32 %v2619_v43, %v7699_v45 }
 0xb68   : > { %2684 = vrot.lane.b32.xlu1 %v8260_v13, %s6668_s25  ;;  %v2623_v57 = vpop.f32.mrb[43].mxu1  ;;  %v8331_v10 = vadd.f32 %v2621_v8, %v7711_v6 }
 0xb69   : > { %v8353_v6 = vadd.f32 %v2623_v57, %v7701_v46 }
 0xb6a   : > { %2686 = vrot.lane.b32.xlu0 %v8265_v40, %s6668_s25 }
 0xb6c   : > { %2748 = vrot.lane.b32.xlu1 %v8260_v13, %s6669_s26 }
 0xb6e   : > { %2750 = vrot.lane.b32.xlu0 %v8265_v40, %s6669_s26 }
 0xb70   : > { %2812 = vrot.lane.b32.xlu1 %v8260_v13, %s6670_s27 }
 0xb71   : > { %v2627_v53 = vpop.f32.mrb[44].mxu1 }
 0xb72   : > { %2814 = vrot.lane.b32.xlu0 %v8265_v40, %s6670_s27  ;;  %v2629_v21 = vpop.f32.mrb[45].mxu1  ;;  %v8370_v45 = vadd.f32 %v2627_v53, %v7735_v58 }
 0xb73   : > { %v2631_v44 = vpop.f32.mrb[46].mxu1  ;;  %v8388_v58 = vadd.f32 %v2629_v21, %v7727_v55 }
 0xb74   : > { %2876 = vrot.lane.b32.xlu1 %v8260_v13, %s6671_s28  ;;  %v2633_v41 = vpop.f32.mrb[47].mxu1  ;;  %v8375_v46 = vadd.f32 %v2631_v44, %v7743_v62 }
 0xb75   : > { %v8393_v62 = vadd.f32 %v2633_v41, %v7729_v56 }
 0xb76   : > { %2878 = vrot.lane.b32.xlu0 %v8265_v40, %s6671_s28 }
 0xb78   : > { %2672 = vrot.lane.b32.xlu1 %v8282_v5, %s6668_s25 }
 0xb7a   : > { %2674 = vrot.lane.b32.xlu0 %v8287_v48, %s6668_s25 }
 0xb7c   : > { %2736 = vrot.lane.b32.xlu1 %v8282_v5, %s6669_s26 }
 0xb7e   : > { %2738 = vrot.lane.b32.xlu0 %v8287_v48, %s6669_s26 }
 0xb80   : > { %2800 = vrot.lane.b32.xlu1 %v8282_v5, %s6670_s27 }
 0xb82   : > { %2802 = vrot.lane.b32.xlu0 %v8287_v48, %s6670_s27 }
 0xb84   : > { %2864 = vrot.lane.b32.xlu1 %v8282_v5, %s6671_s28 }
 0xb86   : > { %2866 = vrot.lane.b32.xlu0 %v8287_v48, %s6671_s28 }
 0xb88   : > { %2688 = vrot.lane.b32.xlu1 %v8304_v12, %s6668_s25 }
 0xb8a   : > { %2690 = vrot.lane.b32.xlu0 %v8309_v18, %s6668_s25 }
 0xb8c   : > { %2752 = vrot.lane.b32.xlu1 %v8304_v12, %s6669_s26 }
 0xb8e   : > { %2754 = vrot.lane.b32.xlu0 %v8309_v18, %s6669_s26 }
 0xb90   : > { %2816 = vrot.lane.b32.xlu1 %v8304_v12, %s6670_s27 }
 0xb92   : > { %2818 = vrot.lane.b32.xlu0 %v8309_v18, %s6670_s27 }
 0xb94   : > { %2880 = vrot.lane.b32.xlu1 %v8304_v12, %s6671_s28 }
 0xb96   : > { %2882 = vrot.lane.b32.xlu0 %v8309_v18, %s6671_s28 }
 0xb98   : > { %2676 = vrot.lane.b32.xlu1 %v8326_v49, %s6668_s25 }
 0xb9a   : > { %2678 = vrot.lane.b32.xlu0 %v8331_v10, %s6668_s25 }
 0xb9c   : > { %2740 = vrot.lane.b32.xlu1 %v8326_v49, %s6669_s26 }
 0xb9e   : > { %2742 = vrot.lane.b32.xlu0 %v8331_v10, %s6669_s26 }
 0xba0   : > { %2804 = vrot.lane.b32.xlu1 %v8326_v49, %s6670_s27 }
 0xba2   : > { %2806 = vrot.lane.b32.xlu0 %v8331_v10, %s6670_s27 }
 0xba4   : > { %2868 = vrot.lane.b32.xlu1 %v8326_v49, %s6671_s28 }
 0xba6   : > { %2870 = vrot.lane.b32.xlu0 %v8331_v10, %s6671_s28 }
 0xba8   : > { %2692 = vrot.lane.b32.xlu1 %v8348_v42, %s6668_s25 }
 0xbaa   : > { %2694 = vrot.lane.b32.xlu0 %v8353_v6, %s6668_s25 }
 0xbac   : > { %2756 = vrot.lane.b32.xlu1 %v8348_v42, %s6669_s26 }
 0xbae   : > { %2758 = vrot.lane.b32.xlu0 %v8353_v6, %s6669_s26 }
 0xbb0   : > { %2820 = vrot.lane.b32.xlu1 %v8348_v42, %s6670_s27 }
 0xbb2   : > { %2822 = vrot.lane.b32.xlu0 %v8353_v6, %s6670_s27 }
 0xbb4   : > { %2884 = vrot.lane.b32.xlu1 %v8348_v42, %s6671_s28 }
 0xbb6   : > { %2886 = vrot.lane.b32.xlu0 %v8353_v6, %s6671_s28 }
 0xbb8   : > { %2680 = vrot.lane.b32.xlu1 %v8370_v45, %s6668_s25 }
 0xbba   : > { %2682 = vrot.lane.b32.xlu0 %v8375_v46, %s6668_s25 }
 0xbbc   : > { %2744 = vrot.lane.b32.xlu1 %v8370_v45, %s6669_s26 }
 0xbbe   : > { %2746 = vrot.lane.b32.xlu0 %v8375_v46, %s6669_s26 }
 0xbc0   : > { %2808 = vrot.lane.b32.xlu1 %v8370_v45, %s6670_s27 }
 0xbc2   : > { %2810 = vrot.lane.b32.xlu0 %v8375_v46, %s6670_s27 }
 0xbc4   : > { %2696 = vrot.lane.b32.xlu1 %v8388_v58, %s6668_s25 }
 0xbc6   : > { %2698 = vrot.lane.b32.xlu0 %v8393_v62, %s6668_s25 }
 0xbc8   : > { %2872 = vrot.lane.b32.xlu1 %v8370_v45, %s6671_s28 }
 0xbca   : > { %2874 = vrot.lane.b32.xlu0 %v8375_v46, %s6671_s28  ;;  %v2669_v55 = vpop.permute.xlu1 %2668 }
 0xbcc   : > { %v2671_v16 = vpop.permute.xlu0 %2670  ;;  %2760 = vrot.lane.b32.xlu1 %v8388_v58, %s6669_s26 }
 0xbce   : > { %2926 = vrot.lane.b32.xlu0 %v8243_v61, %s6672_s29  ;;  %v8407_v56 = vpop.permute.xlu1 %2732 }
 0xbd0   : > { %v8409_v4 = vpop.permute.xlu0 %2734  ;;  %2824 = vrot.lane.b32.xlu1 %v8388_v58, %s6670_s27 }
 0xbd2   : > { %2942 = vrot.lane.b32.xlu0 %v8265_v40, %s6672_s29  ;;  %v8415_v11 = vpop.permute.xlu1 %2796 }
 0xbd4   : > { %v8417_v0 = vpop.permute.xlu0 %2798  ;;  %2888 = vrot.lane.b32.xlu1 %v8388_v58, %s6671_s28 }
 0xbd6   : > { %2762 = vrot.lane.b32.xlu0 %v8393_v62, %s6669_s26  ;;  %v8423_v32 = vpop.permute.xlu1 %2860 }
 0xbd7   : > { %12129 = vst [vmem:[#allocation18_spill] sm:$0xff] %v8423_v32 }
 0xbd8   : > { %v8425_v15 = vpop.permute.xlu0 %2862  ;;  %2924 = vrot.lane.b32.xlu1 %v8240_v54, %s6672_s29 }
 0xbda   : > { %2930 = vrot.lane.b32.xlu0 %v8287_v48, %s6672_s29  ;;  %v2685_v1 = vpop.permute.xlu1 %2684 }
 0xbdb   : > { %v2700_v33 = vsel %vm437_vm0, %v2669_v55, %v2685_v1  ;;  %v2708_v2 = vsel %vm437_vm0, %v2685_v1, %v2669_v55 }
 0xbdc   : > { %v2687_v38 = vpop.permute.xlu0 %2686  ;;  %2940 = vrot.lane.b32.xlu1 %v8260_v13, %s6672_s29  ;;  %v2716_v30 = vmul.f32 %v6356_v28, %v2708_v2  ;;  %v2717_v37 = vmul.f32 %v6357_v39, %v2700_v33 }
 0xbdd   : > { %v2701_v35 = vsel %vm437_vm0, %v2671_v16, %v2687_v38  ;;  %v2709_v19 = vsel %vm437_vm0, %v2687_v38, %v2671_v16  ;;  %v6170_v16 = vld [vmem:[%s12058_s7 + $0x4] ss:$20 sps:$4 sm:$0xff]  }
 0xbde   : > { %v2718_v63 = vmul.f32 %v6358_v20, %v2709_v19  ;;  %v2719_v23 = vmul.f32 %v6359_v31, %v2701_v35  ;;  %2946 = vrot.lane.b32.xlu0 %v8309_v18, %s6672_s29  ;;  %v8455_v34 = vpop.permute.xlu1 %2748  ;;  %3436 = vmatprep.mubr.bf16.mxu1 %v6170_v16 }
 0xbe0   : > { %v3180_v17 = vpack.c.bf16 %v2718_v63, %v2716_v30  ;;  %v8457_v50 = vpop.permute.xlu0 %2750  ;;  %2928 = vrot.lane.b32.xlu1 %v8282_v5, %s6672_s29  ;;  %v3181_v52 = vpack.c.bf16 %v2719_v23, %v2717_v37  ;;  %v6360_v37 = vld [vmem:[%s12053_s2 + $0x20] sm:$0xff]  ;;  %v6361_v63 = vld [vmem:[%s12053_s2 + $0x28] sm:$0xff]  ;;  %v6362_v23 = vld [vmem:[%s12053_s2 + $0x30] sm:$0xff] }
 0xbe2   : > { %2934 = vrot.lane.b32.xlu0 %v8331_v10, %s6672_s29  ;;  %3404 = vmatprep.subr.bf16.mxu1 %v3181_v52  ;;  %v8463_v22 = vpop.permute.xlu1 %2812  ;;  %v6363_v52 = vld [vmem:[%s12053_s2 + $0x38] sm:$0xff] }
 0xbe3   : > { %3405 = vmatpush1.bf16.msra.mxu1 %v3180_v17 }
 0xbe4   : > { %v8465_v43 = vpop.permute.xlu0 %2814  ;;  %2944 = vrot.lane.b32.xlu1 %v8304_v12, %s6672_s29 }
 0xbe6   : > { %2826 = vrot.lane.b32.xlu0 %v8393_v62, %s6670_s27  ;;  %v8471_v8 = vpop.permute.xlu1 %2876 }
 0xbe7   : > { %12130 = vst [vmem:[#allocation19_spill] sm:$0xff] %v8471_v8 }
 0xbe8   : > { %v8473_v57 = vpop.permute.xlu0 %2878  ;;  %2932 = vrot.lane.b32.xlu1 %v8326_v49, %s6672_s29 }
 0xbea   : > { %2950 = vrot.lane.b32.xlu0 %v8353_v6, %s6672_s29  ;;  %v2673_v53 = vpop.permute.xlu1 %2672 }
 0xbec   : > { %v2675_v21 = vpop.permute.xlu0 %2674  ;;  %2948 = vrot.lane.b32.xlu1 %v8348_v42, %s6672_s29 }
 0xbee   : > { %2938 = vrot.lane.b32.xlu0 %v8375_v46, %s6672_s29  ;;  %v8483_v44 = vpop.permute.xlu1 %2736 }
 0xbf0   : > { %v8485_v41 = vpop.permute.xlu0 %2738  ;;  %2936 = vrot.lane.b32.xlu1 %v8370_v45, %s6672_s29 }
 0xbf2   : > { %2990 = vrot.lane.b32.xlu0 %v8243_v61, %s6673_s22  ;;  %v8491_v55 = vpop.permute.xlu1 %2800 }
 0xbf4   : > { %v8496_v1 = vpop.permute.xlu0 %2802  ;;  %2952 = vrot.lane.b32.xlu1 %v8388_v58, %s6672_s29 }
 0xbf6   : > { %2890 = vrot.lane.b32.xlu0 %v8393_v62, %s6671_s28  ;;  %v8502_v33 = vpop.permute.xlu1 %2864 }
 0xbf7   : > { %12131 = vst [vmem:[#allocation20_spill] sm:$0xff] %v8502_v33 }
 0xbf8   : > { %v8504_v2 = vpop.permute.xlu0 %2866  ;;  %2988 = vrot.lane.b32.xlu1 %v8240_v54, %s6673_s22 }
 0xbf9   : > { %12132 = vst [vmem:[#allocation21_spill] sm:$0xff] %v8504_v2 }
 0xbfa   : > { %3006 = vrot.lane.b32.xlu0 %v8265_v40, %s6673_s22  ;;  %v2689_v38 = vpop.permute.xlu1 %2688 }
 0xbfb   : > { %v2702_v35 = vsel %vm437_vm0, %v2673_v53, %v2689_v38  ;;  %v2710_v19 = vsel %vm437_vm0, %v2689_v38, %v2673_v53 }
 0xbfc   : > { %v2691_v28 = vpop.permute.xlu0 %2690  ;;  %3004 = vrot.lane.b32.xlu1 %v8260_v13, %s6673_s22  ;;  %v2720_v20 = vmul.f32 %v6360_v37, %v2710_v19  ;;  %v2721_v31 = vmul.f32 %v6361_v63, %v2702_v35 }
 0xbfd   : > { %v2703_v30 = vsel %vm437_vm0, %v2675_v21, %v2691_v28  ;;  %v2711_v39 = vsel %vm437_vm0, %v2691_v28, %v2675_v21 }
 0xbfe   : > { %v2722_v17 = vmul.f32 %v6362_v23, %v2711_v39  ;;  %v2723_v53 = vmul.f32 %v6363_v52, %v2703_v30  ;;  %2994 = vrot.lane.b32.xlu0 %v8287_v48, %s6673_s22  ;;  %v8534_v21 = vpop.permute.xlu1 %2752 }
 0xc00   : > { %v3182_v16 = vpack.c.bf16 %v2722_v17, %v2720_v20  ;;  %v8536_v38 = vpop.permute.xlu0 %2754  ;;  %2992 = vrot.lane.b32.xlu1 %v8282_v5, %s6673_s22  ;;  %v3183_v35 = vpack.c.bf16 %v2723_v53, %v2721_v31 }
 0xc02   : > { %3010 = vrot.lane.b32.xlu0 %v8309_v18, %s6673_s22  ;;  %3406 = vmatprep.subr.bf16.mxu1 %v3183_v35  ;;  %v8542_v19 = vpop.permute.xlu1 %2816 }
 0xc03   : > { %3407 = vmatpush1.bf16.msra.mxu1 %v3182_v16 }
 0xc04   : > { %v8544_v28 = vpop.permute.xlu0 %2818  ;;  %3008 = vrot.lane.b32.xlu1 %v8304_v12, %s6673_s22 }
 0xc06   : > { %2998 = vrot.lane.b32.xlu0 %v8331_v10, %s6673_s22  ;;  %v8550_v30 = vpop.permute.xlu1 %2880 }
 0xc07   : > { %12133 = vst [vmem:[#allocation22_spill] sm:$0xff] %v8550_v30 }
 0xc08   : > { %v8552_v39 = vpop.permute.xlu0 %2882  ;;  %2996 = vrot.lane.b32.xlu1 %v8326_v49, %s6673_s22 }
 0xc09   : > { %12134 = vst [vmem:[#allocation23_spill] sm:$0xff] %v8552_v39 }
 0xc0a   : > { %3014 = vrot.lane.b32.xlu0 %v8353_v6, %s6673_s22  ;;  %v2677_v37 = vpop.permute.xlu1 %2676 }
 0xc0c   : > { %v2679_v20 = vpop.permute.xlu0 %2678  ;;  %3012 = vrot.lane.b32.xlu1 %v8348_v42, %s6673_s22 }
 0xc0e   : > { %3002 = vrot.lane.b32.xlu0 %v8375_v46, %s6673_s22  ;;  %v8562_v63 = vpop.permute.xlu1 %2740 }
 0xc10   : > { %v8564_v31 = vpop.permute.xlu0 %2742  ;;  %3000 = vrot.lane.b32.xlu1 %v8370_v45, %s6673_s22 }
 0xc12   : > { %3054 = vrot.lane.b32.xlu0 %v8243_v61, %s6674_s23  ;;  %v8570_v23 = vpop.permute.xlu1 %2804 }
 0xc14   : > { %v8572_v17 = vpop.permute.xlu0 %2806  ;;  %3016 = vrot.lane.b32.xlu1 %v8388_v58, %s6673_s22 }
 0xc16   : > { %2954 = vrot.lane.b32.xlu0 %v8393_v62, %s6672_s29  ;;  %v8578_v52 = vpop.permute.xlu1 %2868 }
 0xc17   : > { %12135 = vst [vmem:[#allocation24_spill] sm:$0xff] %v8578_v52 }
 0xc18   : > { %v8580_v53 = vpop.permute.xlu0 %2870  ;;  %3052 = vrot.lane.b32.xlu1 %v8240_v54, %s6674_s23 }
 0xc19   : > { %12136 = vst [vmem:[#allocation25_spill] sm:$0xff] %v8580_v53  ;;  %v465_v53 = vld [vmem:[%s12053_s2 + $0x78] sm:$0xff] }
 0xc1a   : > { %3070 = vrot.lane.b32.xlu0 %v8265_v40, %s6674_s23  ;;  %v2693_v16 = vpop.permute.xlu1 %2692 }
 0xc1b   : > { %v2704_v35 = vsel %vm437_vm0, %v2677_v37, %v2693_v16  ;;  %v2712_v36 = vsel %vm437_vm0, %v2693_v16, %v2677_v37  ;;  %v6366_v16 = vld [vmem:[%s12053_s2 + $0x50] sm:$0xff] }
 0xc1c   : > { %v2695_v47 = vpop.permute.xlu0 %2694  ;;  %3068 = vrot.lane.b32.xlu1 %v8260_v13, %s6674_s23  ;;  %v2724_v51 = vmul.f32 %v6364_v27, %v2712_v36  ;;  %v2725_v37 = vmul.f32 %v6365_v9, %v2704_v35 }
 0xc1d   : > { %v2705_v7 = vsel %vm437_vm0, %v2679_v20, %v2695_v47  ;;  %v2713_v3 = vsel %vm437_vm0, %v2695_v47, %v2679_v20 }
 0xc1e   : > { %v2726_v60 = vmul.f32 %v6366_v16, %v2713_v3  ;;  %v2727_v47 = vmul.f32 %v6367_v59, %v2705_v7  ;;  %3058 = vrot.lane.b32.xlu0 %v8287_v48, %s6674_s23  ;;  %v8610_v20 = vpop.permute.xlu1 %2756 }
 0xc20   : > { %v3184_v36 = vpack.c.bf16 %v2726_v60, %v2724_v51  ;;  %v8612_v27 = vpop.permute.xlu0 %2758  ;;  %3056 = vrot.lane.b32.xlu1 %v8282_v5, %s6674_s23  ;;  %v3185_v9 = vpack.c.bf16 %v2727_v47, %v2725_v37 }
 0xc22   : > { %3074 = vrot.lane.b32.xlu0 %v8309_v18, %s6674_s23  ;;  %3408 = vmatprep.subr.bf16.mxu1 %v3185_v9  ;;  %v8618_v3 = vpop.permute.xlu1 %2820  ;;  %v2765_v9 = vsel %vm502_vm1, %v8409_v4, %v8457_v50 }
 0xc23   : > { %3409 = vmatpush1.bf16.msra.mxu1 %v3184_v36 }
 0xc24   : > { %v8620_v59 = vpop.permute.xlu0 %2822  ;;  %3072 = vrot.lane.b32.xlu1 %v8304_v12, %s6674_s23 }
 0xc26   : > { %3018 = vrot.lane.b32.xlu0 %v8393_v62, %s6673_s22  ;;  %v8626_v51 = vpop.permute.xlu1 %2884 }
 0xc27   : > { %12137 = vst [vmem:[#allocation26_spill] sm:$0xff] %v8626_v51  ;;  %v464_v51 = vld [vmem:[%s12053_s2 + $0x70] sm:$0xff] }
 0xc28   : > { %v8628_v60 = vpop.permute.xlu0 %2886  ;;  %3060 = vrot.lane.b32.xlu1 %v8326_v49, %s6674_s23 }
 0xc29   : > { %12138 = vst [vmem:[#allocation27_spill] sm:$0xff] %v8628_v60  ;;  %v2764_v60 = vsel %vm502_vm1, %v8407_v56, %v8455_v34 }
 0xc2a   : > { %3062 = vrot.lane.b32.xlu0 %v8331_v10, %s6674_s23  ;;  %v2681_v7 = vpop.permute.xlu1 %2680 }
 0xc2c   : > { %v2683_v35 = vpop.permute.xlu0 %2682  ;;  %3076 = vrot.lane.b32.xlu1 %v8348_v42, %s6674_s23 }
 0xc2e   : > { %3078 = vrot.lane.b32.xlu0 %v8353_v6, %s6674_s23  ;;  %v8638_v37 = vpop.permute.xlu1 %2744 }
 0xc30   : > { %v8640_v16 = vpop.permute.xlu0 %2746  ;;  %3064 = vrot.lane.b32.xlu1 %v8370_v45, %s6674_s23 }
 0xc32   : > { %3066 = vrot.lane.b32.xlu0 %v8375_v46, %s6674_s23  ;;  %v8646_v47 = vpop.permute.xlu1 %2808 }
 0xc33   : > { %12139 = vst [vmem:[#allocation28_spill] sm:$0xff] %v8646_v47 }
 0xc34   : > { %v8648_v36 = vpop.permute.xlu0 %2810  ;;  %3080 = vrot.lane.b32.xlu1 %v8388_v58, %s6674_s23 }
 0xc35   : > { %12140 = vst [vmem:[#allocation29_spill] sm:$0xff] %v8648_v36 }
 0xc36   : > { %3082 = vrot.lane.b32.xlu0 %v8393_v62, %s6674_s23  ;;  %v2697_v25 = vpop.permute.xlu1 %2696 }
 0xc37   : > { %v2706_v24 = vsel %vm437_vm0, %v2681_v7, %v2697_v25  ;;  %v2714_v52 = vsel %vm437_vm0, %v2697_v25, %v2681_v7  ;;  %v2773_v25 = vsel %vm502_vm1, %v8457_v50, %v8409_v4  ;;  %v6368_v7 = vld [vmem:[%s12053_s2 + $0x98] sm:$0xff]  ;;  %v2767_v4 = vsel %vm502_vm1, %v8485_v41, %v8536_v38 }
 0xc38   : > { %v2699_v33 = vpop.permute.xlu0 %2698  ;;  %3116 = vrot.lane.b32.xlu1 %v8240_v54, %s12141_s12  ;;  %v2783_v30 = vmul.f32 %v6368_v7, %v2765_v9  ;;  %v2728_v36 = vmul.f32 %v2714_v52, %v462_v29  ;;  %v2729_v32 = vmul.f32 %v2706_v24, %v463_v26  ;;  %v2772_v50 = vsel %vm502_vm1, %v8455_v34, %v8407_v56  ;;  %v6369_v24 = vld [vmem:[%s12053_s2 + $0x88] sm:$0xff] }
 0xc39   : > { %v2707_v2 = vsel %vm437_vm0, %v2683_v35, %v2699_v33  ;;  %v2715_v39 = vsel %vm437_vm0, %v2699_v33, %v2683_v35  ;;  %v2781_v26 = vmul.f32 %v6369_v24, %v2764_v60  ;;  %v2766_v56 = vsel %vm502_vm1, %v8483_v44, %v8534_v21 }
 0xc3a   : > { %v2730_v8 = vmul.f32 %v2715_v39, %v464_v51  ;;  %v2731_v54 = vmul.f32 %v2707_v2, %v465_v53  ;;  %3118 = vrot.lane.b32.xlu0 %v8243_v61, %s12141_s12  ;;  %v8693_v47 = vpop.permute.xlu1 %2872  ;;  %v6370_v39 = vld [vmem:[%s12053_s2 + $0x90] sm:$0xff]  ;;  %v2775_v34 = vsel %vm502_vm1, %v8536_v38, %v8485_v41  ;;  %v6372_v51 = vld [vmem:[%s12053_s2 + $0x80] sm:$0xff]  ;;  %v2769_v41 = vsel %vm502_vm1, %v8564_v31, %v8612_v27 }
 0xc3b   : > { %v2782_v52 = vmul.f32 %v6370_v39, %v2773_v25  ;;  %v3189_v53 = vpack.c.bf16 %v2783_v30, %v2781_v26  ;;  %v2780_v60 = vmul.f32 %v6372_v51, %v2772_v50  ;;  %v2774_v38 = vsel %vm502_vm1, %v8534_v21, %v8483_v44  ;;  %v6373_v30 = vld [vmem:[%s12053_s2 + $0xa8] sm:$0xff]  ;;  %v6374_v25 = vld [vmem:[%s12053_s2 + $0xb0] sm:$0xff]  ;;  %v6379_v51 = vld [vmem:[%s12053_s2 + $0xc0] sm:$0xff] }
 0xc3c   : > { %v3186_v29 = vpack.c.bf16 %v2730_v8, %v2728_v36  ;;  %v8706_v33 = vpop.permute.xlu0 %2874  ;;  %3132 = vrot.lane.b32.xlu1 %v8260_v13, %s12141_s12  ;;  %v3187_v2 = vpack.c.bf16 %v2731_v54, %v2729_v32  ;;  %v6371_v8 = vld [vmem:[%s12053_s2 + $0xb8] sm:$0xff]  ;;  %v2785_v35 = vmul.f32 %v6373_v30, %v2766_v56  ;;  %v2786_v7 = vmul.f32 %v6374_v25, %v2775_v34  ;;  %v6378_v34 = vld [vmem:[%s12053_s2 + $0xd0] sm:$0xff] }
 0xc3d   : > { %v2787_v54 = vmul.f32 %v6371_v8, %v2767_v4  ;;  %v3188_v9 = vpack.c.bf16 %v2782_v52, %v2780_v60  ;;  %v2768_v44 = vsel %vm502_vm1, %v8562_v63, %v8610_v20  ;;  %v2777_v21 = vsel %vm502_vm1, %v8612_v27, %v8564_v31  ;;  %v6375_v4 = vld [vmem:[%s12053_s2 + $0xd8] sm:$0xff]  ;;  %v6377_v27 = vld [vmem:[%s12053_s2 + $0xc8] sm:$0xff] }
 0xc3e   : > { %3134 = vrot.lane.b32.xlu0 %v8265_v40, %s12141_s12  ;;  %3410 = vmatprep.subr.bf16.mxu1 %v3187_v2  ;;  %v2761_v32 = vpop.permute.xlu1 %2760  ;;  %v2791_v50 = vmul.f32 %v6375_v4, %v2769_v41  ;;  %v2776_v31 = vsel %vm502_vm1, %v8610_v20, %v8562_v63  ;;  %v2789_v39 = vmul.f32 %v6377_v27, %v2768_v44  ;;  %v5584_v20 = vld [vmem:[%s12053_s2 + $0xe0] sm:$0xff]  ;;  %v5585_v41 = vld [vmem:[%s12053_s2 + $0xe8] sm:$0xff] }
 0xc3f   : > { %3411 = vmatpush1.bf16.msra.mxu1 %v3186_v29  ;;  %v3191_v26 = vpack.c.bf16 %v2787_v54, %v2785_v35  ;;  %v6376_v29 = vld [vmem:[%s12053_s2 + $0xa0] sm:$0xff]  ;;  %v2790_v8 = vmul.f32 %v6378_v34, %v2777_v21  ;;  %v2829_v63 = vsel %vm568_vm2, %v8417_v0, %v8465_v43  ;;  %v2788_v60 = vmul.f32 %v6379_v51, %v2776_v31  ;;  %v5586_v35 = vld [vmem:[%s12053_s2 + $0xf0] sm:$0xff]  ;;  %v6381_v27 = vld [vmem:[%s12053_s2 + $0x108] sm:$0xff] }
 0xc40   : > { %v8740_v36 = vpop.permute.xlu0 %2926  ;;  %3120 = vrot.lane.b32.xlu1 %v8282_v5, %s12141_s12  ;;  %3412 = vmatprep.subr.bf16.mxu1 %v3189_v53  ;;  %v2784_v2 = vmul.f32 %v6376_v29, %v2774_v38  ;;  %v3193_v53 = vpack.c.bf16 %v2791_v50, %v2789_v39  ;;  %v2770_v38 = vsel %vm502_vm1, %v8638_v37, %v2761_v32 }
 0xc41   : > { %v2778_v30 = vsel %vm502_vm1, %v2761_v32, %v8638_v37  ;;  %v2828_v25 = vsel %vm568_vm2, %v8415_v11, %v8463_v22  ;;  %v6380_v32 = vld [vmem:[%s12053_s2 + $0x118] sm:$0xff]  ;;  %v3192_v21 = vpack.c.bf16 %v2790_v8, %v2788_v60  ;;  %v2831_v31 = vsel %vm568_vm2, %v8496_v1, %v8544_v28 }
 0xc42   : > { %3122 = vrot.lane.b32.xlu0 %v8287_v48, %s12141_s12  ;;  %v8760_v24 = vpop.permute.xlu1 %2824  ;;  %v3190_v56 = vpack.c.bf16 %v2786_v7, %v2784_v2  ;;  %v2837_v7 = vsel %vm568_vm2, %v8465_v43, %v8417_v0  ;;  %v2847_v44 = vmul.f32 %v6380_v32, %v2829_v63  ;;  %v2792_v0 = vmul.f32 %v5584_v20, %v2778_v30  ;;  %v6382_v63 = vld [vmem:[%s12053_s2 + $0x110] sm:$0xff] }
 0xc43   : > { %3413 = vmatpush1.bf16.msra.mxu1 %v3188_v9  ;;  %v5587_v9 = vld [vmem:[%s12053_s2 + $0xf8] sm:$0xff]  ;;  %v2793_v43 = vmul.f32 %v5585_v41, %v2770_v38  ;;  %v2845_v39 = vmul.f32 %v6381_v27, %v2828_v25  ;;  %v2846_v20 = vmul.f32 %v6382_v63, %v2837_v7  ;;  %v6384_v38 = vld [vmem:[%s12053_s2 + $0x100] sm:$0xff] }
 0xc44   : > { %v8772_v52 = vpop.permute.xlu0 %2942  ;;  %3136 = vrot.lane.b32.xlu1 %v8304_v12, %s12141_s12  ;;  %3414 = vmatprep.subr.bf16.mxu1 %v3191_v26 }
 0xc45   : > { %v3197_v41 = vpack.c.bf16 %v2847_v44, %v2845_v39  ;;  %v6387_v44 = vld [vmem:[%s12053_s2 + $0x158] sm:$0xff]  ;;  %v5600_v39 = vld [vmem:[%s12053_s2 + $0x160] sm:$0xff] }
 0xc46   : > { %3138 = vrot.lane.b32.xlu0 %v8309_v18, %s12141_s12  ;;  %v8788_v54 = vpop.permute.xlu1 %2888 }
 0xc47   : > { %3415 = vmatpush1.bf16.msra.mxu1 %v3190_v56 }
 0xc48   : > { %v2763_v37 = vpop.permute.xlu0 %2762  ;;  %3124 = vrot.lane.b32.xlu1 %v8326_v49, %s12141_s12  ;;  %3416 = vmatprep.subr.bf16.mxu1 %v3193_v53  ;;  %v6383_v53 = vld [vmem:[%s12053_s2 + $0x138] sm:$0xff] }
 0xc49   : > { %v2771_v4 = vsel %vm502_vm1, %v8640_v16, %v2763_v37  ;;  %v2779_v50 = vsel %vm502_vm1, %v2763_v37, %v8640_v16  ;;  %v2836_v16 = vsel %vm568_vm2, %v8463_v22, %v8415_v11  ;;  %v2830_v11 = vsel %vm568_vm2, %v8491_v55, %v8542_v19  ;;  %v6386_v37 = vld [vmem:[%s12053_s2 + $0x130] sm:$0xff] }
 0xc4a   : > { %v2794_v26 = vmul.f32 %v5586_v35, %v2779_v50  ;;  %v2795_v29 = vmul.f32 %v5587_v9, %v2771_v4  ;;  %3126 = vrot.lane.b32.xlu0 %v8331_v10, %s12141_s12  ;;  %v8829_v2 = vpop.permute.xlu1 %2924  ;;  %v2839_v22 = vsel %vm568_vm2, %v8544_v28, %v8496_v1  ;;  %v2851_v51 = vmul.f32 %v6383_v53, %v2831_v31  ;;  %v6385_v35 = vld [vmem:[%s12053_s2 + $0x128] sm:$0xff] }
 0xc4b   : > { %3417 = vmatpush1.bf16.msra.mxu1 %v3192_v21  ;;  %v2844_v30 = vmul.f32 %v6384_v38, %v2836_v16  ;;  %v2833_v1 = vsel %vm568_vm2, %v8572_v17, %v8620_v59  ;;  %v2838_v28 = vsel %vm568_vm2, %v8542_v19, %v8491_v55  ;;  %v2849_v9 = vmul.f32 %v6385_v35, %v2830_v11  ;;  %v6390_v16 = vld [vmem:[%s12053_s2 + $0x150] sm:$0xff]  ;;  %v5603_v38 = vld [vmem:[%s12053_s2 + $0x178] sm:$0xff] }
 0xc4c   : > { %v3194_v56 = vpack.c.bf16 %v2794_v26, %v2792_v0  ;;  %v8842_v34 = vpop.permute.xlu0 %2930  ;;  %3140 = vrot.lane.b32.xlu1 %v8348_v42, %s12141_s12  ;;  %v3195_v8 = vpack.c.bf16 %v2795_v29, %v2793_v43  ;;  %v2850_v32 = vmul.f32 %v6386_v37, %v2839_v22  ;;  %v2832_v55 = vsel %vm568_vm2, %v8570_v23, %v8618_v3  ;;  %v6388_v0 = vld [vmem:[%s12053_s2 + $0x120] sm:$0xff]  ;;  %v12142_v22 = vld [vmem:[#allocation28_spill] sm:$0xff] }
 0xc4d   : > { %v3196_v7 = vpack.c.bf16 %v2846_v20, %v2844_v30  ;;  %v2841_v19 = vsel %vm568_vm2, %v8620_v59, %v8572_v17  ;;  %v2855_v21 = vmul.f32 %v6387_v44, %v2833_v1  ;;  %v3199_v50 = vpack.c.bf16 %v2851_v51, %v2849_v9  ;;  %v6389_v59 = vld [vmem:[%s12053_s2 + $0x148] sm:$0xff]  ;;  %v6391_v20 = vld [vmem:[%s12053_s2 + $0x140] sm:$0xff]  ;;  %v12143_v1 = vld [vmem:[#allocation19_spill] sm:$0xff] }
 0xc4e   : > { %3142 = vrot.lane.b32.xlu0 %v8353_v6, %s12141_s12  ;;  %3418 = vmatprep.subr.bf16.mxu1 %v3195_v8  ;;  %v8862_v60 = vpop.permute.xlu1 %2940  ;;  %v2848_v43 = vmul.f32 %v6388_v0, %v2838_v28  ;;  %v2840_v17 = vsel %vm568_vm2, %v8618_v3, %v8570_v23  ;;  %v2853_v26 = vmul.f32 %v6389_v59, %v2832_v55  ;;  %v2660_v23 = vld [vmem:[%s12060_s9 + $0x80] sm:$0xff]  ;;  %v2661_v30 = vld [vmem:[%s12060_s9 + $0x88] sm:$0xff] }
 0xc4f   : > { %3419 = vmatpush1.bf16.msra.mxu1 %v3194_v56  ;;  %v2854_v27 = vmul.f32 %v6390_v16, %v2841_v19  ;;  %v2893_v3 = vsel %vm634_vm3, %v8425_v15, %v8473_v57  ;;  %v5601_v56 = vld [vmem:[%s12053_s2 + $0x168] sm:$0xff]  ;;  %v2852_v11 = vmul.f32 %v6391_v20, %v2840_v17  ;;  %v2834_v53 = vsel %vm568_vm2, %v12142_v22, %v8760_v24  ;;  %v12145_v55 = vld [vmem:[#allocation29_spill] sm:$0xff]  ;;  %v12146_v17 = vld [vmem:[#allocation23_spill] sm:$0xff] }
 0xc50   : > { %v8878_v25 = vpop.permute.xlu0 %2946  ;;  %3128 = vrot.lane.b32.xlu1 %v8370_v45, %s12141_s12  ;;  %3420 = vmatprep.subr.bf16.mxu1 %v3197_v41  ;;  %v3198_v31 = vpack.c.bf16 %v2850_v32, %v2848_v43  ;;  %v3201_v63 = vpack.c.bf16 %v2855_v21, %v2853_v26  ;;  %v2842_v51 = vsel %vm568_vm2, %v8760_v24, %v12142_v22  ;;  %v5602_v41 = vld [vmem:[%s12053_s2 + $0x170] sm:$0xff]  ;;  %v12144_v28 = vld [vmem:[#allocation18_spill] sm:$0xff]  ;;  %v12147_v59 = vld [vmem:[#allocation21_spill] sm:$0xff] }
 0xc51   : > { %v2892_v35 = vsel %vm634_vm3, %v12144_v28, %v12143_v1  ;;  %v2901_v24 = vsel %vm634_vm3, %v8473_v57, %v8425_v15  ;;  %v3200_v32 = vpack.c.bf16 %v2854_v27, %v2852_v11  ;;  %v2664_v15 = vld [vmem:[%s12060_s9 + $0xa0] sm:$0xff]  ;;  %v2856_v57 = vmul.f32 %v5600_v39, %v2842_v51  ;;  %v6393_v27 = vld [vmem:[%s12053_s2 + $0x188] sm:$0xff]  ;;  %v12149_v22 = vld [vmem:[#allocation20_spill] sm:$0xff] }
 0xc52   : > { %3130 = vrot.lane.b32.xlu0 %v8375_v46, %s12141_s12  ;;  %v8898_v4 = vpop.permute.xlu1 %2928  ;;  %v2857_v21 = vmul.f32 %v5601_v56, %v2834_v53  ;;  %v2895_v26 = vsel %vm634_vm3, %v12147_v59, %v12146_v17  ;;  %v2900_v16 = vsel %vm634_vm3, %v12143_v1, %v12144_v28  ;;  %v12148_v11 = vld [vmem:[#allocation22_spill] sm:$0xff]  ;;  %v2662_v51 = vld [vmem:[%s12060_s9 + $0x90] sm:$0xff] }
 0xc53   : > { %3421 = vmatpush1.bf16.msra.mxu1 %v3196_v7  ;;  %v6392_v7 = vld [vmem:[%s12053_s2 + $0x198] sm:$0xff]  ;;  %v2894_v53 = vsel %vm634_vm3, %v12149_v22, %v12148_v11 }
 0xc54   : > { %v8910_v29 = vpop.permute.xlu0 %2934  ;;  %3144 = vrot.lane.b32.xlu1 %v8388_v58, %s12141_s12  ;;  %3422 = vmatprep.subr.bf16.mxu1 %v3199_v50  ;;  %v2911_v37 = vmul.f32 %v6392_v7, %v2893_v3  ;;  %v12151_v7 = vld [vmem:[#allocation25_spill] sm:$0xff] }
 0xc56   : > { %3146 = vrot.lane.b32.xlu0 %v8393_v62, %s12141_s12  ;;  %v8932_v8 = vpop.permute.xlu1 %2944 }
 0xc57   : > { %3423 = vmatpush1.bf16.msra.mxu1 %v3198_v31  ;;  %v2665_v31 = vld [vmem:[%s12060_s9 + $0xa8] sm:$0xff] }
 0xc58   : > { %v2827_v9 = vpop.permute.xlu0 %2826  ;;  %3254 = vperm.xlu1 %6111, %v2660_v23   ;;  %3424 = vmatprep.subr.bf16.mxu1 %v3201_v63  ;;  %v2909_v23 = vmul.f32 %v6393_v27, %v2892_v35  ;;  %v6394_v63 = vld [vmem:[%s12053_s2 + $0x190] sm:$0xff]  ;;  %v6396_v35 = vld [vmem:[%s12053_s2 + $0x180] sm:$0xff] }
 0xc59   : > { %v2835_v19 = vsel %vm568_vm2, %v12145_v55, %v2827_v9  ;;  %v2843_v44 = vsel %vm568_vm2, %v2827_v9, %v12145_v55  ;;  %v2910_v20 = vmul.f32 %v6394_v63, %v2901_v24  ;;  %v2908_v24 = vmul.f32 %v6396_v35, %v2900_v16  ;;  %v12150_v9 = vld [vmem:[#allocation27_spill] sm:$0xff]  ;;  %v2663_v55 = vld [vmem:[%s12060_s9 + $0x98] sm:$0xff] }
 0xc5a   : > { %v2858_v50 = vmul.f32 %v5602_v41, %v2843_v44  ;;  %v2859_v0 = vmul.f32 %v5603_v38, %v2835_v19  ;;  %3259 = vperm.xlu0 %6110, %v2661_v30   ;;  %v8974_v43 = vpop.permute.xlu1 %2932  ;;  %v2903_v41 = vsel %vm634_vm3, %v12146_v17, %v12147_v59  ;;  %v6395_v38 = vld [vmem:[%s12053_s2 + $0x1b8] sm:$0xff]  ;;  %v3205_v28 = vpack.c.bf16 %v2911_v37, %v2909_v23  ;;  %v6397_v19 = vld [vmem:[%s12053_s2 + $0x1a8] sm:$0xff] }
 0xc5b   : > { %3425 = vmatpush1.bf16.msra.mxu1 %v3200_v32  ;;  %v2915_v30 = vmul.f32 %v6395_v38, %v2895_v26  ;;  %v2897_v32 = vsel %vm634_vm3, %v12151_v7, %v12150_v9  ;;  %v2902_v37 = vsel %vm634_vm3, %v12148_v11, %v12149_v22  ;;  %v2913_v44 = vmul.f32 %v6397_v19, %v2894_v53  ;;  %v12153_v17 = vld [vmem:[#allocation24_spill] sm:$0xff]  ;;  %v2666_v26 = vld [vmem:[%s12060_s9 + $0xb0] sm:$0xff]  ;;  %v6401_v22 = vld [vmem:[%s12053_s2 + $0x1c8] sm:$0xff] }
 0xc5c   : > { %v3202_v3 = vpack.c.bf16 %v2858_v50, %v2856_v57  ;;  %v8990_v39 = vpop.permute.xlu0 %2950  ;;  %3274 = vperm.xlu1 %6111, %v2664_v15   ;;  %v3203_v56 = vpack.c.bf16 %v2859_v0, %v2857_v21  ;;  %v3204_v57 = vpack.c.bf16 %v2910_v20, %v2908_v24  ;;  %v6398_v21 = vld [vmem:[%s12053_s2 + $0x1b0] sm:$0xff]  ;;  %v12152_v0 = vld [vmem:[#allocation26_spill] sm:$0xff]  ;;  %v6399_v16 = vld [vmem:[%s12053_s2 + $0x1d8] sm:$0xff] }
 0xc5d   : > { %v2914_v50 = vmul.f32 %v6398_v21, %v2903_v41  ;;  %v2896_v59 = vsel %vm634_vm3, %v12153_v17, %v12152_v0  ;;  %v2919_v27 = vmul.f32 %v6399_v16, %v2897_v32  ;;  %v2667_v20 = vld [vmem:[%s12060_s9 + $0xb8] sm:$0xff]  ;;  %v2904_v11 = vsel %vm634_vm3, %v12152_v0, %v12153_v17  ;;  %v6402_v38 = vld [vmem:[%s12053_s2 + $0x1d0] sm:$0xff]  ;;  %v5617_v32 = vld [vmem:[%s12053_s2 + $0x1e8] sm:$0xff] }
 0xc5e   : > { %3279 = vperm.xlu0 %6110, %v2665_v31   ;;  %3426 = vmatprep.subr.bf16.mxu1 %v3203_v56  ;;  %v9009_v1 = vpop.permute.xlu1 %2948  ;;  %v2905_v31 = vsel %vm634_vm3, %v12150_v9, %v12151_v7  ;;  %v6400_v56 = vld [vmem:[%s12053_s2 + $0x1a0] sm:$0xff]  ;;  %v2917_v53 = vmul.f32 %v6401_v22, %v2896_v59  ;;  %v5618_v19 = vld [vmem:[%s12053_s2 + $0x1f0] sm:$0xff] }
 0xc5f   : > { %3427 = vmatpush1.bf16.msra.mxu1 %v3202_v3  ;;  %v3207_v3 = vpack.c.bf16 %v2915_v30, %v2913_v44  ;;  %v2912_v63 = vmul.f32 %v6400_v56, %v2902_v37  ;;  %v2918_v30 = vmul.f32 %v6402_v38, %v2905_v31  ;;  %v6403_v9 = vld [vmem:[%s12053_s2 + $0x1c0] sm:$0xff]  ;;  %v2906_v37 = vsel %vm634_vm3, %v8788_v54, %v8693_v47  ;;  %v5619_v44 = vld [vmem:[%s12053_s2 + $0x1f8] sm:$0xff]  ;;  %v12155_v31 = vld [vmem:[#allocation7_spill] sm:$0xff] }
 0xc60   : > { %v9028_v15 = vpop.permute.xlu0 %2938  ;;  %3264 = vperm.xlu1 %6111, %v2662_v51   ;;  %3428 = vmatprep.subr.bf16.mxu1 %v3205_v28  ;;  %v5616_v28 = vld [vmem:[%s12053_s2 + $0x1e0] sm:$0xff]  ;;  %v3209_v24 = vpack.c.bf16 %v2919_v27, %v2917_v53  ;;  %v2916_v7 = vmul.f32 %v6403_v9, %v2904_v11  ;;  %v12156_v56 = vld [vmem:[#allocation6_spill] sm:$0xff]  ;;  %v3213_v11 = vpack.c.bf16 %v8265_v40, %v8260_v13  ;;  %v12158_v38 = vld [vmem:[#allocation11_spill] sm:$0xff] }
 0xc61   : > { %v3206_v41 = vpack.c.bf16 %v2914_v50, %v2912_v63  ;;  %v12154_v21 = vld [vmem:[#allocation5_spill] sm:$0xff]  ;;  %v12160_v13 = vld [vmem:[#allocation12_spill] sm:$0xff] }
 0xc62   : > { %3269 = vperm.xlu0 %6110, %v2663_v55   ;;  %v9047_v23 = vpop.permute.xlu1 %2936  ;;  %v2898_v55 = vsel %vm634_vm3, %v8693_v47, %v8788_v54  ;;  %v3208_v50 = vpack.c.bf16 %v2918_v30, %v2916_v7  ;;  %v2920_v54 = vmul.f32 %v5616_v28, %v2906_v37  ;;  %v6168_v22 = vld [vmem:[%s12058_s7] ss:$20 sps:$4 sm:$0xff]   ;;  %v3217_v37 = vpack.c.bf16 %v8353_v6, %v8348_v42 }
 0xc63   : > { %3429 = vmatpush1.bf16.msra.mxu1 %v3204_v57  ;;  %v2921_v17 = vmul.f32 %v5617_v32, %v2898_v55  ;;  %v6171_v53 = vld [vmem:[%s12058_s7 + $0x2c] ss:$20 sps:$4 sm:$0xff]   ;;  %v2965_v42 = vsel %vm700_vm4, %v8772_v52, %v8740_v36  ;;  %v3216_v6 = vpack.c.bf16 %v8331_v10, %v8326_v49  ;;  %v2966_v49 = vsel %vm700_vm4, %v8932_v8, %v8898_v4 }
 0xc64   : > { %v9062_v51 = vpop.permute.xlu0 %2990  ;;  %3284 = vperm.xlu1 %6111, %v2666_v26   ;;  %3430 = vmatprep.subr.bf16.mxu1 %v3207_v3  ;;  %v12159_v30 = vld [vmem:[#allocation17_spill] sm:$0xff]  ;;  %v12162_v32 = vld [vmem:[#allocation10_spill] sm:$0xff]  ;;  %v2957_v10 = vsel %vm700_vm4, %v8740_v36, %v8772_v52  ;;  %v3218_v36 = vpack.c.bf16 %v8375_v46, %v8370_v45  ;;  %v2958_v52 = vsel %vm700_vm4, %v8898_v4, %v8932_v8  ;;  %v6408_v45 = vld [vmem:[%s12053_s2 + $0x290] sm:$0xff] }
 0xc65   : > { %v3212_v28 = vpack.c.bf16 %v8243_v61, %v12159_v30  ;;  %v12161_v7 = vld [vmem:[#allocation9_spill] sm:$0xff]  ;;  %v3214_v61 = vpack.c.bf16 %v8287_v48, %v8282_v5  ;;  %v6174_v5 = vld [vmem:[%s12058_s7 + $0x54] ss:$20 sps:$4 sm:$0xff]   ;;  %v2974_v46 = vmul.f32 %v6408_v45, %v2957_v10  ;;  %v2968_v4 = vsel %vm700_vm4, %v9009_v1, %v8974_v43  ;;  %v6177_v8 = vld [vmem:[%s12058_s7 + $0x7c] ss:$20 sps:$4 sm:$0xff]  }
 0xc66   : > { %3289 = vperm.xlu0 %6110, %v2667_v20   ;;  %v9070_v35 = vpop.permute.xlu1 %2952  ;;  %v12157_v20 = vld [vmem:[#allocation8_spill] sm:$0xff]  ;;  %v6415_v10 = vld [vmem:[%s12053_s2 + $0x2d0] sm:$0xff] }
 0xc67   : > { %3431 = vmatpush1.bf16.msra.mxu1 %v3206_v41 }
 0xc68   : > { %v2891_v57 = vpop.permute.xlu0 %2890  ;;  %3847 = vrot.lane.b32.xlu1 %v12154_v21, %s6668_s25  ;;  %3432 = vmatprep.subr.bf16.mxu1 %v3209_v24  ;;  %v3215_v24 = vpack.c.bf16 %v8309_v18, %v8304_v12  ;;  %v6173_v12 = vld [vmem:[%s12058_s7 + $0x28] ss:$20 sps:$4 sm:$0xff]   ;;  %v2964_v18 = vsel %vm700_vm4, %v8862_v60, %v8829_v2 }
 0xc69   : > { %v2899_v0 = vsel %vm634_vm3, %v8706_v33, %v2891_v57  ;;  %v2907_v47 = vsel %vm634_vm3, %v2891_v57, %v8706_v33 }
 0xc6a   : > { %v2922_v59 = vmul.f32 %v5618_v19, %v2907_v47  ;;  %v2923_v26 = vmul.f32 %v5619_v44, %v2899_v0  ;;  %3849 = vrot.lane.b32.xlu0 %v12155_v31, %s6668_s25  ;;  %v9102_v16 = vpop.permute.xlu1 %2988  ;;  %v2956_v19 = vsel %vm700_vm4, %v8829_v2, %v8862_v60  ;;  %v6404_v44 = vld [vmem:[%s12053_s2 + $0x288] sm:$0xff]  ;;  %v3219_v0 = vpack.c.bf16 %v8393_v62, %v8388_v58  ;;  %v6405_v2 = vld [vmem:[%s12053_s2 + $0x298] sm:$0xff]  ;;  %v6406_v58 = vld [vmem:[%s12053_s2 + $0x280] sm:$0xff] }
 0xc6b   : > { %3433 = vmatpush1.bf16.msra.mxu1 %v3208_v50  ;;  %v2973_v57 = vmul.f32 %v6404_v44, %v2964_v18  ;;  %v2975_v60 = vmul.f32 %v6405_v2, %v2965_v42  ;;  %v2972_v62 = vmul.f32 %v6406_v58, %v2956_v19  ;;  %v6412_v42 = vld [vmem:[%s12053_s2 + $0x2b0] sm:$0xff]  ;;  %v2961_v19 = vsel %vm700_vm4, %v8910_v29, %v8990_v39  ;;  %v6414_v44 = vld [vmem:[%s12053_s2 + $0x2c0] sm:$0xff] }
 0xc6c   : > { %v3210_v27 = vpack.c.bf16 %v2922_v59, %v2920_v54  ;;  %v9104_v3 = vpop.permute.xlu0 %3006  ;;  %3863 = vrot.lane.b32.xlu1 %v12156_v56, %s6668_s25  ;;  %v3211_v63 = vpack.c.bf16 %v2923_v26, %v2921_v17  ;;  %v2967_v54 = vsel %vm700_vm4, %v8878_v25, %v8842_v34  ;;  %v6407_v17 = vld [vmem:[%s12053_s2 + $0x2a8] sm:$0xff]  ;;  %v2982_v2 = vmul.f32 %v6415_v10, %v2961_v19 }
 0xc6d   : > { %v2977_v59 = vmul.f32 %v6407_v17, %v2966_v49  ;;  %v2970_v58 = vsel %vm700_vm4, %v9070_v35, %v9047_v23  ;;  %v5634_v17 = vld [vmem:[%s12053_s2 + $0x2f0] sm:$0xff] }
 0xc6e   : > { %3865 = vrot.lane.b32.xlu0 %v12157_v20, %s6668_s25  ;;  %3434 = vmatprep.subr.bf16.mxu1 %v3211_v63  ;;  %v9110_v33 = vpop.permute.xlu1 %3004  ;;  %v6176_v63 = vld [vmem:[%s12058_s7 + $0x50] ss:$20 sps:$4 sm:$0xff]  }
 0xc6f   : > { %3435 = vmatpush1.bf16.msra.mxu1 %v3210_v27  ;;  %v3221_v27 = vpack.c.bf16 %v2975_v60, %v2973_v57  ;;  %v5633_v60 = vld [vmem:[%s12053_s2 + $0x2e8] sm:$0xff] }
 0xc70   : > { %v9120_v41 = vpop.permute.xlu0 %2994  ;;  %3851 = vrot.lane.b32.xlu1 %v12158_v38, %s6668_s25  ;;  %3477 = vmatprep.subr.bf16.mxu1 %v3213_v11  ;;  %v2959_v11 = vsel %vm700_vm4, %v8842_v34, %v8878_v25  ;;  %v2960_v34 = vsel %vm700_vm4, %v8974_v43, %v9009_v1  ;;  %v6411_v25 = vld [vmem:[%s12053_s2 + $0x2c8] sm:$0xff]  ;;  %v6413_v43 = vld [vmem:[%s12053_s2 + $0x2d8] sm:$0xff]  ;;  %v2985_v45 = vmul.f32 %v5633_v60, %v2970_v58 }
 0xc71   : > { %v2980_v57 = vmul.f32 %v6414_v44, %v2960_v34  ;;  %v6420_v44 = vld [vmem:[%s12053_s2 + $0x310] sm:$0xff] }
 0xc72   : > { %3853 = vrot.lane.b32.xlu0 %v12160_v13, %s6668_s25  ;;  %v9128_v40 = vpop.permute.xlu1 %2992  ;;  %3437 = vmatmul.mubr.bf16.vlgmr.msra.gmra.mrb[48].mxu1 %v6168_v22  ;;  %v6409_v22 = vld [vmem:[%s12053_s2 + $0x2b8] sm:$0xff] }
 0xc73   : > { %3478 = vmatpush1.bf16.msra.mxu1 %v3212_v28  ;;  %3446 = vmatprep.mubr.bf16.mxu1 %v6171_v53  ;;  %v2979_v53 = vmul.f32 %v6409_v22, %v2967_v54  ;;  %v3220_v28 = vpack.c.bf16 %v2974_v46, %v2972_v62  ;;  %v3029_v46 = vsel %vm766_vm5, %v9104_v3, %v9062_v51  ;;  %v6416_v22 = vld [vmem:[%s12053_s2 + $0x308] sm:$0xff] }
 0xc74   : > { %v9132_v9 = vpop.permute.xlu0 %3010  ;;  %3867 = vrot.lane.b32.xlu1 %v12161_v7, %s6668_s25  ;;  %3479 = vmatprep.subr.bf16.mxu1 %v3215_v24  ;;  %v6410_v24 = vld [vmem:[%s12053_s2 + $0x2a0] sm:$0xff] }
 0xc76   : > { %3869 = vrot.lane.b32.xlu0 %v12162_v32, %s6668_s25  ;;  %v9140_v55 = vpop.permute.xlu1 %3008 }
 0xc77   : > { %3480 = vmatpush1.bf16.msra.mxu1 %v3214_v61  ;;  %v2976_v61 = vmul.f32 %v6410_v24, %v2958_v52  ;;  %v3028_v52 = vsel %vm766_vm5, %v9110_v33, %v9102_v16 }
 0xc78   : > { %v9154_v48 = vpop.permute.xlu0 %2998  ;;  %3911 = vrot.lane.b32.xlu1 %v12154_v21, %s6669_s26  ;;  %3481 = vmatprep.subr.bf16.mxu1 %v3217_v37  ;;  %v2969_v37 = vsel %vm700_vm4, %v8990_v39, %v8910_v29  ;;  %v5632_v29 = vld [vmem:[%s12053_s2 + $0x2e0] sm:$0xff]  ;;  %v2962_v39 = vsel %vm700_vm4, %v9047_v23, %v9070_v35  ;;  %v5635_v23 = vld [vmem:[%s12053_s2 + $0x2f8] sm:$0xff] }
 0xc79   : > { %v2983_v1 = vmul.f32 %v6413_v43, %v2969_v37  ;;  %v6182_v35 = vld [vmem:[%s12058_s7 + $0xc] ss:$20 sps:$4 sm:$0xff]  }
 0xc7a   : > { %v9171_v50 = vpop.permute.xlu1 %2996  ;;  %3447 = vmatmul.mubr.bf16.gmra.mrb[52].mxu1 %v6173_v12  ;;  %v2981_v12 = vmul.f32 %v6411_v25, %v2968_v4 }
 0xc7b   : > { %3482 = vmatpush1.bf16.msra.mxu1 %v3216_v6  ;;  %3456 = vmatprep.mubr.bf16.mxu1 %v6174_v5  ;;  %v3223_v5 = vpack.c.bf16 %v2979_v53, %v2977_v59  ;;  %v2978_v6 = vmul.f32 %v6412_v42, %v2959_v11  ;;  %v3224_v59 = vpack.c.bf16 %v2982_v2, %v2980_v57  ;;  %v6422_v2 = vld [vmem:[%s12053_s2 + $0x320] sm:$0xff] }
 0xc7c   : > { %v9186_v47 = vpop.permute.xlu0 %3014  ;;  %3483 = vmatprep.subr.bf16.mxu1 %v3219_v0  ;;  %v3225_v54 = vpack.c.bf16 %v2983_v1, %v2981_v12  ;;  %v3020_v11 = vsel %vm766_vm5, %v9102_v16, %v9110_v33  ;;  %v3037_v53 = vmul.f32 %v6416_v22, %v3028_v52  ;;  %v3021_v16 = vsel %vm766_vm5, %v9062_v51, %v9104_v3  ;;  %v6417_v33 = vld [vmem:[%s12053_s2 + $0x318] sm:$0xff]  ;;  %v6419_v3 = vld [vmem:[%s12053_s2 + $0x328] sm:$0xff] }
 0xc7d   : > { %v3222_v49 = vpack.c.bf16 %v2978_v6, %v2976_v61  ;;  %v3039_v37 = vmul.f32 %v6417_v33, %v3029_v46  ;;  %v3031_v6 = vsel %vm766_vm5, %v9132_v9, %v9120_v41  ;;  %v3022_v51 = vsel %vm766_vm5, %v9128_v40, %v9140_v55  ;;  %v5648_v46 = vld [vmem:[%s12053_s2 + $0x360] sm:$0xff] }
 0xc7e   : > { %v9204_v26 = vpop.permute.xlu1 %3012  ;;  %v3038_v57 = vmul.f32 %v6420_v44, %v3021_v16  ;;  %v3040_v60 = vmul.f32 %v6422_v2, %v3022_v51  ;;  %v3033_v58 = vsel %vm766_vm5, %v9186_v47, %v9154_v48 }
 0xc7f   : > { %3484 = vmatpush1.bf16.msra.mxu1 %v3218_v36  ;;  %v6179_v36 = vld [vmem:[%s12058_s7 + $0x78] ss:$20 sps:$4 sm:$0xff]   ;;  %v3229_v1 = vpack.c.bf16 %v3039_v37, %v3037_v53 }
 0xc80   : > { %v9226_v30 = vpop.permute.xlu0 %3002  ;;  %3485 = vmatprep.subr.bf16.mxu1 %v3221_v27  ;;  %v2984_v27 = vmul.f32 %v5632_v29, %v2962_v39 }
 0xc82   : > { %v9242_v18 = vpop.permute.xlu1 %3000  ;;  %3457 = vmatmul.mubr.bf16.gmra.mrb[56].mxu1 %v6176_v63 }
 0xc83   : > { %3486 = vmatpush1.bf16.msra.mxu1 %v3220_v28  ;;  %3466 = vmatprep.mubr.bf16.mxu1 %v6177_v8 }
 0xc84   : > { %v9257_v0 = vpop.permute.xlu0 %3054  ;;  %3487 = vmatprep.subr.bf16.mxu1 %v3223_v5  ;;  %v6418_v5 = vld [vmem:[%s12053_s2 + $0x300] sm:$0xff] }
 0xc85   : > { %v3036_v42 = vmul.f32 %v6418_v5, %v3020_v11 }
 0xc86   : > { %v9276_v62 = vpop.permute.xlu1 %3016 }
 0xc87   : > { %3488 = vmatpush1.bf16.msra.mxu1 %v3222_v49  ;;  %v3032_v49 = vsel %vm766_vm5, %v9204_v26, %v9171_v50  ;;  %v3228_v10 = vpack.c.bf16 %v3038_v57, %v3036_v42  ;;  %v3034_v11 = vsel %vm766_vm5, %v9276_v62, %v9242_v18  ;;  %v6428_v42 = vld [vmem:[%s12053_s2 + $0x388] sm:$0xff] }
 0xc88   : > { %v2955_v63 = vpop.permute.xlu0 %2954  ;;  %3489 = vmatprep.subr.bf16.mxu1 %v3225_v54 }
 0xc89   : > { %v2963_v4 = vsel %vm700_vm4, %v9028_v15, %v2955_v63  ;;  %v2971_v8 = vsel %vm700_vm4, %v2955_v63, %v9028_v15  ;;  %v3030_v15 = vsel %vm766_vm5, %v9140_v55, %v9128_v40  ;;  %v3023_v40 = vsel %vm766_vm5, %v9120_v41, %v9132_v9  ;;  %v6421_v55 = vld [vmem:[%s12053_s2 + $0x338] sm:$0xff]  ;;  %v6423_v9 = vld [vmem:[%s12053_s2 + $0x348] sm:$0xff] }
 0xc8a   : > { %v2986_v28 = vmul.f32 %v5634_v17, %v2963_v4  ;;  %v2987_v24 = vmul.f32 %v5635_v23, %v2971_v8  ;;  %v9311_v61 = vpop.permute.xlu1 %3052  ;;  %3467 = vmatmul.mubr.bf16.gmra.mrb[60].mxu1 %v6179_v36  ;;  %v3041_v19 = vmul.f32 %v6419_v3, %v3030_v15  ;;  %v3043_v29 = vmul.f32 %v6421_v55, %v3031_v6  ;;  %v6424_v17 = vld [vmem:[%s12053_s2 + $0x330] sm:$0xff]  ;;  %v5649_v8 = vld [vmem:[%s12053_s2 + $0x368] sm:$0xff]  ;;  %v5651_v15 = vld [vmem:[%s12053_s2 + $0x378] sm:$0xff] }
 0xc8b   : > { %3490 = vmatpush1.bf16.msra.mxu1 %v3224_v59  ;;  %3509 = vmatprep.mubr.bf16.mxu1 %v6182_v35  ;;  %v3024_v41 = vsel %vm766_vm5, %v9171_v50, %v9204_v26  ;;  %v3045_v54 = vmul.f32 %v6423_v9, %v3032_v49  ;;  %v3042_v23 = vmul.f32 %v6424_v17, %v3023_v40  ;;  %v6425_v50 = vld [vmem:[%s12053_s2 + $0x358] sm:$0xff]  ;;  %v6426_v59 = vld [vmem:[%s12053_s2 + $0x340] sm:$0xff] }
 0xc8c   : > { %v3226_v34 = vpack.c.bf16 %v2986_v28, %v2984_v27  ;;  %v9324_v25 = vpop.permute.xlu0 %3070  ;;  %v3227_v12 = vpack.c.bf16 %v2987_v24, %v2985_v45  ;;  %v3231_v52 = vpack.c.bf16 %v3043_v29, %v3041_v19  ;;  %v3025_v35 = vsel %vm766_vm5, %v9154_v48, %v9186_v47  ;;  %v6427_v47 = vld [vmem:[%s12053_s2 + $0x350] sm:$0xff]  ;;  %v6430_v40 = vld [vmem:[%s12053_s2 + $0x380] sm:$0xff] }
 0xc8d   : > { %v3047_v26 = vmul.f32 %v6425_v50, %v3033_v58  ;;  %v3044_v27 = vmul.f32 %v6426_v59, %v3024_v41  ;;  %v3230_v45 = vpack.c.bf16 %v3042_v23, %v3040_v60  ;;  %v3026_v48 = vsel %vm766_vm5, %v9242_v18, %v9276_v62  ;;  %v5650_v24 = vld [vmem:[%s12053_s2 + $0x370] sm:$0xff]  ;;  %v6434_v23 = vld [vmem:[%s12053_s2 + $0x3a0] sm:$0xff]  ;;  %v6435_v59 = vld [vmem:[%s12053_s2 + $0x3d8] sm:$0xff] }
 0xc8e   : > { %3491 = vmatprep.subr.bf16.mxu1 %v3227_v12  ;;  %v3069_v43 = vpop.permute.xlu1 %3068  ;;  %v3046_v4 = vmul.f32 %v6427_v47, %v3025_v35  ;;  %v3048_v33 = vmul.f32 %v5648_v46, %v3026_v48  ;;  %v3049_v18 = vmul.f32 %v5649_v8, %v3034_v11  ;;  %v3093_v62 = vsel %vm832_vm7, %v9324_v25, %v9257_v0  ;;  %v6432_v58 = vld [vmem:[%s12053_s2 + $0x390] sm:$0xff] }
 0xc8f   : > { %3492 = vmatpush1.bf16.msra.mxu1 %v3226_v34  ;;  %v3233_v53 = vpack.c.bf16 %v3047_v26, %v3045_v54  ;;  %v3092_v28 = vsel %vm832_vm7, %v3069_v43, %v9311_v61  ;;  %v3084_v5 = vsel %vm832_vm7, %v9311_v61, %v3069_v43  ;;  %v6429_v61 = vld [vmem:[%s12053_s2 + $0x398] sm:$0xff]  ;;  %v6436_v46 = vld [vmem:[%s12053_s2 + $0x3b0] sm:$0xff] }
 0xc90   : > { %v9354_v39 = vpop.permute.xlu0 %3058  ;;  %3493 = vmatprep.subr.bf16.mxu1 %v3229_v1  ;;  %v3232_v16 = vpack.c.bf16 %v3046_v4, %v3044_v27  ;;  %v3101_v6 = vmul.f32 %v6428_v42, %v3092_v28  ;;  %v3103_v43 = vmul.f32 %v6429_v61, %v3093_v62  ;;  %v3100_v55 = vmul.f32 %v6430_v40, %v3084_v5  ;;  %v6433_v54 = vld [vmem:[%s12053_s2 + $0x3b8] sm:$0xff]  ;;  %v6437_v4 = vld [vmem:[%s12053_s2 + $0x3c8] sm:$0xff] }
 0xc91   : > { %v5667_v5 = vld [vmem:[%s12053_s2 + $0x3f8] sm:$0xff] }
 0xc92   : > { %v3057_v36 = vpop.permute.xlu1 %3056  ;;  %v3237_v60 = vpack.c.bf16 %v3103_v43, %v3101_v6 }
 0xc93   : > { %3494 = vmatpush1.bf16.msra.mxu1 %v3228_v10 }
 0xc94   : > { %v3075_v63 = vpop.permute.xlu0 %3074  ;;  %3495 = vmatprep.subr.bf16.mxu1 %v3231_v52 }
 0xc95   : > { %v3095_v29 = vsel %vm832_vm7, %v3075_v63, %v9354_v39  ;;  %v3087_v9 = vsel %vm832_vm7, %v9354_v39, %v3075_v63 }
 0xc96   : > { %v3073_v22 = vpop.permute.xlu1 %3072  ;;  %v3106_v48 = vmul.f32 %v6436_v46, %v3087_v9  ;;  %v6441_v9 = vld [vmem:[%s12053_s2 + $0x408] sm:$0xff]  ;;  %v6186_v46 = vld [vmem:[%s12058_s7 + $0x5c] ss:$20 sps:$4 sm:$0xff]  }
 0xc97   : > { %3496 = vmatpush1.bf16.msra.mxu1 %v3230_v45  ;;  %v3094_v1 = vsel %vm832_vm7, %v3073_v22, %v3057_v36 }
 0xc98   : > { %v3019_v37 = vpop.permute.xlu0 %3018  ;;  %3497 = vmatprep.subr.bf16.mxu1 %v3233_v53  ;;  %v6438_v53 = vld [vmem:[%s12053_s2 + $0x3d0] sm:$0xff] }
 0xc99   : > { %v3027_v34 = vsel %vm766_vm5, %v9226_v30, %v3019_v37  ;;  %v3035_v12 = vsel %vm766_vm5, %v3019_v37, %v9226_v30  ;;  %v3085_v30 = vsel %vm832_vm7, %v9257_v0, %v9324_v25  ;;  %v3086_v0 = vsel %vm832_vm7, %v3057_v36, %v3073_v22  ;;  %v6431_v25 = vld [vmem:[%s12053_s2 + $0x3a8] sm:$0xff] }
 0xc9a   : > { %v3050_v51 = vmul.f32 %v5650_v24, %v3027_v34  ;;  %v3051_v3 = vmul.f32 %v5651_v15, %v3035_v12  ;;  %v3061_v19 = vpop.permute.xlu1 %3060  ;;  %v3105_v10 = vmul.f32 %v6431_v25, %v3094_v1  ;;  %v3102_v41 = vmul.f32 %v6432_v58, %v3085_v30  ;;  %v5664_v24 = vld [vmem:[%s12053_s2 + $0x3e0] sm:$0xff]  ;;  %v5666_v12 = vld [vmem:[%s12053_s2 + $0x3f0] sm:$0xff] }
 0xc9b   : > { %3498 = vmatpush1.bf16.msra.mxu1 %v3232_v16  ;;  %v3107_v36 = vmul.f32 %v6433_v54, %v3095_v29  ;;  %v3104_v35 = vmul.f32 %v6434_v23, %v3086_v0  ;;  %v6183_v25 = vld [vmem:[%s12058_s7 + $0x34] ss:$20 sps:$4 sm:$0xff]   ;;  %v6440_v58 = vld [vmem:[%s12053_s2 + $0x400] sm:$0xff] }
 0xc9c   : > { %v3234_v44 = vpack.c.bf16 %v3050_v51, %v3048_v33  ;;  %v3063_v57 = vpop.permute.xlu0 %3062  ;;  %v3235_v49 = vpack.c.bf16 %v3051_v3, %v3049_v18  ;;  %v3236_v17 = vpack.c.bf16 %v3102_v41, %v3100_v55  ;;  %v6439_v33 = vld [vmem:[%s12053_s2 + $0x3c0] sm:$0xff]  ;;  %v5665_v18 = vld [vmem:[%s12053_s2 + $0x3e8] sm:$0xff] }
 0xc9d   : > { %v3239_v45 = vpack.c.bf16 %v3107_v36, %v3105_v10  ;;  %v3238_v22 = vpack.c.bf16 %v3106_v48, %v3104_v35  ;;  %v6180_v55 = vld [vmem:[%s12058_s7 + $0x8] ss:$20 sps:$4 sm:$0xff]   ;;  %v6442_v36 = vld [vmem:[%s12053_s2 + $0x410] sm:$0xff] }
 0xc9e   : > { %3499 = vmatprep.subr.bf16.mxu1 %v3235_v49  ;;  %v3077_v2 = vpop.permute.xlu1 %3076 }
 0xc9f   : > { %3500 = vmatpush1.bf16.msra.mxu1 %v3234_v44  ;;  %v3096_v50 = vsel %vm832_vm7, %v3077_v2, %v3061_v19  ;;  %v3088_v47 = vsel %vm832_vm7, %v3061_v19, %v3077_v2 }
 0xca0   : > { %v3079_v52 = vpop.permute.xlu0 %3078  ;;  %3501 = vmatprep.subr.bf16.mxu1 %v3237_v60  ;;  %v3109_v8 = vmul.f32 %v6437_v4, %v3096_v50  ;;  %v3108_v37 = vmul.f32 %v6439_v33, %v3088_v47 }
 0xca1   : > { %v3097_v26 = vsel %vm832_vm7, %v3079_v52, %v3063_v57  ;;  %v3089_v39 = vsel %vm832_vm7, %v3063_v57, %v3079_v52 }
 0xca2   : > { %v3111_v27 = vmul.f32 %v6435_v59, %v3097_v26  ;;  %v3065_v63 = vpop.permute.xlu1 %3064  ;;  %v3110_v28 = vmul.f32 %v6438_v53, %v3089_v39 }
 0xca3   : > { %3502 = vmatpush1.bf16.msra.mxu1 %v3236_v17  ;;  %v6443_v17 = vld [vmem:[%s12053_s2 + $0x418] sm:$0xff] }
 0xca4   : > { %v3067_v11 = vpop.permute.xlu0 %3066  ;;  %3503 = vmatprep.subr.bf16.mxu1 %v3239_v45  ;;  %v3241_v16 = vpack.c.bf16 %v3111_v27, %v3109_v8  ;;  %v3240_v6 = vpack.c.bf16 %v3110_v28, %v3108_v37  ;;  %v6185_v27 = vld [vmem:[%s12058_s7 + $0x30] ss:$20 sps:$4 sm:$0xff]  }
 0xca5   : > { %v6444_v8 = vld [vmem:[%s12053_s2 + $0x420] sm:$0xff]  ;;  %v6446_v28 = vld [vmem:[%s12053_s2 + $0x430] sm:$0xff] }
 0xca6   : > { %v3081_v15 = vpop.permute.xlu1 %3080 }
 0xca7   : > { %v3090_v62 = vsel %vm832_vm7, %v3065_v63, %v3081_v15  ;;  %v3098_v34 = vsel %vm832_vm7, %v3081_v15, %v3065_v63  ;;  %3504 = vmatpush1.bf16.msra.mxu1 %v3238_v22  ;;  %v6445_v22 = vld [vmem:[%s12053_s2 + $0x428] sm:$0xff]  ;;  %v6447_v15 = vld [vmem:[%s12053_s2 + $0x438] sm:$0xff] }
 0xca8   : > { %v3083_v42 = vpop.permute.xlu0 %3082  ;;  %3505 = vmatprep.subr.bf16.mxu1 %v3241_v16  ;;  %v3112_v19 = vmul.f32 %v5664_v24, %v3090_v62  ;;  %v3113_v1 = vmul.f32 %v5665_v18, %v3098_v34 }
 0xca9   : > { %v3091_v51 = vsel %vm832_vm7, %v3067_v11, %v3083_v42  ;;  %v3099_v3 = vsel %vm832_vm7, %v3083_v42, %v3067_v11 }
 0xcaa   : > { %v3114_v30 = vmul.f32 %v5666_v12, %v3091_v51  ;;  %v3115_v61 = vmul.f32 %v5667_v5, %v3099_v3  ;;  %v3117_v43 = vpop.permute.xlu1 %3116  ;;  %v6188_v12 = vld [vmem:[%s12058_s7 + $0x58] ss:$20 sps:$4 sm:$0xff]  }
 0xcab   : > { %3506 = vmatpush1.bf16.msra.mxu1 %v3240_v6  ;;  %v6189_v6 = vld [vmem:[%s12058_s7 + $0x84] ss:$20 sps:$4 sm:$0xff]  }
 0xcac   : > { %v3242_v44 = vpack.c.bf16 %v3114_v30, %v3112_v19  ;;  %v3119_v57 = vpop.permute.xlu0 %3118  ;;  %v3243_v49 = vpack.c.bf16 %v3115_v61, %v3113_v1  ;;  %v6448_v1 = vld [vmem:[%s12053_s2 + $0x440] sm:$0xff]  ;;  %v6449_v61 = vld [vmem:[%s12053_s2 + $0x448] sm:$0xff] }
 0xcae   : > { %3507 = vmatprep.subr.bf16.mxu1 %v3243_v49  ;;  %v3133_v40 = vpop.permute.xlu1 %3132  ;;  %v6451_v49 = vld [vmem:[%s12053_s2 + $0x458] sm:$0xff] }
 0xcaf   : > { %v3148_v29 = vsel %vm898_vm8, %v3117_v43, %v3133_v40  ;;  %v3156_v0 = vsel %vm898_vm8, %v3133_v40, %v3117_v43  ;;  %3508 = vmatpush1.bf16.msra.mxu1 %v3242_v44  ;;  %v6450_v44 = vld [vmem:[%s12053_s2 + $0x450] sm:$0xff] }
 0xcb0   : > { %v3135_v10 = vpop.permute.xlu0 %3134  ;;  %v3164_v41 = vmul.f32 %v6440_v58, %v3148_v29  ;;  %v3165_v54 = vmul.f32 %v6441_v9, %v3156_v0  ;;  %v5681_v58 = vld [vmem:[%s12053_s2 + $0x468] sm:$0xff] }
 0xcb1   : > { %v3149_v2 = vsel %vm898_vm8, %v3119_v57, %v3135_v10  ;;  %v3157_v60 = vsel %vm898_vm8, %v3135_v10, %v3119_v57  ;;  %v5680_v10 = vld [vmem:[%s12053_s2 + $0x460] sm:$0xff] }
 0xcb2   : > { %v3166_v52 = vmul.f32 %v6442_v36, %v3149_v2  ;;  %v3167_v23 = vmul.f32 %v6443_v17, %v3157_v60  ;;  %3510 = vmatmul.mubr.bf16.vlgmr.msra.gmra.mrb[48].mxu1 %v6180_v55  ;;  %v3121_v35 = vpop.permute.xlu1 %3120  ;;  %v6191_v60 = vld [vmem:[%s12058_s7 + $0x80] ss:$20 sps:$4 sm:$0xff]   ;;  %v5683_v36 = vld [vmem:[%s12053_s2 + $0x478] sm:$0xff] }
 0xcb3   : > { %3519 = vmatprep.mubr.bf16.mxu1 %v6183_v25 }
 0xcb4   : > { %v3244_v50 = vpack.c.bf16 %v3166_v52, %v3164_v41  ;;  %v3123_v26 = vpop.permute.xlu0 %3122  ;;  %v3245_v39 = vpack.c.bf16 %v3167_v23, %v3165_v54  ;;  %v5682_v54 = vld [vmem:[%s12053_s2 + $0x470] sm:$0xff] }
 0xcb6   : > { %3550 = vmatprep.subr.bf16.mxu1 %v3245_v39  ;;  %v3137_v59 = vpop.permute.xlu1 %3136 }
 0xcb7   : > { %v3150_v63 = vsel %vm898_vm8, %v3121_v35, %v3137_v59  ;;  %v3158_v45 = vsel %vm898_vm8, %v3137_v59, %v3121_v35  ;;  %3551 = vmatpush1.bf16.msra.mxu1 %v3244_v50  ;;  %v12163_v59 = vmov 0  }
 0xcb8   : > { %v3139_v48 = vpop.permute.xlu0 %3138  ;;  %v3168_v11 = vmul.f32 %v6444_v8, %v3150_v63  ;;  %v3169_v53 = vmul.f32 %v6445_v22, %v3158_v45  ;;  %v6192_v45 = vld [vmem:[%s12058_s7 + $0x10] ss:$20 sps:$4 sm:$0xff]  }
 0xcb9   : > { %v3151_v47 = vsel %vm898_vm8, %v3123_v26, %v3139_v48  ;;  %v3159_v4 = vsel %vm898_vm8, %v3139_v48, %v3123_v26  ;;  %v6194_v48 = vld [vmem:[%s12058_s7 + $0x60] ss:$20 sps:$4 sm:$0xff]  }
 0xcba   : > { %v3170_v24 = vmul.f32 %v6446_v28, %v3151_v47  ;;  %v3171_v16 = vmul.f32 %v6447_v15, %v3159_v4  ;;  %3520 = vmatmul.mubr.bf16.gmra.mrb[52].mxu1 %v6185_v27  ;;  %v3125_v33 = vpop.permute.xlu1 %3124  ;;  %v6195_v47 = vld [vmem:[%s12058_s7 + $0x88] ss:$20 sps:$4 sm:$0xff]  }
 0xcbb   : > { %3529 = vmatprep.mubr.bf16.mxu1 %v6186_v46  ;;  %v6193_v46 = vld [vmem:[%s12058_s7 + $0x38] ss:$20 sps:$4 sm:$0xff]  }
 0xcbc   : > { %v3246_v37 = vpack.c.bf16 %v3170_v24, %v3168_v11  ;;  %v3127_v18 = vpop.permute.xlu0 %3126  ;;  %v3247_v62 = vpack.c.bf16 %v3171_v16, %v3169_v53 }
 0xcbe   : > { %3552 = vmatprep.subr.bf16.mxu1 %v3247_v62  ;;  %v3141_v34 = vpop.permute.xlu1 %3140 }
 0xcbf   : > { %v3152_v5 = vsel %vm898_vm8, %v3125_v33, %v3141_v34  ;;  %v3160_v42 = vsel %vm898_vm8, %v3141_v34, %v3125_v33  ;;  %3553 = vmatpush1.bf16.msra.mxu1 %v3246_v37 }
 0xcc0   : > { %v3143_v51 = vpop.permute.xlu0 %3142  ;;  %v3172_v30 = vmul.f32 %v6448_v1, %v3152_v5  ;;  %v3173_v43 = vmul.f32 %v6449_v61, %v3160_v42 }
 0xcc1   : > { %v3153_v3 = vsel %vm898_vm8, %v3127_v18, %v3143_v51  ;;  %v3161_v19 = vsel %vm898_vm8, %v3143_v51, %v3127_v18 }
 0xcc2   : > { %v3174_v57 = vmul.f32 %v6450_v44, %v3153_v3  ;;  %v3175_v40 = vmul.f32 %v6451_v49, %v3161_v19  ;;  %3530 = vmatmul.mubr.bf16.gmra.mrb[56].mxu1 %v6188_v12  ;;  %v3129_v55 = vpop.permute.xlu1 %3128 }
 0xcc3   : > { %3539 = vmatprep.mubr.bf16.mxu1 %v6189_v6 }
 0xcc4   : > { %v3248_v29 = vpack.c.bf16 %v3174_v57, %v3172_v30  ;;  %v3131_v0 = vpop.permute.xlu0 %3130  ;;  %v3249_v25 = vpack.c.bf16 %v3175_v40, %v3173_v43 }
 0xcc6   : > { %3554 = vmatprep.subr.bf16.mxu1 %v3249_v25  ;;  %v3145_v2 = vpop.permute.xlu1 %3144 }
 0xcc7   : > { %v3154_v41 = vsel %vm898_vm8, %v3129_v55, %v3145_v2  ;;  %v3162_v9 = vsel %vm898_vm8, %v3145_v2, %v3129_v55  ;;  %3555 = vmatpush1.bf16.msra.mxu1 %v3248_v29 }
 0xcc8   : > { %v3147_v52 = vpop.permute.xlu0 %3146  ;;  %v3176_v35 = vmul.f32 %v5680_v10, %v3154_v41  ;;  %v3177_v50 = vmul.f32 %v5681_v58, %v3162_v9 }
 0xcc9   : > { %v3155_v17 = vsel %vm898_vm8, %v3131_v0, %v3147_v52  ;;  %v3163_v23 = vsel %vm898_vm8, %v3147_v52, %v3131_v0 }
 0xcca   : > { %v3178_v26 = vmul.f32 %v5682_v54, %v3155_v17  ;;  %v3179_v39 = vmul.f32 %v5683_v36, %v3163_v23  ;;  %3540 = vmatmul.mubr.bf16.gmra.mrb[60].mxu1 %v6191_v60 }
 0xccb   : > { %3582 = vmatprep.mubr.bf16.mxu1 %v12163_v59 }
 0xccc   : > { %v3250_v27 = vpack.c.bf16 %v3178_v26, %v3176_v35  ;;  %v3251_v63 = vpack.c.bf16 %v3179_v39, %v3177_v50 }
 0xcce   : > { %3556 = vmatprep.subr.bf16.mxu1 %v3251_v63 }
 0xccf   : > { %3557 = vmatpush1.bf16.msra.mxu1 %v3250_v27 }
 0xcd2   : > { %5790 = vmatmul.mubr.msk.bf16.vlgmr.msra.gmra.mrb[48].mxu1 %vm12103_vm12, %v6192_v45 }
 0xcd3   : > { %3592 = vmatprep.mubr.bf16.mxu1 %v12163_v59 }
 0xcd7   : > { %v3255_v4 = vpop.permute.xlu1 %3254 }
 0xcd9   : > { %v3260_v8 = vpop.permute.xlu0 %3259 }
 0xcda   : > { %5791 = vmatmul.mubr.msk.bf16.gmra.mrb[52].mxu1 %vm12103_vm12, %v6193_v46 }
 0xcdb   : > { %3602 = vmatprep.mubr.bf16.mxu1 %v12163_v59  ;;  %v3275_v28 = vpop.permute.xlu1 %3274 }
 0xcdd   : > { %v3280_v37 = vpop.permute.xlu0 %3279 }
 0xcdf   : > { %v3265_v12 = vpop.permute.xlu1 %3264 }
 0xce1   : > { %v3270_v51 = vpop.permute.xlu0 %3269 }
 0xce2   : > { %5792 = vmatmul.mubr.msk.bf16.gmra.mrb[56].mxu1 %vm12103_vm12, %v6194_v48 }
 0xce3   : > { %3612 = vmatprep.mubr.bf16.mxu1 %v12163_v59  ;;  %v3285_v58 = vpop.permute.xlu1 %3284 }
 0xce5   : > { %v3290_v36 = vpop.permute.xlu0 %3289 }
 0xce7   : > { %v9689_v27 = vpop.permute.xlu1 %3847 }
 0xce9   : > { %v9693_v45 = vpop.permute.xlu0 %3849 }
 0xcea   : > { %5793 = vmatmul.mubr.msk.bf16.gmra.mrb[60].mxu1 %vm12103_vm12, %v6195_v47 }
 0xceb   : > { %v9691_v63 = vpop.permute.xlu1 %3863 }
 0xced   : > { %v9697_v48 = vpop.permute.xlu0 %3865 }
 0xcef   : > { %v9695_v46 = vpop.permute.xlu1 %3851 }
 0xcf3   : > { %v9699_v47 = vpop.permute.xlu1 %3867 }
 0xda5   : > { %v3584_v11 = vpop.f32.mrb[48].mxu1 }
 0xda6   : > { %v9621_v22 = vadd.f32 %v3584_v11, %v3255_v4  ;;  %v3586_v53 = vpop.f32.mrb[49].mxu1 }
 0xda7   : > { %v9623_v24 = vadd.f32 %v3586_v53, %v3255_v4  ;;  %v3588_v15 = vpop.f32.mrb[50].mxu1  ;;  %v9701_v4 = vpop.permute.xlu0 %3853 }
 0xda8   : > { %v9625_v16 = vadd.f32 %v3588_v15, %v3260_v8  ;;  %v3590_v33 = vpop.f32.mrb[51].mxu1 }
 0xda9   : > { %v3623_v18 = vadd.f32 %v9623_v24, %v9621_v22  ;;  %v9629_v62 = vadd.f32 %v3590_v33, %v3260_v8  ;;  %v9703_v8 = vpop.permute.xlu1 %3911 }
 0xdab   : > { %v3626_v34 = vadd.f32 %v9629_v62, %v9625_v16  ;;  %3624 = vadd.xlane.f32.xlu1 %v3623_v18  ;;  %v9705_v11 = vpop.permute.xlu0 %3869 }
 0xdad   : > { %v3594_v5 = vpop.f32.mrb[52].mxu1  ;;  %3627 = vadd.xlane.f32.xlu0 %v3626_v34 }
 0xdae   : > { %v9633_v42 = vadd.f32 %v3594_v5, %v3265_v12  ;;  %v3596_v6 = vpop.f32.mrb[53].mxu1 }
 0xdaf   : > { %v9635_v3 = vadd.f32 %v3596_v6, %v3265_v12  ;;  %v3598_v19 = vpop.f32.mrb[54].mxu1 }
 0xdb0   : > { %v9637_v1 = vadd.f32 %v3598_v19, %v3270_v51  ;;  %v3600_v30 = vpop.f32.mrb[55].mxu1 }
 0xdb1   : > { %v3629_v61 = vadd.f32 %v9635_v3, %v9633_v42  ;;  %v9641_v43 = vadd.f32 %v3600_v30, %v3270_v51 }
 0xdb3   : > { %v3632_v44 = vadd.f32 %v9641_v43, %v9637_v1  ;;  %3630 = vadd.xlane.f32.xlu0 %v3629_v61 }
 0xdb5   : > { %v3604_v57 = vpop.f32.mrb[56].mxu1  ;;  %3633 = vadd.xlane.f32.xlu1 %v3632_v44 }
 0xdb6   : > { %v9645_v49 = vadd.f32 %v3604_v57, %v3275_v28  ;;  %v3606_v40 = vpop.f32.mrb[57].mxu1 }
 0xdb7   : > { %v9647_v55 = vadd.f32 %v3606_v40, %v3275_v28  ;;  %v3608_v29 = vpop.f32.mrb[58].mxu1 }
 0xdb8   : > { %v9649_v0 = vadd.f32 %v3608_v29, %v3280_v37  ;;  %v3610_v25 = vpop.f32.mrb[59].mxu1 }
 0xdb9   : > { %v3635_v10 = vadd.f32 %v9647_v55, %v9645_v49  ;;  %v9653_v2 = vadd.f32 %v3610_v25, %v3280_v37 }
 0xdbb   : > { %v3638_v60 = vadd.f32 %v9653_v2, %v9649_v0  ;;  %3636 = vadd.xlane.f32.xlu0 %v3635_v10 }
 0xdbd   : > { %v3614_v41 = vpop.f32.mrb[60].mxu1  ;;  %3639 = vadd.xlane.f32.xlu1 %v3638_v60 }
 0xdbe   : > { %v9657_v9 = vadd.f32 %v3614_v41, %v3285_v58  ;;  %v3616_v54 = vpop.f32.mrb[61].mxu1 }
 0xdbf   : > { %v9659_v52 = vadd.f32 %v3616_v54, %v3285_v58  ;;  %v3618_v17 = vpop.f32.mrb[62].mxu1 }
 0xdc0   : > { %v9661_v23 = vadd.f32 %v3618_v17, %v3290_v36  ;;  %v3620_v35 = vpop.f32.mrb[63].mxu1 }
 0xdc1   : > { %v3641_v50 = vadd.f32 %v9659_v52, %v9657_v9  ;;  %v9665_v26 = vadd.f32 %v3620_v35, %v3290_v36 }
 0xdc3   : > { %v3644_v39 = vadd.f32 %v9665_v26, %v9661_v23  ;;  %3642 = vadd.xlane.f32.xlu0 %v3641_v50 }
 0xdc5   : > { %3645 = vadd.xlane.f32.xlu1 %v3644_v39 }
 0xdd6   : > { %3927 = vrot.lane.b32.xlu1 %v12156_v56, %s6669_s26 }
 0xdd9   : > { %3913 = vrot.lane.b32.xlu0 %v12155_v31, %s6669_s26 }
 0xdda   : > { %3915 = vrot.lane.b32.xlu1 %v12158_v38, %s6669_s26 }
 0xddd   : > { %3929 = vrot.lane.b32.xlu0 %v12157_v20, %s6669_s26 }
 0xdde   : > { %3931 = vrot.lane.b32.xlu1 %v12161_v7, %s6669_s26 }
 0xde1   : > { %3917 = vrot.lane.b32.xlu0 %v12160_v13, %s6669_s26 }
 0xde2   : > { %3975 = vrot.lane.b32.xlu1 %v12154_v21, %s6670_s27 }
 0xde5   : > { %3933 = vrot.lane.b32.xlu0 %v12162_v32, %s6669_s26 }
 0xde6   : > { %3991 = vrot.lane.b32.xlu1 %v12156_v56, %s6670_s27 }
 0xde9   : > { %3977 = vrot.lane.b32.xlu0 %v12155_v31, %s6670_s27 }
 0xe38   : > { %v3625_v53 = vpop.xlane.xlu1 %3624 }
 0xe39   : > { %v3647_v28 = vmul.f32 0.00390625, %v3625_v53 }
 0xe3a   : > { %v3628_v15 = vpop.xlane.xlu0 %3627 }
 0xe3b   : > { %v9708_v33 = vsub.f32 %v9621_v22, %v3647_v28  ;;  %v9711_v37 = vsub.f32 %v9623_v24, %v3647_v28  ;;  %v3648_v18 = vmul.f32 0.00390625, %v3628_v15 }
 0xe3d   : > { %v3671_v34 = vmul.f32 %v9708_v33, %v9708_v33  ;;  %v3672_v12 = vmul.f32 %v9711_v37, %v9711_v37  ;;  %v9718_v5 = vsub.f32 %v9625_v16, %v3648_v18  ;;  %v9721_v6 = vsub.f32 %v9629_v62, %v3648_v18 }
 0xe3f   : > { %v3673_v22 = vmul.f32 %v9718_v5, %v9718_v5  ;;  %v3674_v24 = vmul.f32 %v9721_v6, %v9721_v6  ;;  %v3687_v51 = vadd.f32 %v3672_v12, %v3671_v34 }
 0xe40   : > { %v3631_v19 = vpop.xlane.xlu0 %3630 }
 0xe41   : > { %v3649_v30 = vmul.f32 0.00390625, %v3631_v19  ;;  %3688 = vadd.xlane.f32.xlu0 %v3687_v51  ;;  %v3690_v61 = vadd.f32 %v3674_v24, %v3673_v22 }
 0xe42   : > { %v3634_v44 = vpop.xlane.xlu1 %3633 }
 0xe43   : > { %v9728_v57 = vsub.f32 %v9633_v42, %v3649_v30  ;;  %v9731_v16 = vsub.f32 %v9635_v3, %v3649_v30  ;;  %v3650_v62 = vmul.f32 0.00390625, %v3634_v44  ;;  %3691 = vadd.xlane.f32.xlu1 %v3690_v61 }
 0xe45   : > { %v3675_v40 = vmul.f32 %v9728_v57, %v9728_v57  ;;  %v3676_v29 = vmul.f32 %v9731_v16, %v9731_v16  ;;  %v9738_v25 = vsub.f32 %v9637_v1, %v3650_v62  ;;  %v9741_v10 = vsub.f32 %v9641_v43, %v3650_v62 }
 0xe47   : > { %v3677_v42 = vmul.f32 %v9738_v25, %v9738_v25  ;;  %v3678_v3 = vmul.f32 %v9741_v10, %v9741_v10  ;;  %v3693_v60 = vadd.f32 %v3676_v29, %v3675_v40 }
 0xe48   : > { %v3637_v58 = vpop.xlane.xlu0 %3636 }
 0xe49   : > { %v3651_v41 = vmul.f32 0.00390625, %v3637_v58  ;;  %3694 = vadd.xlane.f32.xlu0 %v3693_v60  ;;  %v3696_v54 = vadd.f32 %v3678_v3, %v3677_v42 }
 0xe4a   : > { %v3640_v36 = vpop.xlane.xlu1 %3639 }
 0xe4b   : > { %v9748_v17 = vsub.f32 %v9645_v49, %v3651_v41  ;;  %v9751_v1 = vsub.f32 %v9647_v55, %v3651_v41  ;;  %v3652_v43 = vmul.f32 0.00390625, %v3640_v36  ;;  %3697 = vadd.xlane.f32.xlu1 %v3696_v54 }
 0xe4d   : > { %v3679_v35 = vmul.f32 %v9748_v17, %v9748_v17  ;;  %v3680_v50 = vmul.f32 %v9751_v1, %v9751_v1  ;;  %v9758_v39 = vsub.f32 %v9649_v0, %v3652_v43  ;;  %v9761_v53 = vsub.f32 %v9653_v2, %v3652_v43 }
 0xe4f   : > { %v3681_v49 = vmul.f32 %v9758_v39, %v9758_v39  ;;  %v3682_v55 = vmul.f32 %v9761_v53, %v9761_v53  ;;  %v3699_v28 = vadd.f32 %v3680_v50, %v3679_v35 }
 0xe50   : > { %v3643_v15 = vpop.xlane.xlu0 %3642 }
 0xe51   : > { %v3653_v18 = vmul.f32 0.00390625, %v3643_v15  ;;  %3700 = vadd.xlane.f32.xlu0 %v3699_v28  ;;  %v3702_v34 = vadd.f32 %v3682_v55, %v3681_v49 }
 0xe52   : > { %v3646_v12 = vpop.xlane.xlu1 %3645 }
 0xe53   : > { %v9768_v22 = vsub.f32 %v9657_v9, %v3653_v18  ;;  %v9771_v0 = vsub.f32 %v9659_v52, %v3653_v18  ;;  %v3654_v2 = vmul.f32 0.00390625, %v3646_v12  ;;  %3703 = vadd.xlane.f32.xlu1 %v3702_v34 }
 0xe55   : > { %v3683_v24 = vmul.f32 %v9768_v22, %v9768_v22  ;;  %v3684_v51 = vmul.f32 %v9771_v0, %v9771_v0  ;;  %v9778_v19 = vsub.f32 %v9661_v23, %v3654_v2  ;;  %v9781_v30 = vsub.f32 %v9665_v26, %v3654_v2  ;;  %v9813_v23 = vpop.permute.xlu0 %3913 }
 0xe56   : > { %v9815_v26 = vpop.permute.xlu1 %3927 }
 0xe57   : > { %v3685_v9 = vmul.f32 %v9778_v19, %v9778_v19  ;;  %v3686_v52 = vmul.f32 %v9781_v30, %v9781_v30  ;;  %v3705_v61 = vadd.f32 %v3684_v51, %v3683_v24 }
 0xe59   : > { %v3708_v44 = vadd.f32 %v3686_v52, %v3685_v9  ;;  %3706 = vadd.xlane.f32.xlu0 %v3705_v61  ;;  %v9817_v62 = vpop.permute.xlu0 %3929 }
 0xe5a   : > { %v9819_v40 = vpop.permute.xlu1 %3915 }
 0xe5b   : > { %3709 = vadd.xlane.f32.xlu1 %v3708_v44 }
 0xe5d   : > { %v9821_v29 = vpop.permute.xlu0 %3917 }
 0xe5e   : > { %v9823_v42 = vpop.permute.xlu1 %3931 }
 0xe61   : > { %v9825_v3 = vpop.permute.xlu0 %3933 }
 0xe62   : > { %v9827_v60 = vpop.permute.xlu1 %3975 }
 0xe63   : > { %12164 = vst [vmem:[#allocation28_spill] sm:$0xff] %v9827_v60 }
 0xe65   : > { %v9829_v58 = vpop.permute.xlu0 %3977 }
 0xe66   : > { %v9831_v54 = vpop.permute.xlu1 %3991 }
 0xe67   : > { %12165 = vst [vmem:[#allocation19_spill] sm:$0xff] %v9831_v54 }
 0xe6c   : > { %3979 = vrot.lane.b32.xlu1 %v12158_v38, %s6670_s27 }
 0xe6f   : > { %3993 = vrot.lane.b32.xlu0 %v12157_v20, %s6670_s27 }
 0xe70   : > { %3995 = vrot.lane.b32.xlu1 %v12161_v7, %s6670_s27 }
 0xe73   : > { %3981 = vrot.lane.b32.xlu0 %v12160_v13, %s6670_s27 }
 0xe74   : > { %4039 = vrot.lane.b32.xlu1 %v12154_v21, %s6671_s28 }
 0xe77   : > { %3997 = vrot.lane.b32.xlu0 %v12162_v32, %s6670_s27 }
 0xe78   : > { %4055 = vrot.lane.b32.xlu1 %v12156_v56, %s6671_s28 }
 0xe7b   : > { %4041 = vrot.lane.b32.xlu0 %v12155_v31, %s6671_s28 }
 0xe7c   : > { %4043 = vrot.lane.b32.xlu1 %v12158_v38, %s6671_s28 }
 0xe7f   : > { %4057 = vrot.lane.b32.xlu0 %v12157_v20, %s6671_s28 }
 0xe80   : > { %4059 = vrot.lane.b32.xlu1 %v12161_v7, %s6671_s28 }
 0xe83   : > { %4045 = vrot.lane.b32.xlu0 %v12160_v13, %s6671_s28 }
 0xe87   : > { %4061 = vrot.lane.b32.xlu0 %v12162_v32, %s6671_s28 }
 0xece   : > { %v3689_v41 = vpop.xlane.xlu0 %3688 }
 0xecf   : > { %v3711_v36 = vmul.f32 0.00390625, %v3689_v41 }
 0xed0   : > { %v3692_v43 = vpop.xlane.xlu1 %3691 }
 0xed1   : > { %v3719_v35 = vadd.f32 1e-05, %v3711_v36  ;;  %v3712_v50 = vmul.f32 0.00390625, %v3692_v43 }
 0xed3   : > { %6324 = vrsqrt.f32 %v3719_v35  ;;  %v3720_v28 = vadd.f32 1e-05, %v3712_v50 }
 0xed5   : > { %6326 = vrsqrt.f32 %v3720_v28 }
 0xed6   : > { %v3695_v49 = vpop.xlane.xlu0 %3694 }
 0xed8   : > { %v3698_v55 = vpop.xlane.xlu1 %3697 }
 0xedd   : > { %v6325_v51 = vpop.eup %6324 }
 0xede   : > { %v3701_v15 = vpop.xlane.xlu0 %3700  ;;  %v3735_v9 = vmul.f32 %v6325_v51, %v9708_v33  ;;  %v3736_v52 = vmul.f32 %v6325_v51, %v9711_v37 }
 0xedf   : > { %v3715_v18 = vmul.f32 0.00390625, %v3701_v15  ;;  %v6327_v61 = vpop.eup %6326 }
 0xee0   : > { %v3704_v34 = vpop.xlane.xlu1 %3703  ;;  %vm3751_vm13 = vcmp.ge.f32.partialorder %v3735_v9, 0.0  ;;  %v3767_v41 = vmul.f32 0.3, %v3735_v9  ;;  %v3768_v36 = vmul.f32 0.3, %v3736_v52  ;;  %v3738_v43 = vmul.f32 %v6327_v61, %v9721_v6 }
 0xee1   : > { %v3723_v12 = vadd.f32 1e-05, %v3715_v18  ;;  %v3716_v2 = vmul.f32 0.00390625, %v3704_v34  ;;  %vm3752_vm14 = vcmp.ge.f32.partialorder %v3736_v52, 0.0  ;;  %v3737_v37 = vmul.f32 %v6327_v61, %v9718_v5 }
 0xee2   : > { %v3783_v34 = vsel %vm3751_vm13, %v3735_v9, %v3767_v41  ;;  %v3784_v6 = vsel %vm3752_vm14, %v3736_v52, %v3768_v36  ;;  %v3770_v51 = vmul.f32 0.3, %v3738_v43  ;;  %vm3754_vm11 = vcmp.ge.f32.partialorder %v3738_v43, 0.0 }
 0xee3   : > { %6328 = vrsqrt.f32 %v3723_v12  ;;  %v3724_v24 = vadd.f32 1e-05, %v3716_v2  ;;  %v3713_v41 = vmul.f32 0.00390625, %v3695_v49  ;;  %v3769_v52 = vmul.f32 0.3, %v3737_v37 }
 0xee4   : > { %v3786_v61 = vsel %vm3754_vm11, %v3738_v43, %v3770_v51  ;;  %vm3753_vm14 = vcmp.ge.f32.partialorder %v3737_v37, 0.0 }
 0xee5   : > { %6330 = vrsqrt.f32 %v3724_v24 }
 0xee6   : > { %v3707_v33 = vpop.xlane.xlu0 %3706 }
 0xee7   : > { %v3717_v60 = vmul.f32 0.00390625, %v3707_v33 }
 0xee8   : > { %v3710_v24 = vpop.xlane.xlu1 %3709 }
 0xee9   : > { %v3718_v9 = vmul.f32 0.00390625, %v3710_v24 }
 0xeed   : > { %v6329_v44 = vpop.eup %6328 }
 0xeee   : > { %v3743_v35 = vmul.f32 %v6329_v44, %v9748_v17  ;;  %v3744_v50 = vmul.f32 %v6329_v44, %v9751_v1 }
 0xeef   : > { %v6331_v28 = vpop.eup %6330 }
 0xef0   : > { %vm3759_vm15 = vcmp.ge.f32.partialorder %v3743_v35, 0.0  ;;  %vm3760_vm6 = vcmp.ge.f32.partialorder %v3744_v50, 0.0  ;;  %v3775_v15 = vmul.f32 0.3, %v3743_v35  ;;  %v3776_v18 = vmul.f32 0.3, %v3744_v50 }
 0xef1   : > { %v3745_v12 = vmul.f32 %v6331_v28, %v9758_v39  ;;  %v3746_v2 = vmul.f32 %v6331_v28, %v9761_v53  ;;  %v3714_v39 = vmul.f32 0.00390625, %v3698_v55 }
 0xef2   : > { %v3791_v17 = vsel %vm3759_vm15, %v3743_v35, %v3775_v15  ;;  %v3792_v59 = vsel %vm3760_vm6, %v3744_v50, %v3776_v18  ;;  %v3726_v35 = vadd.f32 1e-05, %v3718_v9  ;;  %v3721_v50 = vadd.f32 1e-05, %v3713_v41 }
 0xef3   : > { %v9841_v1 = vadd.f32 %v3791_v17, %v3783_v34  ;;  %v9843_v44 = vadd.f32 %v3792_v59, %v3784_v6  ;;  %vm3762_vm10 = vcmp.ge.f32.partialorder %v3746_v2, 0.0  ;;  %v3778_v54 = vmul.f32 0.3, %v3746_v2 }
 0xef4   : > { %v3777_v5 = vmul.f32 0.3, %v3745_v12  ;;  %vm3761_vm13 = vcmp.ge.f32.partialorder %v3745_v12, 0.0  ;;  %v3725_v59 = vadd.f32 1e-05, %v3717_v60  ;;  %v3785_v15 = vsel %vm3753_vm14, %v3737_v37, %v3769_v52 }
 0xef5   : > { %3839 = vrot.lane.b32.xlu0 %v9841_v1, %s6668_s25  ;;  %3855 = vrot.lane.b32.xlu1 %v9843_v44, %s6668_s25  ;;  %v3794_v53 = vsel %vm3762_vm10, %v3746_v2, %v3778_v54  ;;  %v3722_v49 = vadd.f32 1e-05, %v3714_v39 }
 0xef6   : > { %v9849_v36 = vadd.f32 %v3794_v53, %v3786_v61  ;;  %v3793_v28 = vsel %vm3761_vm13, %v3745_v12, %v3777_v5  ;;  %6332 = vrsqrt.f32 %v3725_v59 }
 0xef7   : > { %v9855_v55 = vadd.f32 %v3793_v28, %v3785_v15  ;;  %6334 = vrsqrt.f32 %v3726_v35  ;;  %v9947_v15 = vpop.permute.xlu1 %3979 }
 0xef8   : > { %6336 = vrsqrt.f32 %v3721_v50 }
 0xef9   : > { %3903 = vrot.lane.b32.xlu1 %v9841_v1, %s6669_s26  ;;  %3857 = vrot.lane.b32.xlu0 %v9849_v36, %s6668_s25  ;;  %6338 = vrsqrt.f32 %v3722_v49  ;;  %v9941_v49 = vpop.permute.xlu0 %3993 }
 0xefd   : > { %3919 = vrot.lane.b32.xlu1 %v9843_v44, %s6669_s26  ;;  %3905 = vrot.lane.b32.xlu0 %v9855_v55, %s6669_s26 }
 0xf00   : > { %v6333_v60 = vpop.eup %6332 }
 0xf01   : > { %3967 = vrot.lane.b32.xlu1 %v9841_v1, %s6670_s27  ;;  %3921 = vrot.lane.b32.xlu0 %v9849_v36, %s6669_s26  ;;  %v6335_v54 = vpop.eup %6334  ;;  %v3747_v33 = vmul.f32 %v6333_v60, %v9768_v22  ;;  %v3748_v2 = vmul.f32 %v6333_v60, %v9771_v0  ;;  %v9949_v60 = vpop.permute.xlu0 %3981 }
 0xf02   : > { %v6337_v43 = vpop.eup %6336  ;;  %v3749_v34 = vmul.f32 %v6335_v54, %v9778_v19  ;;  %v3750_v6 = vmul.f32 %v6335_v54, %v9781_v30  ;;  %v9959_v54 = vpop.permute.xlu1 %3995 }
 0xf03   : > { %v6339_v18 = vpop.eup %6338  ;;  %v3739_v37 = vmul.f32 %v6337_v43, %v9728_v57  ;;  %v3779_v24 = vmul.f32 0.3, %v3747_v33  ;;  %vm3763_vm15 = vcmp.ge.f32.partialorder %v3747_v33, 0.0  ;;  %v3740_v22 = vmul.f32 %v6337_v43, %v9731_v16 }
 0xf04   : > { %v3741_v12 = vmul.f32 %v6339_v18, %v9738_v25  ;;  %v3781_v51 = vmul.f32 0.3, %v3749_v34  ;;  %vm3765_vm6 = vcmp.ge.f32.partialorder %v3749_v34, 0.0  ;;  %v3742_v57 = vmul.f32 %v6339_v18, %v9741_v10  ;;  %v6198_v18 = vld [vmem:[%s12058_s7 + $0xa4] ss:$20 sps:$4 sm:$0xff]  }
 0xf05   : > { %3983 = vrot.lane.b32.xlu1 %v9843_v44, %s6670_s27  ;;  %3969 = vrot.lane.b32.xlu0 %v9855_v55, %s6670_s27  ;;  %v3771_v19 = vmul.f32 0.3, %v3739_v37  ;;  %vm3755_vm10 = vcmp.ge.f32.partialorder %v3739_v37, 0.0  ;;  %v3780_v0 = vmul.f32 0.3, %v3748_v2  ;;  %v3795_v17 = vsel %vm3763_vm15, %v3747_v33, %v3779_v24  ;;  %v9961_v43 = vpop.permute.xlu0 %3997 }
 0xf06   : > { %v3773_v25 = vmul.f32 0.3, %v3741_v12  ;;  %vm3757_vm11 = vcmp.ge.f32.partialorder %v3741_v12, 0.0  ;;  %vm3764_vm13 = vcmp.ge.f32.partialorder %v3748_v2, 0.0  ;;  %v3782_v30 = vmul.f32 0.3, %v3750_v6  ;;  %v9970_v33 = vpop.permute.xlu1 %4039  ;;  %4603 = vmatprep.mubr.bf16.mxu0 %v6198_v18 }
 0xf07   : > { %v3797_v9 = vsel %vm3765_vm6, %v3749_v34, %v3781_v51  ;;  %v3772_v41 = vmul.f32 0.3, %v3740_v22  ;;  %v3787_v16 = vsel %vm3755_vm10, %v3739_v37, %v3771_v19  ;;  %vm3766_vm14 = vcmp.ge.f32.partialorder %v3750_v6, 0.0  ;;  %12166 = vst [vmem:[#allocation18_spill] sm:$0xff] %v9970_v33 }
 0xf08   : > { %vm3756_vm9 = vcmp.ge.f32.partialorder %v3740_v22, 0.0  ;;  %v3774_v5 = vmul.f32 0.3, %v3742_v57  ;;  %v3789_v39 = vsel %vm3757_vm11, %v3741_v12, %v3773_v25  ;;  %v9889_v10 = vadd.f32 %v3795_v17, %v3787_v16 }
 0xf09   : > { %4031 = vrot.lane.b32.xlu1 %v9841_v1, %s6671_s28  ;;  %3985 = vrot.lane.b32.xlu0 %v9849_v36, %s6670_s27  ;;  %vm3758_vm12 = vcmp.ge.f32.partialorder %v3742_v57, 0.0  ;;  %v3796_v53 = vsel %vm3764_vm13, %v3748_v2, %v3780_v0  ;;  %v9891_v52 = vadd.f32 %v3797_v9, %v3789_v39  ;;  %v3798_v61 = vsel %vm3766_vm14, %v3750_v6, %v3782_v30  ;;  %v9972_v34 = vpop.permute.xlu0 %4041 }
 0xf0a   : > { %v3788_v59 = vsel %vm3756_vm9, %v3740_v22, %v3772_v41  ;;  %v3790_v35 = vsel %vm3758_vm12, %v3742_v57, %v3774_v5  ;;  %12167 = vst [vmem:[#allocation29_spill] sm:$0xff] %v9972_v34  ;;  %v9982_v37 = vpop.permute.xlu1 %4055  ;;  %vm12195_vm9 = vcmask 523264   ;;  %vm12199_vm10 = vcmask 261120  }
 0xf0b   : > { %v9897_v50 = vadd.f32 %v3796_v53, %v3788_v59  ;;  %v9899_v28 = vadd.f32 %v3798_v61, %v3790_v35  ;;  %12168 = vst [vmem:[#allocation23_spill] sm:$0xff] %v9982_v37  ;;  %v6454_v37 = vld [vmem:[%s12053_s2 + $0x10] sm:$0xff]  ;;  %vm12196_vm12 = vmmov %vm12195_vm9  ;;  %vm5445_vm11 = vcmask 130048  }
 0xf0c   : > { %vm12197_vm15 = vmmov %vm12195_vm9 }
 0xf0d   : > { %4047 = vrot.lane.b32.xlu1 %v9843_v44, %s6671_s28  ;;  %4033 = vrot.lane.b32.xlu0 %v9855_v55, %s6671_s28  ;;  %v9984_v12 = vpop.permute.xlu0 %4057  ;;  %vm12198_vm6 = vmmov %vm12195_vm9 }
 0xf0e   : > { %12169 = vst [vmem:[#allocation21_spill] sm:$0xff] %v9984_v12  ;;  %v9990_v2 = vpop.permute.xlu1 %4043  ;;  %v6455_v12 = vld [vmem:[%s12053_s2 + $0x18] sm:$0xff] }
 0xf0f   : > { %12170 = vst [vmem:[#allocation22_spill] sm:$0xff] %v9990_v2 }
 0xf11   : > { %3841 = vrot.lane.b32.xlu1 %v9855_v55, %s6668_s25  ;;  %4049 = vrot.lane.b32.xlu0 %v9849_v36, %s6671_s28  ;;  %v9992_v24 = vpop.permute.xlu0 %4045 }
 0xf12   : > { %12171 = vst [vmem:[#allocation20_spill] sm:$0xff] %v9992_v24  ;;  %v10002_v6 = vpop.permute.xlu1 %4059 }
 0xf13   : > { %12172 = vst [vmem:[#allocation27_spill] sm:$0xff] %v10002_v6 }
 0xf15   : > { %3843 = vrot.lane.b32.xlu1 %v9889_v10, %s6668_s25  ;;  %3845 = vrot.lane.b32.xlu0 %v9891_v52, %s6668_s25  ;;  %v10004_v51 = vpop.permute.xlu0 %4061 }
 0xf16   : > { %12173 = vst [vmem:[#allocation25_spill] sm:$0xff] %v10004_v51  ;;  %v6452_v51 = vld [vmem:[%s12053_s2] sm:$0xff] }
 0xf19   : > { %3859 = vrot.lane.b32.xlu1 %v9897_v50, %s6668_s25  ;;  %3861 = vrot.lane.b32.xlu0 %v9899_v28, %s6668_s25 }
 0xf1d   : > { %4095 = vrot.lane.b32.xlu1 %v9841_v1, %s6672_s29  ;;  %4097 = vrot.lane.b32.xlu0 %v9855_v55, %s6672_s29 }
 0xf21   : > { %3907 = vrot.lane.b32.xlu1 %v9889_v10, %s6669_s26  ;;  %4113 = vrot.lane.b32.xlu0 %v9849_v36, %s6672_s29 }
 0xf25   : > { %3923 = vrot.lane.b32.xlu1 %v9897_v50, %s6669_s26  ;;  %3909 = vrot.lane.b32.xlu0 %v9891_v52, %s6669_s26 }
 0xf29   : > { %3971 = vrot.lane.b32.xlu1 %v9889_v10, %s6670_s27  ;;  %3925 = vrot.lane.b32.xlu0 %v9899_v28, %s6669_s26 }
 0xf2d   : > { %3987 = vrot.lane.b32.xlu1 %v9897_v50, %s6670_s27  ;;  %4105 = vrot.lane.b32.xlu0 %v12155_v31, %s6672_s29 }
 0xf31   : > { %4035 = vrot.lane.b32.xlu1 %v9889_v10, %s6671_s28  ;;  %4121 = vrot.lane.b32.xlu0 %v12157_v20, %s6672_s29 }
 0xf35   : > { %4051 = vrot.lane.b32.xlu1 %v9897_v50, %s6671_s28  ;;  %3973 = vrot.lane.b32.xlu0 %v9891_v52, %s6670_s27 }
 0xf39   : > { %4111 = vrot.lane.b32.xlu1 %v9843_v44, %s6672_s29  ;;  %3989 = vrot.lane.b32.xlu0 %v9899_v28, %s6670_s27 }
 0xf3d   : > { %4099 = vrot.lane.b32.xlu1 %v9889_v10, %s6672_s29  ;;  %4109 = vrot.lane.b32.xlu0 %v12160_v13, %s6672_s29 }
 0xf41   : > { %4115 = vrot.lane.b32.xlu1 %v9897_v50, %s6672_s29  ;;  %4125 = vrot.lane.b32.xlu0 %v12162_v32, %s6672_s29 }
 0xf45   : > { %4103 = vrot.lane.b32.xlu1 %v12154_v21, %s6672_s29  ;;  %4037 = vrot.lane.b32.xlu0 %v9891_v52, %s6671_s28 }
 0xf49   : > { %4119 = vrot.lane.b32.xlu1 %v12156_v56, %s6672_s29  ;;  %4053 = vrot.lane.b32.xlu0 %v9899_v28, %s6671_s28 }
 0xf4d   : > { %4107 = vrot.lane.b32.xlu1 %v12158_v38, %s6672_s29  ;;  %4161 = vrot.lane.b32.xlu0 %v9855_v55, %s6673_s22 }
 0xf51   : > { %4123 = vrot.lane.b32.xlu1 %v12161_v7, %s6672_s29  ;;  %4177 = vrot.lane.b32.xlu0 %v9849_v36, %s6673_s22 }
 0xf55   : > { %4159 = vrot.lane.b32.xlu1 %v9841_v1, %s6673_s22  ;;  %4169 = vrot.lane.b32.xlu0 %v12155_v31, %s6673_s22 }
 0xf59   : > { %4175 = vrot.lane.b32.xlu1 %v9843_v44, %s6673_s22  ;;  %4185 = vrot.lane.b32.xlu0 %v12157_v20, %s6673_s22 }
 0xf5d   : > { %4163 = vrot.lane.b32.xlu1 %v9889_v10, %s6673_s22  ;;  %4173 = vrot.lane.b32.xlu0 %v12160_v13, %s6673_s22 }
 0xf61   : > { %4179 = vrot.lane.b32.xlu1 %v9897_v50, %s6673_s22  ;;  %4189 = vrot.lane.b32.xlu0 %v12162_v32, %s6673_s22 }
 0xf65   : > { %4167 = vrot.lane.b32.xlu1 %v12154_v21, %s6673_s22  ;;  %4101 = vrot.lane.b32.xlu0 %v9891_v52, %s6672_s29 }
 0xf67   : > { %v3840_v22 = vpop.permute.xlu0 %3839  ;;  %v3856_v19 = vpop.permute.xlu1 %3855 }
 0xf68   : > { %v3871_v59 = vsel %vm437_vm0, %v3840_v22, %v3856_v19  ;;  %v3879_v35 = vsel %vm437_vm0, %v3856_v19, %v3840_v22  ;;  %v6453_v22 = vld [vmem:[%s12053_s2 + $0x8] sm:$0xff] }
 0xf69   : > { %4183 = vrot.lane.b32.xlu1 %v12156_v56, %s6673_s22  ;;  %4117 = vrot.lane.b32.xlu0 %v9899_v28, %s6672_s29  ;;  %v3887_v33 = vmul.f32 %v6452_v51, %v3879_v35  ;;  %v3888_v19 = vmul.f32 %v6453_v22, %v3871_v59 }
 0xf6b   : > { %v10014_v57 = vpop.permute.xlu1 %3903  ;;  %v3858_v25 = vpop.permute.xlu0 %3857 }
 0xf6d   : > { %4171 = vrot.lane.b32.xlu1 %v12158_v38, %s6673_s22  ;;  %4225 = vrot.lane.b32.xlu0 %v9855_v55, %s6674_s23 }
 0xf6f   : > { %v10020_v0 = vpop.permute.xlu1 %3919  ;;  %v10022_v17 = vpop.permute.xlu0 %3905 }
 0xf71   : > { %4187 = vrot.lane.b32.xlu1 %v12161_v7, %s6673_s22  ;;  %4241 = vrot.lane.b32.xlu0 %v9849_v36, %s6674_s23 }
 0xf73   : > { %v10028_v30 = vpop.permute.xlu1 %3967  ;;  %v10030_v9 = vpop.permute.xlu0 %3921 }
 0xf75   : > { %4223 = vrot.lane.b32.xlu1 %v9841_v1, %s6674_s23  ;;  %4165 = vrot.lane.b32.xlu0 %v9891_v52, %s6673_s22 }
 0xf77   : > { %v10036_v41 = vpop.permute.xlu1 %3983  ;;  %v10038_v16 = vpop.permute.xlu0 %3969 }
 0xf79   : > { %4239 = vrot.lane.b32.xlu1 %v9843_v44, %s6674_s23  ;;  %4181 = vrot.lane.b32.xlu0 %v9899_v28, %s6673_s22 }
 0xf7b   : > { %v10044_v5 = vpop.permute.xlu1 %4031  ;;  %v10046_v39 = vpop.permute.xlu0 %3985 }
 0xf7c   : > { %12174 = vst [vmem:[#allocation26_spill] sm:$0xff] %v10044_v5 }
 0xf7d   : > { %4227 = vrot.lane.b32.xlu1 %v9889_v10, %s6674_s23  ;;  %4233 = vrot.lane.b32.xlu0 %v12155_v31, %s6674_s23 }
 0xf7f   : > { %v10052_v53 = vpop.permute.xlu1 %4047  ;;  %v10054_v61 = vpop.permute.xlu0 %4033 }
 0xf80   : > { %12175 = vst [vmem:[#allocation24_spill] sm:$0xff] %v10052_v53 }
 0xf81   : > { %4243 = vrot.lane.b32.xlu1 %v9897_v50, %s6674_s23  ;;  %4249 = vrot.lane.b32.xlu0 %v12157_v20, %s6674_s23 }
 0xf83   : > { %v3842_v18 = vpop.permute.xlu1 %3841  ;;  %v10064_v2 = vpop.permute.xlu0 %4049 }
 0xf84   : > { %v3872_v6 = vsel %vm437_vm0, %v3842_v18, %v3858_v25  ;;  %v3880_v24 = vsel %vm437_vm0, %v3858_v25, %v3842_v18 }
 0xf85   : > { %v3889_v34 = vmul.f32 %v6454_v37, %v3880_v24  ;;  %v3890_v25 = vmul.f32 %v6455_v12, %v3872_v6  ;;  %4231 = vrot.lane.b32.xlu1 %v12154_v21, %s6674_s23  ;;  %4229 = vrot.lane.b32.xlu0 %v9891_v52, %s6674_s23  ;;  %v3876_v37 = vsel %vm437_vm0, %v9693_v45, %v9697_v48 }
 0xf87   : > { %v4351_v51 = vpack.c.bf16 %v3889_v34, %v3887_v33  ;;  %v3844_v35 = vpop.permute.xlu1 %3843  ;;  %v4352_v18 = vpack.c.bf16 %v3890_v25, %v3888_v19  ;;  %v3846_v59 = vpop.permute.xlu0 %3845  ;;  %v3875_v33 = vsel %vm437_vm0, %v9689_v27, %v9691_v63  ;;  %v6456_v25 = vld [vmem:[%s12053_s2 + $0x20] sm:$0xff] }
 0xf89   : > { %4247 = vrot.lane.b32.xlu1 %v12156_v56, %s6674_s23  ;;  %4571 = vmatprep.subr.bf16.mxu0 %v4352_v18  ;;  %v6457_v18 = vld [vmem:[%s12053_s2 + $0x28] sm:$0xff] }
 0xf8a   : > { %4245 = vrot.lane.b32.xlu0 %v9899_v28, %s6674_s23  ;;  %4572 = vmatpush1.bf16.msra.mxu0 %v4351_v51 }
 0xf8b   : > { %v3860_v12 = vpop.permute.xlu1 %3859  ;;  %v3862_v34 = vpop.permute.xlu0 %3861 }
 0xf8c   : > { %v3873_v24 = vsel %vm437_vm0, %v3844_v35, %v3860_v12  ;;  %v3881_v6 = vsel %vm437_vm0, %v3860_v12, %v3844_v35  ;;  %v3874_v22 = vsel %vm437_vm0, %v3846_v59, %v3862_v34  ;;  %v3882_v19 = vsel %vm437_vm0, %v3862_v34, %v3846_v59  ;;  %v6458_v59 = vld [vmem:[%s12053_s2 + $0x58] sm:$0xff]  ;;  %v6459_v34 = vld [vmem:[%s12053_s2 + $0x30] sm:$0xff] }
 0xf8d   : > { %v3891_v51 = vmul.f32 %v6456_v25, %v3881_v6  ;;  %v3892_v5 = vmul.f32 %v6457_v18, %v3873_v24  ;;  %4235 = vrot.lane.b32.xlu1 %v12158_v38, %s6674_s23  ;;  %v3884_v35 = vsel %vm437_vm0, %v9697_v48, %v9693_v45  ;;  %v3898_v12 = vmul.f32 %v6458_v59, %v3876_v37  ;;  %v6460_v24 = vld [vmem:[%s12053_s2 + $0x38] sm:$0xff] }
 0xf8e   : > { %v3893_v6 = vmul.f32 %v6459_v34, %v3882_v19  ;;  %v3894_v25 = vmul.f32 %v6460_v24, %v3874_v22  ;;  %4237 = vrot.lane.b32.xlu0 %v12160_v13, %s6674_s23  ;;  %v3878_v45 = vsel %vm437_vm0, %v9701_v4, %v9705_v11  ;;  %v3883_v37 = vsel %vm437_vm0, %v9691_v63, %v9689_v27  ;;  %v6461_v19 = vld [vmem:[%s12053_s2 + $0x48] sm:$0xff]  ;;  %v6462_v24 = vld [vmem:[%s12053_s2 + $0x50] sm:$0xff]  ;;  %v6463_v63 = vld [vmem:[%s12053_s2 + $0x78] sm:$0xff] }
 0xf8f   : > { %v10133_v48 = vpop.permute.xlu1 %4095  ;;  %v3896_v22 = vmul.f32 %v6461_v19, %v3875_v33  ;;  %v10142_v59 = vpop.permute.xlu0 %4097  ;;  %v3897_v53 = vmul.f32 %v6462_v24, %v3884_v35  ;;  %v3886_v27 = vsel %vm437_vm0, %v9705_v11, %v9701_v4  ;;  %v3936_v4 = vsel %vm502_vm1, %v10022_v17, %v10030_v9  ;;  %v6466_v19 = vld [vmem:[%s12053_s2 + $0x70] sm:$0xff] }
 0xf90   : > { %12176 = vst [vmem:[#allocation5_spill] sm:$0xff] %v10133_v48  ;;  %v4353_v18 = vpack.c.bf16 %v3893_v6, %v3891_v51  ;;  %v4354_v34 = vpack.c.bf16 %v3894_v25, %v3892_v5  ;;  %v3877_v48 = vsel %vm437_vm0, %v9695_v46, %v9699_v47  ;;  %v3902_v5 = vmul.f32 %v6463_v63, %v3878_v45  ;;  %v6464_v51 = vld [vmem:[%s12053_s2 + $0x40] sm:$0xff] }
 0xf91   : > { %4251 = vrot.lane.b32.xlu1 %v12161_v7, %s6674_s23  ;;  %v4356_v33 = vpack.c.bf16 %v3898_v12, %v3896_v22  ;;  %v3895_v35 = vmul.f32 %v6464_v51, %v3883_v37  ;;  %v3885_v6 = vsel %vm437_vm0, %v9699_v47, %v9695_v46  ;;  %v6465_v12 = vld [vmem:[%s12053_s2 + $0x68] sm:$0xff]  ;;  %v3901_v22 = vmul.f32 %v6466_v19, %v3886_v27  ;;  %v6467_v47 = vld [vmem:[%s12053_s2 + $0x98] sm:$0xff]  ;;  %v6470_v51 = vld [vmem:[%s12053_s2 + $0x90] sm:$0xff] }
 0xf92   : > { %4253 = vrot.lane.b32.xlu0 %v12162_v32, %s6674_s23  ;;  %4573 = vmatprep.subr.bf16.mxu0 %v4354_v34  ;;  %v3900_v25 = vmul.f32 %v6465_v12, %v3877_v48  ;;  %v3944_v46 = vsel %vm502_vm1, %v10030_v9, %v10022_v17  ;;  %v6468_v34 = vld [vmem:[%s12053_s2 + $0x60] sm:$0xff]  ;;  %v3943_v17 = vsel %vm502_vm1, %v10020_v0, %v10014_v57  ;;  %v6469_v9 = vld [vmem:[%s12053_s2 + $0x88] sm:$0xff] }
 0xf93   : > { %4574 = vmatpush1.bf16.msra.mxu0 %v4353_v18  ;;  %v3908_v11 = vpop.permute.xlu1 %3907  ;;  %v10176_v45 = vpop.permute.xlu0 %4113  ;;  %v4355_v37 = vpack.c.bf16 %v3897_v53, %v3895_v35  ;;  %v3935_v18 = vsel %vm502_vm1, %v10014_v57, %v10020_v0  ;;  %v3954_v53 = vmul.f32 %v6467_v47, %v3936_v4  ;;  %v3899_v24 = vmul.f32 %v6468_v34, %v3885_v6  ;;  %v6471_v4 = vld [vmem:[%s12053_s2 + $0x80] sm:$0xff]  ;;  %v6474_v34 = vld [vmem:[%s12053_s2 + $0xa8] sm:$0xff] }
 0xf94   : > { %4575 = vmatprep.subr.bf16.mxu0 %v4356_v33  ;;  %v4358_v48 = vpack.c.bf16 %v3902_v5, %v3900_v25  ;;  %v3952_v63 = vmul.f32 %v6469_v9, %v3935_v18  ;;  %v3953_v35 = vmul.f32 %v6470_v51, %v3944_v46  ;;  %v3940_v57 = vsel %vm502_vm1, %v9813_v23, %v9817_v62  ;;  %v6472_v46 = vld [vmem:[%s12053_s2 + $0xd8] sm:$0xff] }
 0xf95   : > { %4287 = vrot.lane.b32.xlu1 %v9841_v1, %s12141_s12  ;;  %v4357_v5 = vpack.c.bf16 %v3901_v22, %v3899_v24  ;;  %v3951_v6 = vmul.f32 %v6471_v4, %v3943_v17  ;;  %v3939_v19 = vsel %vm502_vm1, %v9703_v8, %v9815_v26  ;;  %v3948_v22 = vsel %vm502_vm1, %v9817_v62, %v9813_v23  ;;  %v6473_v23 = vld [vmem:[%s12053_s2 + $0xa0] sm:$0xff]  ;;  %v6476_v9 = vld [vmem:[%s12053_s2 + $0xb8] sm:$0xff] }
 0xf96   : > { %4289 = vrot.lane.b32.xlu0 %v9855_v55, %s12141_s12  ;;  %v4360_v0 = vpack.c.bf16 %v3954_v53, %v3952_v63  ;;  %v3947_v51 = vsel %vm502_vm1, %v9815_v26, %v9703_v8  ;;  %v3950_v8 = vsel %vm502_vm1, %v9825_v3, %v9821_v29  ;;  %v6479_v26 = vld [vmem:[%s12053_s2 + $0xf8] sm:$0xff] }
 0xf97   : > { %4576 = vmatpush1.bf16.msra.mxu0 %v4355_v37  ;;  %v3924_v27 = vpop.permute.xlu1 %3923  ;;  %v3910_v33 = vpop.permute.xlu0 %3909  ;;  %v4359_v47 = vpack.c.bf16 %v3953_v35, %v3951_v6  ;;  %v6477_v35 = vld [vmem:[%s12053_s2 + $0xc8] sm:$0xff]  ;;  %v6478_v6 = vld [vmem:[%s12053_s2 + $0xd0] sm:$0xff] }
 0xf98   : > { %4577 = vmatprep.subr.bf16.mxu0 %v4358_v48  ;;  %v3937_v12 = vsel %vm502_vm1, %v3908_v11, %v3924_v27  ;;  %v3945_v25 = vsel %vm502_vm1, %v3924_v27, %v3908_v11  ;;  %v3962_v11 = vmul.f32 %v6472_v46, %v3940_v57  ;;  %v6475_v27 = vld [vmem:[%s12053_s2 + $0xb0] sm:$0xff]  ;;  %v3960_v57 = vmul.f32 %v6477_v35, %v3939_v19 }
 0xf99   : > { %4303 = vrot.lane.b32.xlu1 %v9843_v44, %s12141_s12  ;;  %v3955_v62 = vmul.f32 %v6473_v23, %v3945_v25  ;;  %v3956_v24 = vmul.f32 %v6474_v34, %v3937_v12  ;;  %v3961_v12 = vmul.f32 %v6478_v6, %v3948_v22  ;;  %v3941_v25 = vsel %vm502_vm1, %v9819_v40, %v9823_v42  ;;  %v6482_v23 = vld [vmem:[%s12053_s2 + $0xf0] sm:$0xff] }
 0xf9a   : > { %4305 = vrot.lane.b32.xlu0 %v9849_v36, %s12141_s12  ;;  %v4364_v22 = vpack.c.bf16 %v3962_v11, %v3960_v57  ;;  %v6481_v11 = vld [vmem:[%s12053_s2 + $0xe8] sm:$0xff]  ;;  %v3999_v34 = vsel %vm568_vm2, %v10028_v30, %v10036_v41  ;;  %v6486_v35 = vld [vmem:[%s12053_s2 + $0x110] sm:$0xff] }
 0xf9b   : > { %4578 = vmatpush1.bf16.msra.mxu0 %v4357_v5  ;;  %v10224_v37 = vpop.permute.xlu1 %3971  ;;  %v3926_v18 = vpop.permute.xlu0 %3925 }
 0xf9c   : > { %4579 = vmatprep.subr.bf16.mxu0 %v4360_v0  ;;  %v3938_v53 = vsel %vm502_vm1, %v3910_v33, %v3926_v18  ;;  %v3946_v48 = vsel %vm502_vm1, %v3926_v18, %v3910_v33  ;;  %v3942_v33 = vsel %vm502_vm1, %v9821_v29, %v9825_v3  ;;  %v6480_v18 = vld [vmem:[%s12053_s2 + $0xc0] sm:$0xff]  ;;  %v4000_v29 = vsel %vm568_vm2, %v10038_v16, %v10046_v39 }
 0xf9d   : > { %4291 = vrot.lane.b32.xlu1 %v9889_v10, %s12141_s12  ;;  %v3957_v17 = vmul.f32 %v6475_v27, %v3946_v48  ;;  %v3958_v63 = vmul.f32 %v6476_v9, %v3938_v53  ;;  %v3966_v19 = vmul.f32 %v6479_v26, %v3942_v33  ;;  %v3959_v46 = vmul.f32 %v6480_v18, %v3947_v51  ;;  %v6488_v18 = vld [vmem:[%s12053_s2 + $0x158] sm:$0xff] }
 0xf9e   : > { %4297 = vrot.lane.b32.xlu0 %v12155_v31, %s12141_s12 }
 0xf9f   : > { %4580 = vmatpush1.bf16.msra.mxu0 %v4359_v47  ;;  %v3988_v5 = vpop.permute.xlu1 %3987  ;;  %v4361_v0 = vpack.c.bf16 %v3957_v17, %v3955_v62  ;;  %v10268_v4 = vpop.permute.xlu0 %4105  ;;  %v4362_v31 = vpack.c.bf16 %v3958_v63, %v3956_v24  ;;  %v3964_v47 = vmul.f32 %v6481_v11, %v3941_v25  ;;  %v4363_v48 = vpack.c.bf16 %v3961_v12, %v3959_v46  ;;  %v6484_v17 = vld [vmem:[%s12053_s2 + $0xe0] sm:$0xff]  ;;  %v12177_v25 = vld [vmem:[#allocation19_spill] sm:$0xff] }
 0xfa0   : > { %v3965_v62 = vmul.f32 %v6482_v23, %v3950_v8  ;;  %v4001_v6 = vsel %vm568_vm2, %v10224_v37, %v3988_v5  ;;  %v12178_v8 = vld [vmem:[#allocation28_spill] sm:$0xff] }
 0xfa1   : > { %4307 = vrot.lane.b32.xlu1 %v9897_v50, %s12141_s12  ;;  %4581 = vmatprep.subr.bf16.mxu0 %v4362_v31  ;;  %v4366_v27 = vpack.c.bf16 %v3966_v19, %v3964_v47  ;;  %v4003_v26 = vsel %vm568_vm2, %v12178_v8, %v12177_v25  ;;  %v4012_v19 = vsel %vm568_vm2, %v9941_v49, %v9829_v58  ;;  %v6491_v47 = vld [vmem:[%s12053_s2 + $0x130] sm:$0xff]  ;;  %v6492_v23 = vld [vmem:[%s12053_s2 + $0x138] sm:$0xff] }
 0xfa2   : > { %4313 = vrot.lane.b32.xlu0 %v12157_v20, %s12141_s12  ;;  %v3949_v20 = vsel %vm502_vm1, %v9823_v42, %v9819_v40  ;;  %v4008_v40 = vsel %vm568_vm2, %v10046_v39, %v10038_v16  ;;  %v6483_v42 = vld [vmem:[%s12053_s2 + $0x118] sm:$0xff]  ;;  %v4007_v16 = vsel %vm568_vm2, %v10036_v41, %v10028_v30  ;;  %v6485_v39 = vld [vmem:[%s12053_s2 + $0x108] sm:$0xff]  ;;  %v4004_v30 = vsel %vm568_vm2, %v9829_v58, %v9941_v49  ;;  %v6489_v58 = vld [vmem:[%s12053_s2 + $0x120] sm:$0xff] }
 0xfa3   : > { %4582 = vmatpush1.bf16.msra.mxu0 %v4361_v0  ;;  %v10295_v3 = vpop.permute.xlu1 %4035  ;;  %v10304_v53 = vpop.permute.xlu0 %4121  ;;  %v4018_v24 = vmul.f32 %v6483_v42, %v4000_v29  ;;  %v3963_v9 = vmul.f32 %v6484_v17, %v3949_v20  ;;  %v4016_v63 = vmul.f32 %v6485_v39, %v3999_v34  ;;  %v4017_v57 = vmul.f32 %v6486_v35, %v4008_v40  ;;  %v6487_v0 = vld [vmem:[%s12053_s2 + $0x100] sm:$0xff]  ;;  %v6490_v20 = vld [vmem:[%s12053_s2 + $0x128] sm:$0xff] }
 0xfa4   : > { %4583 = vmatprep.subr.bf16.mxu0 %v4364_v22  ;;  %v4015_v31 = vmul.f32 %v6487_v0, %v4007_v16  ;;  %v4020_v11 = vmul.f32 %v6490_v20, %v4001_v6  ;;  %v4011_v40 = vsel %vm568_vm2, %v12177_v25, %v12178_v8  ;;  %v6493_v42 = vld [vmem:[%s12053_s2 + $0x148] sm:$0xff]  ;;  %v4005_v39 = vsel %vm568_vm2, %v9947_v15, %v9959_v54  ;;  %v6498_v25 = vld [vmem:[%s12053_s2 + $0x170] sm:$0xff] }
 0xfa5   : > { %4295 = vrot.lane.b32.xlu1 %v12154_v21, %s12141_s12  ;;  %v4365_v51 = vpack.c.bf16 %v3965_v62, %v3963_v9  ;;  %v4368_v41 = vpack.c.bf16 %v4018_v24, %v4016_v63  ;;  %v4006_v62 = vsel %vm568_vm2, %v9949_v60, %v9961_v43  ;;  %v4024_v24 = vmul.f32 %v6493_v42, %v4003_v26  ;;  %v6494_v9 = vld [vmem:[%s12053_s2 + $0x150] sm:$0xff]  ;;  %v6497_v0 = vld [vmem:[%s12053_s2 + $0x168] sm:$0xff]  ;;  %v12179_v26 = vld [vmem:[#allocation24_spill] sm:$0xff] }
 0xfa6   : > { %4293 = vrot.lane.b32.xlu0 %v9891_v52, %s12141_s12  ;;  %v4025_v16 = vmul.f32 %v6494_v9, %v4012_v19  ;;  %v4014_v63 = vsel %vm568_vm2, %v9961_v43, %v9949_v60  ;;  %v4064_v60 = vsel %vm634_vm3, %v10054_v61, %v10064_v2  ;;  %v12180_v19 = vld [vmem:[#allocation26_spill] sm:$0xff] }
 0xfa7   : > { %4584 = vmatpush1.bf16.msra.mxu0 %v4363_v48  ;;  %v10327_v21 = vpop.permute.xlu1 %4051  ;;  %v3974_v33 = vpop.permute.xlu0 %3973  ;;  %v4029_v8 = vmul.f32 %v6498_v25, %v4014_v63  ;;  %v3836_v63 = vld [vmem:[%s12060_s9 + $0xe8] sm:$0xff]  ;;  %v6507_v25 = vld [vmem:[%s12053_s2 + $0x1b0] sm:$0xff] }
 0xfa8   : > { %4585 = vmatprep.subr.bf16.mxu0 %v4366_v27  ;;  %v4065_v9 = vsel %vm634_vm3, %v10295_v3, %v10327_v21 }
 0xfa9   : > { %4311 = vrot.lane.b32.xlu1 %v12156_v56, %s12141_s12  ;;  %v4009_v56 = vsel %vm568_vm2, %v3988_v5, %v10224_v37  ;;  %v4026_v37 = vmul.f32 %v6488_v18, %v4004_v30  ;;  %v4367_v5 = vpack.c.bf16 %v4017_v57, %v4015_v31  ;;  %v3831_v57 = vld [vmem:[%s12060_s9 + $0xc0] sm:$0xff]  ;;  %v4028_v31 = vmul.f32 %v6497_v0, %v4005_v39 }
 0xfaa   : > { %4309 = vrot.lane.b32.xlu0 %v9899_v28, %s12141_s12  ;;  %v4019_v49 = vmul.f32 %v6489_v58, %v4009_v56 }
 0xfab   : > { %4586 = vmatpush1.bf16.msra.mxu0 %v4365_v51  ;;  %v10356_v12 = vpop.permute.xlu1 %4111  ;;  %v3990_v22 = vpop.permute.xlu0 %3989  ;;  %v4372_v35 = vpack.c.bf16 %v4026_v37, %v4024_v24  ;;  %v3835_v24 = vld [vmem:[%s12060_s9 + $0xe0] sm:$0xff] }
 0xfac   : > { %4587 = vmatprep.subr.bf16.mxu0 %v4368_v41  ;;  %v4002_v46 = vsel %vm568_vm2, %v3974_v33, %v3990_v22  ;;  %v4010_v29 = vsel %vm568_vm2, %v3990_v22, %v3974_v33  ;;  %v6495_v33 = vld [vmem:[%s12053_s2 + $0x178] sm:$0xff]  ;;  %v4013_v41 = vsel %vm568_vm2, %v9959_v54, %v9947_v15  ;;  %v4063_v22 = vsel %vm634_vm3, %v12180_v19, %v12179_v26 }
 0xfad   : > { %4299 = vrot.lane.b32.xlu1 %v12158_v38, %s12141_s12  ;;  %v4021_v48 = vmul.f32 %v6491_v47, %v4010_v29  ;;  %v4022_v38 = vmul.f32 %v6492_v23, %v4002_v46  ;;  %v4030_v51 = vmul.f32 %v6495_v33, %v4006_v62  ;;  %v4072_v15 = vsel %vm634_vm3, %v10064_v2, %v10054_v61  ;;  %v6499_v54 = vld [vmem:[%s12053_s2 + $0x198] sm:$0xff]  ;;  %v6500_v46 = vld [vmem:[%s12053_s2 + $0x160] sm:$0xff]  ;;  %v12183_v33 = vld [vmem:[#allocation23_spill] sm:$0xff] }
 0xfae   : > { %4301 = vrot.lane.b32.xlu0 %v12160_v13, %s12141_s12  ;;  %v4082_v18 = vmul.f32 %v6499_v54, %v4064_v60  ;;  %v4027_v29 = vmul.f32 %v6500_v46, %v4013_v41  ;;  %v3834_v2 = vld [vmem:[%s12060_s9 + $0xd8] sm:$0xff]  ;;  %v4071_v61 = vsel %vm634_vm3, %v12179_v26, %v12180_v19  ;;  %v12182_v62 = vld [vmem:[#allocation29_spill] sm:$0xff] }
 0xfaf   : > { %4588 = vmatpush1.bf16.msra.mxu0 %v4367_v5  ;;  %v10393_v34 = vpop.permute.xlu1 %4099  ;;  %v4369_v27 = vpack.c.bf16 %v4021_v48, %v4019_v49  ;;  %v10402_v13 = vpop.permute.xlu0 %4109  ;;  %v4370_v17 = vpack.c.bf16 %v4022_v38, %v4020_v11  ;;  %v4374_v37 = vpack.c.bf16 %v4030_v51, %v4028_v31  ;;  %v3833_v5 = vld [vmem:[%s12060_s9 + $0xd0] sm:$0xff]  ;;  %v6501_v49 = vld [vmem:[%s12053_s2 + $0x188] sm:$0xff]  ;;  %v12181_v38 = vld [vmem:[#allocation21_spill] sm:$0xff] }
 0xfb0   : > { %v4080_v20 = vmul.f32 %v6501_v49, %v4063_v22  ;;  %v4373_v47 = vpack.c.bf16 %v4029_v8, %v4027_v29  ;;  %v6502_v48 = vld [vmem:[%s12053_s2 + $0x190] sm:$0xff]  ;;  %v12184_v51 = vld [vmem:[#allocation18_spill] sm:$0xff]  ;;  %v6505_v41 = vld [vmem:[%s12053_s2 + $0x1a0] sm:$0xff] }
 0xfb1   : > { %4315 = vrot.lane.b32.xlu1 %v12161_v7, %s12141_s12  ;;  %4589 = vmatprep.subr.bf16.mxu0 %v4370_v17  ;;  %v6496_v7 = vld [vmem:[%s12053_s2 + $0x140] sm:$0xff]  ;;  %v4081_v23 = vmul.f32 %v6502_v48, %v4072_v15  ;;  %v6506_v31 = vld [vmem:[%s12053_s2 + $0x1a8] sm:$0xff]  ;;  %v6508_v26 = vld [vmem:[%s12053_s2 + $0x1b8] sm:$0xff]  ;;  %v4075_v46 = vsel %vm634_vm3, %v12183_v33, %v12184_v51 }
 0xfb2   : > { %4317 = vrot.lane.b32.xlu0 %v12162_v32, %s12141_s12  ;;  %v4023_v30 = vmul.f32 %v6496_v7, %v4011_v40  ;;  %v3832_v32 = vld [vmem:[%s12060_s9 + $0xc8] sm:$0xff]  ;;  %v4068_v40 = vsel %vm634_vm3, %v12182_v62, %v12181_v38  ;;  %v4376_v42 = vpack.c.bf16 %v4082_v18, %v4080_v20  ;;  %v3837_v22 = vld [vmem:[%s12060_s9 + $0xf0] sm:$0xff]  ;;  %v12185_v15 = vld [vmem:[#allocation25_spill] sm:$0xff] }
 0xfb3   : > { %4590 = vmatpush1.bf16.msra.mxu0 %v4369_v27  ;;  %v10432_v43 = vpop.permute.xlu1 %4115  ;;  %v10444_v6 = vpop.permute.xlu0 %4125  ;;  %v6503_v27 = vld [vmem:[%s12053_s2 + $0x180] sm:$0xff]  ;;  %v12186_v54 = vld [vmem:[#allocation20_spill] sm:$0xff]  ;;  %v6509_v29 = vld [vmem:[%s12053_s2 + $0x1c8] sm:$0xff] }
 0xfb4   : > { %4591 = vmatprep.subr.bf16.mxu0 %v4372_v35  ;;  %v4371_v56 = vpack.c.bf16 %v4025_v16, %v4023_v30  ;;  %v4079_v17 = vmul.f32 %v6503_v27, %v4071_v61  ;;  %v4073_v16 = vsel %vm634_vm3, %v10327_v21, %v10295_v3  ;;  %v4067_v35 = vsel %vm634_vm3, %v12184_v51, %v12183_v33  ;;  %v6504_v3 = vld [vmem:[%s12053_s2 + $0x1d8] sm:$0xff]  ;;  %v12187_v48 = vld [vmem:[#allocation27_spill] sm:$0xff]  ;;  %v6512_v27 = vld [vmem:[%s12053_s2 + $0x1c0] sm:$0xff] }
 0xfb5   : > { %4421 = vperm.xlu1 %6111, %v3831_v57   ;;  %v4076_v57 = vsel %vm634_vm3, %v12181_v38, %v12182_v62  ;;  %v4090_v21 = vmul.f32 %v6504_v3, %v4068_v40  ;;  %v4083_v0 = vmul.f32 %v6505_v41, %v4073_v16  ;;  %v4070_v18 = vsel %vm634_vm3, %v12186_v54, %v12185_v15  ;;  %v6511_v40 = vld [vmem:[%s12053_s2 + $0x1f8] sm:$0xff] }
 0xfb6   : > { %4426 = vperm.xlu0 %6110, %v3832_v32   ;;  %v4375_v30 = vpack.c.bf16 %v4081_v23, %v4079_v17  ;;  %v12188_v23 = vld [vmem:[#allocation22_spill] sm:$0xff]  ;;  %v4078_v62 = vsel %vm634_vm3, %v12185_v15, %v12186_v54  ;;  %v4087_v17 = vmul.f32 %v6512_v27, %v4075_v46  ;;  %v12189_v54 = vld [vmem:[#allocation5_spill] sm:$0xff]  ;;  %v12193_v27 = vld [vmem:[#allocation16_spill] sm:$0xff] }
 0xfb7   : > { %4592 = vmatpush1.bf16.msra.mxu0 %v4371_v56  ;;  %v10466_v58 = vpop.permute.xlu1 %4103  ;;  %v4038_v11 = vpop.permute.xlu0 %4037  ;;  %v4084_v56 = vmul.f32 %v6506_v31, %v4065_v9  ;;  %v4069_v38 = vsel %vm634_vm3, %v12188_v23, %v12187_v48  ;;  %v4077_v16 = vsel %vm634_vm3, %v12187_v48, %v12188_v23  ;;  %v6196_v31 = vld [vmem:[%s12058_s7 + $0xa0] ss:$20 sps:$4 sm:$0xff]   ;;  %v6201_v15 = vld [vmem:[%s12058_s7 + $0xc8] ss:$20 sps:$4 sm:$0xff]  }
 0xfb8   : > { %4593 = vmatprep.subr.bf16.mxu0 %v4374_v37  ;;  %v10664_v48 = vld [vmem:[%s12053_s2 + $0x290] sm:$0xff] }
 0xfb9   : > { %4431 = vperm.xlu1 %6111, %v3833_v5   ;;  %v3838_v5 = vld [vmem:[%s12060_s9 + $0xf8] sm:$0xff] }
 0xfba   : > { %4436 = vperm.xlu0 %6110, %v3834_v2   ;;  %v4088_v2 = vmul.f32 %v6509_v29, %v4067_v35  ;;  %v4128_v29 = vsel %vm700_vm4, %v10142_v59, %v10176_v45 }
 0xfbb   : > { %4594 = vmatpush1.bf16.msra.mxu0 %v4373_v47  ;;  %v10499_v39 = vpop.permute.xlu1 %4119  ;;  %v4054_v7 = vpop.permute.xlu0 %4053  ;;  %v4145_v23 = vmul.f32 %v10664_v48, %v4128_v29 }
 0xfbc   : > { %4595 = vmatprep.subr.bf16.mxu0 %v4376_v42  ;;  %v4066_v60 = vsel %vm634_vm3, %v4038_v11, %v4054_v7  ;;  %v4074_v32 = vsel %vm634_vm3, %v4054_v7, %v4038_v11  ;;  %v6510_v11 = vld [vmem:[%s12053_s2 + $0x1d0] sm:$0xff]  ;;  %v4094_v42 = vmul.f32 %v6511_v40, %v4070_v18  ;;  %v12190_v18 = vld [vmem:[#allocation13_spill] sm:$0xff] }
 0xfbd   : > { %4441 = vperm.xlu1 %6111, %v3835_v24   ;;  %v4085_v8 = vmul.f32 %v6507_v25, %v4074_v32  ;;  %v4086_v19 = vmul.f32 %v6508_v26, %v4066_v60  ;;  %v4089_v47 = vmul.f32 %v6510_v11, %v4076_v57  ;;  %v4380_v24 = vpack.c.bf16 %v4090_v21, %v4088_v2  ;;  %v6514_v57 = vld [vmem:[%s12053_s2 + $0x1f0] sm:$0xff]  ;;  %v6515_v21 = vld [vmem:[%s12053_s2 + $0x1e0] sm:$0xff]  ;;  %v12191_v2 = vld [vmem:[#allocation14_spill] sm:$0xff] }
 0xfbe   : > { %4446 = vperm.xlu0 %6110, %v3836_v63   ;;  %v6513_v63 = vld [vmem:[%s12053_s2 + $0x1e8] sm:$0xff]  ;;  %v4093_v7 = vmul.f32 %v6514_v57, %v4078_v62  ;;  %v4383_v26 = vpack.c.bf16 %v9855_v55, %v9841_v1  ;;  %v4135_v1 = vsel %vm700_vm4, %v10356_v12, %v12189_v54  ;;  %v10657_v11 = vld [vmem:[%s12053_s2 + $0x280] sm:$0xff]  ;;  %v4137_v62 = vsel %vm700_vm4, %v10432_v43, %v10393_v34 }
 0xfbf   : > { %4596 = vmatpush1.bf16.msra.mxu0 %v4375_v30  ;;  %v10538_v37 = vpop.permute.xlu1 %4107  ;;  %v4377_v61 = vpack.c.bf16 %v4085_v8, %v4083_v0  ;;  %v10550_v49 = vpop.permute.xlu0 %4161  ;;  %v4378_v20 = vpack.c.bf16 %v4086_v19, %v4084_v56  ;;  %v4092_v33 = vmul.f32 %v6513_v63, %v4069_v38  ;;  %v4379_v35 = vpack.c.bf16 %v4089_v47, %v4087_v17  ;;  %v6199_v25 = vld [vmem:[%s12058_s7 + $0xcc] ss:$20 sps:$4 sm:$0xff]  }
 0xfc0   : > { %v4091_v30 = vmul.f32 %v6515_v21, %v4077_v16  ;;  %v4384_v0 = vpack.c.bf16 %v9849_v36, %v9843_v44  ;;  %v4386_v44 = vpack.c.bf16 %v9899_v28, %v9897_v50  ;;  %v6202_v50 = vld [vmem:[%s12058_s7 + $0xf4] ss:$20 sps:$4 sm:$0xff]   ;;  %v4129_v38 = vsel %vm700_vm4, %v10393_v34, %v10432_v43  ;;  %v6205_v16 = vld [vmem:[%s12058_s7 + $0x11c] ss:$20 sps:$4 sm:$0xff]  }
 0xfc1   : > { %4451 = vperm.xlu1 %6111, %v3837_v22   ;;  %4597 = vmatprep.subr.bf16.mxu0 %v4378_v20  ;;  %v4382_v3 = vpack.c.bf16 %v4094_v42, %v4092_v33  ;;  %v4385_v22 = vpack.c.bf16 %v9891_v52, %v9889_v10  ;;  %v4136_v10 = vsel %vm700_vm4, %v10176_v45, %v10142_v59  ;;  %v12192_v45 = vld [vmem:[#allocation15_spill] sm:$0xff]  ;;  %v6520_v33 = vld [vmem:[%s12053_s2 + $0x2a0] sm:$0xff]  ;;  %v6521_v57 = vld [vmem:[%s12053_s2 + $0x2a8] sm:$0xff] }
 0xfc2   : > { %4456 = vperm.xlu0 %6110, %v3838_v5   ;;  %v4381_v41 = vpack.c.bf16 %v4093_v7, %v4091_v30  ;;  %v4127_v52 = vsel %vm700_vm4, %v12189_v54, %v10356_v12  ;;  %v10638_v5 = vld [vmem:[%s12053_s2 + $0x288] sm:$0xff]  ;;  %v10651_v12 = vld [vmem:[%s12053_s2 + $0x298] sm:$0xff]  ;;  %v6204_v42 = vld [vmem:[%s12058_s7 + $0xf0] ss:$20 sps:$4 sm:$0xff]   ;;  %v4140_v34 = vsel %vm700_vm4, %v10304_v53, %v10268_v4  ;;  %v4148_v7 = vmul.f32 %v6521_v57, %v4137_v62 }
 0xfc3   : > { %4598 = vmatpush1.bf16.msra.mxu0 %v4377_v61  ;;  %v10569_v9 = vpop.permute.xlu1 %4123  ;;  %v10578_v51 = vpop.permute.xlu0 %4177  ;;  %v4144_v46 = vmul.f32 %v10638_v5, %v4135_v1  ;;  %v4146_v20 = vmul.f32 %v10651_v12, %v4136_v10  ;;  %v4143_v47 = vmul.f32 %v10657_v11, %v4127_v52  ;;  %v4131_v30 = vsel %vm700_vm4, %v10466_v58, %v10499_v39  ;;  %v6526_v52 = vld [vmem:[%s12053_s2 + $0x2c0] sm:$0xff] }
 0xfc4   : > { %4599 = vmatprep.subr.bf16.mxu0 %v4380_v24  ;;  %v4139_v24 = vsel %vm700_vm4, %v10499_v39, %v10466_v58  ;;  %v4141_v58 = vsel %vm700_vm4, %v10569_v9, %v10538_v37  ;;  %v4142_v10 = vsel %vm700_vm4, %v10444_v6, %v10402_v13 }
 0xfc5   : > { %v4388_v40 = vpack.c.bf16 %v4146_v20, %v4144_v46  ;;  %v4387_v43 = vpack.c.bf16 %v4145_v23, %v4143_v47  ;;  %v4151_v46 = vmul.f32 %v6526_v52, %v4131_v30  ;;  %v6207_v20 = vld [vmem:[%s12058_s7 + $0x118] ss:$20 sps:$4 sm:$0xff]   ;;  %v6528_v47 = vld [vmem:[%s12053_s2 + $0x2d0] sm:$0xff]  ;;  %v4134_v23 = vsel %vm700_vm4, %v10402_v13, %v10444_v6 }
 0xfc6   : > { %v6531_v6 = vld [vmem:[%s12053_s2 + $0x308] sm:$0xff] }
 0xfc7   : > { %4600 = vmatpush1.bf16.msra.mxu0 %v4379_v35  ;;  %v10586_v60 = vpop.permute.xlu1 %4159  ;;  %v10588_v32 = vpop.permute.xlu0 %4169  ;;  %v4147_v35 = vmul.f32 %v6520_v33, %v4129_v38  ;;  %v6529_v38 = vld [vmem:[%s12053_s2 + $0x2f8] sm:$0xff]  ;;  %v6538_v52 = vld [vmem:[%s12053_s2 + $0x348] sm:$0xff] }
 0xfc8   : > { %4601 = vmatprep.subr.bf16.mxu0 %v4382_v3  ;;  %v4158_v62 = vmul.f32 %v6529_v38, %v4142_v10 }
 0xfcb   : > { %4602 = vmatpush1.bf16.msra.mxu0 %v4381_v41  ;;  %v10595_v56 = vpop.permute.xlu1 %4175  ;;  %v10600_v8 = vpop.permute.xlu0 %4185  ;;  %v6522_v41 = vld [vmem:[%s12053_s2 + $0x2c8] sm:$0xff] }
 0xfcc   : > { %4644 = vmatprep.subr.bf16.mxu0 %v4384_v0  ;;  %v4152_v0 = vmul.f32 %v6522_v41, %v4139_v24  ;;  %v4200_v24 = vsel %vm766_vm5, %v10578_v51, %v10550_v49  ;;  %v4191_v13 = vsel %vm766_vm5, %v10586_v60, %v10595_v56 }
 0xfce   : > { %4604 = vmatmul.mubr.bf16.vlgmr.msra.gmra.mrb[24].mxu0 %v6196_v31  ;;  %v6523_v31 = vld [vmem:[%s12053_s2 + $0x2b0] sm:$0xff] }
 0xfcf   : > { %4645 = vmatpush1.bf16.msra.mxu0 %v4383_v26  ;;  %v10606_v36 = vpop.permute.xlu1 %4163  ;;  %4613 = vmatprep.mubr.bf16.mxu0 %v6199_v25  ;;  %v10608_v19 = vpop.permute.xlu0 %4173  ;;  %v6524_v26 = vld [vmem:[%s12053_s2 + $0x2b8] sm:$0xff] }
 0xfd0   : > { %4646 = vmatprep.subr.bf16.mxu0 %v4386_v44 }
 0xfd3   : > { %4647 = vmatpush1.bf16.msra.mxu0 %v4385_v22  ;;  %v10619_v55 = vpop.permute.xlu1 %4179  ;;  %v10624_v28 = vpop.permute.xlu0 %4189  ;;  %v4132_v22 = vsel %vm700_vm4, %v10268_v4, %v10304_v53  ;;  %v4133_v4 = vsel %vm700_vm4, %v10538_v37, %v10569_v9  ;;  %v6527_v53 = vld [vmem:[%s12053_s2 + $0x2e8] sm:$0xff]  ;;  %v4199_v37 = vsel %vm766_vm5, %v10595_v56, %v10586_v60  ;;  %v6533_v60 = vld [vmem:[%s12053_s2 + $0x318] sm:$0xff] }
 0xfd4   : > { %4648 = vmatprep.subr.bf16.mxu0 %v12190_v18  ;;  %v4156_v29 = vmul.f32 %v6527_v53, %v4141_v58  ;;  %v4210_v56 = vmul.f32 %v6533_v60, %v4200_v24  ;;  %v4193_v41 = vsel %vm766_vm5, %v10606_v36, %v10619_v55  ;;  %v4206_v38 = vsel %vm766_vm5, %v10624_v28, %v10608_v19  ;;  %v6546_v60 = vld [vmem:[%s12053_s2 + $0x360] sm:$0xff] }
 0xfd6   : > { %4614 = vmatmul.mubr.bf16.gmra.mrb[28].mxu0 %v6201_v15  ;;  %v6525_v15 = vld [vmem:[%s12053_s2 + $0x2d8] sm:$0xff] }
 0xfd7   : > { %4649 = vmatpush1.bf16.msra.mxu0 %v12191_v2  ;;  %v10646_v61 = vpop.permute.xlu1 %4167  ;;  %4623 = vmatprep.mubr.bf16.mxu0 %v6202_v50  ;;  %v4102_v59 = vpop.permute.xlu0 %4101  ;;  %v4154_v54 = vmul.f32 %v6525_v15, %v4140_v34  ;;  %v4208_v34 = vmul.f32 %v6531_v6, %v4199_v37  ;;  %v6537_v15 = vld [vmem:[%s12053_s2 + $0x328] sm:$0xff] }
 0xfd8   : > { %4650 = vmatprep.subr.bf16.mxu0 %v12192_v45  ;;  %v6210_v45 = vld [vmem:[%s12058_s7 + $0xac] ss:$20 sps:$4 sm:$0xff]  }
 0xfd9   : > { %v4392_v2 = vpack.c.bf16 %v4154_v54, %v4152_v0  ;;  %v4201_v0 = vsel %vm766_vm5, %v10619_v55, %v10606_v36  ;;  %v6536_v36 = vld [vmem:[%s12053_s2 + $0x320] sm:$0xff] }
 0xfda   : > { %v4211_v55 = vmul.f32 %v6536_v36, %v4193_v41  ;;  %v4212_v54 = vmul.f32 %v6537_v15, %v4201_v0  ;;  %v6550_v0 = vld [vmem:[%s12053_s2 + $0x380] sm:$0xff] }
 0xfdb   : > { %4651 = vmatpush1.bf16.msra.mxu0 %v12193_v27  ;;  %v10683_v17 = vpop.permute.xlu1 %4183  ;;  %v4118_v63 = vpop.permute.xlu0 %4117  ;;  %v6530_v27 = vld [vmem:[%s12053_s2 + $0x2e0] sm:$0xff] }
 0xfdc   : > { %4652 = vmatprep.subr.bf16.mxu0 %v4388_v40  ;;  %v4130_v3 = vsel %vm700_vm4, %v4102_v59, %v4118_v63  ;;  %v4138_v21 = vsel %vm700_vm4, %v4118_v63, %v4102_v59  ;;  %v4153_v59 = vmul.f32 %v6528_v47, %v4132_v22  ;;  %v6532_v63 = vld [vmem:[%s12053_s2 + $0x2f0] sm:$0xff]  ;;  %v4195_v10 = vsel %vm766_vm5, %v10646_v61, %v10683_v17  ;;  %v6541_v47 = vld [vmem:[%s12053_s2 + $0x358] sm:$0xff] }
 0xfdd   : > { %v4149_v25 = vmul.f32 %v6523_v31, %v4130_v3  ;;  %v4150_v44 = vmul.f32 %v6524_v26, %v4138_v21  ;;  %v4157_v33 = vmul.f32 %v6532_v63, %v4134_v23  ;;  %v4396_v31 = vpack.c.bf16 %v4210_v56, %v4208_v34 }
 0xfde   : > { %4624 = vmatmul.mubr.bf16.gmra.mrb[32].mxu0 %v6204_v42  ;;  %v4391_v42 = vpack.c.bf16 %v4153_v59, %v4151_v46 }
 0xfdf   : > { %4653 = vmatpush1.bf16.msra.mxu0 %v4387_v43  ;;  %v10719_v39 = vpop.permute.xlu1 %4171  ;;  %4633 = vmatprep.mubr.bf16.mxu0 %v6205_v16  ;;  %v4389_v1 = vpack.c.bf16 %v4149_v25, %v4147_v35  ;;  %v10728_v50 = vpop.permute.xlu0 %4225  ;;  %v4390_v18 = vpack.c.bf16 %v4150_v44, %v4148_v7  ;;  %v4155_v16 = vmul.f32 %v6530_v27, %v4133_v4  ;;  %v6534_v7 = vld [vmem:[%s12053_s2 + $0x300] sm:$0xff]  ;;  %v6539_v4 = vld [vmem:[%s12053_s2 + $0x330] sm:$0xff] }
 0xfe0   : > { %v4394_v43 = vpack.c.bf16 %v4158_v62, %v4156_v29  ;;  %v4192_v35 = vsel %vm766_vm5, %v10550_v49, %v10578_v51  ;;  %v4207_v3 = vmul.f32 %v6534_v7, %v4191_v13  ;;  %v6535_v49 = vld [vmem:[%s12053_s2 + $0x310] sm:$0xff]  ;;  %v4203_v25 = vsel %vm766_vm5, %v10683_v17, %v10646_v61  ;;  %v6540_v29 = vld [vmem:[%s12053_s2 + $0x338] sm:$0xff]  ;;  %v6542_v62 = vld [vmem:[%s12053_s2 + $0x340] sm:$0xff] }
 0xfe1   : > { %4654 = vmatprep.subr.bf16.mxu0 %v4390_v18  ;;  %v4393_v30 = vpack.c.bf16 %v4157_v33, %v4155_v16  ;;  %v4209_v51 = vmul.f32 %v6535_v49, %v4192_v35  ;;  %v4204_v44 = vsel %vm766_vm5, %v10600_v8, %v10588_v32  ;;  %v4216_v46 = vmul.f32 %v6538_v52, %v4203_v25  ;;  %v6544_v16 = vld [vmem:[%s12053_s2 + $0x350] sm:$0xff] }
 0xfe2   : > { %v4218_v59 = vmul.f32 %v6541_v47, %v4204_v44  ;;  %v6551_v44 = vld [vmem:[%s12053_s2 + $0x390] sm:$0xff]  ;;  %v6556_v47 = vld [vmem:[%s12053_s2 + $0x3c8] sm:$0xff] }
 0xfe3   : > { %4655 = vmatpush1.bf16.msra.mxu0 %v4389_v1  ;;  %v10754_v9 = vpop.permute.xlu1 %4187  ;;  %v10766_v40 = vpop.permute.xlu0 %4241  ;;  %v4395_v58 = vpack.c.bf16 %v4209_v51, %v4207_v3 }
 0xfe4   : > { %4656 = vmatprep.subr.bf16.mxu0 %v4392_v2  ;;  %v4205_v61 = vsel %vm766_vm5, %v10754_v9, %v10719_v39  ;;  %v4400_v27 = vpack.c.bf16 %v4218_v59, %v4216_v46  ;;  %v4264_v35 = vsel %vm832_vm7, %v10766_v40, %v10728_v50  ;;  %v4256_v49 = vsel %vm832_vm7, %v10728_v50, %v10766_v40 }
 0xfe5   : > { %v4273_v50 = vmul.f32 %v6551_v44, %v4256_v49 }
 0xfe6   : > { %4634 = vmatmul.mubr.bf16.gmra.mrb[36].mxu0 %v6207_v20  ;;  %v4196_v20 = vsel %vm766_vm5, %v10588_v32, %v10600_v8  ;;  %v4197_v32 = vsel %vm766_vm5, %v10719_v39, %v10754_v9  ;;  %v6543_v8 = vld [vmem:[%s12053_s2 + $0x368] sm:$0xff]  ;;  %v4198_v39 = vsel %vm766_vm5, %v10608_v19, %v10624_v28  ;;  %v6545_v9 = vld [vmem:[%s12053_s2 + $0x378] sm:$0xff] }
 0xfe7   : > { %4657 = vmatpush1.bf16.msra.mxu0 %v4391_v42  ;;  %v10789_v57 = vpop.permute.xlu1 %4223  ;;  %4676 = vmatprep.mubr.bf16.mxu0 %v6210_v45  ;;  %v4166_v21 = vpop.permute.xlu0 %4165  ;;  %v4215_v42 = vmul.f32 %v6542_v62, %v4195_v10  ;;  %v4220_v24 = vmul.f32 %v6543_v8, %v4205_v61  ;;  %v4217_v13 = vmul.f32 %v6544_v16, %v4196_v20  ;;  %v6547_v28 = vld [vmem:[%s12053_s2 + $0x388] sm:$0xff]  ;;  %v6559_v16 = vld [vmem:[%s12053_s2 + $0x3d0] sm:$0xff] }
 0xfe8   : > { %4658 = vmatprep.subr.bf16.mxu0 %v4394_v43  ;;  %v4222_v43 = vmul.f32 %v6545_v9, %v4206_v38  ;;  %v4219_v56 = vmul.f32 %v6546_v60, %v4197_v32  ;;  %v6557_v38 = vld [vmem:[%s12053_s2 + $0x3d8] sm:$0xff]  ;;  %v6558_v32 = vld [vmem:[%s12053_s2 + $0x3c0] sm:$0xff] }
 0xfe9   : > { %v4399_v33 = vpack.c.bf16 %v4217_v13, %v4215_v42 }
 0xfea   : > { %v4402_v3 = vpack.c.bf16 %v4222_v43, %v4220_v24 }
 0xfeb   : > { %4659 = vmatpush1.bf16.msra.mxu0 %v4393_v30  ;;  %v4240_v26 = vpop.permute.xlu1 %4239  ;;  %v4182_v22 = vpop.permute.xlu0 %4181 }
 0xfec   : > { %4660 = vmatprep.subr.bf16.mxu0 %v4396_v31  ;;  %v4194_v1 = vsel %vm766_vm5, %v4166_v21, %v4182_v22  ;;  %v4202_v18 = vsel %vm766_vm5, %v4182_v22, %v4166_v21  ;;  %v4263_v6 = vsel %vm832_vm7, %v4240_v26, %v10789_v57  ;;  %v4255_v19 = vsel %vm832_vm7, %v10789_v57, %v4240_v26  ;;  %v6548_v21 = vld [vmem:[%s12053_s2 + $0x370] sm:$0xff]  ;;  %v6549_v57 = vld [vmem:[%s12053_s2 + $0x398] sm:$0xff] }
 0xfed   : > { %v4213_v53 = vmul.f32 %v6539_v4, %v4194_v1  ;;  %v4214_v2 = vmul.f32 %v6540_v29, %v4202_v18  ;;  %v4272_v7 = vmul.f32 %v6547_v28, %v4263_v6  ;;  %v4221_v30 = vmul.f32 %v6548_v21, %v4198_v39  ;;  %v6552_v18 = vld [vmem:[%s12053_s2 + $0x3a0] sm:$0xff]  ;;  %v6562_v28 = vld [vmem:[%s12053_s2 + $0x3f0] sm:$0xff] }
 0xfee   : > { %v4274_v41 = vmul.f32 %v6549_v57, %v4264_v35  ;;  %v4271_v31 = vmul.f32 %v6550_v0, %v4255_v19  ;;  %v6560_v35 = vld [vmem:[%s12053_s2 + $0x3e0] sm:$0xff] }
 0xfef   : > { %4661 = vmatpush1.bf16.msra.mxu0 %v4395_v58  ;;  %v4228_v17 = vpop.permute.xlu1 %4227  ;;  %v4397_v37 = vpack.c.bf16 %v4213_v53, %v4211_v55  ;;  %v10850_v45 = vpop.permute.xlu0 %4233  ;;  %v4398_v23 = vpack.c.bf16 %v4214_v2, %v4212_v54  ;;  %v4401_v26 = vpack.c.bf16 %v4221_v30, %v4219_v56  ;;  %v6553_v53 = vld [vmem:[%s12053_s2 + $0x3a8] sm:$0xff]  ;;  %v6554_v2 = vld [vmem:[%s12053_s2 + $0x3b0] sm:$0xff] }
 0xff0   : > { %v4404_v58 = vpack.c.bf16 %v4274_v41, %v4272_v7  ;;  %v4403_v55 = vpack.c.bf16 %v4273_v50, %v4271_v31  ;;  %v6561_v56 = vld [vmem:[%s12053_s2 + $0x3e8] sm:$0xff] }
 0xff1   : > { %4662 = vmatprep.subr.bf16.mxu0 %v4398_v23  ;;  %v6208_v41 = vld [vmem:[%s12058_s7 + $0xa8] ss:$20 sps:$4 sm:$0xff]  }
 0xff2   : > { %v6211_v31 = vld [vmem:[%s12058_s7 + $0xd4] ss:$20 sps:$4 sm:$0xff]  }
 0xff3   : > { %4663 = vmatpush1.bf16.msra.mxu0 %v4397_v37  ;;  %v4244_v34 = vpop.permute.xlu1 %4243  ;;  %v4250_v63 = vpop.permute.xlu0 %4249 }
 0xff4   : > { %4664 = vmatprep.subr.bf16.mxu0 %v4400_v27  ;;  %v4257_v40 = vsel %vm832_vm7, %v4228_v17, %v4244_v34  ;;  %v4265_v22 = vsel %vm832_vm7, %v4244_v34, %v4228_v17  ;;  %v4268_v15 = vsel %vm832_vm7, %v4250_v63, %v10850_v45  ;;  %v6555_v17 = vld [vmem:[%s12053_s2 + $0x3b8] sm:$0xff]  ;;  %v4260_v37 = vsel %vm832_vm7, %v10850_v45, %v4250_v63 }
 0xff5   : > { %v4275_v10 = vmul.f32 %v6552_v18, %v4257_v40  ;;  %v4276_v29 = vmul.f32 %v6553_v53, %v4265_v22  ;;  %v4282_v62 = vmul.f32 %v6557_v38, %v4268_v15  ;;  %v4281_v45 = vmul.f32 %v6559_v16, %v4260_v37  ;;  %v6566_v15 = vld [vmem:[%s12053_s2 + $0x410] sm:$0xff]  ;;  %v6217_v38 = vld [vmem:[%s12058_s7 + $0x124] ss:$20 sps:$4 sm:$0xff]  }
 0xff6   : > { %v6213_v53 = vld [vmem:[%s12058_s7 + $0xd0] ss:$20 sps:$4 sm:$0xff]  }
 0xff7   : > { %4665 = vmatpush1.bf16.msra.mxu0 %v4399_v33  ;;  %v4232_v51 = vpop.permute.xlu1 %4231  ;;  %v4230_v25 = vpop.permute.xlu0 %4229 }
 0xff8   : > { %4666 = vmatprep.subr.bf16.mxu0 %v4402_v3  ;;  %v6563_v3 = vld [vmem:[%s12053_s2 + $0x3f8] sm:$0xff] }
 0xffb   : > { %4667 = vmatpush1.bf16.msra.mxu0 %v4401_v26  ;;  %v4248_v36 = vpop.permute.xlu1 %4247 }
 0xffc   : > { %v4246_v54 = vpop.permute.xlu0 %4245  ;;  %4668 = vmatprep.subr.bf16.mxu0 %v4404_v58  ;;  %v4267_v1 = vsel %vm832_vm7, %v4248_v36, %v4232_v51  ;;  %v4259_v4 = vsel %vm832_vm7, %v4232_v51, %v4248_v36  ;;  %v6564_v58 = vld [vmem:[%s12053_s2 + $0x400] sm:$0xff]  ;;  %v6565_v36 = vld [vmem:[%s12053_s2 + $0x408] sm:$0xff] }
 0xffd   : > { %v4258_v52 = vsel %vm832_vm7, %v4230_v25, %v4246_v54  ;;  %v4266_v46 = vsel %vm832_vm7, %v4246_v54, %v4230_v25  ;;  %v4280_v59 = vmul.f32 %v6556_v47, %v4267_v1  ;;  %v4279_v8 = vmul.f32 %v6558_v32, %v4259_v4  ;;  %v6567_v1 = vld [vmem:[%s12053_s2 + $0x418] sm:$0xff] }
 0xffe   : > { %v4277_v61 = vmul.f32 %v6554_v2, %v4258_v52  ;;  %v4278_v20 = vmul.f32 %v6555_v17, %v4266_v46  ;;  %v6214_v2 = vld [vmem:[%s12058_s7 + $0xfc] ss:$20 sps:$4 sm:$0xff]  }
 0xfff   : > { %4669 = vmatpush1.bf16.msra.mxu0 %v4403_v55  ;;  %v4236_v23 = vpop.permute.xlu1 %4235  ;;  %v4408_v13 = vpack.c.bf16 %v4282_v62, %v4280_v59  ;;  %v4407_v34 = vpack.c.bf16 %v4281_v45, %v4279_v8  ;;  %v6216_v59 = vld [vmem:[%s12058_s7 + $0xf8] ss:$20 sps:$4 sm:$0xff]   ;;  %v11019_v8 = vld [vmem:[%s12053_s2 + $0x420] sm:$0xff] }
0x1000   : > { %v4405_v42 = vpack.c.bf16 %v4277_v61, %v4275_v10  ;;  %v4238_v24 = vpop.permute.xlu0 %4237  ;;  %v4406_v27 = vpack.c.bf16 %v4278_v20, %v4276_v29 }
0x1002   : > { %4670 = vmatprep.subr.bf16.mxu0 %v4406_v27 }
0x1003   : > { %4671 = vmatpush1.bf16.msra.mxu0 %v4405_v42  ;;  %v4252_v6 = vpop.permute.xlu1 %4251 }
0x1004   : > { %v4254_v39 = vpop.permute.xlu0 %4253  ;;  %4672 = vmatprep.subr.bf16.mxu0 %v4408_v13  ;;  %v4261_v9 = vsel %vm832_vm7, %v4236_v23, %v4252_v6  ;;  %v4269_v43 = vsel %vm832_vm7, %v4252_v6, %v4236_v23  ;;  %v11031_v13 = vld [vmem:[%s12053_s2 + $0x428] sm:$0xff] }
0x1005   : > { %v4262_v63 = vsel %vm832_vm7, %v4238_v24, %v4254_v39  ;;  %v4270_v33 = vsel %vm832_vm7, %v4254_v39, %v4238_v24  ;;  %v4283_v60 = vmul.f32 %v6560_v35, %v4261_v9  ;;  %v4284_v19 = vmul.f32 %v6561_v56, %v4269_v43  ;;  %v11043_v9 = vld [vmem:[%s12053_s2 + $0x438] sm:$0xff] }
0x1006   : > { %v4285_v7 = vmul.f32 %v6562_v28, %v4262_v63  ;;  %v4286_v21 = vmul.f32 %v6563_v3, %v4270_v33  ;;  %v6572_v63 = vld [vmem:[%s12053_s2 + $0x448] sm:$0xff]  ;;  %v6573_v56 = vld [vmem:[%s12053_s2 + $0x458] sm:$0xff] }
0x1007   : > { %4673 = vmatpush1.bf16.msra.mxu0 %v4407_v34  ;;  %v4288_v30 = vpop.permute.xlu1 %4287  ;;  %v11037_v34 = vld [vmem:[%s12053_s2 + $0x430] sm:$0xff] }
0x1008   : > { %v4409_v49 = vpack.c.bf16 %v4285_v7, %v4283_v60  ;;  %v4290_v51 = vpop.permute.xlu0 %4289  ;;  %v4410_v57 = vpack.c.bf16 %v4286_v21, %v4284_v19  ;;  %v6574_v7 = vld [vmem:[%s12053_s2 + $0x440] sm:$0xff] }
0x100a   : > { %4674 = vmatprep.subr.bf16.mxu0 %v4410_v57 }
0x100b   : > { %4675 = vmatpush1.bf16.msra.mxu0 %v4409_v49  ;;  %v4304_v0 = vpop.permute.xlu1 %4303  ;;  %v6575_v49 = vld [vmem:[%s12053_s2 + $0x450] sm:$0xff] }
0x100c   : > { %v4306_v25 = vpop.permute.xlu0 %4305  ;;  %v4319_v26 = vsel %vm898_vm8, %v4288_v30, %v4304_v0  ;;  %v4327_v44 = vsel %vm898_vm8, %v4304_v0, %v4288_v30 }
0x100d   : > { %v4320_v50 = vsel %vm898_vm8, %v4290_v51, %v4306_v25  ;;  %v4328_v40 = vsel %vm898_vm8, %v4306_v25, %v4290_v51  ;;  %v4335_v22 = vmul.f32 %v6564_v58, %v4319_v26  ;;  %v4336_v55 = vmul.f32 %v6565_v36, %v4327_v44  ;;  %v6576_v58 = vld [vmem:[%s12053_s2 + $0x460] sm:$0xff]  ;;  %v6577_v36 = vld [vmem:[%s12053_s2 + $0x468] sm:$0xff] }
0x100e   : > { %v4337_v54 = vmul.f32 %v6566_v15, %v4320_v50  ;;  %v4338_v18 = vmul.f32 %v6567_v1, %v4328_v40  ;;  %4677 = vmatmul.mubr.bf16.vlgmr.msra.gmra.mrb[24].mxu0 %v6208_v41  ;;  %v6219_v41 = vld [vmem:[%s12058_s7 + $0x120] ss:$20 sps:$4 sm:$0xff]   ;;  %v6579_v1 = vld [vmem:[%s12053_s2 + $0x478] sm:$0xff] }
0x100f   : > { %v4292_v10 = vpop.permute.xlu1 %4291  ;;  %4686 = vmatprep.mubr.bf16.mxu0 %v6211_v31  ;;  %v6578_v15 = vld [vmem:[%s12053_s2 + $0x470] sm:$0xff] }
0x1010   : > { %v4411_v52 = vpack.c.bf16 %v4337_v54, %v4335_v22  ;;  %v4298_v46 = vpop.permute.xlu0 %4297  ;;  %v4412_v4 = vpack.c.bf16 %v4338_v18, %v4336_v55 }
0x1012   : > { %4717 = vmatprep.subr.bf16.mxu0 %v4412_v4  ;;  %v6220_v4 = vld [vmem:[%s12058_s7 + $0xb0] ss:$20 sps:$4 sm:$0xff]  }
0x1013   : > { %4718 = vmatpush1.bf16.msra.mxu0 %v4411_v52  ;;  %v4308_v29 = vpop.permute.xlu1 %4307 }
0x1014   : > { %v4314_v61 = vpop.permute.xlu0 %4313  ;;  %v4321_v47 = vsel %vm898_vm8, %v4292_v10, %v4308_v29  ;;  %v4329_v37 = vsel %vm898_vm8, %v4308_v29, %v4292_v10  ;;  %v12194_v10 = vmov 0   ;;  %v6222_v29 = vld [vmem:[%s12058_s7 + $0x100] ss:$20 sps:$4 sm:$0xff]  }
0x1015   : > { %v4332_v62 = vsel %vm898_vm8, %v4314_v61, %v4298_v46  ;;  %v4339_v24 = vmul.f32 %v11019_v8, %v4321_v47  ;;  %v4340_v6 = vmul.f32 %v11031_v13, %v4329_v37  ;;  %v4324_v35 = vsel %vm898_vm8, %v4298_v46, %v4314_v61 }
0x1016   : > { %4687 = vmatmul.mubr.bf16.gmra.mrb[28].mxu0 %v6213_v53  ;;  %v4346_v19 = vmul.f32 %v6573_v56, %v4332_v62  ;;  %v4345_v51 = vmul.f32 %v6575_v49, %v4324_v35  ;;  %v6221_v53 = vld [vmem:[%s12058_s7 + $0xd8] ss:$20 sps:$4 sm:$0xff]  }
0x1017   : > { %v4296_v17 = vpop.permute.xlu1 %4295  ;;  %4696 = vmatprep.mubr.bf16.mxu0 %v6214_v2  ;;  %v6223_v2 = vld [vmem:[%s12058_s7 + $0x128] ss:$20 sps:$4 sm:$0xff]  }
0x1018   : > { %v4294_v20 = vpop.permute.xlu0 %4293 }
0x101b   : > { %v4312_v23 = vpop.permute.xlu1 %4311 }
0x101c   : > { %v4310_v42 = vpop.permute.xlu0 %4309  ;;  %v4331_v32 = vsel %vm898_vm8, %v4312_v23, %v4296_v17  ;;  %v4323_v45 = vsel %vm898_vm8, %v4296_v17, %v4312_v23 }
0x101d   : > { %v4322_v27 = vsel %vm898_vm8, %v4294_v20, %v4310_v42  ;;  %v4330_v16 = vsel %vm898_vm8, %v4310_v42, %v4294_v20  ;;  %v4344_v33 = vmul.f32 %v6572_v63, %v4331_v32  ;;  %v4343_v3 = vmul.f32 %v6574_v7, %v4323_v45 }
0x101e   : > { %v4341_v39 = vmul.f32 %v11037_v34, %v4322_v27  ;;  %v4342_v43 = vmul.f32 %v11043_v9, %v4330_v16  ;;  %4697 = vmatmul.mubr.bf16.gmra.mrb[32].mxu0 %v6216_v59 }
0x101f   : > { %v4300_v60 = vpop.permute.xlu1 %4299  ;;  %4706 = vmatprep.mubr.bf16.mxu0 %v6217_v38  ;;  %v4416_v57 = vpack.c.bf16 %v4346_v19, %v4344_v33  ;;  %v4415_v31 = vpack.c.bf16 %v4345_v51, %v4343_v3 }
0x1020   : > { %v4413_v28 = vpack.c.bf16 %v4341_v39, %v4339_v24  ;;  %v4302_v21 = vpop.permute.xlu0 %4301  ;;  %v4414_v30 = vpack.c.bf16 %v4342_v43, %v4340_v6 }
0x1022   : > { %4719 = vmatprep.subr.bf16.mxu0 %v4414_v30 }
0x1023   : > { %4720 = vmatpush1.bf16.msra.mxu0 %v4413_v28  ;;  %v4316_v0 = vpop.permute.xlu1 %4315 }
0x1024   : > { %v4318_v25 = vpop.permute.xlu0 %4317  ;;  %4721 = vmatprep.subr.bf16.mxu0 %v4416_v57  ;;  %v4325_v26 = vsel %vm898_vm8, %v4300_v60, %v4316_v0  ;;  %v4333_v44 = vsel %vm898_vm8, %v4316_v0, %v4300_v60 }
0x1025   : > { %v4326_v50 = vsel %vm898_vm8, %v4302_v21, %v4318_v25  ;;  %v4334_v40 = vsel %vm898_vm8, %v4318_v25, %v4302_v21  ;;  %v4347_v22 = vmul.f32 %v6576_v58, %v4325_v26  ;;  %v4348_v55 = vmul.f32 %v6577_v36, %v4333_v44 }
0x1026   : > { %v4349_v54 = vmul.f32 %v6578_v15, %v4326_v50  ;;  %v4350_v18 = vmul.f32 %v6579_v1, %v4334_v40  ;;  %4707 = vmatmul.mubr.bf16.gmra.mrb[36].mxu0 %v6219_v41 }
0x1027   : > { %4722 = vmatpush1.bf16.msra.mxu0 %v4415_v31  ;;  %4749 = vmatprep.mubr.bf16.mxu0 %v12194_v10 }
0x1028   : > { %v4417_v52 = vpack.c.bf16 %v4349_v54, %v4347_v22  ;;  %v4418_v46 = vpack.c.bf16 %v4350_v18, %v4348_v55 }
0x102a   : > { %4723 = vmatprep.subr.bf16.mxu0 %v4418_v46 }
0x102b   : > { %4724 = vmatpush1.bf16.msra.mxu0 %v4417_v52 }
0x102e   : > { %5814 = vmatmul.mubr.msk.bf16.vlgmr.msra.gmra.mrb[24].mxu0 %vm12195_vm9, %v6220_v4 }
0x102f   : > { %4759 = vmatprep.mubr.bf16.mxu0 %v12194_v10 }
0x1034   : > { %v4422_v61 = vpop.permute.xlu1 %4421 }
0x1035   : > { %v4427_v59 = vpop.permute.xlu0 %4426 }
0x1036   : > { %5815 = vmatmul.mubr.msk.bf16.gmra.mrb[28].mxu0 %vm12196_vm12, %v6221_v53 }
0x1037   : > { %4769 = vmatprep.mubr.bf16.mxu0 %v12194_v10 }
0x1038   : > { %v4432_v63 = vpop.permute.xlu1 %4431 }
0x1039   : > { %v4437_v3 = vpop.permute.xlu0 %4436 }
0x103e   : > { %5816 = vmatmul.mubr.msk.bf16.gmra.mrb[32].mxu0 %vm12197_vm15, %v6222_v29 }
0x103f   : > { %4779 = vmatprep.mubr.bf16.mxu0 %v12194_v10 }
0x1046   : > { %5817 = vmatmul.mubr.msk.bf16.gmra.mrb[36].mxu0 %vm12198_vm6, %v6223_v2 }
0x1101   : > { %v4751_v17 = vpop.f32.mrb[24].mxu0 }
0x1102   : > { %v11103_v20 = vadd.f32 %v4751_v17, %v4422_v61  ;;  %v4753_v47 = vpop.f32.mrb[25].mxu0 }
0x1103   : > { %v11105_v37 = vadd.f32 %v4753_v47, %v4422_v61  ;;  %v4755_v23 = vpop.f32.mrb[26].mxu0 }
0x1104   : > { %v4798_v38 = vmul.f32 0.044715, %v11103_v20  ;;  %v11108_v62 = vadd.f32 %v4755_v23, %v4427_v59  ;;  %v4757_v42 = vpop.f32.mrb[27].mxu0 }
0x1105   : > { %v4799_v32 = vmul.f32 0.044715, %v11105_v37  ;;  %v11111_v24 = vadd.f32 %v4757_v42, %v4427_v59 }
0x1106   : > { %v4806_v27 = vmul.f32 %v11103_v20, %v4798_v38  ;;  %v4800_v16 = vmul.f32 0.044715, %v11108_v62 }
0x1107   : > { %v4807_v45 = vmul.f32 %v11105_v37, %v4799_v32  ;;  %v4801_v6 = vmul.f32 0.044715, %v11111_v24 }
0x1108   : > { %v4808_v39 = vmul.f32 %v11108_v62, %v4800_v16  ;;  %v4814_v43 = vmul.f32 %v11103_v20, %v4806_v27 }
0x1109   : > { %v4809_v33 = vmul.f32 %v11111_v24, %v4801_v6  ;;  %v4761_v35 = vpop.f32.mrb[28].mxu0  ;;  %v4815_v60 = vmul.f32 %v11105_v37, %v4807_v45 }
0x110a   : > { %v11121_v56 = vadd.f32 %v4761_v35, %v4432_v63  ;;  %v4763_v19 = vpop.f32.mrb[29].mxu0  ;;  %v4822_v28 = vadd.f32 %v11103_v20, %v4814_v43  ;;  %v4816_v7 = vmul.f32 %v11108_v62, %v4808_v39  ;;  %v4790_v39 = vmul.f32 0.5, %v11103_v20  ;;  %v4442_v35 = vpop.permute.xlu1 %4441 }
0x110b   : > { %v11125_v21 = vadd.f32 %v4763_v19, %v4432_v63  ;;  %v4765_v30 = vpop.f32.mrb[30].mxu0  ;;  %v4823_v49 = vadd.f32 %v11105_v37, %v4815_v60  ;;  %v4817_v51 = vmul.f32 %v11111_v24, %v4809_v33  ;;  %v4791_v60 = vmul.f32 0.5, %v11105_v37 }
0x110c   : > { %v4802_v57 = vmul.f32 0.044715, %v11121_v56  ;;  %v11130_v41 = vadd.f32 %v4765_v30, %v4437_v3  ;;  %v4767_v0 = vpop.f32.mrb[31].mxu0  ;;  %v4830_v31 = vmul.f32 0.7978846, %v4822_v28  ;;  %v4824_v25 = vadd.f32 %v11108_v62, %v4816_v7 }
0x110d   : > { %v4803_v26 = vmul.f32 0.044715, %v11125_v21  ;;  %v11134_v44 = vadd.f32 %v4767_v0, %v4437_v3  ;;  %v4831_v50 = vmul.f32 0.7978846, %v4823_v49  ;;  %v4825_v40 = vadd.f32 %v11111_v24, %v4817_v51  ;;  %v4447_v0 = vpop.permute.xlu0 %4446 }
0x110e   : > { %v4810_v58 = vmul.f32 %v11121_v56, %v4802_v57  ;;  %v4804_v22 = vmul.f32 0.044715, %v11130_v41  ;;  %6340 = vtanh.f32 %v4830_v31  ;;  %v4832_v36 = vmul.f32 0.7978846, %v4824_v25 }
0x110f   : > { %v4811_v55 = vmul.f32 %v11125_v21, %v4803_v26  ;;  %v4805_v15 = vmul.f32 0.044715, %v11134_v44  ;;  %6342 = vtanh.f32 %v4831_v50  ;;  %v4833_v54 = vmul.f32 0.7978846, %v4825_v40 }
0x1110   : > { %v4812_v1 = vmul.f32 %v11130_v41, %v4804_v22  ;;  %6344 = vtanh.f32 %v4832_v36  ;;  %v4818_v18 = vmul.f32 %v11121_v56, %v4810_v58  ;;  %v4792_v49 = vmul.f32 0.5, %v11108_v62 }
0x1111   : > { %v4813_v52 = vmul.f32 %v11134_v44, %v4805_v15  ;;  %v4771_v46 = vpop.f32.mrb[32].mxu0  ;;  %6346 = vtanh.f32 %v4833_v54  ;;  %v4819_v4 = vmul.f32 %v11125_v21, %v4811_v55  ;;  %v4793_v20 = vmul.f32 0.5, %v11111_v24 }
0x1112   : > { %v4773_v53 = vpop.f32.mrb[33].mxu0  ;;  %v4826_v29 = vadd.f32 %v11121_v56, %v4818_v18  ;;  %v4820_v2 = vmul.f32 %v11130_v41, %v4812_v1  ;;  %v5977_v3 = vadd.f32 %v4771_v46, %v4442_v35  ;;  %v4794_v24 = vmul.f32 0.5, %v11121_v56  ;;  %v4452_v46 = vpop.permute.xlu1 %4451 }
0x1113   : > { %v4775_v61 = vpop.f32.mrb[34].mxu0  ;;  %v4827_v17 = vadd.f32 %v11125_v21, %v4819_v4  ;;  %v4821_v47 = vmul.f32 %v11134_v44, %v4813_v52  ;;  %v5978_v31 = vadd.f32 %v4773_v53, %v4442_v35  ;;  %v4795_v4 = vmul.f32 0.5, %v11125_v21 }
0x1114   : > { %v4777_v59 = vpop.f32.mrb[35].mxu0  ;;  %v4834_v23 = vmul.f32 0.7978846, %v4826_v29  ;;  %v4828_v38 = vadd.f32 %v11130_v41, %v4820_v2  ;;  %v5979_v58 = vadd.f32 %v4775_v61, %v4447_v0 }
0x1115   : > { %v4835_v42 = vmul.f32 0.7978846, %v4827_v17  ;;  %v4829_v32 = vadd.f32 %v11134_v44, %v4821_v47  ;;  %v5980_v36 = vadd.f32 %v4777_v59, %v4447_v0  ;;  %v4796_v17 = vmul.f32 0.5, %v11130_v41  ;;  %v4457_v59 = vpop.permute.xlu0 %4456 }
0x1116   : > { %6348 = vtanh.f32 %v4834_v23  ;;  %v4836_v27 = vmul.f32 0.7978846, %v4828_v38  ;;  %v4797_v38 = vmul.f32 0.5, %v11134_v44  ;;  %v6226_v44 = vld [vmem:[%s12057_s6 + $0x64] ss:$12 sps:$4 sm:$0xff]  }
0x1117   : > { %6350 = vtanh.f32 %v4835_v42  ;;  %v4837_v16 = vmul.f32 0.7978846, %v4829_v32  ;;  %5228 = vmatprep.mubr.bf16.mxu1 %v6226_v44 }
0x1118   : > { %v6341_v45 = vpop.eup %6340  ;;  %6352 = vtanh.f32 %v4836_v27 }
0x1119   : > { %v6343_v6 = vpop.eup %6342  ;;  %v4846_v43 = vadd.f32 1.0, %v6341_v45  ;;  %v4781_v63 = vpop.f32.mrb[36].mxu0  ;;  %6354 = vtanh.f32 %v4837_v16 }
0x111a   : > { %v6345_v33 = vpop.eup %6344  ;;  %v4847_v19 = vadd.f32 1.0, %v6343_v6  ;;  %v4783_v28 = vpop.f32.mrb[37].mxu0  ;;  %v5981_v2 = vadd.f32 %v4781_v63, %v4452_v46 }
0x111b   : > { %v6347_v7 = vpop.eup %6346  ;;  %v4854_v30 = vmul.f32 %v4846_v43, %v4790_v39  ;;  %v4848_v51 = vadd.f32 1.0, %v6345_v33  ;;  %v4785_v57 = vpop.f32.mrb[38].mxu0  ;;  %v5982_v56 = vadd.f32 %v4783_v28, %v4452_v46  ;;  %v4874_v28 = vld [vmem:[%s12060_s9 + $0x100] sm:$0xff] }
0x111c   : > { %v4855_v25 = vmul.f32 %v4847_v19, %v4791_v60  ;;  %v4849_v26 = vadd.f32 1.0, %v6347_v7  ;;  %v4787_v50 = vpop.f32.mrb[39].mxu0  ;;  %v5983_v27 = vadd.f32 %v4785_v57, %v4457_v59 }
0x111d   : > { %v11155_v40 = vadd.f32 %v5977_v3, %v4854_v30  ;;  %v4856_v37 = vmul.f32 %v4848_v51, %v4792_v49  ;;  %v5984_v41 = vadd.f32 %v4787_v50, %v4457_v59  ;;  %v4875_v3 = vld [vmem:[%s12060_s9 + $0x108] sm:$0xff]  ;;  %v11335_v50 = vld [vmem:[%s12053_s2] sm:$0xff] }
0x111e   : > { %v11157_v22 = vadd.f32 %v5978_v31, %v4855_v25  ;;  %v4857_v55 = vmul.f32 %v4849_v26, %v4793_v20  ;;  %v11375_v59 = vld [vmem:[%s12053_s2 + $0x180] sm:$0xff] }
0x111f   : > { %v11159_v15 = vadd.f32 %v5979_v58, %v4856_v37  ;;  %4876 = vrot.lane.b32.xlu1 %v11155_v40, %s6668_s25  ;;  %v11341_v37 = vld [vmem:[%s12053_s2 + $0x8] sm:$0xff] }
0x1120   : > { %v6349_v62 = vpop.eup %6348  ;;  %v11163_v54 = vadd.f32 %v5980_v36, %v4857_v55  ;;  %v11347_v55 = vld [vmem:[%s12053_s2 + $0x10] sm:$0xff] }
0x1121   : > { %v6351_v1 = vpop.eup %6350  ;;  %v4850_v18 = vadd.f32 1.0, %v6349_v62  ;;  %4878 = vrot.lane.b32.xlu0 %v11159_v15, %s6668_s25 }
0x1122   : > { %v6353_v52 = vpop.eup %6352  ;;  %v4851_v53 = vadd.f32 1.0, %v6351_v1  ;;  %v11353_v1 = vld [vmem:[%s12053_s2 + $0x18] sm:$0xff] }
0x1123   : > { %v6355_v29 = vpop.eup %6354  ;;  %v4858_v61 = vmul.f32 %v4850_v18, %v4794_v24  ;;  %v4852_v47 = vadd.f32 1.0, %v6353_v52  ;;  %4908 = vrot.lane.b32.xlu1 %v11155_v40, %s6669_s26 }
0x1124   : > { %v4859_v23 = vmul.f32 %v4851_v53, %v4795_v4  ;;  %v4853_v42 = vadd.f32 1.0, %v6355_v29 }
0x1125   : > { %v11173_v32 = vadd.f32 %v5981_v2, %v4858_v61  ;;  %v4860_v21 = vmul.f32 %v4852_v47, %v4796_v17  ;;  %4910 = vrot.lane.b32.xlu0 %v11159_v15, %s6669_s26 }
0x1126   : > { %v11177_v16 = vadd.f32 %v5982_v56, %v4859_v23  ;;  %v4861_v45 = vmul.f32 %v4853_v42, %v4797_v38  ;;  %v11383_v23 = vld [vmem:[%s12053_s2 + $0x190] sm:$0xff] }
0x1127   : > { %v11179_v6 = vadd.f32 %v5983_v27, %v4860_v21  ;;  %4940 = vrot.lane.b32.xlu1 %v11155_v40, %s6670_s27 }
0x1128   : > { %v11183_v39 = vadd.f32 %v5984_v41, %v4861_v45 }
0x1129   : > { %4942 = vrot.lane.b32.xlu0 %v11159_v15, %s6670_s27 }
0x112b   : > { %4972 = vrot.lane.b32.xlu1 %v11155_v40, %s6671_s28 }
0x112d   : > { %4974 = vrot.lane.b32.xlu0 %v11159_v15, %s6671_s28 }
0x112f   : > { %5004 = vrot.lane.b32.xlu1 %v11155_v40, %s6672_s29 }
0x1131   : > { %5006 = vrot.lane.b32.xlu0 %v11159_v15, %s6672_s29 }
0x1133   : > { %4884 = vrot.lane.b32.xlu1 %v11157_v22, %s6668_s25 }
0x1135   : > { %4886 = vrot.lane.b32.xlu0 %v11163_v54, %s6668_s25 }
0x1137   : > { %4916 = vrot.lane.b32.xlu1 %v11157_v22, %s6669_s26 }
0x1139   : > { %4918 = vrot.lane.b32.xlu0 %v11163_v54, %s6669_s26 }
0x113b   : > { %4948 = vrot.lane.b32.xlu1 %v11157_v22, %s6670_s27 }
0x113d   : > { %4950 = vrot.lane.b32.xlu0 %v11163_v54, %s6670_s27 }
0x113f   : > { %4980 = vrot.lane.b32.xlu1 %v11157_v22, %s6671_s28 }
0x1141   : > { %4982 = vrot.lane.b32.xlu0 %v11163_v54, %s6671_s28 }
0x1143   : > { %5012 = vrot.lane.b32.xlu1 %v11157_v22, %s6672_s29 }
0x1145   : > { %5014 = vrot.lane.b32.xlu0 %v11163_v54, %s6672_s29 }
0x1147   : > { %4880 = vrot.lane.b32.xlu1 %v11173_v32, %s6668_s25 }
0x1149   : > { %4882 = vrot.lane.b32.xlu0 %v11179_v6, %s6668_s25 }
0x114b   : > { %4912 = vrot.lane.b32.xlu1 %v11173_v32, %s6669_s26 }
0x114d   : > { %4914 = vrot.lane.b32.xlu0 %v11179_v6, %s6669_s26 }
0x114f   : > { %4944 = vrot.lane.b32.xlu1 %v11173_v32, %s6670_s27 }
0x1151   : > { %4946 = vrot.lane.b32.xlu0 %v11179_v6, %s6670_s27 }
0x1153   : > { %4976 = vrot.lane.b32.xlu1 %v11173_v32, %s6671_s28 }
0x1155   : > { %4978 = vrot.lane.b32.xlu0 %v11179_v6, %s6671_s28 }
0x1157   : > { %4888 = vrot.lane.b32.xlu1 %v11177_v16, %s6668_s25 }
0x1159   : > { %4890 = vrot.lane.b32.xlu0 %v11183_v39, %s6668_s25 }
0x115b   : > { %5008 = vrot.lane.b32.xlu1 %v11173_v32, %s6672_s29 }
0x115d   : > { %5010 = vrot.lane.b32.xlu0 %v11179_v6, %s6672_s29 }
0x115f   : > { %4920 = vrot.lane.b32.xlu1 %v11177_v16, %s6669_s26 }
0x1161   : > { %4922 = vrot.lane.b32.xlu0 %v11183_v39, %s6669_s26 }
0x1163   : > { %4952 = vrot.lane.b32.xlu1 %v11177_v16, %s6670_s27 }
0x1165   : > { %5038 = vrot.lane.b32.xlu0 %v11159_v15, %s6673_s22 }
0x1167   : > { %4984 = vrot.lane.b32.xlu1 %v11177_v16, %s6671_s28 }
0x1169   : > { %4954 = vrot.lane.b32.xlu0 %v11183_v39, %s6670_s27 }
0x116b   : > { %5016 = vrot.lane.b32.xlu1 %v11177_v16, %s6672_s29 }
0x116d   : > { %5046 = vrot.lane.b32.xlu0 %v11163_v54, %s6673_s22 }
0x116f   : > { %5036 = vrot.lane.b32.xlu1 %v11155_v40, %s6673_s22 }
0x1171   : > { %4986 = vrot.lane.b32.xlu0 %v11183_v39, %s6671_s28 }
0x1173   : > { %5044 = vrot.lane.b32.xlu1 %v11157_v22, %s6673_s22 }
0x1175   : > { %5042 = vrot.lane.b32.xlu0 %v11179_v6, %s6673_s22 }
0x1177   : > { %5040 = vrot.lane.b32.xlu1 %v11173_v32, %s6673_s22 }
0x1179   : > { %5070 = vrot.lane.b32.xlu0 %v11159_v15, %s6674_s23 }
0x117b   : > { %5048 = vrot.lane.b32.xlu1 %v11177_v16, %s6673_s22 }
0x117d   : > { %5078 = vrot.lane.b32.xlu0 %v11163_v54, %s6674_s23 }
0x117f   : > { %5068 = vrot.lane.b32.xlu1 %v11155_v40, %s6674_s23 }
0x1181   : > { %5018 = vrot.lane.b32.xlu0 %v11183_v39, %s6672_s29 }
0x1183   : > { %5076 = vrot.lane.b32.xlu1 %v11157_v22, %s6674_s23 }
0x1185   : > { %5074 = vrot.lane.b32.xlu0 %v11179_v6, %s6674_s23 }
0x1187   : > { %5072 = vrot.lane.b32.xlu1 %v11173_v32, %s6674_s23 }
0x1189   : > { %5050 = vrot.lane.b32.xlu0 %v11183_v39, %s6673_s22 }
0x118b   : > { %5080 = vrot.lane.b32.xlu1 %v11177_v16, %s6674_s23 }
0x118d   : > { %5102 = vrot.lane.b32.xlu0 %v11159_v15, %s12141_s12 }
0x118f   : > { %5100 = vrot.lane.b32.xlu1 %v11155_v40, %s12141_s12 }
0x1191   : > { %5082 = vrot.lane.b32.xlu0 %v11183_v39, %s6674_s23  ;;  %v4877_v43 = vpop.permute.xlu1 %4876 }
0x1193   : > { %v4879_v63 = vpop.permute.xlu0 %4878  ;;  %5108 = vrot.lane.b32.xlu1 %v11157_v22, %s12141_s12 }
0x1195   : > { %5110 = vrot.lane.b32.xlu0 %v11163_v54, %s12141_s12  ;;  %v11298_v33 = vpop.permute.xlu1 %4908 }
0x1197   : > { %v11300_v35 = vpop.permute.xlu0 %4910  ;;  %5104 = vrot.lane.b32.xlu1 %v11173_v32, %s12141_s12 }
0x1199   : > { %5106 = vrot.lane.b32.xlu0 %v11179_v6, %s12141_s12  ;;  %v11306_v60 = vpop.permute.xlu1 %4940 }
0x119b   : > { %v11308_v19 = vpop.permute.xlu0 %4942  ;;  %5112 = vrot.lane.b32.xlu1 %v11177_v16, %s12141_s12 }
0x119d   : > { %5114 = vrot.lane.b32.xlu0 %v11183_v39, %s12141_s12  ;;  %v11317_v7 = vpop.permute.xlu1 %4972 }
0x119f   : > { %v11322_v30 = vpop.permute.xlu0 %4974  ;;  %5170 = vperm.xlu1 %6111, %v4874_v28  }
0x11a1   : > { %5175 = vperm.xlu0 %6110, %v4875_v3   ;;  %v5005_v49 = vpop.permute.xlu1 %5004 }
0x11a3   : > { %v5007_v51 = vpop.permute.xlu0 %5006 }
0x11a5   : > { %v4885_v57 = vpop.permute.xlu1 %4884 }
0x11a6   : > { %v4892_v0 = vsel %vm437_vm0, %v4877_v43, %v4885_v57  ;;  %v4896_v31 = vsel %vm437_vm0, %v4885_v57, %v4877_v43 }
0x11a7   : > { %v4887_v25 = vpop.permute.xlu0 %4886  ;;  %v4900_v58 = vmul.f32 %v11335_v50, %v4896_v31  ;;  %v4901_v36 = vmul.f32 %v11341_v37, %v4892_v0 }
0x11a8   : > { %v4893_v20 = vsel %vm437_vm0, %v4879_v63, %v4887_v25  ;;  %v4897_v26 = vsel %vm437_vm0, %v4887_v25, %v4879_v63 }
0x11a9   : > { %v4902_v62 = vmul.f32 %v11347_v55, %v4897_v26  ;;  %v4903_v24 = vmul.f32 %v11353_v1, %v4893_v20  ;;  %v4917_v18 = vpop.permute.xlu1 %4916 }
0x11ab   : > { %v5132_v52 = vpack.c.bf16 %v4902_v62, %v4900_v58  ;;  %v4919_v46 = vpop.permute.xlu0 %4918  ;;  %v5133_v4 = vpack.c.bf16 %v4903_v24, %v4901_v36  ;;  %v4924_v24 = vsel %vm502_vm1, %v11298_v33, %v4917_v18 }
0x11ad   : > { %5196 = vmatprep.subr.bf16.mxu1 %v5133_v4  ;;  %v11356_v53 = vpop.permute.xlu1 %4948  ;;  %v4929_v4 = vsel %vm502_vm1, %v4919_v46, %v11300_v35 }
0x11ae   : > { %5197 = vmatpush1.bf16.msra.mxu1 %v5132_v52 }
0x11af   : > { %v11358_v29 = vpop.permute.xlu0 %4950 }
0x11b1   : > { %v11360_v2 = vpop.permute.xlu1 %4980 }
0x11b2   : > { %v4992_v61 = vsel %vm634_vm3, %v11360_v2, %v11317_v7 }
0x11b3   : > { %v11366_v17 = vpop.permute.xlu0 %4982  ;;  %v11378_v56 = vmul.f32 %v11375_v59, %v4992_v61  ;;  %v11438_v61 = vld [vmem:[%s12053_s2 + $0x98] sm:$0xff] }
0x11b4   : > { %v4993_v47 = vsel %vm634_vm3, %v11366_v17, %v11322_v30 }
0x11b5   : > { %v11386_v38 = vmul.f32 %v11383_v23, %v4993_v47  ;;  %v5013_v42 = vpop.permute.xlu1 %5012 }
0x11b6   : > { %v5020_v27 = vsel %vm700_vm4, %v5005_v49, %v5013_v42  ;;  %v5024_v21 = vsel %vm700_vm4, %v5013_v42, %v5005_v49 }
0x11b7   : > { %v5144_v41 = vpack.c.bf16 %v11386_v38, %v11378_v56  ;;  %v5015_v45 = vpop.permute.xlu0 %5014  ;;  %v11399_v63 = vmul.f32 %v10657_v11, %v5020_v27  ;;  %v11402_v28 = vmul.f32 %v10638_v5, %v5024_v21  ;;  %v6587_v21 = vld [vmem:[%s12053_s2 + $0x20] sm:$0xff]  ;;  %v5151_v56 = vpack.c.bf16 %v11183_v39, %v11177_v16 }
0x11b8   : > { %v5021_v44 = vsel %vm700_vm4, %v5007_v51, %v5015_v45  ;;  %v5025_v43 = vsel %vm700_vm4, %v5015_v45, %v5007_v51  ;;  %v6612_v16 = vld [vmem:[%s12053_s2 + $0x2a0] sm:$0xff] }
0x11b9   : > { %v11405_v3 = vmul.f32 %v10664_v48, %v5021_v44  ;;  %v11408_v49 = vmul.f32 %v10651_v12, %v5025_v43  ;;  %v4881_v57 = vpop.permute.xlu1 %4880  ;;  %v4925_v12 = vsel %vm502_vm1, %v11300_v35, %v4919_v46  ;;  %v6588_v35 = vld [vmem:[%s12053_s2 + $0x28] sm:$0xff]  ;;  %v6589_v44 = vld [vmem:[%s12053_s2 + $0x30] sm:$0xff] }
0x11ba   : > { %v4935_v47 = vmul.f32 %v11438_v61, %v4925_v12 }
0x11bb   : > { %v5152_v0 = vpack.c.bf16 %v11405_v3, %v11399_v63  ;;  %v4883_v31 = vpop.permute.xlu0 %4882  ;;  %v5153_v51 = vpack.c.bf16 %v11408_v49, %v11402_v28  ;;  %v6613_v28 = vld [vmem:[%s12053_s2 + $0x2a8] sm:$0xff]  ;;  %v11692_v3 = vld [vmem:[%s12053_s2 + $0x310] sm:$0xff] }
0x11bd   : > { %v4913_v25 = vpop.permute.xlu1 %4912 }
0x11bf   : > { %v4915_v11 = vpop.permute.xlu0 %4914 }
0x11c1   : > { %v11414_v20 = vpop.permute.xlu1 %4944 }
0x11c3   : > { %v11416_v5 = vpop.permute.xlu0 %4946 }
0x11c5   : > { %v11418_v26 = vpop.permute.xlu1 %4976 }
0x11c7   : > { %v11420_v48 = vpop.permute.xlu0 %4978 }
0x11c9   : > { %v4889_v58 = vpop.permute.xlu1 %4888 }
0x11ca   : > { %v4894_v36 = vsel %vm437_vm0, %v4881_v57, %v4889_v58  ;;  %v4898_v62 = vsel %vm437_vm0, %v4889_v58, %v4881_v57  ;;  %v6590_v57 = vld [vmem:[%s12053_s2 + $0x38] sm:$0xff]  ;;  %v4928_v58 = vsel %vm502_vm1, %v4917_v18, %v11298_v33  ;;  %v11479_v33 = vld [vmem:[%s12053_s2 + $0x80] sm:$0xff] }
0x11cb   : > { %v4891_v52 = vpop.permute.xlu0 %4890  ;;  %v4904_v45 = vmul.f32 %v6587_v21, %v4898_v62  ;;  %v4905_v46 = vmul.f32 %v6588_v35, %v4894_v36  ;;  %v11465_v36 = vld [vmem:[%s12053_s2 + $0x88] sm:$0xff]  ;;  %v4932_v18 = vmul.f32 %v11479_v33, %v4928_v58  ;;  %v11501_v58 = vld [vmem:[%s12053_s2 + $0x118] sm:$0xff] }
0x11cc   : > { %v4895_v42 = vsel %vm437_vm0, %v4883_v31, %v4891_v52  ;;  %v4899_v27 = vsel %vm437_vm0, %v4891_v52, %v4883_v31  ;;  %v4933_v62 = vmul.f32 %v11465_v36, %v4924_v24  ;;  %v11471_v52 = vld [vmem:[%s12053_s2 + $0x90] sm:$0xff]  ;;  %v4957_v24 = vsel %vm568_vm2, %v11308_v19, %v11358_v29 }
0x11cd   : > { %v4906_v43 = vmul.f32 %v6589_v44, %v4899_v27  ;;  %v4907_v31 = vmul.f32 %v6590_v57, %v4895_v42  ;;  %v11457_v12 = vpop.permute.xlu1 %5008  ;;  %v4934_v42 = vmul.f32 %v11471_v52, %v4929_v4 }
0x11ce   : > { %v5137_v57 = vpack.c.bf16 %v4935_v47, %v4933_v62  ;;  %v4961_v47 = vsel %vm568_vm2, %v11358_v29, %v11308_v19  ;;  %v6596_v19 = vld [vmem:[%s12053_s2 + $0xa8] sm:$0xff] }
0x11cf   : > { %v5134_v27 = vpack.c.bf16 %v4906_v43, %v4904_v45  ;;  %v11474_v21 = vpop.permute.xlu0 %5010  ;;  %v5135_v35 = vpack.c.bf16 %v4907_v31, %v4905_v46  ;;  %v5136_v46 = vpack.c.bf16 %v4934_v42, %v4932_v18  ;;  %v4956_v43 = vsel %vm568_vm2, %v11306_v60, %v11356_v53  ;;  %v6597_v18 = vld [vmem:[%s12053_s2 + $0xb0] sm:$0xff] }
0x11d1   : > { %5198 = vmatprep.subr.bf16.mxu1 %v5135_v35  ;;  %v4921_v44 = vpop.permute.xlu1 %4920 }
0x11d2   : > { %v4926_v4 = vsel %vm502_vm1, %v4913_v25, %v4921_v44  ;;  %v4930_v45 = vsel %vm502_vm1, %v4921_v44, %v4913_v25  ;;  %5199 = vmatpush1.bf16.msra.mxu1 %v5134_v27  ;;  %v4967_v25 = vmul.f32 %v11501_v58, %v4957_v24  ;;  %v6595_v27 = vld [vmem:[%s12053_s2 + $0xa0] sm:$0xff]  ;;  %v6598_v44 = vld [vmem:[%s12053_s2 + $0xb8] sm:$0xff] }
0x11d3   : > { %v4923_v31 = vpop.permute.xlu0 %4922  ;;  %5200 = vmatprep.subr.bf16.mxu1 %v5137_v57  ;;  %v4936_v35 = vmul.f32 %v6595_v27, %v4930_v45  ;;  %v4937_v29 = vmul.f32 %v6596_v19, %v4926_v4  ;;  %v4960_v45 = vsel %vm568_vm2, %v11356_v53, %v11306_v60  ;;  %v11527_v4 = vld [vmem:[%s12053_s2 + $0x108] sm:$0xff]  ;;  %v4989_v60 = vsel %vm634_vm3, %v11322_v30, %v11366_v17 }
0x11d4   : > { %v4927_v62 = vsel %vm502_vm1, %v4915_v11, %v4923_v31  ;;  %v4931_v42 = vsel %vm502_vm1, %v4923_v31, %v4915_v11  ;;  %v4965_v31 = vmul.f32 %v11527_v4, %v4956_v43  ;;  %v11545_v43 = vld [vmem:[%s12053_s2 + $0x100] sm:$0xff]  ;;  %v4988_v30 = vsel %vm634_vm3, %v11317_v7, %v11360_v2 }
0x11d5   : > { %v4938_v24 = vmul.f32 %v6597_v18, %v4931_v42  ;;  %v4939_v11 = vmul.f32 %v6598_v44, %v4927_v62  ;;  %v4953_v57 = vpop.permute.xlu1 %4952  ;;  %v6603_v7 = vld [vmem:[%s12053_s2 + $0x120] sm:$0xff] }
0x11d6   : > { %5201 = vmatpush1.bf16.msra.mxu1 %v5136_v46  ;;  %v11535_v46 = vld [vmem:[%s12053_s2 + $0x110] sm:$0xff]  ;;  %v5141_v18 = vpack.c.bf16 %v4967_v25, %v4965_v31 }
0x11d7   : > { %v5138_v42 = vpack.c.bf16 %v4938_v24, %v4936_v35  ;;  %v11530_v27 = vpop.permute.xlu0 %5038  ;;  %v5139_v19 = vpack.c.bf16 %v4939_v11, %v4937_v29  ;;  %v4966_v62 = vmul.f32 %v11535_v46, %v4961_v47  ;;  %v4964_v35 = vmul.f32 %v11545_v43, %v4960_v45  ;;  %v11561_v24 = vld [vmem:[%s12053_s2 + $0x198] sm:$0xff]  ;;  %v6605_v31 = vld [vmem:[%s12053_s2 + $0x130] sm:$0xff] }
0x11d8   : > { %v4958_v29 = vsel %vm568_vm2, %v11414_v20, %v4953_v57  ;;  %v4962_v47 = vsel %vm568_vm2, %v4953_v57, %v11414_v20  ;;  %v4999_v44 = vmul.f32 %v11561_v24, %v4989_v60  ;;  %v6604_v57 = vld [vmem:[%s12053_s2 + $0x128] sm:$0xff] }
0x11d9   : > { %5202 = vmatprep.subr.bf16.mxu1 %v5139_v19  ;;  %v4985_v53 = vpop.permute.xlu1 %4984  ;;  %v5140_v25 = vpack.c.bf16 %v4966_v62, %v4964_v35  ;;  %v4968_v2 = vmul.f32 %v6603_v7, %v4962_v47  ;;  %v4969_v45 = vmul.f32 %v6604_v57, %v4958_v29  ;;  %v6606_v19 = vld [vmem:[%s12053_s2 + $0x138] sm:$0xff]  ;;  %v11585_v60 = vld [vmem:[%s12053_s2 + $0x188] sm:$0xff] }
0x11da   : > { %5203 = vmatpush1.bf16.msra.mxu1 %v5138_v42  ;;  %v4990_v7 = vsel %vm634_vm3, %v11418_v26, %v4985_v53 }
0x11db   : > { %v4955_v17 = vpop.permute.xlu0 %4954  ;;  %5204 = vmatprep.subr.bf16.mxu1 %v5141_v18  ;;  %v4997_v18 = vmul.f32 %v11585_v60, %v4988_v30 }
0x11dc   : > { %v4959_v20 = vsel %vm568_vm2, %v11416_v5, %v4955_v17  ;;  %v4963_v11 = vsel %vm568_vm2, %v4955_v17, %v11416_v5 }
0x11dd   : > { %v4970_v42 = vmul.f32 %v6605_v31, %v4963_v11  ;;  %v4971_v5 = vmul.f32 %v6606_v19, %v4959_v20  ;;  %v5017_v62 = vpop.permute.xlu1 %5016  ;;  %v5145_v11 = vpack.c.bf16 %v4999_v44, %v4997_v18  ;;  %v6608_v44 = vld [vmem:[%s12053_s2 + $0x1a0] sm:$0xff] }
0x11de   : > { %5205 = vmatpush1.bf16.msra.mxu1 %v5140_v25  ;;  %v4994_v25 = vsel %vm634_vm3, %v4985_v53, %v11418_v26  ;;  %v6609_v26 = vld [vmem:[%s12053_s2 + $0x1a8] sm:$0xff] }
0x11df   : > { %v5142_v35 = vpack.c.bf16 %v4970_v42, %v4968_v2  ;;  %v5047_v29 = vpop.permute.xlu0 %5046  ;;  %v5143_v47 = vpack.c.bf16 %v4971_v5, %v4969_v45  ;;  %v5000_v57 = vmul.f32 %v6608_v44, %v4994_v25  ;;  %v5001_v53 = vmul.f32 %v6609_v26, %v4990_v7  ;;  %v6610_v45 = vld [vmem:[%s12053_s2 + $0x1b0] sm:$0xff]  ;;  %v6611_v42 = vld [vmem:[%s12053_s2 + $0x1b8] sm:$0xff] }
0x11e0   : > { %v5148_v25 = vpack.c.bf16 %v11159_v15, %v11155_v40  ;;  %v5026_v40 = vsel %vm700_vm4, %v5017_v62, %v11457_v12 }
0x11e1   : > { %5206 = vmatprep.subr.bf16.mxu1 %v5143_v47  ;;  %v5037_v17 = vpop.permute.xlu1 %5036  ;;  %v5033_v49 = vmul.f32 %v6613_v28, %v5026_v40  ;;  %v6624_v28 = vld [vmem:[%s12053_s2 + $0x338] sm:$0xff] }
0x11e2   : > { %5207 = vmatpush1.bf16.msra.mxu1 %v5142_v35 }
0x11e3   : > { %v4987_v20 = vpop.permute.xlu0 %4986  ;;  %5208 = vmatprep.subr.bf16.mxu1 %v5145_v11  ;;  %v5149_v11 = vpack.c.bf16 %v11163_v54, %v11157_v22  ;;  %v5150_v22 = vpack.c.bf16 %v11179_v6, %v11173_v32  ;;  %v5057_v32 = vsel %vm766_vm5, %v5047_v29, %v11530_v27 }
0x11e4   : > { %v4991_v30 = vsel %vm634_vm3, %v11420_v48, %v4987_v20  ;;  %v4995_v2 = vsel %vm634_vm3, %v4987_v20, %v11420_v48 }
0x11e5   : > { %v5002_v31 = vmul.f32 %v6610_v45, %v4995_v2  ;;  %v5003_v48 = vmul.f32 %v6611_v42, %v4991_v30  ;;  %v5045_v19 = vpop.permute.xlu1 %5044  ;;  %v6615_v2 = vld [vmem:[%s12053_s2 + $0x2b0] sm:$0xff]  ;;  %v11678_v45 = vld [vmem:[%s12053_s2 + $0x318] sm:$0xff]  ;;  %v11684_v42 = vld [vmem:[%s12053_s2 + $0x300] sm:$0xff] }
0x11e6   : > { %5209 = vmatpush1.bf16.msra.mxu1 %v5144_v41  ;;  %v5022_v41 = vsel %vm700_vm4, %v11457_v12, %v5017_v62  ;;  %v5056_v15 = vsel %vm766_vm5, %v5045_v19, %v5037_v17  ;;  %v5052_v6 = vsel %vm766_vm5, %v5037_v17, %v5045_v19 }
0x11e7   : > { %v5146_v5 = vpack.c.bf16 %v5002_v31, %v5000_v57  ;;  %v11615_v18 = vpop.permute.xlu0 %5042  ;;  %v5147_v35 = vpack.c.bf16 %v5003_v48, %v5001_v53  ;;  %v5032_v39 = vmul.f32 %v6612_v16, %v5022_v41  ;;  %v5053_v53 = vsel %vm766_vm5, %v11530_v27, %v5047_v29  ;;  %v6620_v41 = vld [vmem:[%s12053_s2 + $0x320] sm:$0xff] }
0x11e8   : > { %v5063_v31 = vmul.f32 %v11678_v45, %v5057_v32  ;;  %v5060_v48 = vmul.f32 %v11684_v42, %v5052_v6  ;;  %v11720_v32 = vld [vmem:[%s12053_s2 + $0x388] sm:$0xff] }
0x11e9   : > { %5210 = vmatprep.subr.bf16.mxu1 %v5147_v35  ;;  %v5041_v47 = vpop.permute.xlu1 %5040 }
0x11ea   : > { %5211 = vmatpush1.bf16.msra.mxu1 %v5146_v5 }
0x11eb   : > { %v11619_v7 = vpop.permute.xlu0 %5070  ;;  %5212 = vmatprep.subr.bf16.mxu1 %v5149_v11 }
0x11ed   : > { %v5049_v20 = vpop.permute.xlu1 %5048 }
0x11ee   : > { %5213 = vmatpush1.bf16.msra.mxu1 %v5148_v25  ;;  %v5054_v63 = vsel %vm766_vm5, %v5041_v47, %v5049_v20  ;;  %v5058_v5 = vsel %vm766_vm5, %v5049_v20, %v5041_v47 }
0x11ef   : > { %v11625_v38 = vpop.permute.xlu0 %5078  ;;  %5214 = vmatprep.subr.bf16.mxu1 %v5151_v56 }
0x11f0   : > { %v5089_v20 = vsel %vm832_vm7, %v11625_v38, %v11619_v7 }
0x11f1   : > { %v5069_v54 = vpop.permute.xlu1 %5068 }
0x11f2   : > { %5215 = vmatpush1.bf16.msra.mxu1 %v5150_v22  ;;  %v5064_v22 = vmul.f32 %v6620_v41, %v5054_v63  ;;  %v6629_v41 = vld [vmem:[%s12053_s2 + $0x3a8] sm:$0xff] }
0x11f3   : > { %v5019_v30 = vpop.permute.xlu0 %5018  ;;  %5216 = vmatprep.subr.bf16.mxu1 %v5153_v51  ;;  %v11660_v51 = vld [vmem:[%s12053_s2 + $0x308] sm:$0xff] }
0x11f4   : > { %v5023_v12 = vsel %vm700_vm4, %v11474_v21, %v5019_v30  ;;  %v5027_v62 = vsel %vm700_vm4, %v5019_v30, %v11474_v21  ;;  %v5061_v17 = vmul.f32 %v11660_v51, %v5056_v15  ;;  %v6616_v21 = vld [vmem:[%s12053_s2 + $0x2b8] sm:$0xff]  ;;  %v6621_v15 = vld [vmem:[%s12053_s2 + $0x328] sm:$0xff] }
0x11f5   : > { %v5034_v44 = vmul.f32 %v6615_v2, %v5023_v12  ;;  %v5035_v57 = vmul.f32 %v6616_v21, %v5027_v62  ;;  %v5077_v26 = vpop.permute.xlu1 %5076  ;;  %v5065_v47 = vmul.f32 %v6621_v15, %v5058_v5  ;;  %v6623_v12 = vld [vmem:[%s12053_s2 + $0x330] sm:$0xff]  ;;  %v6631_v15 = vld [vmem:[%s12053_s2 + $0x3b8] sm:$0xff] }
0x11f6   : > { %5217 = vmatpush1.bf16.msra.mxu1 %v5152_v0  ;;  %v5062_v0 = vmul.f32 %v11692_v3, %v5053_v53  ;;  %v5157_v11 = vpack.c.bf16 %v5063_v31, %v5061_v17  ;;  %v5088_v25 = vsel %vm832_vm7, %v5077_v26, %v5069_v54  ;;  %v5084_v30 = vsel %vm832_vm7, %v5069_v54, %v5077_v26  ;;  %v11736_v17 = vld [vmem:[%s12053_s2 + $0x398] sm:$0xff]  ;;  %v11742_v26 = vld [vmem:[%s12053_s2 + $0x380] sm:$0xff] }
0x11f7   : > { %v5154_v19 = vpack.c.bf16 %v5034_v44, %v5032_v39  ;;  %v5075_v27 = vpop.permute.xlu0 %5074  ;;  %v5155_v29 = vpack.c.bf16 %v5035_v57, %v5033_v49  ;;  %v5093_v6 = vmul.f32 %v11720_v32, %v5088_v25  ;;  %v5085_v54 = vsel %vm832_vm7, %v11619_v7, %v11625_v38  ;;  %v11748_v38 = vld [vmem:[%s12053_s2 + $0x390] sm:$0xff]  ;;  %v6628_v25 = vld [vmem:[%s12053_s2 + $0x3a0] sm:$0xff] }
0x11f8   : > { %v5156_v56 = vpack.c.bf16 %v5062_v0, %v5060_v48  ;;  %v5095_v2 = vmul.f32 %v11736_v17, %v5089_v20  ;;  %v5092_v53 = vmul.f32 %v11742_v26, %v5084_v30  ;;  %v5094_v48 = vmul.f32 %v11748_v38, %v5085_v54 }
0x11f9   : > { %5218 = vmatprep.subr.bf16.mxu1 %v5155_v29  ;;  %v5073_v35 = vpop.permute.xlu1 %5072 }
0x11fa   : > { %5219 = vmatpush1.bf16.msra.mxu1 %v5154_v19  ;;  %v5161_v7 = vpack.c.bf16 %v5095_v2, %v5093_v6  ;;  %v5160_v0 = vpack.c.bf16 %v5094_v48, %v5092_v53  ;;  %v11794_v2 = vld [vmem:[%s12053_s2 + $0x410] sm:$0xff] }
0x11fb   : > { %v5051_v40 = vpop.permute.xlu0 %5050  ;;  %5220 = vmatprep.subr.bf16.mxu1 %v5157_v11 }
0x11fc   : > { %v5055_v16 = vsel %vm766_vm5, %v11615_v18, %v5051_v40  ;;  %v5059_v39 = vsel %vm766_vm5, %v5051_v40, %v11615_v18 }
0x11fd   : > { %v5066_v62 = vmul.f32 %v6623_v12, %v5055_v16  ;;  %v5067_v18 = vmul.f32 %v6624_v28, %v5059_v39  ;;  %v5081_v49 = vpop.permute.xlu1 %5080  ;;  %v11782_v28 = vld [vmem:[%s12053_s2 + $0x400] sm:$0xff] }
0x11fe   : > { %5221 = vmatpush1.bf16.msra.mxu1 %v5156_v56  ;;  %v5086_v19 = vsel %vm832_vm7, %v5073_v35, %v5081_v49  ;;  %v5090_v29 = vsel %vm832_vm7, %v5081_v49, %v5073_v35  ;;  %v11788_v49 = vld [vmem:[%s12053_s2 + $0x408] sm:$0xff] }
0x11ff   : > { %v5158_v44 = vpack.c.bf16 %v5066_v62, %v5064_v22  ;;  %v5103_v21 = vpop.permute.xlu0 %5102  ;;  %v5159_v57 = vpack.c.bf16 %v5067_v18, %v5065_v47  ;;  %v5096_v56 = vmul.f32 %v6628_v25, %v5086_v19  ;;  %v5097_v35 = vmul.f32 %v6629_v41, %v5090_v29  ;;  %v6630_v22 = vld [vmem:[%s12053_s2 + $0x3b0] sm:$0xff] }
0x1201   : > { %5222 = vmatprep.subr.bf16.mxu1 %v5159_v57  ;;  %v5101_v31 = vpop.permute.xlu1 %5100 }
0x1202   : > { %5223 = vmatpush1.bf16.msra.mxu1 %v5158_v44 }
0x1203   : > { %v5083_v63 = vpop.permute.xlu0 %5082  ;;  %5224 = vmatprep.subr.bf16.mxu1 %v5161_v7 }
0x1204   : > { %v5087_v5 = vsel %vm832_vm7, %v5075_v27, %v5083_v63  ;;  %v5091_v11 = vsel %vm832_vm7, %v5083_v63, %v5075_v27 }
0x1205   : > { %v5098_v40 = vmul.f32 %v6630_v22, %v5087_v5  ;;  %v5099_v27 = vmul.f32 %v6631_v15, %v5091_v11  ;;  %v5109_v47 = vpop.permute.xlu1 %5108 }
0x1206   : > { %v5116_v20 = vsel %vm898_vm8, %v5101_v31, %v5109_v47  ;;  %v5120_v16 = vsel %vm898_vm8, %v5109_v47, %v5101_v31  ;;  %5225 = vmatpush1.bf16.msra.mxu1 %v5160_v0  ;;  %v6224_v31 = vld [vmem:[%s12057_s6 + $0x60] ss:$12 sps:$4 sm:$0xff]  }
0x1207   : > { %v5162_v39 = vpack.c.bf16 %v5098_v40, %v5096_v56  ;;  %v5111_v30 = vpop.permute.xlu0 %5110  ;;  %v5163_v6 = vpack.c.bf16 %v5099_v27, %v5097_v35  ;;  %v5124_v18 = vmul.f32 %v11782_v28, %v5116_v20  ;;  %v5125_v54 = vmul.f32 %v11788_v49, %v5120_v16 }
0x1208   : > { %v5117_v12 = vsel %vm898_vm8, %v5103_v21, %v5111_v30  ;;  %v5121_v62 = vsel %vm898_vm8, %v5111_v30, %v5103_v21  ;;  %v11800_v21 = vld [vmem:[%s12053_s2 + $0x418] sm:$0xff] }
0x1209   : > { %v5126_v44 = vmul.f32 %v11794_v2, %v5117_v12  ;;  %v5127_v57 = vmul.f32 %v11800_v21, %v5121_v62  ;;  %5226 = vmatprep.subr.bf16.mxu1 %v5163_v6  ;;  %v5105_v53 = vpop.permute.xlu1 %5104  ;;  %v11894_v62 = vld.sshfl [vmem:[%s12059_s8] sm:$0x33 pattern:$0x76325410] }
0x120a   : > { %5227 = vmatpush1.bf16.msra.mxu1 %v5162_v39 }
0x120b   : > { %v5164_v7 = vpack.c.bf16 %v5126_v44, %v5124_v18  ;;  %v5107_v48 = vpop.permute.xlu0 %5106  ;;  %v5165_v19 = vpack.c.bf16 %v5127_v57, %v5125_v54  ;;  %v5443_v18 = vcombine.high %v11894_v62, %v11894_v62  ;;  %v5283_v54 = vld [vmem:[%s12060_s9 + $0x110] sm:$0xf] }
0x120d   : > { %5229 = vmatmul.mubr.bf16.vlgmr.msra.gmra.mrb[64].mxu1 %v6224_v31  ;;  %5239 = vmatprep.subr.bf16.mxu1 %v5165_v19  ;;  %v5113_v29 = vpop.permute.xlu1 %5112 }
0x120e   : > { %v5118_v63 = vsel %vm898_vm8, %v5105_v53, %v5113_v29  ;;  %v5122_v0 = vsel %vm898_vm8, %v5113_v29, %v5105_v53  ;;  %5240 = vmatpush1.bf16.msra.mxu1 %v5164_v7  ;;  %5271 = vmatprep.mubr.bf16.mxu1 %v12194_v10  ;;  %v6227_v10 = vld [vmem:[%s12057_s6 + $0x68] ss:$12 sps:$4 sm:$0xff]  }
0x120f   : > { %v5115_v5 = vpop.permute.xlu0 %5114  ;;  %v5128_v56 = vmul.f32 %v11019_v8, %v5118_v63  ;;  %v5129_v41 = vmul.f32 %v11031_v13, %v5122_v0  ;;  %5823 = vmatprep.mubr.msk.bf16.mxu0 %vm5445_vm11, %v5443_v18 }
0x1210   : > { %v5119_v11 = vsel %vm898_vm8, %v5107_v48, %v5115_v5  ;;  %v5123_v25 = vsel %vm898_vm8, %v5115_v5, %v5107_v48 }
0x1211   : > { %v5130_v35 = vmul.f32 %v11037_v34, %v5119_v11  ;;  %v5131_v22 = vmul.f32 %v11043_v9, %v5123_v25 }
0x1213   : > { %v5166_v40 = vpack.c.bf16 %v5130_v35, %v5128_v56  ;;  %v5167_v15 = vpack.c.bf16 %v5131_v22, %v5129_v41 }
0x1215   : > { %5241 = vmatprep.subr.bf16.mxu1 %v5167_v15 }
0x1216   : > { %5242 = vmatpush1.bf16.msra.mxu1 %v5166_v40 }
0x1219   : > { %5821 = vmatmul.mubr.msk.bf16.vlgmr.msra.gmra.mrb[64].mxu1 %vm12199_vm10, %v6227_v10 }
0x121e   : > { %v5171_v27 = vpop.permute.xlu1 %5170 }
0x1220   : > { %v5176_v13 = vpop.permute.xlu0 %5175 }
0x12ec   : > { %v5273_v47 = vpop.f32.mrb[64].mxu1 }
0x12ed   : > { %v11823_v20 = vadd.f32 %v5273_v47, %v5171_v27  ;;  %v5275_v8 = vpop.f32.mrb[65].mxu1 }
0x12ee   : > { %v5277_v16 = vpop.f32.mrb[66].mxu1  ;;  %v11829_v39 = vadd.f32 %v5275_v8, %v5171_v27 }
0x12ef   : > { %v11825_v34 = vadd.f32 %v5277_v16, %v5176_v13  ;;  %v5279_v9 = vpop.f32.mrb[67].mxu1  ;;  %5284 = vrot.lane.b32.xlu1 %v11823_v20, %s6668_s25 }
0x12f0   : > { %v11831_v30 = vadd.f32 %v5279_v9, %v5176_v13 }
0x12f1   : > { %5286 = vrot.lane.b32.xlu0 %v11825_v34, %s6668_s25  ;;  %v5420_v6 = vpack.c.bf16 %v11825_v34, %v11823_v20 }
0x12f2   : > { %v5421_v12 = vpack.c.bf16 %v11831_v30, %v11829_v39 }
0x12f3   : > { %5300 = vrot.lane.b32.xlu1 %v11823_v20, %s6669_s26 }
0x12f5   : > { %5302 = vrot.lane.b32.xlu0 %v11825_v34, %s6669_s26 }
0x12f7   : > { %5316 = vrot.lane.b32.xlu1 %v11823_v20, %s6670_s27 }
0x12f9   : > { %5318 = vrot.lane.b32.xlu0 %v11825_v34, %s6670_s27 }
0x12fb   : > { %5332 = vrot.lane.b32.xlu1 %v11823_v20, %s6671_s28 }
0x12fd   : > { %5334 = vrot.lane.b32.xlu0 %v11825_v34, %s6671_s28 }
0x12ff   : > { %5348 = vrot.lane.b32.xlu1 %v11823_v20, %s6672_s29 }
0x1301   : > { %5350 = vrot.lane.b32.xlu0 %v11825_v34, %s6672_s29 }
0x1303   : > { %5364 = vrot.lane.b32.xlu1 %v11823_v20, %s6673_s22 }
0x1305   : > { %5366 = vrot.lane.b32.xlu0 %v11825_v34, %s6673_s22 }
0x1307   : > { %5380 = vrot.lane.b32.xlu1 %v11823_v20, %s6674_s23 }
0x1309   : > { %5382 = vrot.lane.b32.xlu0 %v11825_v34, %s6674_s23 }
0x130b   : > { %5288 = vrot.lane.b32.xlu1 %v11829_v39, %s6668_s25 }
0x130d   : > { %5290 = vrot.lane.b32.xlu0 %v11831_v30, %s6668_s25 }
0x130f   : > { %5304 = vrot.lane.b32.xlu1 %v11829_v39, %s6669_s26 }
0x1311   : > { %5306 = vrot.lane.b32.xlu0 %v11831_v30, %s6669_s26 }
0x1313   : > { %5320 = vrot.lane.b32.xlu1 %v11829_v39, %s6670_s27 }
0x1315   : > { %5322 = vrot.lane.b32.xlu0 %v11831_v30, %s6670_s27 }
0x1317   : > { %5336 = vrot.lane.b32.xlu1 %v11829_v39, %s6671_s28 }
0x1319   : > { %5338 = vrot.lane.b32.xlu0 %v11831_v30, %s6671_s28 }
0x131b   : > { %5396 = vrot.lane.b32.xlu1 %v11823_v20, %s12141_s12 }
0x131d   : > { %5398 = vrot.lane.b32.xlu0 %v11825_v34, %s12141_s12 }
0x131f   : > { %5352 = vrot.lane.b32.xlu1 %v11829_v39, %s6672_s29 }
0x1321   : > { %5354 = vrot.lane.b32.xlu0 %v11831_v30, %s6672_s29 }
0x1323   : > { %5368 = vrot.lane.b32.xlu1 %v11829_v39, %s6673_s22 }
0x1325   : > { %5370 = vrot.lane.b32.xlu0 %v11831_v30, %s6673_s22 }
0x1327   : > { %5384 = vrot.lane.b32.xlu1 %v11829_v39, %s6674_s23 }
0x1329   : > { %5386 = vrot.lane.b32.xlu0 %v11831_v30, %s6674_s23 }
0x132b   : > { %5400 = vrot.lane.b32.xlu1 %v11829_v39, %s12141_s12  ;;  %v6638_v39 = vld [vmem:[%s12053_s2 + $0x290] sm:$0xff] }
0x132d   : > { %5402 = vrot.lane.b32.xlu0 %v11831_v30, %s12141_s12 }
0x132f   : > { %5432 = vperm.xlu1 %6111, %v5283_v54  }
0x1361   : > { %v5285_v44 = vpop.permute.xlu1 %5284 }
0x1363   : > { %v5287_v57 = vpop.permute.xlu0 %5286 }
0x1365   : > { %v5301_v53 = vpop.permute.xlu1 %5300 }
0x1367   : > { %v5303_v31 = vpop.permute.xlu0 %5302 }
0x1369   : > { %v5317_v7 = vpop.permute.xlu1 %5316 }
0x136b   : > { %v5319_v48 = vpop.permute.xlu0 %5318 }
0x136d   : > { %v5333_v19 = vpop.permute.xlu1 %5332 }
0x136f   : > { %v5335_v29 = vpop.permute.xlu0 %5334 }
0x1371   : > { %v11909_v63 = vpop.permute.xlu1 %5348 }
0x1373   : > { %v11911_v0 = vpop.permute.xlu0 %5350 }
0x1375   : > { %v11913_v5 = vpop.permute.xlu1 %5364 }
0x1377   : > { %v11915_v11 = vpop.permute.xlu0 %5366 }
0x1379   : > { %v11917_v25 = vpop.permute.xlu1 %5380 }
0x137b   : > { %v11919_v56 = vpop.permute.xlu0 %5382 }
0x137d   : > { %v5289_v41 = vpop.permute.xlu1 %5288 }
0x137e   : > { %v5292_v35 = vsel %vm437_vm0, %v5285_v44, %v5289_v41  ;;  %v5294_v22 = vsel %vm437_vm0, %v5289_v41, %v5285_v44 }
0x137f   : > { %v5291_v40 = vpop.permute.xlu0 %5290  ;;  %v5296_v27 = vmul.f32 %v11335_v50, %v5294_v22  ;;  %v5297_v47 = vmul.f32 %v11341_v37, %v5292_v35 }
0x1380   : > { %v5293_v15 = vsel %vm437_vm0, %v5287_v57, %v5291_v40  ;;  %v5295_v10 = vsel %vm437_vm0, %v5291_v40, %v5287_v57 }
0x1381   : > { %v5298_v8 = vmul.f32 %v11347_v55, %v5295_v10  ;;  %v5299_v13 = vmul.f32 %v11353_v1, %v5293_v15  ;;  %v5305_v16 = vpop.permute.xlu1 %5304 }
0x1382   : > { %v5308_v9 = vsel %vm502_vm1, %v5301_v53, %v5305_v16  ;;  %v5310_v18 = vsel %vm502_vm1, %v5305_v16, %v5301_v53 }
0x1383   : > { %v5412_v54 = vpack.c.bf16 %v5298_v8, %v5296_v27  ;;  %v5307_v44 = vpop.permute.xlu0 %5306  ;;  %v5413_v41 = vpack.c.bf16 %v5299_v13, %v5297_v47  ;;  %v5312_v37 = vmul.f32 %v11479_v33, %v5310_v18  ;;  %v5313_v55 = vmul.f32 %v11465_v36, %v5308_v9 }
0x1384   : > { %v5309_v57 = vsel %vm502_vm1, %v5303_v31, %v5307_v44  ;;  %v5311_v50 = vsel %vm502_vm1, %v5307_v44, %v5303_v31 }
0x1385   : > { %v5314_v1 = vmul.f32 %v11471_v52, %v5311_v50  ;;  %v5315_v35 = vmul.f32 %v11438_v61, %v5309_v57  ;;  %5449 = vmatprep.subr.bf16.mxu0 %v5413_v41  ;;  %v5321_v22 = vpop.permute.xlu1 %5320 }
0x1386   : > { %v5324_v53 = vsel %vm568_vm2, %v5317_v7, %v5321_v22  ;;  %v5326_v40 = vsel %vm568_vm2, %v5321_v22, %v5317_v7  ;;  %5450 = vmatpush1.bf16.msra.mxu0 %v5412_v54 }
0x1387   : > { %v5414_v15 = vpack.c.bf16 %v5314_v1, %v5312_v37  ;;  %v5323_v10 = vpop.permute.xlu0 %5322  ;;  %v5415_v31 = vpack.c.bf16 %v5315_v35, %v5313_v55  ;;  %v5328_v61 = vmul.f32 %v11545_v43, %v5326_v40  ;;  %v5329_v52 = vmul.f32 %v11527_v4, %v5324_v53  ;;  %v6636_v37 = vld [vmem:[%s12053_s2 + $0x280] sm:$0xff] }
0x1388   : > { %v5325_v33 = vsel %vm568_vm2, %v5319_v48, %v5323_v10  ;;  %v5327_v36 = vsel %vm568_vm2, %v5323_v10, %v5319_v48 }
0x1389   : > { %v5330_v27 = vmul.f32 %v11535_v46, %v5327_v36  ;;  %v5331_v47 = vmul.f32 %v11501_v58, %v5325_v33  ;;  %5451 = vmatprep.subr.bf16.mxu0 %v5415_v31  ;;  %v5337_v7 = vpop.permute.xlu1 %5336 }
0x138a   : > { %v5340_v8 = vsel %vm634_vm3, %v5333_v19, %v5337_v7  ;;  %v5342_v13 = vsel %vm634_vm3, %v5337_v7, %v5333_v19  ;;  %5452 = vmatpush1.bf16.msra.mxu0 %v5414_v15 }
0x138b   : > { %v5416_v16 = vpack.c.bf16 %v5330_v27, %v5328_v61  ;;  %v5339_v9 = vpop.permute.xlu0 %5338  ;;  %v5417_v48 = vpack.c.bf16 %v5331_v47, %v5329_v52  ;;  %v5344_v58 = vmul.f32 %v11375_v59, %v5342_v13  ;;  %v5345_v46 = vmul.f32 %v11585_v60, %v5340_v8 }
0x138c   : > { %v5341_v43 = vsel %vm634_vm3, %v5335_v29, %v5339_v9  ;;  %v5343_v4 = vsel %vm634_vm3, %v5339_v9, %v5335_v29 }
0x138d   : > { %v5346_v18 = vmul.f32 %v11383_v23, %v5343_v4  ;;  %v5347_v54 = vmul.f32 %v11561_v24, %v5341_v43  ;;  %5453 = vmatprep.subr.bf16.mxu0 %v5417_v48  ;;  %v5397_v19 = vpop.permute.xlu1 %5396 }
0x138e   : > { %5454 = vmatpush1.bf16.msra.mxu0 %v5416_v16 }
0x138f   : > { %v5418_v44 = vpack.c.bf16 %v5346_v18, %v5344_v58  ;;  %v5399_v41 = vpop.permute.xlu0 %5398  ;;  %v5419_v57 = vpack.c.bf16 %v5347_v54, %v5345_v46 }
0x1391   : > { %5455 = vmatprep.subr.bf16.mxu0 %v5419_v57  ;;  %v5353_v50 = vpop.permute.xlu1 %5352 }
0x1392   : > { %v5356_v29 = vsel %vm700_vm4, %v11909_v63, %v5353_v50  ;;  %v5358_v59 = vsel %vm700_vm4, %v5353_v50, %v11909_v63  ;;  %5456 = vmatpush1.bf16.msra.mxu0 %v5418_v44  ;;  %v6637_v63 = vld [vmem:[%s12053_s2 + $0x288] sm:$0xff] }
0x1393   : > { %v5355_v23 = vpop.permute.xlu0 %5354  ;;  %5457 = vmatprep.subr.bf16.mxu0 %v5421_v12  ;;  %v5360_v55 = vmul.f32 %v6636_v37, %v5356_v29  ;;  %v5361_v1 = vmul.f32 %v6637_v63, %v5358_v59  ;;  %v6639_v12 = vld [vmem:[%s12053_s2 + $0x298] sm:$0xff] }
0x1394   : > { %v5357_v24 = vsel %vm700_vm4, %v11911_v0, %v5355_v23  ;;  %v5359_v60 = vsel %vm700_vm4, %v5355_v23, %v11911_v0 }
0x1395   : > { %v5362_v30 = vmul.f32 %v6638_v39, %v5357_v24  ;;  %v5363_v0 = vmul.f32 %v6639_v12, %v5359_v60  ;;  %v5369_v35 = vpop.permute.xlu1 %5368 }
0x1396   : > { %v5372_v22 = vsel %vm766_vm5, %v11913_v5, %v5369_v35  ;;  %v5374_v53 = vsel %vm766_vm5, %v5369_v35, %v11913_v5  ;;  %5458 = vmatpush1.bf16.msra.mxu0 %v5420_v6 }
0x1397   : > { %v5422_v40 = vpack.c.bf16 %v5362_v30, %v5360_v55  ;;  %v5371_v15 = vpop.permute.xlu0 %5370  ;;  %v5423_v10 = vpack.c.bf16 %v5363_v0, %v5361_v1  ;;  %v5376_v36 = vmul.f32 %v11684_v42, %v5372_v22  ;;  %v5377_v61 = vmul.f32 %v11660_v51, %v5374_v53 }
0x1398   : > { %v5373_v31 = vsel %vm766_vm5, %v11915_v11, %v5371_v15  ;;  %v5375_v33 = vsel %vm766_vm5, %v5371_v15, %v11915_v11 }
0x1399   : > { %v5378_v5 = vmul.f32 %v11692_v3, %v5373_v31  ;;  %v5379_v20 = vmul.f32 %v11678_v45, %v5375_v33  ;;  %v5385_v34 = vpop.permute.xlu1 %5384  ;;  %5459 = vmatprep.subr.bf16.mxu0 %v5423_v10 }
0x139a   : > { %v5388_v6 = vsel %vm832_vm7, %v11917_v25, %v5385_v34  ;;  %v5390_v52 = vsel %vm832_vm7, %v5385_v34, %v11917_v25  ;;  %5460 = vmatpush1.bf16.msra.mxu0 %v5422_v40 }
0x139b   : > { %v5424_v11 = vpack.c.bf16 %v5378_v5, %v5376_v36  ;;  %v5387_v27 = vpop.permute.xlu0 %5386  ;;  %v5425_v42 = vpack.c.bf16 %v5379_v20, %v5377_v61  ;;  %v5392_v3 = vmul.f32 %v11742_v26, %v5388_v6  ;;  %v5393_v47 = vmul.f32 %v11720_v32, %v5390_v52 }
0x139c   : > { %v5389_v51 = vsel %vm832_vm7, %v11919_v56, %v5387_v27  ;;  %v5391_v45 = vsel %vm832_vm7, %v5387_v27, %v11919_v56 }
0x139d   : > { %v5394_v7 = vmul.f32 %v11748_v38, %v5389_v51  ;;  %v5395_v25 = vmul.f32 %v11736_v17, %v5391_v45  ;;  %v5401_v8 = vpop.permute.xlu1 %5400  ;;  %5461 = vmatprep.subr.bf16.mxu0 %v5425_v42 }
0x139e   : > { %v5404_v13 = vsel %vm898_vm8, %v5397_v19, %v5401_v8  ;;  %v5406_v16 = vsel %vm898_vm8, %v5401_v8, %v5397_v19  ;;  %5462 = vmatpush1.bf16.msra.mxu0 %v5424_v11 }
0x139f   : > { %v5426_v9 = vpack.c.bf16 %v5394_v7, %v5392_v3  ;;  %v5403_v48 = vpop.permute.xlu0 %5402  ;;  %v5427_v56 = vpack.c.bf16 %v5395_v25, %v5393_v47  ;;  %v5408_v17 = vmul.f32 %v11782_v28, %v5404_v13  ;;  %v5409_v38 = vmul.f32 %v11788_v49, %v5406_v16 }
0x13a0   : > { %v5405_v32 = vsel %vm898_vm8, %v5399_v41, %v5403_v48  ;;  %v5407_v26 = vsel %vm898_vm8, %v5403_v48, %v5399_v41 }
0x13a1   : > { %v5410_v43 = vmul.f32 %v11794_v2, %v5405_v32  ;;  %v5411_v4 = vmul.f32 %v11800_v21, %v5407_v26  ;;  %5463 = vmatprep.subr.bf16.mxu0 %v5427_v56 }
0x13a2   : > { %5464 = vmatpush1.bf16.msra.mxu0 %v5426_v9 }
0x13a3   : > { %v5428_v58 = vpack.c.bf16 %v5410_v43, %v5408_v17  ;;  %v5429_v46 = vpack.c.bf16 %v5411_v4, %v5409_v38 }
0x13a5   : > { %5465 = vmatprep.subr.bf16.mxu0 %v5429_v46 }
0x13a6   : > { %5466 = vmatpush1.bf16.msra.mxu0 %v5428_v58 }
0x13a9   : > { %5482 = vmatmul.mubr.bf16.vlgmr.msra.gmra.mrb[40].mxu0 %v11894_v62 }
0x13ae   : > { %v5433_v18 = vpop.permute.xlu1 %5432 }
0x147c   : > { %v5483_v54 = vpop.f32.mrb[40].mxu0 }
0x147d   : > { %v5484_v14 = vadd.f32 %v5483_v54, %v5433_v18  ;;  %v5485_v19 = vpop.f32.mrb[41].mxu0 }
0x147e   : > { %v5486_v28 = vadd.f32 %v5485_v19, %v5433_v18  ;;  %v5487_v44 = vpop.f32.mrb[42].mxu0 }
0x147f   : > { %v5488_v49 = vpop.f32.mrb[43].mxu0 }
0x1480   : > { %v5492_v2 = vcombine.low %v5484_v14, %v5486_v28 }
0x1482   : > { %5494 = vst [vmem:[%s373_s30] sm:$0xff] %v5492_v2 }
0x1483 PF: > { %s21_s13 = sadd.s32 1, %s6665_s13  }
0x1484   : > { %p18_p1 = scmp.ge.s32.totalorder %s21_s13, 4  }
0x1486   :  { %20 = sbr.rel (!%p18_p1) target bundleno = 1 (0x1), region = 110 }
0x148d   :  { %5516 = vsyncpa [#allocation3], 1 }
0x148e   :  { %5518 = vsyncpa [#allocation3 + $0x1], 1 }

</bundles_post_ra>
